<compile_context>
chip_gen: v7x
topology: tpu7x:2x2x1
jax: 0.10.0
libtpu: 0.0.40
codegen_flags: <defaults>
</compile_context>

<pallas_src>
import jax
import jax.numpy as jnp
import numpy as np
from jax.experimental import pallas as pl
from jax.experimental.pallas import tpu as pltpu


# ---------------------------------------------------------------------------
# In-kernel helper: conv3x3(pad=1, no bias) -> ReLU -> maxpool2x2, one stage.
# ---------------------------------------------------------------------------
def _conv_relu_pool(p_ref, w_ref, width, cout):
    """p_ref : (B, H+2, (W+2)*Cin) zero-padded rows, (w, c) lane-flattened.
       w_ref : (3, (W+2)*Cin, W*Cout) band matrices (one per dy), with output
               columns permuted to [even-w block | odd-w block].
       Returns (B, H//2, (W//2)*Cout) pooled activations in natural (w, c) order."""
    B, Hp, Kw = p_ref.shape
    H = Hp - 2
    Ho, Wo = H // 2, width // 2
    half = Wo * cout

    # Conv: three banded MXU matmuls (one per kernel row), accumulated.
    acc = None
    for dy in range(3):
        lhs = p_ref[:, dy:dy + H, :].reshape(B * H, Kw)
        part = jnp.dot(lhs, w_ref[dy], preferred_element_type=jnp.float32)
        acc = part if acc is None else acc + part
    y = jnp.maximum(acc, 0.0)                       # (B*H, W*Cout), [even-w | odd-w]

    # W pool: pre-permuted columns -> single aligned lane-half max.
    y = jnp.maximum(y[:, :half], y[:, half:])       # (B*H, Wo*Cout), natural (w,c)
    # H pool: adjacent row pairs.
    y = y.reshape(B * Ho, 2, half).max(axis=1)      # (B*Ho, Wo*Cout)
    return y.reshape(B, Ho, half)


# ---------------------------------------------------------------------------
# Wrapper
# ---------------------------------------------------------------------------
def simple_nn_forward(x_nchw, kparams):
    """x_nchw: (N, 1, H, W) f32 (PyTorch layout); kparams from prepare_params()."""
    N, Cin, H, W = x_nchw.shape
    # TODO(synk): in_channel > 1 would need an NHWC conv1 path; module default is 1.
    assert Cin == 1, "fused kernel supports the module default in_channel=1"
    assert H % 8 == 0 and W % 8 == 0, (H, W)

    x = x_nchw.reshape(N, H, W)                     # squeeze the size-1 channel dim

    w1, w2, w3 = kparams["conv1"], kparams["conv2"], kparams["conv3"]
    fc1, fc2 = kparams["fc1"], kparams["fc2"]
    assert w1.shape[1] == W + 2, (w1.shape, W)
    C1 = w1.shape[2] // W
    C2 = w2.shape[2] // (W // 2)
    C3 = w3.shape[2] // (W // 4)
    n_out = fc2.shape[1]
    H2, W2, H3, W3 = H // 2, W // 2, H // 4, W // 4
    P = (H // 8) * (W // 8)
    chunk = (W // 8) * C3
    assert fc1.shape[0] == P * C3, (fc1.shape, P, C3)

    # Batch tile: whole (tiny) batch, else 8 or 32 images; pad N to a multiple.
    if N <= 8:
        bt = N
    elif N < 32:
        bt = 8
    else:
        bt = 32
    Np = pl.cdiv(N, bt) * bt
    if Np != N:
        x = jnp.pad(x, ((0, Np - N), (0, 0), (0, 0)))
    grid = (Np // bt,)

    def kernel(x_ref, w1_ref, w2_ref, w3_ref, fc1_ref, fc2_ref, o_ref,
               p1_ref, p2_ref, p3_ref, flat_ref):
        B = x_ref.shape[0]

        # conv1 -> ReLU -> pool    (channel dim squeezed; lane dim = W+2)
        p1_ref[...] = jnp.zeros(p1_ref.shape, jnp.float32)
        p1_ref[:, 1:H + 1, 1:W + 1] = x_ref[...]
        a1 = _conv_relu_pool(p1_ref, w1_ref, W, C1)        # (B, H/2, (W/2)*C1)

        # conv2 -> ReLU -> pool
        p2_ref[...] = jnp.zeros(p2_ref.shape, jnp.float32)
        p2_ref[:, 1:H2 + 1, C1:(W2 + 1) * C1] = a1
        a2 = _conv_relu_pool(p2_ref, w2_ref, W2, C2)       # (B, H/4, (W/4)*C2)

        # conv3 -> ReLU -> pool
        p3_ref[...] = jnp.zeros(p3_ref.shape, jnp.float32)
        p3_ref[:, 1:H3 + 1, C2:(W3 + 1) * C2] = a2
        a3 = _conv_relu_pool(p3_ref, w3_ref, W3, C3)       # (B, H/8, (W/8)*C3)

        # Flatten to (B, P*C3) in (h, w, c) order with 128-lane-aligned stores
        # (fc1 weight is pre-permuted to this order), then two MXU matmuls.
        for h in range(H // 8):
            flat_ref[:, h * chunk:(h + 1) * chunk] = a3[:, h, :]
        h1 = jnp.maximum(
            jnp.dot(flat_ref[...], fc1_ref[...],
                    preferred_element_type=jnp.float32), 0.0)
        o_ref[...] = jnp.dot(h1, fc2_ref[...],
                             preferred_element_type=jnp.float32).astype(o_ref.dtype)

    out = pl.pallas_call(
        kernel,
        out_shape=jax.ShapeDtypeStruct((Np, n_out), jnp.float32),
        grid=grid,
        in_specs=[
            pl.BlockSpec((bt, H, W), lambda n: (n, 0, 0)),
            pl.BlockSpec(w1.shape, lambda n: (0, 0, 0)),
            pl.BlockSpec(w2.shape, lambda n: (0, 0, 0)),
            pl.BlockSpec(w3.shape, lambda n: (0, 0, 0)),
            pl.BlockSpec(fc1.shape, lambda n: (0, 0)),
            pl.BlockSpec(fc2.shape, lambda n: (0, 0)),
        ],
        out_specs=pl.BlockSpec((bt, n_out), lambda n: (n, 0)),
        scratch_shapes=[
            pltpu.VMEM((bt, H + 2, W + 2), jnp.float32),              # padded conv1 in
            pltpu.VMEM((bt, H2 + 2, (W2 + 2) * C1), jnp.float32),     # padded conv2 in
            pltpu.VMEM((bt, H3 + 2, (W3 + 2) * C2), jnp.float32),     # padded conv3 in
            pltpu.VMEM((bt, P * C3), jnp.float32),                    # fc1 flatten
        ],
        compiler_params=pltpu.CompilerParams(
            dimension_semantics=("parallel",),
            vmem_limit_bytes=32 * 1024 * 1024),
    )(x, w1, w2, w3, fc1, fc2)

    return out[:N] if Np != N else out


# ---------------------------------------------------------------------------
# One-time weight repacking (outside jit)
# ---------------------------------------------------------------------------
def _band_weights(w, width):
    """(Cout, Cin, 3, 3) PyTorch conv weight -> (3, (W+2)*Cin, W*Cout) band
    matrices: for each kernel row dy,
        out[(b,h), col(wo,co)] += padded_row[(b, h+dy), :] @ band[dy]
    implements the 3x3 conv along W on the lane-flattened layout.  Output
    columns are permuted to [even-wo | odd-wo] so the W max-pool in the kernel
    is a single lane-half max."""
    w = np.asarray(jax.device_get(w), np.float32)
    cout, cin, kh, kw = w.shape
    assert (kh, kw) == (3, 3), w.shape
    half = (width // 2) * cout
    band = np.zeros((3, (width + 2) * cin, width * cout), np.float32)
    for dy in range(3):
        for dx in range(3):
            blk = w[:, :, dy, dx].T                       # (Cin, Cout)
            for wo in range(width):
                wi = wo + dx
                base = (wo // 2) * cout + (0 if wo % 2 == 0 else half)
                band[dy, wi * cin:(wi + 1) * cin, base:base + cout] = blk
    return jnp.asarray(band)


def prepare_params(params, image_hw=32):
    """One-time (outside jit) conversion of PyTorch-layout parameters into the
    layouts the fused kernel consumes."""
    c3 = params["conv3"].shape[0]
    fc1, fc2 = params["fc1"], params["fc2"]
    out_f, in_f = fc1.shape
    p = in_f // c3
    # torch.flatten order is (c, h, w); permute to the kernel's (h, w, c)
    # flatten order so no channel transpose is needed in the forward.
    fc1_k = jnp.transpose(fc1.reshape(out_f, c3, p), (0, 2, 1)).reshape(out_f, in_f).T
    return {
        "conv1": _band_weights(params["conv1"], image_hw),        # (3, 34, 512)
        "conv2": _band_weights(params["conv2"], image_hw // 2),   # (3, 288, 512)
        "conv3": _band_weights(params["conv3"], image_hw // 4),   # (3, 320, 256)
        "fc1": fc1_k,                                             # (512, 300)
        "fc2": fc2.T,                                             # (300, 10)
    }


def init_params(key, in_channel=1, rank=16):
    # TODO(synk): lrk_conv3x3 keeps low-rank factors (rank) only for the DP
    # gradient-projection machinery; the forward uses the composed full 3x3
    # weight, which is what we initialize (deterministically) here.
    del rank
    ks = jax.random.split(key, 5)

    def conv_w(k, cout, cin):
        return jax.random.normal(k, (cout, cin, 3, 3), jnp.float32) / jnp.sqrt(cin * 9.0)

    def lin_w(k, cout, cin):
        return jax.random.normal(k, (cout, cin), jnp.float32) / jnp.sqrt(float(cin))

    return {
        "conv1": conv_w(ks[0], 16, in_channel),
        "conv2": conv_w(ks[1], 32, 16),
        "conv3": conv_w(ks[2], 32, 32),
        "fc1": lin_w(ks[3], 300, 32 * 4 * 4),
        "fc2": lin_w(ks[4], 10, 300),
    }


def _reference_forward(x_nchw, params):
    """Pure-XLA reference with PyTorch semantics (self-check only)."""
    y = x_nchw
    for name in ("conv1", "conv2", "conv3"):
        y = jax.lax.conv_general_dilated(
            y, params[name], window_strides=(1, 1), padding=((1, 1), (1, 1)),
            dimension_numbers=("NCHW", "OIHW", "NCHW"),
            precision=jax.lax.Precision.HIGHEST)
        y = jnp.maximum(y, 0.0)
        y = jax.lax.reduce_window(y, -jnp.inf, jax.lax.max,
                                  (1, 1, 2, 2), (1, 1, 2, 2), "VALID")
    y = y.reshape(y.shape[0], -1)                        # torch.flatten(x, 1)
    y = jnp.maximum(jnp.dot(y, params["fc1"].T,
                            precision=jax.lax.Precision.HIGHEST), 0.0)
    return jnp.dot(y, params["fc2"].T, precision=jax.lax.Precision.HIGHEST)


if __name__ == "__main__":
    key = jax.random.PRNGKey(0)
    kp, kx = jax.random.split(key)
    params = init_params(kp, in_channel=1)
    kparams = prepare_params(params, image_hw=32)   # one-time repack, outside jit

    # fc1 expects 32*4*4 features after three 2x2 pools -> 32x32 spatial input.
    x = jax.random.normal(kx, (2, 1, 32, 32), jnp.float32)   # NCHW like PyTorch

    fwd = jax.jit(simple_nn_forward)
    out = jax.block_until_ready(fwd(x, kparams))

    assert out.shape == (2, 10), out.shape
    assert bool(jnp.all(jnp.isfinite(out)))
    ref = _reference_forward(x, params)
    assert bool(jnp.allclose(out, ref, rtol=2e-3, atol=2e-3)), (
        float(jnp.max(jnp.abs(out - ref))))
    print("KERNEL_OK")
</pallas_src>

<mosaic_0001>
module attributes {stable_mosaic.version = 11 : i64} {
  func.func @kernel(%arg0: i32, %arg1: memref<2x32x32xf32, #tpu.memory_space<vmem>>, %arg2: memref<3x34x512xf32, #tpu.memory_space<vmem>>, %arg3: memref<3x288x512xf32, #tpu.memory_space<vmem>>, %arg4: memref<3x320x256xf32, #tpu.memory_space<vmem>>, %arg5: memref<512x300xf32, #tpu.memory_space<vmem>>, %arg6: memref<300x10xf32, #tpu.memory_space<vmem>>, %arg7: memref<2x10xf32, #tpu.memory_space<vmem>>, %arg8: memref<2x34x34xf32, #tpu.memory_space<vmem>>, %arg9: memref<2x18x288xf32, #tpu.memory_space<vmem>>, %arg10: memref<2x10x320xf32, #tpu.memory_space<vmem>>, %arg11: memref<2x512xf32, #tpu.memory_space<vmem>>) attributes {dimension_semantics = [#tpu.dimension_semantics<parallel>], iteration_bounds = array<i64: 1>, scalar_prefetch = 0 : i64, scratch_operands = 4 : i64, tpu.core_type = #tpu.core_type<tc>, window_params = [{transform_indices = @transform_0, window_bounds = array<i64: 2, 32, 32>}, {pipeline_mode = #tpu.pipeline_mode<synchronous>, transform_indices = @transform_1, window_bounds = array<i64: 3, 34, 512>}, {pipeline_mode = #tpu.pipeline_mode<synchronous>, transform_indices = @transform_2, window_bounds = array<i64: 3, 288, 512>}, {pipeline_mode = #tpu.pipeline_mode<synchronous>, transform_indices = @transform_3, window_bounds = array<i64: 3, 320, 256>}, {pipeline_mode = #tpu.pipeline_mode<synchronous>, transform_indices = @transform_4, window_bounds = array<i64: 512, 300>}, {pipeline_mode = #tpu.pipeline_mode<synchronous>, transform_indices = @transform_5, window_bounds = array<i64: 300, 10>}, {transform_indices = @transform_6, window_bounds = array<i64: 2, 10>}]} {
    %cst = arith.constant 0.000000e+00 : f32
    %0 = vector.broadcast %cst : f32 to vector<2x34x34xf32>
    %c0 = arith.constant 0 : index
    %c0_0 = arith.constant 0 : index
    %c0_1 = arith.constant 0 : index
    %1 = vector.load %arg8[%c0, %c0_0, %c0_1] : memref<2x34x34xf32, #tpu.memory_space<vmem>>, vector<2x34x34xf32>
    tpu.vector_store %arg8[%c0, %c0_0, %c0_1], %0 {strides = array<i32>} : memref<2x34x34xf32, #tpu.memory_space<vmem>>, vector<2x34x34xf32>,
    %c0_2 = arith.constant 0 : index
    %c0_3 = arith.constant 0 : index
    %c0_4 = arith.constant 0 : index
    %2 = vector.load %arg1[%c0_2, %c0_3, %c0_4] : memref<2x32x32xf32, #tpu.memory_space<vmem>>, vector<2x32x32xf32>
    %c0_5 = arith.constant 0 : index
    %c1 = arith.constant 1 : index
    %c1_6 = arith.constant 1 : index
    %3 = vector.load %arg8[%c0_5, %c1, %c1_6] : memref<2x34x34xf32, #tpu.memory_space<vmem>>, vector<2x32x32xf32>
    tpu.vector_store %arg8[%c0_5, %c1, %c1_6], %2 {strides = array<i32>} : memref<2x34x34xf32, #tpu.memory_space<vmem>>, vector<2x32x32xf32>,
    %c0_7 = arith.constant 0 : index
    %c0_8 = arith.constant 0 : index
    %c0_9 = arith.constant 0 : index
    %4 = vector.load %arg8[%c0_7, %c0_8, %c0_9] : memref<2x34x34xf32, #tpu.memory_space<vmem>>, vector<2x32x34xf32>
    %5 = vector.shape_cast %4 : vector<2x32x34xf32> to vector<64x34xf32>
    %c0_10 = arith.constant 0 : index
    %c0_11 = arith.constant 0 : index
    %c0_12 = arith.constant 0 : index
    %6 = vector.load %arg2[%c0_10, %c0_11, %c0_12] : memref<3x34x512xf32, #tpu.memory_space<vmem>>, vector<1x34x512xf32>
    %7 = vector.shape_cast %6 : vector<1x34x512xf32> to vector<34x512xf32>
    %cst_13 = arith.constant dense<0.000000e+00> : vector<64x512xf32>
    %8 = tpu.matmul %5, %7, %cst_13 {dimension_numbers = #tpu.dot_dimension_numbers<[1], [0], [0], [1], [0, 0, 1, 1], [], []>} : vector<64x34xf32>, vector<34x512xf32>, vector<64x512xf32> -> vector<64x512xf32>
    %c0_14 = arith.constant 0 : index
    %c1_15 = arith.constant 1 : index
    %c0_16 = arith.constant 0 : index
    %9 = vector.load %arg8[%c0_14, %c1_15, %c0_16] : memref<2x34x34xf32, #tpu.memory_space<vmem>>, vector<2x32x34xf32>
    %10 = vector.shape_cast %9 : vector<2x32x34xf32> to vector<64x34xf32>
    %c1_17 = arith.constant 1 : index
    %c0_18 = arith.constant 0 : index
    %c0_19 = arith.constant 0 : index
    %11 = vector.load %arg2[%c1_17, %c0_18, %c0_19] : memref<3x34x512xf32, #tpu.memory_space<vmem>>, vector<1x34x512xf32>
    %12 = vector.shape_cast %11 : vector<1x34x512xf32> to vector<34x512xf32>
    %cst_20 = arith.constant dense<0.000000e+00> : vector<64x512xf32>
    %13 = tpu.matmul %10, %12, %cst_20 {dimension_numbers = #tpu.dot_dimension_numbers<[1], [0], [0], [1], [0, 0, 1, 1], [], []>} : vector<64x34xf32>, vector<34x512xf32>, vector<64x512xf32> -> vector<64x512xf32>
    %14 = arith.addf %8, %13 : vector<64x512xf32>
    %c0_21 = arith.constant 0 : index
    %c2 = arith.constant 2 : index
    %c0_22 = arith.constant 0 : index
    %15 = vector.load %arg8[%c0_21, %c2, %c0_22] : memref<2x34x34xf32, #tpu.memory_space<vmem>>, vector<2x32x34xf32>
    %16 = vector.shape_cast %15 : vector<2x32x34xf32> to vector<64x34xf32>
    %c2_23 = arith.constant 2 : index
    %c0_24 = arith.constant 0 : index
    %c0_25 = arith.constant 0 : index
    %17 = vector.load %arg2[%c2_23, %c0_24, %c0_25] : memref<3x34x512xf32, #tpu.memory_space<vmem>>, vector<1x34x512xf32>
    %18 = vector.shape_cast %17 : vector<1x34x512xf32> to vector<34x512xf32>
    %cst_26 = arith.constant dense<0.000000e+00> : vector<64x512xf32>
    %19 = tpu.matmul %16, %18, %cst_26 {dimension_numbers = #tpu.dot_dimension_numbers<[1], [0], [0], [1], [0, 0, 1, 1], [], []>} : vector<64x34xf32>, vector<34x512xf32>, vector<64x512xf32> -> vector<64x512xf32>
    %20 = arith.addf %14, %19 : vector<64x512xf32>
    %cst_27 = arith.constant 0.000000e+00 : f32
    %21 = vector.broadcast %cst_27 : f32 to vector<64x512xf32>
    %22 = arith.maximumf %20, %21 : vector<64x512xf32>
    %23 = vector.extract_strided_slice %22 {offsets = [0, 0], sizes = [64, 256], strides = [1, 1]} : vector<64x512xf32> to vector<64x256xf32>
    %24 = vector.extract_strided_slice %22 {offsets = [0, 256], sizes = [64, 256], strides = [1, 1]} : vector<64x512xf32> to vector<64x256xf32>
    %25 = arith.maximumf %23, %24 : vector<64x256xf32>
    %26 = vector.shape_cast %25 : vector<64x256xf32> to vector<32x2x256xf32>
    %cst_28 = arith.constant dense<0xFF800000> : vector<32x256xf32>
    %27 = vector.multi_reduction <maximumf>, %26, %cst_28 [1] : vector<32x2x256xf32> to vector<32x256xf32>
    %28 = vector.shape_cast %27 : vector<32x256xf32> to vector<2x16x256xf32>
    %cst_29 = arith.constant 0.000000e+00 : f32
    %29 = vector.broadcast %cst_29 : f32 to vector<2x18x288xf32>
    %c0_30 = arith.constant 0 : index
    %c0_31 = arith.constant 0 : index
    %c0_32 = arith.constant 0 : index
    %30 = vector.load %arg9[%c0_30, %c0_31, %c0_32] : memref<2x18x288xf32, #tpu.memory_space<vmem>>, vector<2x18x288xf32>
    tpu.vector_store %arg9[%c0_30, %c0_31, %c0_32], %29 {strides = array<i32>} : memref<2x18x288xf32, #tpu.memory_space<vmem>>, vector<2x18x288xf32>,
    %c0_33 = arith.constant 0 : index
    %c1_34 = arith.constant 1 : index
    %c16 = arith.constant 16 : index
    %31 = vector.load %arg9[%c0_33, %c1_34, %c16] : memref<2x18x288xf32, #tpu.memory_space<vmem>>, vector<2x16x256xf32>
    tpu.vector_store %arg9[%c0_33, %c1_34, %c16], %28 {strides = array<i32>} : memref<2x18x288xf32, #tpu.memory_space<vmem>>, vector<2x16x256xf32>,
    %c0_35 = arith.constant 0 : index
    %c0_36 = arith.constant 0 : index
    %c0_37 = arith.constant 0 : index
    %32 = vector.load %arg9[%c0_35, %c0_36, %c0_37] : memref<2x18x288xf32, #tpu.memory_space<vmem>>, vector<2x16x288xf32>
    %33 = vector.shape_cast %32 : vector<2x16x288xf32> to vector<32x288xf32>
    %c0_38 = arith.constant 0 : index
    %c0_39 = arith.constant 0 : index
    %c0_40 = arith.constant 0 : index
    %34 = vector.load %arg3[%c0_38, %c0_39, %c0_40] : memref<3x288x512xf32, #tpu.memory_space<vmem>>, vector<1x288x512xf32>
    %35 = vector.shape_cast %34 : vector<1x288x512xf32> to vector<288x512xf32>
    %cst_41 = arith.constant dense<0.000000e+00> : vector<32x512xf32>
    %36 = tpu.matmul %33, %35, %cst_41 {dimension_numbers = #tpu.dot_dimension_numbers<[1], [0], [0], [1], [0, 0, 1, 1], [], []>} : vector<32x288xf32>, vector<288x512xf32>, vector<32x512xf32> -> vector<32x512xf32>
    %c0_42 = arith.constant 0 : index
    %c1_43 = arith.constant 1 : index
    %c0_44 = arith.constant 0 : index
    %37 = vector.load %arg9[%c0_42, %c1_43, %c0_44] : memref<2x18x288xf32, #tpu.memory_space<vmem>>, vector<2x16x288xf32>
    %38 = vector.shape_cast %37 : vector<2x16x288xf32> to vector<32x288xf32>
    %c1_45 = arith.constant 1 : index
    %c0_46 = arith.constant 0 : index
    %c0_47 = arith.constant 0 : index
    %39 = vector.load %arg3[%c1_45, %c0_46, %c0_47] : memref<3x288x512xf32, #tpu.memory_space<vmem>>, vector<1x288x512xf32>
    %40 = vector.shape_cast %39 : vector<1x288x512xf32> to vector<288x512xf32>
    %cst_48 = arith.constant dense<0.000000e+00> : vector<32x512xf32>
    %41 = tpu.matmul %38, %40, %cst_48 {dimension_numbers = #tpu.dot_dimension_numbers<[1], [0], [0], [1], [0, 0, 1, 1], [], []>} : vector<32x288xf32>, vector<288x512xf32>, vector<32x512xf32> -> vector<32x512xf32>
    %42 = arith.addf %36, %41 : vector<32x512xf32>
    %c0_49 = arith.constant 0 : index
    %c2_50 = arith.constant 2 : index
    %c0_51 = arith.constant 0 : index
    %43 = vector.load %arg9[%c0_49, %c2_50, %c0_51] : memref<2x18x288xf32, #tpu.memory_space<vmem>>, vector<2x16x288xf32>
    %44 = vector.shape_cast %43 : vector<2x16x288xf32> to vector<32x288xf32>
    %c2_52 = arith.constant 2 : index
    %c0_53 = arith.constant 0 : index
    %c0_54 = arith.constant 0 : index
    %45 = vector.load %arg3[%c2_52, %c0_53, %c0_54] : memref<3x288x512xf32, #tpu.memory_space<vmem>>, vector<1x288x512xf32>
    %46 = vector.shape_cast %45 : vector<1x288x512xf32> to vector<288x512xf32>
    %cst_55 = arith.constant dense<0.000000e+00> : vector<32x512xf32>
    %47 = tpu.matmul %44, %46, %cst_55 {dimension_numbers = #tpu.dot_dimension_numbers<[1], [0], [0], [1], [0, 0, 1, 1], [], []>} : vector<32x288xf32>, vector<288x512xf32>, vector<32x512xf32> -> vector<32x512xf32>
    %48 = arith.addf %42, %47 : vector<32x512xf32>
    %cst_56 = arith.constant 0.000000e+00 : f32
    %49 = vector.broadcast %cst_56 : f32 to vector<32x512xf32>
    %50 = arith.maximumf %48, %49 : vector<32x512xf32>
    %51 = vector.extract_strided_slice %50 {offsets = [0, 0], sizes = [32, 256], strides = [1, 1]} : vector<32x512xf32> to vector<32x256xf32>
    %52 = vector.extract_strided_slice %50 {offsets = [0, 256], sizes = [32, 256], strides = [1, 1]} : vector<32x512xf32> to vector<32x256xf32>
    %53 = arith.maximumf %51, %52 : vector<32x256xf32>
    %54 = vector.shape_cast %53 : vector<32x256xf32> to vector<16x2x256xf32>
    %cst_57 = arith.constant dense<0xFF800000> : vector<16x256xf32>
    %55 = vector.multi_reduction <maximumf>, %54, %cst_57 [1] : vector<16x2x256xf32> to vector<16x256xf32>
    %56 = vector.shape_cast %55 : vector<16x256xf32> to vector<2x8x256xf32>
    %cst_58 = arith.constant 0.000000e+00 : f32
    %57 = vector.broadcast %cst_58 : f32 to vector<2x10x320xf32>
    %c0_59 = arith.constant 0 : index
    %c0_60 = arith.constant 0 : index
    %c0_61 = arith.constant 0 : index
    %58 = vector.load %arg10[%c0_59, %c0_60, %c0_61] : memref<2x10x320xf32, #tpu.memory_space<vmem>>, vector<2x10x320xf32>
    tpu.vector_store %arg10[%c0_59, %c0_60, %c0_61], %57 {strides = array<i32>} : memref<2x10x320xf32, #tpu.memory_space<vmem>>, vector<2x10x320xf32>,
    %c0_62 = arith.constant 0 : index
    %c1_63 = arith.constant 1 : index
    %c32 = arith.constant 32 : index
    %59 = vector.load %arg10[%c0_62, %c1_63, %c32] : memref<2x10x320xf32, #tpu.memory_space<vmem>>, vector<2x8x256xf32>
    tpu.vector_store %arg10[%c0_62, %c1_63, %c32], %56 {strides = array<i32>} : memref<2x10x320xf32, #tpu.memory_space<vmem>>, vector<2x8x256xf32>,
    %c0_64 = arith.constant 0 : index
    %c0_65 = arith.constant 0 : index
    %c0_66 = arith.constant 0 : index
    %60 = vector.load %arg10[%c0_64, %c0_65, %c0_66] : memref<2x10x320xf32, #tpu.memory_space<vmem>>, vector<2x8x320xf32>
    %61 = vector.shape_cast %60 : vector<2x8x320xf32> to vector<16x320xf32>
    %c0_67 = arith.constant 0 : index
    %c0_68 = arith.constant 0 : index
    %c0_69 = arith.constant 0 : index
    %62 = vector.load %arg4[%c0_67, %c0_68, %c0_69] : memref<3x320x256xf32, #tpu.memory_space<vmem>>, vector<1x320x256xf32>
    %63 = vector.shape_cast %62 : vector<1x320x256xf32> to vector<320x256xf32>
    %cst_70 = arith.constant dense<0.000000e+00> : vector<16x256xf32>
    %64 = tpu.matmul %61, %63, %cst_70 {dimension_numbers = #tpu.dot_dimension_numbers<[1], [0], [0], [1], [0, 0, 1, 1], [], []>} : vector<16x320xf32>, vector<320x256xf32>, vector<16x256xf32> -> vector<16x256xf32>
    %c0_71 = arith.constant 0 : index
    %c1_72 = arith.constant 1 : index
    %c0_73 = arith.constant 0 : index
    %65 = vector.load %arg10[%c0_71, %c1_72, %c0_73] : memref<2x10x320xf32, #tpu.memory_space<vmem>>, vector<2x8x320xf32>
    %66 = vector.shape_cast %65 : vector<2x8x320xf32> to vector<16x320xf32>
    %c1_74 = arith.constant 1 : index
    %c0_75 = arith.constant 0 : index
    %c0_76 = arith.constant 0 : index
    %67 = vector.load %arg4[%c1_74, %c0_75, %c0_76] : memref<3x320x256xf32, #tpu.memory_space<vmem>>, vector<1x320x256xf32>
    %68 = vector.shape_cast %67 : vector<1x320x256xf32> to vector<320x256xf32>
    %cst_77 = arith.constant dense<0.000000e+00> : vector<16x256xf32>
    %69 = tpu.matmul %66, %68, %cst_77 {dimension_numbers = #tpu.dot_dimension_numbers<[1], [0], [0], [1], [0, 0, 1, 1], [], []>} : vector<16x320xf32>, vector<320x256xf32>, vector<16x256xf32> -> vector<16x256xf32>
    %70 = arith.addf %64, %69 : vector<16x256xf32>
    %c0_78 = arith.constant 0 : index
    %c2_79 = arith.constant 2 : index
    %c0_80 = arith.constant 0 : index
    %71 = vector.load %arg10[%c0_78, %c2_79, %c0_80] : memref<2x10x320xf32, #tpu.memory_space<vmem>>, vector<2x8x320xf32>
    %72 = vector.shape_cast %71 : vector<2x8x320xf32> to vector<16x320xf32>
    %c2_81 = arith.constant 2 : index
    %c0_82 = arith.constant 0 : index
    %c0_83 = arith.constant 0 : index
    %73 = vector.load %arg4[%c2_81, %c0_82, %c0_83] : memref<3x320x256xf32, #tpu.memory_space<vmem>>, vector<1x320x256xf32>
    %74 = vector.shape_cast %73 : vector<1x320x256xf32> to vector<320x256xf32>
    %cst_84 = arith.constant dense<0.000000e+00> : vector<16x256xf32>
    %75 = tpu.matmul %72, %74, %cst_84 {dimension_numbers = #tpu.dot_dimension_numbers<[1], [0], [0], [1], [0, 0, 1, 1], [], []>} : vector<16x320xf32>, vector<320x256xf32>, vector<16x256xf32> -> vector<16x256xf32>
    %76 = arith.addf %70, %75 : vector<16x256xf32>
    %cst_85 = arith.constant 0.000000e+00 : f32
    %77 = vector.broadcast %cst_85 : f32 to vector<16x256xf32>
    %78 = arith.maximumf %76, %77 : vector<16x256xf32>
    %79 = vector.extract_strided_slice %78 {offsets = [0, 0], sizes = [16, 128], strides = [1, 1]} : vector<16x256xf32> to vector<16x128xf32>
    %80 = vector.extract_strided_slice %78 {offsets = [0, 128], sizes = [16, 128], strides = [1, 1]} : vector<16x256xf32> to vector<16x128xf32>
    %81 = arith.maximumf %79, %80 : vector<16x128xf32>
    %82 = vector.shape_cast %81 : vector<16x128xf32> to vector<8x2x128xf32>
    %cst_86 = arith.constant dense<0xFF800000> : vector<8x128xf32>
    %83 = vector.multi_reduction <maximumf>, %82, %cst_86 [1] : vector<8x2x128xf32> to vector<8x128xf32>
    %84 = vector.shape_cast %83 : vector<8x128xf32> to vector<2x4x128xf32>
    %85 = vector.extract_strided_slice %84 {offsets = [0, 0, 0], sizes = [2, 1, 128], strides = [1, 1, 1]} : vector<2x4x128xf32> to vector<2x1x128xf32>
    %86 = vector.shape_cast %85 : vector<2x1x128xf32> to vector<2x128xf32>
    %c0_87 = arith.constant 0 : index
    %c0_88 = arith.constant 0 : index
    %87 = vector.load %arg11[%c0_87, %c0_88] : memref<2x512xf32, #tpu.memory_space<vmem>>, vector<2x128xf32>
    tpu.vector_store %arg11[%c0_87, %c0_88], %86 {strides = array<i32>} : memref<2x512xf32, #tpu.memory_space<vmem>>, vector<2x128xf32>,
    %88 = vector.extract_strided_slice %84 {offsets = [0, 1, 0], sizes = [2, 1, 128], strides = [1, 1, 1]} : vector<2x4x128xf32> to vector<2x1x128xf32>
    %89 = vector.shape_cast %88 : vector<2x1x128xf32> to vector<2x128xf32>
    %c0_89 = arith.constant 0 : index
    %c128 = arith.constant 128 : index
    %90 = vector.load %arg11[%c0_89, %c128] : memref<2x512xf32, #tpu.memory_space<vmem>>, vector<2x128xf32>
    tpu.vector_store %arg11[%c0_89, %c128], %89 {strides = array<i32>} : memref<2x512xf32, #tpu.memory_space<vmem>>, vector<2x128xf32>,
    %91 = vector.extract_strided_slice %84 {offsets = [0, 2, 0], sizes = [2, 1, 128], strides = [1, 1, 1]} : vector<2x4x128xf32> to vector<2x1x128xf32>
    %92 = vector.shape_cast %91 : vector<2x1x128xf32> to vector<2x128xf32>
    %c0_90 = arith.constant 0 : index
    %c256 = arith.constant 256 : index
    %93 = vector.load %arg11[%c0_90, %c256] : memref<2x512xf32, #tpu.memory_space<vmem>>, vector<2x128xf32>
    tpu.vector_store %arg11[%c0_90, %c256], %92 {strides = array<i32>} : memref<2x512xf32, #tpu.memory_space<vmem>>, vector<2x128xf32>,
    %94 = vector.extract_strided_slice %84 {offsets = [0, 3, 0], sizes = [2, 1, 128], strides = [1, 1, 1]} : vector<2x4x128xf32> to vector<2x1x128xf32>
    %95 = vector.shape_cast %94 : vector<2x1x128xf32> to vector<2x128xf32>
    %c0_91 = arith.constant 0 : index
    %c384 = arith.constant 384 : index
    %96 = vector.load %arg11[%c0_91, %c384] : memref<2x512xf32, #tpu.memory_space<vmem>>, vector<2x128xf32>
    tpu.vector_store %arg11[%c0_91, %c384], %95 {strides = array<i32>} : memref<2x512xf32, #tpu.memory_space<vmem>>, vector<2x128xf32>,
    %c0_92 = arith.constant 0 : index
    %c0_93 = arith.constant 0 : index
    %97 = vector.load %arg11[%c0_92, %c0_93] : memref<2x512xf32, #tpu.memory_space<vmem>>, vector<2x512xf32>
    %c0_94 = arith.constant 0 : index
    %c0_95 = arith.constant 0 : index
    %98 = vector.load %arg5[%c0_94, %c0_95] : memref<512x300xf32, #tpu.memory_space<vmem>>, vector<512x300xf32>
    %cst_96 = arith.constant dense<0.000000e+00> : vector<2x300xf32>
    %99 = tpu.matmul %97, %98, %cst_96 {dimension_numbers = #tpu.dot_dimension_numbers<[1], [0], [0], [1], [0, 0, 1, 1], [], []>} : vector<2x512xf32>, vector<512x300xf32>, vector<2x300xf32> -> vector<2x300xf32>
    %cst_97 = arith.constant 0.000000e+00 : f32
    %100 = vector.broadcast %cst_97 : f32 to vector<2x300xf32>
    %101 = arith.maximumf %99, %100 : vector<2x300xf32>
    %c0_98 = arith.constant 0 : index
    %c0_99 = arith.constant 0 : index
    %102 = vector.load %arg6[%c0_98, %c0_99] : memref<300x10xf32, #tpu.memory_space<vmem>>, vector<300x10xf32>
    %cst_100 = arith.constant dense<0.000000e+00> : vector<2x10xf32>
    %103 = tpu.matmul %101, %102, %cst_100 {dimension_numbers = #tpu.dot_dimension_numbers<[1], [0], [0], [1], [0, 0, 1, 1], [], []>} : vector<2x300xf32>, vector<300x10xf32>, vector<2x10xf32> -> vector<2x10xf32>
    %c0_101 = arith.constant 0 : index
    %c0_102 = arith.constant 0 : index
    %104 = vector.load %arg7[%c0_101, %c0_102] : memref<2x10xf32, #tpu.memory_space<vmem>>, vector<2x10xf32>
    tpu.vector_store %arg7[%c0_101, %c0_102], %103 {strides = array<i32>} : memref<2x10xf32, #tpu.memory_space<vmem>>, vector<2x10xf32>,
    return
  }
  func.func @transform_0(%arg0: i32) -> (i32, i32, i32) {
    %c0_i32 = arith.constant 0 : i32
    %c0_i32_0 = arith.constant 0 : i32
    %c0_i32_1 = arith.constant 0 : i32
    return %arg0, %c0_i32, %c0_i32_0 : i32, i32, i32
  }
  func.func @transform_1(%arg0: i32) -> (i32, i32, i32) {
    %c0_i32 = arith.constant 0 : i32
    %c0_i32_0 = arith.constant 0 : i32
    %c0_i32_1 = arith.constant 0 : i32
    %c0_i32_2 = arith.constant 0 : i32
    return %c0_i32, %c0_i32_0, %c0_i32_1 : i32, i32, i32
  }
  func.func @transform_2(%arg0: i32) -> (i32, i32, i32) {
    %c0_i32 = arith.constant 0 : i32
    %c0_i32_0 = arith.constant 0 : i32
    %c0_i32_1 = arith.constant 0 : i32
    %c0_i32_2 = arith.constant 0 : i32
    return %c0_i32, %c0_i32_0, %c0_i32_1 : i32, i32, i32
  }
  func.func @transform_3(%arg0: i32) -> (i32, i32, i32) {
    %c0_i32 = arith.constant 0 : i32
    %c0_i32_0 = arith.constant 0 : i32
    %c0_i32_1 = arith.constant 0 : i32
    %c0_i32_2 = arith.constant 0 : i32
    return %c0_i32, %c0_i32_0, %c0_i32_1 : i32, i32, i32
  }
  func.func @transform_4(%arg0: i32) -> (i32, i32) {
    %c0_i32 = arith.constant 0 : i32
    %c0_i32_0 = arith.constant 0 : i32
    %c0_i32_1 = arith.constant 0 : i32
    return %c0_i32, %c0_i32_0 : i32, i32
  }
  func.func @transform_5(%arg0: i32) -> (i32, i32) {
    %c0_i32 = arith.constant 0 : i32
    %c0_i32_0 = arith.constant 0 : i32
    %c0_i32_1 = arith.constant 0 : i32
    return %c0_i32, %c0_i32_0 : i32, i32
  }
  func.func @transform_6(%arg0: i32) -> (i32, i32) {
    %c0_i32 = arith.constant 0 : i32
    %c0_i32_0 = arith.constant 0 : i32
    return %arg0, %c0_i32 : i32, i32
  }
}

</mosaic_0001>

<bundles_post_ra>
// kernel: simple_nn_forward.1
= control target key start
LH: loop header
LB: loop body
LE: loop exit
PB: predicated region body
PF: predicated region fallthrough
CT: control target
= control target key end

     0   :  { %11 = vsyncpa [#allocation7], 0  ;;  %s10665_s0 = inlined_call_operand.hbm [shape: f32[2,32,32], index: 0, kind: input, shape index: {}]   ;;  %s10666_s1 = inlined_call_operand.hbm [shape: f32[3,34,512], index: 1, kind: input, shape index: {}]   ;;  %s10667_s2 = inlined_call_operand.hbm [shape: f32[3,288,512], index: 2, kind: input, shape index: {}]   ;;  %s10668_s3 = inlined_call_operand.vmem [shape: f32[3,320,256], index: 3, kind: input, shape index: {}]   ;;  %s10669_s4 = inlined_call_operand.vmem [shape: f32[512,300], index: 4, kind: input, shape index: {}]   ;;  %s10670_s5 = inlined_call_operand.vmem [shape: f32[300,10], index: 5, kind: input, shape index: {}]   ;;  %s10671_s6 = inlined_call_operand.hbm [shape: f32[2,10], index: 6, kind: output, shape index: {}]  }
   0x1   :  { %12 = vsyncpa [#allocation10], 0 }
   0x2   :  { %13 = vsyncpa [#allocation8], 0  ;;  %s7863_s21 = smov [#allocation9]   ;;  %s7769_s25 = scalar_lea.hbm %s10666_s1, 7680 }
   0x3   :  { %s31_s22 = sshll.u32 %s7863_s21, 4  ;;  %p7770_p0 = scmp.ne.s32.totalorder %s10666_s1, %s7769_s25  ;;  %s32_s22 = int_to_ptr.vmem [resolvable:$true] %s31_s22 }
   0x4   :  { %p7773_p1 = scmp.lt.u32.totalorder %s7769_s25, %s10666_s1 }
   0x6   :  { %p7775_p2 = pnand %p7773_p1, %p7770_p0 }
   0x8   :  { %7778 = shalt.err (!%p7775_p2)
}
   0x9   :  { %s7779_s30 = scalar_lea.vmem %s32_s22, 7680  ;;  %p7784_p4 = scmp.lt.s32.totalorder %s32_s22, %s32_s22 }
   0xa   :  { %p7780_p3 = scmp.ne.s32.totalorder %s32_s22, %s7779_s30  ;;  %p7785_p5 = scmp.lt.s32.totalorder %s7779_s30, %s7779_s30 }
   0xc   :  { %p7786_p6 = por %p7785_p5, %p7784_p4 }
   0xe   :  { %p7787_p7 = pnand %p7786_p6, %p7780_p3 }
  0x10   :  { %7790 = shalt.err (!%p7787_p7)
}
  0x11   :  { %s7864_s7 = smov 512   ;;  %s7865_s8 = smov 32  }
  0x12   :  { %37 = dma.hbm_to_vmem [thread:$0]  %s10666_s1, 7680, %s32_s22, [#allocation10], %s7864_s7, %s7864_s7, %s7865_s8  }
  0x13   :  { %s7866_s11 = smov [#allocation6]   ;;  %s7791_s15 = scalar_lea.hbm %s10665_s0, 1024 }
  0x14   :  { %s19_s12 = sshll.u32 %s7866_s11, 4  ;;  %p7792_p8 = scmp.ne.s32.totalorder %s10665_s0, %s7791_s15  ;;  %s20_s12 = int_to_ptr.vmem [resolvable:$true] %s19_s12 }
  0x15   :  { %p7795_p9 = scmp.lt.u32.totalorder %s7791_s15, %s10665_s0 }
  0x17   :  { %p7797_p10 = pnand %p7795_p9, %p7792_p8 }
  0x19   :  { %7800 = shalt.err (!%p7797_p10)
}
  0x1a   :  { %s7801_s20 = scalar_lea.vmem %s20_s12, 1024  ;;  %p7806_p12 = scmp.lt.s32.totalorder %s20_s12, %s20_s12 }
  0x1b   :  { %p7802_p11 = scmp.ne.s32.totalorder %s20_s12, %s7801_s20  ;;  %p7807_p13 = scmp.lt.s32.totalorder %s7801_s20, %s7801_s20 }
  0x1d   :  { %p7808_p0 = por %p7807_p13, %p7806_p12 }
  0x1f   :  { %p7809_p1 = pnand %p7808_p0, %p7802_p11 }
  0x21   :  { %7812 = shalt.err (!%p7809_p1)
}
  0x22   :  { %s7867_s1 = smov 128   ;;  %s7868_s21 = smov 8  }
  0x23   :  { %25 = dma.hbm_to_vmem [thread:$0]  %s10665_s0, 1024, %s20_s12, [#allocation7], %s7867_s1, %s7867_s1, %s7868_s21  }
  0x24   :  { %s7869_s24 = smov [#allocation11]   ;;  %s7813_s28 = scalar_lea.hbm %s10667_s2, 55296 }
  0x25   :  { %s43_s25 = sshll.u32 %s7869_s24, 4  ;;  %p7814_p2 = scmp.ne.s32.totalorder %s10667_s2, %s7813_s28  ;;  %s44_s25 = int_to_ptr.vmem [resolvable:$true] %s43_s25 }
  0x26   :  { %p7817_p3 = scmp.lt.u32.totalorder %s7813_s28, %s10667_s2 }
  0x28   :  { %p7819_p4 = pnand %p7817_p3, %p7814_p2 }
  0x2a   :  { %7822 = shalt.err (!%p7819_p4)
}
  0x2b   :  { %s7823_s11 = scalar_lea.vmem %s44_s25, 55296  ;;  %p7828_p6 = scmp.lt.s32.totalorder %s44_s25, %s44_s25 }
  0x2c   :  { %p7824_p5 = scmp.ne.s32.totalorder %s44_s25, %s7823_s11  ;;  %p7829_p7 = scmp.lt.s32.totalorder %s7823_s11, %s7823_s11 }
  0x2e   :  { %p7830_p8 = por %p7829_p7, %p7828_p6 }
  0x30   :  { %p7831_p9 = pnand %p7830_p8, %p7824_p5 }
  0x32   :  { %7834 = shalt.err (!%p7831_p9)
}
  0x33   :  { %49 = dma.hbm_to_vmem [thread:$0]  %s10667_s2, 55296, %s44_s25, [#allocation10], %s7864_s7, %s7864_s7, %s7865_s8  }
  0x34   :  { %7857 = dma.done.wait [#allocation7], 1024  }
  0x35   :  { %7858 = vsyncadd [#allocation7], 4294966272 }
  0x36   :  { %7859 = dma.done.wait [#allocation10], 62976  }
  0x37   :  { %7860 = vsyncadd [#allocation10], 4294904320  ;;  %vm65_vm0 = vcmask 277504   ;;  %v7870_v0 = vmov 0.0   ;;  %vm70_vm1 = vcmask 271360   ;;  %v77_v1 = vld [vmem:[#allocation6] sm:$0xff] }
  0x38   :  { %66 = vst.msk [vmem:[#allocation2] sm:$0xff] %vm65_vm0, %v7870_v0  ;;  %67 = vst.msk [vmem:[#allocation2 + $0x8] sm:$0xff] %vm65_vm0, %v7870_v0  ;;  %284 = vmatprep.mubr.f32.mxu0 %v7870_v0  ;;  %397 = vmatprep.mubr.f32.mxu1 %v7870_v0  ;;  %v79_v2 = vld [vmem:[#allocation6 + $0x10] sm:$0xff]  ;;  %s7871_s2 = smov 1   ;;  %v78_v3 = vld [vmem:[#allocation6 + $0x8] sm:$0xff]  ;;  %vm207_vm2 = vcmask 1041408  }
  0x39   :  { %68 = vst.msk [vmem:[#allocation2 + $0x10] sm:$0xff] %vm65_vm0, %v7870_v0  ;;  %69 = vst.msk [vmem:[#allocation2 + $0x18] sm:$0xff] %vm65_vm0, %v7870_v0  ;;  %93 = vrot.lane.b32.xlu0 %v77_v1, %s7871_s2  ;;  %97 = vrot.lane.b32.xlu1 %v79_v2, %s7871_s2  ;;  %v80_v4 = vld [vmem:[#allocation6 + $0x18] sm:$0xff]  ;;  %v164_v5 = vld [vmem:[#allocation9 + $0xa8] sm:$0xff]  ;;  %vm117_vm3 = vcmask 269320   ;;  %vm2091_vm4 = vcmask 1042434  }
  0x3a   :  { %72 = vst.msk [vmem:[#allocation2 + $0x28] sm:$0xff] %vm65_vm0, %v7870_v0  ;;  %73 = vst.msk [vmem:[#allocation2 + $0x30] sm:$0xff] %vm65_vm0, %v7870_v0  ;;  %v168_v6 = vld [vmem:[#allocation9 + $0xc8] sm:$0xff]  ;;  %v166_v7 = vld [vmem:[#allocation9 + $0xb8] sm:$0xff]  ;;  %vm2093_vm5 = vcmask 1043459   ;;  %vm2095_vm6 = vcmask 1044484  }
  0x3b   :  { %74 = vst.msk [vmem:[#allocation2 + $0x38] sm:$0xff] %vm65_vm0, %v7870_v0  ;;  %75 = vst.msk [vmem:[#allocation2 + $0x40] sm:$0xff] %vm65_vm0, %v7870_v0  ;;  %v170_v8 = vld [vmem:[#allocation9 + $0xd8] sm:$0xff]  ;;  %v82_v9 = vld [vmem:[#allocation6 + $0x28] sm:$0xff]  ;;  %v6625_v11 = vpack.c.bf16 %v168_v6, %v164_v5  ;;  %vm2097_vm7 = vcmask 1045509   ;;  %vm2099_vm8 = vcmask 1046534  }
  0x3c   :  { %2007 = vst [vmem:[#allocation3] sm:$0xff] %v7870_v0  ;;  %2008 = vst [vmem:[#allocation3 + $0x8] sm:$0xff] %v7870_v0  ;;  %v81_v10 = vld [vmem:[#allocation6 + $0x20] sm:$0xff]  ;;  %v6633_v12 = vpack.c.bf16 %v170_v8, %v166_v7  ;;  %v165_v15 = vld [vmem:[#allocation9 + $0xb0] sm:$0xff]  ;;  %vm2101_vm9 = vcmask 1047559   ;;  %vm2109_vm10 = vcmask 1041409  }
  0x3d   :  { %2011 = vst [vmem:[#allocation3 + $0x18] sm:$0xff] %v7870_v0  ;;  %2014 = vst [vmem:[#allocation3 + $0x30] sm:$0x3] %v7870_v0  ;;  %v163_v13 = vld [vmem:[#allocation9 + $0xa0] sm:$0xff]  ;;  %95 = vrot.lane.b32.xlu0 %v78_v3, %s7871_s2  ;;  %99 = vrot.lane.b32.xlu1 %v80_v4, %s7871_s2  ;;  %v169_v17 = vld [vmem:[#allocation9 + $0xd0] sm:$0xff]  ;;  %s7873_s7 = smov 16  }
  0x3e   :  { %2015 = vst [vmem:[#allocation3 + $0x38] sm:$0x3] %v7870_v0  ;;  %2018 = vst [vmem:[#allocation3 + $0x48] sm:$0xff] %v7870_v0  ;;  %v167_v14 = vld [vmem:[#allocation9 + $0xc0] sm:$0xff]  ;;  %v172_v18 = vld [vmem:[#allocation9 + $0xe8] sm:$0xff]  ;;  %6626 = vmatprep.subr.bf16.mxu0 %v6625_v11  ;;  %6634 = vmatprep.subr.bf16.mxu1 %v6633_v12  ;;  %v6635_v20 = vpack.c.bf16 %v169_v17, %v165_v15  ;;  %vm2009_vm11 = vcmask 261120  }
  0x3f   :  { %2019 = vst [vmem:[#allocation3 + $0x50] sm:$0xff] %v7870_v0  ;;  %2021 = vst [vmem:[#allocation3 + $0x60] sm:$0xff] %v7870_v0  ;;  %v6627_v16 = vpack.c.bf16 %v167_v14, %v163_v13  ;;  %v176_v19 = vld [vmem:[#allocation9 + $0x108] sm:$0xff]  ;;  %v174_v22 = vld [vmem:[#allocation9 + $0xf8] sm:$0xff]  ;;  %vm2016_vm12 = vcmask 254976   ;;  %vm2199_vm13 = vcmask 1047681  }
  0x40   :  { %2024 = vst [vmem:[#allocation3 + $0x78] sm:$0x3] %v7870_v0  ;;  %2025 = vst [vmem:[#allocation3 + $0x80] sm:$0x3] %v7870_v0  ;;  %v6629_v21 = vpack.c.bf16 %v176_v19, %v172_v18  ;;  %v178_v23 = vld [vmem:[#allocation9 + $0x118] sm:$0xff]  ;;  %v171_v24 = vld [vmem:[#allocation9 + $0xe0] sm:$0xff]  ;;  %6636 = vmatpush1.bf16.msra.mxu1 %v6635_v20 }
  0x41   :  { %4398 = vst [vmem:[#allocation4] sm:$0xff] %v7870_v0  ;;  %4399 = vst [vmem:[#allocation4 + $0x8] sm:$0xff] %v7870_v0  ;;  %6628 = vmatpush1.bf16.msra.mxu0 %v6627_v16  ;;  %v6637_v25 = vpack.c.bf16 %v178_v23, %v174_v22  ;;  %v175_v26 = vld [vmem:[#allocation9 + $0x100] sm:$0xff]  ;;  %v173_v27 = vld [vmem:[#allocation9 + $0xf0] sm:$0xff]  ;;  %103 = vrot.lane.b32.xlu1 %v82_v9, %s7871_s2  ;;  %vm2174_vm14 = vcmask 130048   ;;  %vm2202_vm15 = vcmask 130049  }
  0x42   :  { %4402 = vst [vmem:[#allocation4 + $0x18] sm:$0x3] %v7870_v0  ;;  %4403 = vst [vmem:[#allocation4 + $0x20] sm:$0x3] %v7870_v0  ;;  %v177_v28 = vld [vmem:[#allocation9 + $0x110] sm:$0xff]  ;;  %6630 = vmatprep.subr.bf16.mxu0 %v6629_v21  ;;  %v6631_v30 = vpack.c.bf16 %v175_v26, %v171_v24  ;;  %101 = vrot.lane.b32.xlu0 %v81_v10, %s7871_s2  ;;  %v135_v33 = vld [vmem:[#allocation9 + $0x8] sm:$0xff] }
  0x43   :  { %4406 = vst [vmem:[#allocation4 + $0x30] sm:$0xff] %v7870_v0  ;;  %4407 = vst [vmem:[#allocation4 + $0x38] sm:$0xff] %v7870_v0  ;;  %v83_v29 = vld [vmem:[#allocation6 + $0x30] sm:$0xff]  ;;  %v6639_v31 = vpack.c.bf16 %v177_v28, %v173_v27  ;;  %v180_v32 = vld [vmem:[#allocation9 + $0x128] sm:$0x3]  ;;  %6638 = vmatprep.subr.bf16.mxu1 %v6637_v25 }
  0x44   :  { %4409 = vst [vmem:[#allocation4 + $0x48] sm:$0x3] %v7870_v0  ;;  %4410 = vst [vmem:[#allocation4 + $0x50] sm:$0x3] %v7870_v0  ;;  %v139_v34 = vld [vmem:[#allocation9 + $0x28] sm:$0xff]  ;;  %v84_v35 = vld [vmem:[#allocation6 + $0x38] sm:$0xff] }
  0x45   :  { %71 = vst.msk [vmem:[#allocation2 + $0x20] sm:$0x3] %vm70_vm1, %v7870_v0  ;;  %76 = vst.msk [vmem:[#allocation2 + $0x48] sm:$0x3] %vm70_vm1, %v7870_v0  ;;  %v137_v36 = vld [vmem:[#allocation9 + $0x18] sm:$0xff]  ;;  %6632 = vmatpush1.bf16.msra.mxu0 %v6631_v30  ;;  %6640 = vmatpush1.bf16.msra.mxu1 %v6639_v31  ;;  %v6641_v40 = vpack.c.bf16 %v139_v34, %v135_v33  ;;  %v134_v45 = vld [vmem:[#allocation9] sm:$0xff] }
  0x46   :  { %v141_v37 = vld [vmem:[#allocation9 + $0x38] sm:$0xff]  ;;  %6246 = vmatprep.subr.msk.mxu0 %vm207_vm2, %v180_v32  ;;  %v179_v39 = vld [vmem:[#allocation9 + $0x120] sm:$0x3]  ;;  %105 = vrot.lane.b32.xlu0 %v83_v29, %s7871_s2  ;;  %v181_v41 = vld [vmem:[#allocation9 + $0x130] sm:$0x3]  ;;  %vm2211_vm1 = vcmask 122880  }
  0x47   :  { %v182_v38 = vld [vmem:[#allocation9 + $0x138] sm:$0x3]  ;;  %107 = vrot.lane.b32.xlu1 %v84_v35, %s7871_s2  ;;  %v6649_v42 = vpack.c.bf16 %v141_v37, %v137_v36  ;;  %v138_v46 = vld [vmem:[#allocation9 + $0x20] sm:$0xff]  ;;  %v136_v47 = vld [vmem:[#allocation9 + $0x10] sm:$0xff] }
  0x48   :  { %6256 = vmatprep.subr.msk.mxu1 %vm207_vm2, %v182_v38  ;;  %v140_v48 = vld [vmem:[#allocation9 + $0x30] sm:$0xff]  ;;  %v143_v51 = vld [vmem:[#allocation9 + $0x48] sm:$0xff]  ;;  %v145_v53 = vld [vmem:[#allocation9 + $0x58] sm:$0xff]  ;;  %v6643_v55 = vpack.c.bf16 %v138_v46, %v134_v45 }
  0x49   :  { %6247 = vmatpush1.msk.msra.mxu0 %vm207_vm2, %v179_v39  ;;  %6257 = vmatpush1.msk.msra.mxu1 %vm207_vm2, %v181_v41  ;;  %v147_v52 = vld [vmem:[#allocation9 + $0x68] sm:$0xff]  ;;  %v149_v54 = vld [vmem:[#allocation9 + $0x78] sm:$0xff]  ;;  %v6651_v56 = vpack.c.bf16 %v140_v48, %v136_v47  ;;  %v142_v57 = vld [vmem:[#allocation9 + $0x40] sm:$0xff] }
  0x4a   :  { %6642 = vmatprep.subr.bf16.mxu0 %v6641_v40  ;;  %6650 = vmatprep.subr.bf16.mxu1 %v6649_v42  ;;  %v146_v58 = vld [vmem:[#allocation9 + $0x60] sm:$0xff]  ;;  %v6645_v62 = vpack.c.bf16 %v147_v52, %v143_v51  ;;  %v6653_v63 = vpack.c.bf16 %v149_v54, %v145_v53  ;;  %v144_v1 = vld [vmem:[#allocation9 + $0x50] sm:$0xff]  ;;  %v151_v5 = vld [vmem:[#allocation9 + $0x88] sm:$0x3] }
  0x4b   :  { %v148_v2 = vld [vmem:[#allocation9 + $0x70] sm:$0xff]  ;;  %v6647_v3 = vpack.c.bf16 %v146_v58, %v142_v57  ;;  %v153_v9 = vld [vmem:[#allocation9 + $0x98] sm:$0x3]  ;;  %v718_v10 = vld [vmem:[#allocation9 + $0x148] sm:$0xff] }
  0x4c   :  { %v6655_v4 = vpack.c.bf16 %v148_v2, %v144_v1  ;;  %v722_v11 = vld [vmem:[#allocation9 + $0x168] sm:$0xff]  ;;  %v720_v12 = vld [vmem:[#allocation9 + $0x158] sm:$0xff]  ;;  %v150_v15 = vld [vmem:[#allocation9 + $0x80] sm:$0x3]  ;;  %v1100_v1 = vlaneseq }
  0x4d   :  { %v724_v13 = vld [vmem:[#allocation9 + $0x178] sm:$0xff]  ;;  %v152_v16 = vld [vmem:[#allocation9 + $0x90] sm:$0x3]  ;;  %v6657_v17 = vpack.c.bf16 %v722_v11, %v718_v10  ;;  %v717_v24 = vld [vmem:[#allocation9 + $0x140] sm:$0xff] }
  0x4e   :  { %v6665_v18 = vpack.c.bf16 %v724_v13, %v720_v12  ;;  %v721_v25 = vld [vmem:[#allocation9 + $0x160] sm:$0xff]  ;;  %v719_v26 = vld [vmem:[#allocation9 + $0x150] sm:$0xff]  ;;  %v726_v28 = vld [vmem:[#allocation9 + $0x188] sm:$0xff] }
  0x4f   :  { %v723_v27 = vld [vmem:[#allocation9 + $0x170] sm:$0xff]  ;;  %v730_v29 = vld [vmem:[#allocation9 + $0x1a8] sm:$0xff]  ;;  %v728_v30 = vld [vmem:[#allocation9 + $0x198] sm:$0xff]  ;;  %v6659_v32 = vpack.c.bf16 %v721_v25, %v717_v24 }
  0x50   :  { %v732_v31 = vld [vmem:[#allocation9 + $0x1b8] sm:$0xff]  ;;  %v6667_v33 = vpack.c.bf16 %v723_v27, %v719_v26  ;;  %v725_v34 = vld [vmem:[#allocation9 + $0x180] sm:$0xff]  ;;  %v6661_v37 = vpack.c.bf16 %v730_v29, %v726_v28  ;;  %v727_v39 = vld [vmem:[#allocation9 + $0x190] sm:$0xff] }
  0x51   :  { %v729_v35 = vld [vmem:[#allocation9 + $0x1a0] sm:$0xff]  ;;  %v6669_v38 = vpack.c.bf16 %v732_v31, %v728_v30  ;;  %v731_v40 = vld [vmem:[#allocation9 + $0x1b0] sm:$0xff]  ;;  %v736_v45 = vld [vmem:[#allocation9 + $0x1d8] sm:$0x3] }
  0x52   :  { %v6663_v41 = vpack.c.bf16 %v729_v35, %v725_v34  ;;  %v6671_v42 = vpack.c.bf16 %v731_v40, %v727_v39  ;;  %v733_v47 = vld [vmem:[#allocation9 + $0x1c0] sm:$0x3]  ;;  %v735_v48 = vld [vmem:[#allocation9 + $0x1d0] sm:$0x3] }
  0xab   :  { %v94_v43 = vpop.permute.xlu0 %93  ;;  %v98_v44 = vpop.permute.xlu1 %97 }
  0xac   :  { %118 = vst.msk [vmem:[#allocation2 + $0x1] sm:$0xff] %vm117_vm3, %v94_v43  ;;  %120 = vst.msk [vmem:[#allocation2 + $0x11] sm:$0xff] %vm117_vm3, %v98_v44  ;;  %v734_v44 = vld [vmem:[#allocation9 + $0x1c8] sm:$0x3] }
  0xaf   :  { %v96_v49 = vpop.permute.xlu0 %95  ;;  %v100_v50 = vpop.permute.xlu1 %99 }
  0xb0   :  { %119 = vst.msk [vmem:[#allocation2 + $0x9] sm:$0xff] %vm117_vm3, %v96_v49  ;;  %121 = vst.msk [vmem:[#allocation2 + $0x19] sm:$0xff] %vm117_vm3, %v100_v50 }
  0xb3   :  { %v154_v59 = vld [vmem:[#allocation2 + $0x1] sm:$0xff]  ;;  %v104_v60 = vpop.permute.xlu1 %103  ;;  %v156_v14 = vld [vmem:[#allocation2 + $0x11] sm:$0xff] }
  0xb4   :  { %v102_v61 = vpop.permute.xlu0 %101  ;;  %6248 = vmatmul.mubr.msk.f32.vlgmr.msra.gmra.mrb[0].mxu0 %vm65_vm0, %v154_v59  ;;  %6258 = vmatmul.mubr.msk.f32.vlgmr.msra.gmra.mrb[0].mxu1 %vm65_vm0, %v154_v59  ;;  %123 = vst.msk [vmem:[#allocation2 + $0x31] sm:$0xff] %vm117_vm3, %v104_v60  ;;  %v126_v36 = vld [vmem:[#allocation2] sm:$0xff] }
  0xb5   :  { %122 = vst.msk [vmem:[#allocation2 + $0x29] sm:$0xff] %vm117_vm3, %v102_v61  ;;  %6644 = vmatpush1.bf16.msra.mxu0 %v6643_v55  ;;  %6652 = vmatpush1.bf16.msra.mxu1 %v6651_v56 }
  0xb6   :  { %290 = vmatprep.mubr.f32.mxu0 %v7870_v0  ;;  %403 = vmatprep.mubr.f32.mxu1 %v7870_v0 }
  0xb7   :  { %v155_v6 = vld [vmem:[#allocation2 + $0x9] sm:$0xff]  ;;  %6646 = vmatprep.subr.bf16.mxu0 %v6645_v62  ;;  %6654 = vmatprep.subr.bf16.mxu1 %v6653_v63  ;;  %v157_v19 = vld [vmem:[#allocation2 + $0x19] sm:$0xff]  ;;  %v7872_v62 = vmov 1983009808  }
  0xb8   :  { %v106_v7 = vpop.permute.xlu0 %105  ;;  %6249 = vmatmul.mubr.msk.f32.gmra.mrb[2].mxu0 %vm65_vm0, %v155_v6  ;;  %6259 = vmatmul.mubr.msk.f32.gmra.mrb[2].mxu1 %vm65_vm0, %v155_v6  ;;  %v127_v43 = vld [vmem:[#allocation2 + $0x8] sm:$0xff]  ;;  %v128_v46 = vld [vmem:[#allocation2 + $0x10] sm:$0xff]  ;;  %v129_v49 = vld [vmem:[#allocation2 + $0x18] sm:$0xff]  ;;  %v1098_v63 = vunpack.c.l.s4 %v7872_v62 }
  0xb9   :  { %v108_v8 = vpop.permute.xlu1 %107  ;;  %124 = vst.msk [vmem:[#allocation2 + $0x39] sm:$0xff] %vm117_vm3, %v106_v7  ;;  %296 = vmatprep.mubr.f32.mxu0 %v7870_v0  ;;  %409 = vmatprep.mubr.f32.mxu1 %v7870_v0  ;;  %v708_v54 = vld [vmem:[#allocation2 + $0x2] sm:$0xff]  ;;  %v709_v55 = vld [vmem:[#allocation2 + $0xa] sm:$0xff]  ;;  %v710_v56 = vld [vmem:[#allocation2 + $0x12] sm:$0xff] }
  0xba   :  { %125 = vst.msk [vmem:[#allocation2 + $0x41] sm:$0xff] %vm117_vm3, %v108_v8  ;;  %6648 = vmatpush1.bf16.msra.mxu0 %v6647_v3  ;;  %6656 = vmatpush1.bf16.msra.mxu1 %v6655_v4  ;;  %v711_v57 = vld [vmem:[#allocation2 + $0x1a] sm:$0xff]  ;;  %v1099_v4 = vunpack.c.0.s8 %v1098_v63  ;;  %vm2204_vm3 = vcmask 1047680  }
  0xbb   :  { %6266 = vmatprep.subr.msk.mxu0 %vm207_vm2, %v151_v5  ;;  %6276 = vmatprep.subr.msk.mxu1 %vm207_vm2, %v153_v9  ;;  %v159_v21 = vld [vmem:[#allocation2 + $0x31] sm:$0xff]  ;;  %v1101_v5 = vshrl.u32 %v1100_v1, 7 }
  0xbc   :  { %6250 = vmatmul.mubr.msk.f32.gmra.mrb[4].mxu0 %vm65_vm0, %v156_v14  ;;  %6260 = vmatmul.mubr.msk.f32.gmra.mrb[4].mxu1 %vm65_vm0, %v156_v14  ;;  %v158_v20 = vld [vmem:[#allocation2 + $0x29] sm:$0xff] }
  0xbd   :  { %302 = vmatprep.mubr.f32.mxu0 %v7870_v0  ;;  %415 = vmatprep.mubr.f32.mxu1 %v7870_v0  ;;  %v130_v50 = vld [vmem:[#allocation2 + $0x28] sm:$0xff]  ;;  %v131_v51 = vld [vmem:[#allocation2 + $0x30] sm:$0xff]  ;;  %v8115_v13 = vsub.s32 %v1099_v4, %v1101_v5 }
  0xbe   :  { %6267 = vmatpush1.msk.msra.mxu0 %vm207_vm2, %v150_v15  ;;  %6277 = vmatpush1.msk.msra.mxu1 %vm207_vm2, %v152_v16  ;;  %v712_v58 = vld [vmem:[#allocation2 + $0x2a] sm:$0xff] }
  0xbf   :  { %6658 = vmatprep.subr.bf16.mxu0 %v6657_v17  ;;  %6666 = vmatprep.subr.bf16.mxu1 %v6665_v18 }
  0xc0   :  { %6251 = vmatmul.mubr.msk.f32.gmra.mrb[6].mxu0 %vm65_vm0, %v157_v19  ;;  %6261 = vmatmul.mubr.msk.f32.gmra.mrb[6].mxu1 %vm65_vm0, %v157_v19  ;;  %v160_v22 = vld [vmem:[#allocation2 + $0x39] sm:$0xff] }
  0xc1   :  { %308 = vmatprep.mubr.f32.mxu0 %v7870_v0  ;;  %421 = vmatprep.mubr.f32.mxu1 %v7870_v0  ;;  %v161_v23 = vld [vmem:[#allocation2 + $0x41] sm:$0xff]  ;;  %v132_v52 = vld [vmem:[#allocation2 + $0x38] sm:$0xff] }
  0xc2   :  { %v133_v53 = vld [vmem:[#allocation2 + $0x40] sm:$0xff]  ;;  %v713_v59 = vld [vmem:[#allocation2 + $0x32] sm:$0xff] }
  0xc3   :  { %v714_v60 = vld [vmem:[#allocation2 + $0x3a] sm:$0xff]  ;;  %v715_v61 = vld [vmem:[#allocation2 + $0x42] sm:$0xff] }
  0xc4   :  { %6252 = vmatmul.mubr.msk.f32.gmra.mrb[8].mxu0 %vm65_vm0, %v158_v20  ;;  %6262 = vmatmul.mubr.msk.f32.gmra.mrb[8].mxu1 %vm65_vm0, %v158_v20 }
  0xc5   :  { %314 = vmatprep.mubr.f32.mxu0 %v7870_v0  ;;  %427 = vmatprep.mubr.f32.mxu1 %v7870_v0 }
  0xc8   :  { %6253 = vmatmul.mubr.msk.f32.gmra.mrb[10].mxu0 %vm65_vm0, %v159_v21  ;;  %6263 = vmatmul.mubr.msk.f32.gmra.mrb[10].mxu1 %vm65_vm0, %v159_v21 }
  0xc9   :  { %320 = vmatprep.mubr.f32.mxu0 %v7870_v0  ;;  %433 = vmatprep.mubr.f32.mxu1 %v7870_v0 }
  0xcc   :  { %6254 = vmatmul.mubr.msk.f32.gmra.mrb[12].mxu0 %vm65_vm0, %v160_v22  ;;  %6264 = vmatmul.mubr.msk.f32.gmra.mrb[12].mxu1 %vm65_vm0, %v160_v22 }
  0xcd   :  { %326 = vmatprep.mubr.f32.mxu0 %v7870_v0  ;;  %439 = vmatprep.mubr.f32.mxu1 %v7870_v0 }
  0xd0   :  { %6255 = vmatmul.mubr.msk.f32.gmra.mrb[14].mxu0 %vm65_vm0, %v161_v23  ;;  %6265 = vmatmul.mubr.msk.f32.gmra.mrb[14].mxu1 %vm65_vm0, %v161_v23 }
  0xd1   :  { %546 = vmatprep.mubr.f32.mxu0 %v7870_v0  ;;  %659 = vmatprep.mubr.f32.mxu1 %v7870_v0 }
  0xd4   :  { %6268 = vmatmul.mubr.msk.f32.vlgmr.msra.gmra.mrb[0].mxu0 %vm65_vm0, %v126_v36  ;;  %6278 = vmatmul.mubr.msk.f32.vlgmr.msra.gmra.mrb[0].mxu1 %vm65_vm0, %v126_v36 }
  0xd5   :  { %6660 = vmatpush1.bf16.msra.mxu0 %v6659_v32  ;;  %6668 = vmatpush1.bf16.msra.mxu1 %v6667_v33 }
  0xd6   :  { %552 = vmatprep.mubr.f32.mxu0 %v7870_v0  ;;  %665 = vmatprep.mubr.f32.mxu1 %v7870_v0 }
  0xd7   :  { %6662 = vmatprep.subr.bf16.mxu0 %v6661_v37  ;;  %6670 = vmatprep.subr.bf16.mxu1 %v6669_v38 }
  0xd8   :  { %6269 = vmatmul.mubr.msk.f32.gmra.mrb[2].mxu0 %vm65_vm0, %v127_v43  ;;  %6279 = vmatmul.mubr.msk.f32.gmra.mrb[2].mxu1 %vm65_vm0, %v127_v43 }
  0xd9   :  { %558 = vmatprep.mubr.f32.mxu0 %v7870_v0  ;;  %671 = vmatprep.mubr.f32.mxu1 %v7870_v0 }
  0xda   :  { %6664 = vmatpush1.bf16.msra.mxu0 %v6663_v41  ;;  %6672 = vmatpush1.bf16.msra.mxu1 %v6671_v42 }
  0xdb   :  { %6286 = vmatprep.subr.msk.mxu0 %vm207_vm2, %v734_v44  ;;  %6296 = vmatprep.subr.msk.mxu1 %vm207_vm2, %v736_v45 }
  0xdc   :  { %6270 = vmatmul.mubr.msk.f32.gmra.mrb[4].mxu0 %vm65_vm0, %v128_v46  ;;  %6280 = vmatmul.mubr.msk.f32.gmra.mrb[4].mxu1 %vm65_vm0, %v128_v46 }
  0xdd   :  { %564 = vmatprep.mubr.f32.mxu0 %v7870_v0  ;;  %677 = vmatprep.mubr.f32.mxu1 %v7870_v0 }
  0xde   :  { %6287 = vmatpush1.msk.msra.mxu0 %vm207_vm2, %v733_v47  ;;  %6297 = vmatpush1.msk.msra.mxu1 %vm207_vm2, %v735_v48 }
  0xe0   :  { %6271 = vmatmul.mubr.msk.f32.gmra.mrb[6].mxu0 %vm65_vm0, %v129_v49  ;;  %6281 = vmatmul.mubr.msk.f32.gmra.mrb[6].mxu1 %vm65_vm0, %v129_v49 }
  0xe1   :  { %570 = vmatprep.mubr.f32.mxu0 %v7870_v0  ;;  %683 = vmatprep.mubr.f32.mxu1 %v7870_v0 }
  0xe4   :  { %6272 = vmatmul.mubr.msk.f32.gmra.mrb[8].mxu0 %vm65_vm0, %v130_v50  ;;  %6282 = vmatmul.mubr.msk.f32.gmra.mrb[8].mxu1 %vm65_vm0, %v130_v50 }
  0xe5   :  { %576 = vmatprep.mubr.f32.mxu0 %v7870_v0  ;;  %689 = vmatprep.mubr.f32.mxu1 %v7870_v0 }
  0xe8   :  { %6273 = vmatmul.mubr.msk.f32.gmra.mrb[10].mxu0 %vm65_vm0, %v131_v51  ;;  %6283 = vmatmul.mubr.msk.f32.gmra.mrb[10].mxu1 %vm65_vm0, %v131_v51 }
  0xe9   :  { %582 = vmatprep.mubr.f32.mxu0 %v7870_v0  ;;  %695 = vmatprep.mubr.f32.mxu1 %v7870_v0 }
  0xec   :  { %6274 = vmatmul.mubr.msk.f32.gmra.mrb[12].mxu0 %vm65_vm0, %v132_v52  ;;  %6284 = vmatmul.mubr.msk.f32.gmra.mrb[12].mxu1 %vm65_vm0, %v132_v52 }
  0xed   :  { %588 = vmatprep.mubr.f32.mxu0 %v7870_v0  ;;  %701 = vmatprep.mubr.f32.mxu1 %v7870_v0 }
  0xf0   :  { %6275 = vmatmul.mubr.msk.f32.gmra.mrb[14].mxu0 %vm65_vm0, %v133_v53  ;;  %6285 = vmatmul.mubr.msk.f32.gmra.mrb[14].mxu1 %vm65_vm0, %v133_v53 }
  0xf1   :  { %837 = vmatprep.mubr.f32.mxu0 %v7870_v0  ;;  %950 = vmatprep.mubr.f32.mxu1 %v7870_v0 }
  0xf4   :  { %6288 = vmatmul.mubr.msk.f32.vlgmr.msra.gmra.mrb[0].mxu0 %vm65_vm0, %v708_v54  ;;  %6298 = vmatmul.mubr.msk.f32.vlgmr.msra.gmra.mrb[0].mxu1 %vm65_vm0, %v708_v54 }
  0xf5   :  { %843 = vmatprep.mubr.f32.mxu0 %v7870_v0  ;;  %956 = vmatprep.mubr.f32.mxu1 %v7870_v0 }
  0xf8   :  { %6289 = vmatmul.mubr.msk.f32.gmra.mrb[2].mxu0 %vm65_vm0, %v709_v55  ;;  %6299 = vmatmul.mubr.msk.f32.gmra.mrb[2].mxu1 %vm65_vm0, %v709_v55 }
  0xf9   :  { %849 = vmatprep.mubr.f32.mxu0 %v7870_v0  ;;  %962 = vmatprep.mubr.f32.mxu1 %v7870_v0 }
  0xfc   :  { %6290 = vmatmul.mubr.msk.f32.gmra.mrb[4].mxu0 %vm65_vm0, %v710_v56  ;;  %6300 = vmatmul.mubr.msk.f32.gmra.mrb[4].mxu1 %vm65_vm0, %v710_v56 }
  0xfd   :  { %855 = vmatprep.mubr.f32.mxu0 %v7870_v0  ;;  %968 = vmatprep.mubr.f32.mxu1 %v7870_v0 }
 0x100   :  { %6291 = vmatmul.mubr.msk.f32.gmra.mrb[6].mxu0 %vm65_vm0, %v711_v57  ;;  %6301 = vmatmul.mubr.msk.f32.gmra.mrb[6].mxu1 %vm65_vm0, %v711_v57 }
 0x101   :  { %861 = vmatprep.mubr.f32.mxu0 %v7870_v0  ;;  %974 = vmatprep.mubr.f32.mxu1 %v7870_v0 }
 0x104   :  { %6292 = vmatmul.mubr.msk.f32.gmra.mrb[8].mxu0 %vm65_vm0, %v712_v58  ;;  %6302 = vmatmul.mubr.msk.f32.gmra.mrb[8].mxu1 %vm65_vm0, %v712_v58 }
 0x105   :  { %867 = vmatprep.mubr.f32.mxu0 %v7870_v0  ;;  %980 = vmatprep.mubr.f32.mxu1 %v7870_v0 }
 0x108   :  { %6293 = vmatmul.mubr.msk.f32.gmra.mrb[10].mxu0 %vm65_vm0, %v713_v59  ;;  %6303 = vmatmul.mubr.msk.f32.gmra.mrb[10].mxu1 %vm65_vm0, %v713_v59 }
 0x109   :  { %873 = vmatprep.mubr.f32.mxu0 %v7870_v0  ;;  %986 = vmatprep.mubr.f32.mxu1 %v7870_v0 }
 0x10c   :  { %6294 = vmatmul.mubr.msk.f32.gmra.mrb[12].mxu0 %vm65_vm0, %v714_v60  ;;  %6304 = vmatmul.mubr.msk.f32.gmra.mrb[12].mxu1 %vm65_vm0, %v714_v60 }
 0x10d   :  { %879 = vmatprep.mubr.f32.mxu0 %v7870_v0  ;;  %992 = vmatprep.mubr.f32.mxu1 %v7870_v0 }
 0x110   :  { %6295 = vmatmul.mubr.msk.f32.gmra.mrb[14].mxu0 %vm65_vm0, %v715_v61  ;;  %6305 = vmatmul.mubr.msk.f32.gmra.mrb[14].mxu1 %vm65_vm0, %v715_v61  ;;  %vm2208_vm0 = vcmask 1040512  }
 0x1c7   :  { %v839_v2 = vpop.f32.mrb[0].mxu0  ;;  %v952_v3 = vpop.f32.mrb[0].mxu1 }
 0x1c8   :  { %v1031_v6 = vmax.f32 %v839_v2, 0.0  ;;  %v1033_v7 = vmax.f32 %v952_v3, 0.0  ;;  %v841_v8 = vpop.f32.mrb[1].mxu0  ;;  %v954_v9 = vpop.f32.mrb[1].mxu1 }
 0x1c9   :  { %v1032_v10 = vmax.f32 %v841_v8, 0.0  ;;  %v1034_v11 = vmax.f32 %v954_v9, 0.0 }
 0x1ca   :  { %v1063_v12 = vmax.f32 %v1031_v6, %v1033_v7 }
 0x1cb   :  { %v1064_v0 = vmax.f32 %v1032_v10, %v1034_v11  ;;  %v845_v14 = vpop.f32.mrb[2].mxu0  ;;  %v958_v15 = vpop.f32.mrb[2].mxu1 }
 0x1cc   :  { %v1035_v16 = vmax.f32 %v845_v14, 0.0  ;;  %v1037_v17 = vmax.f32 %v958_v15, 0.0  ;;  %v847_v18 = vpop.f32.mrb[3].mxu0  ;;  %v960_v19 = vpop.f32.mrb[3].mxu1 }
 0x1cd   :  { %v1095_v20 = vcombine.low %v1063_v12, %v1064_v0  ;;  %v1096_v21 = vcombine.high %v1063_v12, %v1064_v0  ;;  %v1036_v22 = vmax.f32 %v847_v18, 0.0  ;;  %v1038_v23 = vmax.f32 %v960_v19, 0.0 }
 0x1ce   :  { %v1065_v24 = vmax.f32 %v1035_v16, %v1037_v17 }
 0x1cf   :  { %v1103_v25 = vrot.slane %v1095_v20, %v8115_v13  ;;  %v1110_v26 = vrot.slane %v1096_v21, %v8115_v13  ;;  %v1066_v27 = vmax.f32 %v1036_v22, %v1038_v23  ;;  %v851_v28 = vpop.f32.mrb[4].mxu0  ;;  %v964_v29 = vpop.f32.mrb[4].mxu1 }
 0x1d0   :  { %v1039_v30 = vmax.f32 %v851_v28, 0.0  ;;  %v1041_v31 = vmax.f32 %v964_v29, 0.0  ;;  %v8119_v32 = vpop.f32.mrb[5].mxu0  ;;  %v8121_v33 = vpop.f32.mrb[5].mxu1 }
 0x1d1   :  { %v1111_v34 = vcombine.high %v1103_v25, %v1103_v25  ;;  %v1112_v35 = vcombine.high %v1110_v26, %v1110_v26  ;;  %v1245_v36 = vrot.slane %v1103_v25, %v8115_v13  ;;  %v1261_v37 = vrot.slane %v1110_v26, %v8115_v13 }
 0x1d2   :  { %v1113_v38 = vcombine.low %v1065_v24, %v1066_v27  ;;  %v1114_v39 = vcombine.high %v1065_v24, %v1066_v27  ;;  %v8125_v40 = vmax.f32 %v1039_v30, %v1041_v31  ;;  %v1040_v41 = vmax.f32 %v8119_v32, 0.0 }
 0x1d3   :  { %v1246_v42 = vcombine.high %v1245_v36, %v1245_v36  ;;  %v1253_v43 = vrot.slane %v1111_v34, %v8115_v13  ;;  %v1262_v44 = vcombine.high %v1261_v37, %v1261_v37  ;;  %v1269_v45 = vrot.slane %v1112_v35, %v8115_v13  ;;  %v8130_v46 = vpop.f32.mrb[6].mxu0  ;;  %v8132_v47 = vpop.f32.mrb[6].mxu1 }
 0x1d4   :  { %v1559_v48 = vsel %vm207_vm2, %v1245_v36, -inf  ;;  %v1587_v49 = vsel %vm207_vm2, %v1261_v37, -inf  ;;  %v8137_v50 = vrot.slane %v1113_v38, %v8115_v13  ;;  %v8140_v51 = vrot.slane %v1114_v39, %v8115_v13  ;;  %v8142_v52 = vpop.f32.mrb[7].mxu0  ;;  %v8144_v53 = vpop.f32.mrb[7].mxu1 }
 0x1d5   :  { %v1254_v54 = vcombine.high %v1253_v43, %v1253_v43  ;;  %v1270_v55 = vcombine.high %v1269_v45, %v1269_v45  ;;  %v1560_v56 = vrot.slane %v1559_v48, 4  ;;  %v1566_v57 = vsel %vm207_vm2, %v1246_v42, -inf }
 0x1d6   :  { %v1567_v58 = vrot.slane %v1566_v57, 4  ;;  %v1573_v59 = vsel %vm207_vm2, %v1253_v43, -inf  ;;  %v1588_v60 = vrot.slane %v1587_v49, 4  ;;  %v1594_v61 = vsel %vm207_vm2, %v1262_v44, -inf }
 0x1d7   :  { %v1561_v62 = vmax.f32 %v1559_v48, %v1560_v56  ;;  %v1574_v63 = vrot.slane %v1573_v59, 4  ;;  %v1580_v1 = vsel %vm207_vm2, %v1254_v54, -inf  ;;  %v1595_v2 = vrot.slane %v1594_v61, 4  ;;  %v8150_v3 = vpop.f32.mrb[8].mxu0  ;;  %v8152_v4 = vpop.f32.mrb[8].mxu1 }
 0x1d8   :  { %v1568_v5 = vmax.f32 %v1566_v57, %v1567_v58  ;;  %v1581_v6 = vrot.slane %v1580_v1, 4  ;;  %v1589_v7 = vmax.f32 %v1587_v49, %v1588_v60  ;;  %v1601_v8 = vsel %vm207_vm2, %v1269_v45, -inf  ;;  %v8155_v9 = vpop.f32.mrb[9].mxu0  ;;  %v8157_v10 = vpop.f32.mrb[9].mxu1 }
 0x1d9   :  { %v1562_v11 = vrot.slane %v1561_v62, 2  ;;  %v1575_v12 = vmax.f32 %v1573_v59, %v1574_v63  ;;  %v1596_v0 = vmax.f32 %v1594_v61, %v1595_v2  ;;  %v1602_v14 = vrot.slane %v1601_v8, 4 }
 0x1da   :  { %v1569_v15 = vrot.slane %v1568_v5, 2  ;;  %v1582_v16 = vmax.f32 %v1580_v1, %v1581_v6  ;;  %v1590_v17 = vrot.slane %v1589_v7, 2  ;;  %v1608_v18 = vsel %vm207_vm2, %v1270_v55, -inf }
 0x1db   :  { %v1563_v19 = vmax.f32 %v1561_v62, %v1562_v11  ;;  %v1576_v20 = vrot.slane %v1575_v12, 2  ;;  %v1597_v21 = vrot.slane %v1596_v0, 2  ;;  %v8160_v22 = vmax.f32 %v1601_v8, %v1602_v14  ;;  %v8162_v23 = vpop.f32.mrb[10].mxu0  ;;  %v8164_v24 = vpop.f32.mrb[10].mxu1 }
 0x1dc   :  { %v8166_v25 = vmax.f32 %v1568_v5, %v1569_v15  ;;  %v1583_v26 = vrot.slane %v1582_v16, 2  ;;  %v8168_v27 = vmax.f32 %v1589_v7, %v1590_v17  ;;  %v1609_v28 = vrot.slane %v1608_v18, 4  ;;  %v8170_v29 = vpop.f32.mrb[11].mxu0  ;;  %v8172_v30 = vpop.f32.mrb[11].mxu1 }
 0x1dd   :  { %v1564_v31 = vrot.slane %v1563_v19, 1  ;;  %v8174_v34 = vmax.f32 %v1575_v12, %v1576_v20  ;;  %v8176_v35 = vmax.f32 %v1596_v0, %v1597_v21  ;;  %v1129_v45 = vcombine.high %v8137_v50, %v8137_v50 }
 0x1de   :  { %v8180_v38 = vmax.f32 %v1582_v16, %v1583_v26  ;;  %v8183_v42 = vmax.f32 %v1608_v18, %v1609_v28  ;;  %v1130_v48 = vcombine.high %v8140_v51, %v8140_v51  ;;  %v1277_v55 = vrot.slane %v8137_v50, %v8115_v13 }
 0x1df   :  { %v8185_v43 = vmax.f32 %v1563_v19, %v1564_v31  ;;  %v8192_v49 = vpop.f32.mrb[12].mxu0  ;;  %v8194_v54 = vpop.f32.mrb[12].mxu1  ;;  %v8200_v56 = vrot.slane %v8140_v51, %v8115_v13  ;;  %v1042_v57 = vmax.f32 %v8121_v33, 0.0  ;;  %v1043_v58 = vmax.f32 %v8130_v46, 0.0 }
 0x1e0   :  { %v8204_v59 = vpop.f32.mrb[13].mxu0  ;;  %v8206_v60 = vpop.f32.mrb[13].mxu1  ;;  %v8209_v61 = vrot.slane %v1129_v45, %v8115_v13  ;;  %v1301_v62 = vrot.slane %v1130_v48, %v8115_v13  ;;  %v1045_v63 = vmax.f32 %v8132_v47, 0.0  ;;  %v1044_v50 = vmax.f32 %v8142_v52, 0.0 }
 0x1e1   :  { %v1278_v1 = vcombine.high %v1277_v55, %v1277_v55  ;;  %v1615_v33 = vsel %vm207_vm2, %v1277_v55, -inf  ;;  %v8219_v46 = vsel %vm207_vm2, %v8200_v56, -inf  ;;  %v1068_v21 = vmax.f32 %v1040_v41, %v1042_v57 }
 0x1e2   :  { %v1302_v5 = vcombine.high %v1301_v62, %v1301_v62  ;;  %v1616_v6 = vrot.slane %v1615_v33, 4  ;;  %v8225_v47 = vsel %vm207_vm2, %v8209_v61, -inf  ;;  %v1657_v0 = vsel %vm207_vm2, %v1301_v62, -inf }
 0x1e3   :  { %v8227_v52 = vpop.f32.mrb[14].mxu0  ;;  %v8229_v7 = vpop.f32.mrb[14].mxu1  ;;  %v1622_v8 = vsel %vm207_vm2, %v1278_v1, -inf  ;;  %v1658_v18 = vrot.slane %v1657_v0, 4  ;;  %v1069_v26 = vmax.f32 %v1043_v58, %v1045_v63  ;;  %v1046_v28 = vmax.f32 %v8144_v53, 0.0 }
 0x1e4   :  { %v8235_v14 = vpop.f32.mrb[15].mxu0  ;;  %v8237_v15 = vpop.f32.mrb[15].mxu1  ;;  %v8239_v16 = vmax.f32 %v1615_v33, %v1616_v6  ;;  %v1623_v17 = vrot.slane %v1622_v8, 4  ;;  %v1664_v19 = vsel %vm207_vm2, %v1302_v5, -inf  ;;  %v1047_v55 = vmax.f32 %v8150_v3, 0.0 }
 0x1e5   :  { %v1665_v20 = vrot.slane %v1664_v19, 4  ;;  %v1659_v48 = vmax.f32 %v1657_v0, %v1658_v18  ;;  %v1131_v1 = vcombine.low %v8125_v40, %v1068_v21  ;;  %v1132_v33 = vcombine.high %v8125_v40, %v1068_v21 }
 0x1e6   :  { %v8246_v45 = vmax.f32 %v1622_v8, %v1623_v17  ;;  %v1070_v5 = vmax.f32 %v1044_v50, %v1046_v28  ;;  %v1049_v32 = vmax.f32 %v8152_v4, 0.0  ;;  %v1048_v41 = vmax.f32 %v8155_v9, 0.0 }
 0x1e7   :  { %v1666_v62 = vmax.f32 %v1664_v19, %v1665_v20  ;;  %v1660_v6 = vrot.slane %v1659_v48, 2  ;;  %v1050_v53 = vmax.f32 %v8157_v10, 0.0  ;;  %v1139_v58 = vrot.slane %v1131_v1, %v8115_v13 }
 0x1e8   :  { %v1146_v63 = vrot.slane %v1132_v33, %v8115_v13  ;;  %v1149_v8 = vcombine.low %v1069_v26, %v1070_v5  ;;  %v1150_v0 = vcombine.high %v1069_v26, %v1070_v5  ;;  %v8256_v17 = vmax.f32 %v1047_v55, %v1049_v32 }
 0x1e9   :  { %v1667_v57 = vrot.slane %v1666_v62, 2  ;;  %v1661_v3 = vmax.f32 %v1659_v48, %v1660_v6  ;;  %v8258_v18 = vmax.f32 %v1048_v41, %v1050_v53  ;;  %v1147_v50 = vcombine.high %v1139_v58, %v1139_v58 }
 0x1ea   :  { %v1148_v19 = vcombine.high %v1146_v63, %v1146_v63  ;;  %v1309_v4 = vrot.slane %v1139_v58, %v8115_v13  ;;  %v1325_v10 = vrot.slane %v1146_v63, %v8115_v13  ;;  %v1157_v20 = vrot.slane %v1149_v8, %v8115_v13 }
 0x1eb   :  { %v1668_v40 = vmax.f32 %v1666_v62, %v1667_v57  ;;  %v1662_v9 = vrot.slane %v1661_v3, 1  ;;  %v8264_v21 = vrot.slane %v1150_v0, %v8115_v13  ;;  %v1317_v26 = vrot.slane %v1147_v50, %v8115_v13 }
 0x1ec   :  { %v1310_v48 = vcombine.high %v1309_v4, %v1309_v4  ;;  %v1333_v55 = vrot.slane %v1148_v19, %v8115_v13  ;;  %v1326_v62 = vcombine.high %v1325_v10, %v1325_v10  ;;  %v1671_v33 = vsel %vm207_vm2, %v1309_v4, -inf }
 0x1ed   :  { %v1669_v28 = vrot.slane %v1668_v40, 1  ;;  %v8268_v1 = vmax.f32 %v1661_v3, %v1662_v9  ;;  %v1699_v5 = vsel %vm207_vm2, %v1325_v10, -inf  ;;  %v1318_v32 = vcombine.high %v1317_v26, %v1317_v26 }
 0x1ee   :  { %v1334_v41 = vcombine.high %v1333_v55, %v1333_v55  ;;  %v1672_v53 = vrot.slane %v1671_v33, 4  ;;  %v1678_v57 = vsel %vm207_vm2, %v1310_v48, -inf  ;;  %v1685_v58 = vsel %vm207_vm2, %v1317_v26, -inf }
 0x1ef   :  { %v8272_v6 = vmax.f32 %v1668_v40, %v1669_v28  ;;  %v1700_v63 = vrot.slane %v1699_v5, 4  ;;  %v1706_v8 = vsel %vm207_vm2, %v1326_v62, -inf  ;;  %v1679_v3 = vrot.slane %v1678_v57, 4 }
 0x1f0   :  { %v1673_v0 = vmax.f32 %v1671_v33, %v1672_v53  ;;  %v1686_v50 = vrot.slane %v1685_v58, 4  ;;  %v1692_v19 = vsel %vm207_vm2, %v1318_v32, -inf  ;;  %v1707_v10 = vrot.slane %v1706_v8, 4 }
 0x1f1   :  { %10691 = vst [vmem:[#allocation16_spill] sm:$0xff] %v8272_v6  ;;  %v1693_v4 = vrot.slane %v1692_v19, 4  ;;  %v1701_v9 = vmax.f32 %v1699_v5, %v1700_v63  ;;  %v1713_v40 = vsel %vm207_vm2, %v1333_v55, -inf  ;;  %v1680_v51 = vmax.f32 %v1678_v57, %v1679_v3 }
 0x1f2   :  { %v1674_v28 = vrot.slane %v1673_v0, 2  ;;  %v1687_v2 = vmax.f32 %v1685_v58, %v1686_v50  ;;  %v1714_v37 = vrot.slane %v1713_v40, 4  ;;  %v1708_v26 = vmax.f32 %v1706_v8, %v1707_v10 }
 0x1f3   :  { %v1694_v48 = vmax.f32 %v1692_v19, %v1693_v4  ;;  %v1702_v12 = vrot.slane %v1701_v9, 2  ;;  %v1720_v11 = vsel %vm207_vm2, %v1334_v41, -inf  ;;  %v1681_v33 = vrot.slane %v1680_v51, 2 }
 0x1f4   :  { %v1675_v62 = vmax.f32 %v1673_v0, %v1674_v28  ;;  %v1688_v53 = vrot.slane %v1687_v2, 2  ;;  %v8280_v31 = vmax.f32 %v1713_v40, %v1714_v37  ;;  %v1709_v5 = vrot.slane %v1708_v26, 2 }
 0x1f5   :  { %v1695_v32 = vrot.slane %v1694_v48, 2  ;;  %v8282_v36 = vmax.f32 %v1701_v9, %v1702_v12  ;;  %v1721_v63 = vrot.slane %v1720_v11, 4  ;;  %v1682_v39 = vmax.f32 %v1680_v51, %v1681_v33 }
 0x1f6   :  { %v1676_v55 = vrot.slane %v1675_v62, 1  ;;  %v8284_v57 = vmax.f32 %v1687_v2, %v1688_v53  ;;  %v8290_v8 = vmax.f32 %v1708_v26, %v1709_v5  ;;  %v1165_v19 = vcombine.high %v1157_v20, %v1157_v20 }
 0x1f7   :  { %v8287_v3 = vmax.f32 %v1694_v48, %v1695_v32  ;;  %v8292_v0 = vmax.f32 %v1720_v11, %v1721_v63  ;;  %v1683_v12 = vrot.slane %v1682_v39, 1  ;;  %v1166_v51 = vcombine.high %v8264_v21, %v8264_v21 }
 0x1f8   :  { %10692 = vst [vmem:[#allocation17_spill] sm:$0xff] %v8290_v8  ;;  %v8294_v37 = vmax.f32 %v1675_v62, %v1676_v55  ;;  %v1341_v2 = vrot.slane %v1157_v20, %v8115_v13  ;;  %v8302_v4 = vrot.slane %v8264_v21, %v8115_v13  ;;  %v1167_v9 = vcombine.low %v8256_v17, %v8258_v18 }
 0x1f9   :  { %10693 = vst [vmem:[#allocation18_spill] sm:$0xff] %v8292_v0  ;;  %v8306_v11 = vmax.f32 %v1682_v39, %v1683_v12  ;;  %v8309_v10 = vrot.slane %v1165_v19, %v8115_v13  ;;  %v1168_v40 = vcombine.high %v8256_v17, %v8258_v18  ;;  %v1051_v28 = vmax.f32 %v8162_v23, 0.0 }
 0x1fa   :  { %10694 = vst [vmem:[#allocation19_spill] sm:$0xff] %v8302_v4  ;;  %v1342_v48 = vcombine.high %v1341_v2, %v1341_v2  ;;  %v8317_v21 = vrot.slane %v1166_v51, %v8115_v13  ;;  %v1727_v26 = vsel %vm207_vm2, %v1341_v2, -inf  ;;  %v8328_v23 = vsel %vm207_vm2, %v8302_v4, -inf }
 0x1fb   :  { %10695 = vst [vmem:[#allocation20_spill] sm:$0xff] %v8306_v11  ;;  %10696 = vst [vmem:[#allocation21_spill] sm:$0xff] %v8309_v10  ;;  %v1728_v62 = vrot.slane %v1727_v26, 4  ;;  %v8324_v33 = vsel %vm207_vm2, %v8309_v10, -inf  ;;  %v1175_v32 = vrot.slane %v1167_v9, %v8115_v13  ;;  %v1182_v55 = vrot.slane %v1168_v40, %v8115_v13 }
 0x1fc   :  { %v1734_v17 = vsel %vm207_vm2, %v1342_v48, -inf  ;;  %v1053_v12 = vmax.f32 %v8164_v24, 0.0  ;;  %v1052_v2 = vmax.f32 %v8170_v29, 0.0  ;;  %v1054_v48 = vmax.f32 %v8172_v30, 0.0 }
 0x1fd   :  { %v8334_v5 = vmax.f32 %v1727_v26, %v1728_v62  ;;  %v1735_v63 = vrot.slane %v1734_v17, 4  ;;  %v1183_v19 = vcombine.high %v1175_v32, %v1175_v32  ;;  %v1373_v51 = vrot.slane %v1175_v32, %v8115_v13 }
 0x1fe   :  { %v1184_v53 = vcombine.high %v1182_v55, %v1182_v55  ;;  %v1389_v9 = vrot.slane %v1182_v55, %v8115_v13  ;;  %v8347_v24 = vmax.f32 %v1051_v28, %v1053_v12 }
 0x1ff   :  { %v8342_v39 = vmax.f32 %v1734_v17, %v1735_v63  ;;  %v1374_v26 = vcombine.high %v1373_v51, %v1373_v51  ;;  %v1381_v62 = vrot.slane %v1183_v19, %v8115_v13  ;;  %v1783_v40 = vsel %vm207_vm2, %v1373_v51, -inf }
 0x200   :  { %v1390_v18 = vcombine.high %v1389_v9, %v1389_v9  ;;  %v1397_v32 = vrot.slane %v1184_v53, %v8115_v13  ;;  %v1784_v29 = vrot.slane %v1783_v40, 4  ;;  %v1811_v30 = vsel %vm207_vm2, %v1389_v9, -inf }
 0x201   :  { %10697 = vst [vmem:[#allocation22_spill] sm:$0xff] %v8342_v39  ;;  %v1382_v58 = vcombine.high %v1381_v62, %v1381_v62  ;;  %v1790_v17 = vsel %vm207_vm2, %v1374_v26, -inf  ;;  %v1797_v63 = vsel %vm207_vm2, %v1381_v62, -inf  ;;  %v1812_v20 = vrot.slane %v1811_v30, 4 }
 0x202   :  { %v1398_v55 = vcombine.high %v1397_v32, %v1397_v32  ;;  %v1785_v41 = vmax.f32 %v1783_v40, %v1784_v29  ;;  %v1791_v50 = vrot.slane %v1790_v17, 4  ;;  %v1798_v19 = vrot.slane %v1797_v63, 4 }
 0x203   :  { %v1804_v51 = vsel %vm207_vm2, %v1382_v58, -inf  ;;  %v1813_v28 = vmax.f32 %v1811_v30, %v1812_v20  ;;  %v1818_v12 = vsel %vm207_vm2, %v1390_v18, -inf  ;;  %v1825_v53 = vsel %vm207_vm2, %v1397_v32, -inf }
 0x204   :  { %v1786_v44 = vrot.slane %v1785_v41, 2  ;;  %v1792_v11 = vmax.f32 %v1790_v17, %v1791_v50  ;;  %v1799_v9 = vmax.f32 %v1797_v63, %v1798_v19  ;;  %v1805_v6 = vrot.slane %v1804_v51, 4 }
 0x205   :  { %v1814_v4 = vrot.slane %v1813_v28, 2  ;;  %v1819_v26 = vrot.slane %v1818_v12, 4  ;;  %v1826_v10 = vrot.slane %v1825_v53, 4  ;;  %v1832_v62 = vsel %vm207_vm2, %v1398_v55, -inf }
 0x206   :  { %v1787_v39 = vmax.f32 %v1785_v41, %v1786_v44  ;;  %v1793_v40 = vrot.slane %v1792_v11, 2  ;;  %v1800_v29 = vrot.slane %v1799_v9, 2  ;;  %v1806_v0 = vmax.f32 %v1804_v51, %v1805_v6 }
 0x207   :  { %v8357_v8 = vmax.f32 %v1813_v28, %v1814_v4  ;;  %v1820_v58 = vmax.f32 %v1818_v12, %v1819_v26  ;;  %v8359_v20 = vmax.f32 %v1825_v53, %v1826_v10  ;;  %v1833_v18 = vrot.slane %v1832_v62, 4 }
 0x208   :  { %v1788_v32 = vrot.slane %v1787_v39, 1  ;;  %v8361_v30 = vmax.f32 %v1792_v11, %v1793_v40  ;;  %v8363_v50 = vmax.f32 %v1799_v9, %v1800_v29  ;;  %v1807_v17 = vrot.slane %v1806_v0, 2 }
 0x209   :  { %v1821_v19 = vrot.slane %v1820_v58, 2  ;;  %v8367_v41 = vmax.f32 %v1832_v62, %v1833_v18  ;;  %v1074_v51 = vmax.f32 %v1052_v2, %v1054_v48  ;;  %v1055_v28 = vmax.f32 %v8192_v49, 0.0 }
 0x20a   :  { %10698 = vst [vmem:[#allocation23_spill] sm:$0xff] %v8361_v30  ;;  %v8369_v6 = vmax.f32 %v1787_v39, %v1788_v32  ;;  %v8373_v55 = vmax.f32 %v1806_v0, %v1807_v17  ;;  %v1057_v12 = vmax.f32 %v8194_v54, 0.0  ;;  %v1056_v53 = vmax.f32 %v8204_v59, 0.0 }
 0x20b   :  { %10699 = vst [vmem:[#allocation24_spill] sm:$0xff] %v8367_v41  ;;  %v8375_v11 = vmax.f32 %v1820_v58, %v1821_v19  ;;  %v1058_v9 = vmax.f32 %v8206_v60, 0.0  ;;  %v1059_v39 = vmax.f32 %v8227_v52, 0.0  ;;  %v1061_v26 = vmax.f32 %v8229_v7, 0.0 }
 0x20c   :  { %10700 = vst [vmem:[#allocation25_spill] sm:$0xff] %v8369_v6  ;;  %10701 = vst [vmem:[#allocation26_spill] sm:$0xff] %v8373_v55  ;;  %v1185_v62 = vcombine.low %v8347_v24, %v1074_v51  ;;  %v1186_v0 = vcombine.high %v8347_v24, %v1074_v51  ;;  %v1075_v40 = vmax.f32 %v1055_v28, %v1057_v12  ;;  %v1060_v29 = vmax.f32 %v8235_v14, 0.0 }
 0x20d   :  { %10702 = vst [vmem:[#allocation27_spill] sm:$0xff] %v8375_v11  ;;  %v1076_v2 = vmax.f32 %v1056_v53, %v1058_v9  ;;  %v8386_v48 = vmax.f32 %v1059_v39, %v1061_v26  ;;  %v1062_v49 = vmax.f32 %v8237_v15, 0.0  ;;  %v10703_v54 = vrot.slane %v8174_v34, 1 }
 0x20e   :  { %v1193_v60 = vrot.slane %v1185_v62, %v8115_v13  ;;  %v1200_v52 = vrot.slane %v1186_v0, %v8115_v13  ;;  %v10704_v7 = vrot.slane %v8168_v27, 1  ;;  %v10705_v14 = vrot.slane %v8160_v22, 2 }
 0x20f   :  { %v8392_v59 = vmax.f32 %v8174_v34, %v10703_v54  ;;  %v1203_v15 = vcombine.low %v1075_v40, %v1076_v2  ;;  %v1204_v18 = vcombine.high %v1075_v40, %v1076_v2  ;;  %v8406_v32 = vmax.f32 %v1060_v29, %v1062_v49 }
 0x210   :  { %v8399_v24 = vmax.f32 %v8168_v27, %v10704_v7  ;;  %v8404_v58 = vmax.f32 %v8160_v22, %v10705_v14  ;;  %v10706_v34 = vrot.slane %v8239_v16, 2  ;;  %v1201_v19 = vcombine.high %v1193_v60, %v1193_v60 }
 0x211   :  { %v1202_v51 = vcombine.high %v1200_v52, %v1200_v52  ;;  %v1405_v28 = vrot.slane %v1193_v60, %v8115_v13  ;;  %v8415_v27 = vrot.slane %v1200_v52, %v8115_v13  ;;  %v1211_v12 = vrot.slane %v1203_v15, %v8115_v13 }
 0x212   :  { %v8411_v17 = vmax.f32 %v8239_v16, %v10706_v34  ;;  %v1218_v22 = vrot.slane %v1204_v18, %v8115_v13  ;;  %v8424_v16 = vrot.slane %v1201_v19, %v8115_v13 }
 0x213   :  { %10707 = vst [vmem:[#allocation28_spill] sm:$0xff] %v8415_v27  ;;  %v1406_v39 = vcombine.high %v1405_v28, %v1405_v28  ;;  %v1429_v62 = vrot.slane %v1202_v51, %v8115_v13  ;;  %v1839_v0 = vsel %vm207_vm2, %v1405_v28, -inf  ;;  %v8432_v40 = vsel %vm207_vm2, %v8415_v27, -inf }
 0x214   :  { %10708 = vst [vmem:[#allocation29_spill] sm:$0xff] %v8424_v16  ;;  %10709 = vst [vmem:[#allocation30_spill] sm:$0xff] %v8432_v40  ;;  %v1219_v29 = vcombine.high %v1211_v12, %v1211_v12  ;;  %v1220_v2 = vcombine.high %v1218_v22, %v1218_v22  ;;  %v1840_v60 = vrot.slane %v1839_v0, 4  ;;  %v8439_v14 = vsel %vm207_vm2, %v8424_v16, -inf }
 0x215   :  { %v1430_v54 = vcombine.high %v1429_v62, %v1429_v62  ;;  %v1846_v52 = vsel %vm207_vm2, %v1406_v39, -inf  ;;  %v1881_v18 = vsel %vm207_vm2, %v1429_v62, -inf  ;;  %v1437_v39 = vrot.slane %v1211_v12, %v8115_v13 }
 0x216   :  { %v1847_v7 = vrot.slane %v1846_v52, 4  ;;  %v8443_v34 = vmax.f32 %v1839_v0, %v1840_v60  ;;  %v1882_v51 = vrot.slane %v1881_v18, 4  ;;  %v1445_v4 = vrot.slane %v1219_v29, %v8115_v13 }
 0x217   :  { %v1888_v28 = vsel %vm207_vm2, %v1430_v54, -inf  ;;  %v1453_v15 = vrot.slane %v1218_v22, %v8115_v13  ;;  %v1461_v62 = vrot.slane %v1220_v2, %v8115_v13  ;;  %v1438_v60 = vcombine.high %v1437_v39, %v1437_v39 }
 0x218   :  { %v8447_v26 = vmax.f32 %v1846_v52, %v1847_v7  ;;  %v1889_v49 = vrot.slane %v1888_v28, 4  ;;  %v1883_v63 = vmax.f32 %v1881_v18, %v1882_v51  ;;  %v1446_v19 = vcombine.high %v1445_v4, %v1445_v4 }
 0x219   :  { %v1895_v10 = vsel %vm207_vm2, %v1437_v39, -inf  ;;  %v1454_v52 = vcombine.high %v1453_v15, %v1453_v15  ;;  %v1462_v7 = vcombine.high %v1461_v62, %v1461_v62  ;;  %v1902_v12 = vsel %vm207_vm2, %v1438_v60, -inf }
 0x21a   :  { %10710 = vst [vmem:[#allocation31_spill] sm:$0xff] %v8447_v26  ;;  %v1890_v0 = vmax.f32 %v1888_v28, %v1889_v49  ;;  %v1884_v54 = vrot.slane %v1883_v63, 2  ;;  %v1896_v9 = vrot.slane %v1895_v10, 4  ;;  %v1909_v29 = vsel %vm207_vm2, %v1445_v4, -inf }
 0x21b   :  { %v1916_v18 = vsel %vm207_vm2, %v1446_v19, -inf  ;;  %v1903_v44 = vrot.slane %v1902_v12, 4  ;;  %v1910_v2 = vrot.slane %v1909_v29, 4  ;;  %v1923_v27 = vsel %vm207_vm2, %v1453_v15, -inf }
 0x21c   :  { %v1891_v53 = vrot.slane %v1890_v0, 2  ;;  %v1885_v51 = vmax.f32 %v1883_v63, %v1884_v54  ;;  %v1897_v22 = vmax.f32 %v1895_v10, %v1896_v9  ;;  %v1917_v28 = vrot.slane %v1916_v18, 4 }
 0x21d   :  { %v1930_v39 = vsel %vm207_vm2, %v1454_v52, -inf  ;;  %v1904_v41 = vmax.f32 %v1902_v12, %v1903_v44  ;;  %v1911_v11 = vmax.f32 %v1909_v29, %v1910_v2  ;;  %v1924_v30 = vrot.slane %v1923_v27, 4 }
 0x21e   :  { %v1892_v49 = vmax.f32 %v1890_v0, %v1891_v53  ;;  %v1886_v16 = vrot.slane %v1885_v51, 1  ;;  %v1898_v26 = vrot.slane %v1897_v22, 2  ;;  %v1918_v60 = vmax.f32 %v1916_v18, %v1917_v28 }
 0x21f   :  { %v1931_v4 = vrot.slane %v1930_v39, 4  ;;  %v1905_v10 = vrot.slane %v1904_v41, 2  ;;  %v1912_v9 = vrot.slane %v1911_v11, 2  ;;  %v1925_v0 = vmax.f32 %v1923_v27, %v1924_v30 }
 0x220   :  { %v1893_v55 = vrot.slane %v1892_v49, 1  ;;  %v8460_v6 = vmax.f32 %v1885_v51, %v1886_v16  ;;  %v1899_v63 = vmax.f32 %v1897_v22, %v1898_v26  ;;  %v1919_v53 = vrot.slane %v1918_v60, 2 }
 0x221   :  { %v1932_v15 = vmax.f32 %v1930_v39, %v1931_v4  ;;  %v1906_v52 = vmax.f32 %v1904_v41, %v1905_v10  ;;  %v8464_v40 = vmax.f32 %v1911_v11, %v1912_v9  ;;  %v1937_v44 = vsel %vm207_vm2, %v1461_v62, -inf }
 0x222   :  { %v8462_v19 = vmax.f32 %v1892_v49, %v1893_v55  ;;  %v1900_v54 = vrot.slane %v1899_v63, 1  ;;  %v8467_v12 = vmax.f32 %v1918_v60, %v1919_v53  ;;  %v1926_v29 = vrot.slane %v1925_v0, 2 }
 0x223   :  { %v1933_v18 = vrot.slane %v1932_v15, 2  ;;  %v1938_v16 = vrot.slane %v1937_v44, 4  ;;  %v1907_v51 = vrot.slane %v1906_v52, 1  ;;  %v1914_v55 = vrot.slane %v8464_v40, 1 }
 0x224   :  { %v8469_v26 = vmax.f32 %v1899_v63, %v1900_v54  ;;  %v1944_v30 = vsel %vm207_vm2, %v1462_v7, -inf  ;;  %v8473_v27 = vmax.f32 %v1925_v0, %v1926_v29  ;;  %v10711_v2 = vcombine.low %v8386_v48, %v8406_v32 }
 0x225   :  { %v8475_v41 = vmax.f32 %v1932_v15, %v1933_v18  ;;  %v8477_v11 = vmax.f32 %v1937_v44, %v1938_v16  ;;  %v1945_v62 = vrot.slane %v1944_v30, 4  ;;  %v8479_v22 = vmax.f32 %v1906_v52, %v1907_v51 }
 0x226   :  { %v1229_v49 = vrot.slane %v10711_v2, %v8115_v13  ;;  %v10712_v7 = vcombine.high %v8386_v48, %v8406_v32  ;;  %v1606_v39 = vrot.slane %v8404_v58, 1  ;;  %v1928_v60 = vrot.slane %v8473_v27, 1 }
 0x227   :  { %v1940_v4 = vrot.slane %v8477_v11, 2  ;;  %v8492_v63 = vmax.f32 %v1944_v30, %v1945_v62  ;;  %v1620_v10 = vrot.slane %v8411_v17, 1  ;;  %v10713_v54 = vrot.slane %v8225_v47, 4 }
 0x228   :  { %v1236_v28 = vrot.slane %v10712_v7, %v8115_v13  ;;  %v1237_v9 = vcombine.high %v1229_v49, %v1229_v49  ;;  %v1469_v0 = vrot.slane %v1229_v49, %v8115_v13  ;;  %v1607_v48 = vmax.f32 %v8404_v58, %v1606_v39 }
 0x229   :  { %v1621_v32 = vmax.f32 %v8411_v17, %v1620_v10  ;;  %v1631_v52 = vmax.f32 %v8225_v47, %v10713_v54  ;;  %v10714_v44 = vrot.slane %v8219_v46, 4  ;;  %v2092_v54 = vsel %vm2091_vm4, %v8392_v59, %v8185_v43 }
 0x22a   :  { %v1238_v53 = vcombine.high %v1236_v28, %v1236_v28  ;;  %v8497_v15 = vrot.slane %v1236_v28, %v8115_v13  ;;  %v1470_v18 = vcombine.high %v1469_v0, %v1469_v0  ;;  %v8508_v16 = vrot.slane %v1237_v9, %v8115_v13 }
 0x22b   :  { %v1645_v29 = vmax.f32 %v8219_v46, %v10714_v44  ;;  %v1951_v17 = vsel %vm207_vm2, %v1469_v0, -inf  ;;  %v1632_v30 = vrot.slane %v1631_v52, 2  ;;  %v10715_v44 = vrot.slane %v8166_v25, 1 }
 0x22c   :  { %v8513_v58 = vrot.slane %v1238_v53, %v8115_v13  ;;  %v8518_v47 = vsel %vm207_vm2, %v8497_v15, -inf  ;;  %v1952_v2 = vrot.slane %v1951_v17, 4  ;;  %v1958_v49 = vsel %vm207_vm2, %v1470_v18, -inf }
 0x22d   :  { %v1646_v62 = vrot.slane %v1645_v29, 2  ;;  %v8525_v7 = vsel %vm207_vm2, %v8508_v16, -inf  ;;  %v1959_v28 = vrot.slane %v1958_v49, 4  ;;  %v1633_v9 = vmax.f32 %v1631_v52, %v1632_v30 }
 0x22e   :  { %v8529_v53 = vmax.f32 %v1951_v17, %v1952_v2  ;;  %v1572_v18 = vmax.f32 %v8166_v25, %v10715_v44  ;;  %v2094_v39 = vsel %vm2093_vm5, %v8399_v24, %v2092_v54  ;;  %v1585_v10 = vrot.slane %v8180_v38, 1 }
 0x22f   :  { %v1647_v0 = vmax.f32 %v1645_v29, %v1646_v62  ;;  %v8537_v51 = vmax.f32 %v1958_v49, %v1959_v28  ;;  %v1634_v46 = vrot.slane %v1633_v9, 1  ;;  %v2096_v29 = vsel %vm2095_vm6, %v1607_v48, %v2094_v39 }
 0x230   :  { %v1954_v52 = vrot.slane %v8529_v53, 2  ;;  %v1599_v30 = vrot.slane %v8176_v35, 1  ;;  %v2098_v59 = vsel %vm2097_vm7, %v1621_v32, %v2096_v29  ;;  %v1586_v25 = vmax.f32 %v8180_v38, %v1585_v10 }
 0x231   :  { %v1648_v17 = vrot.slane %v1647_v0, 1  ;;  %v1635_v43 = vmax.f32 %v1633_v9, %v1634_v46  ;;  %v1611_v62 = vrot.slane %v8183_v42, 2  ;;  %v1625_v24 = vrot.slane %v8246_v45, 2 }
 0x232   :  { %v1600_v49 = vmax.f32 %v8176_v35, %v1599_v30  ;;  %v10716_v28 = vcombine.high %v8209_v61, %v8209_v61  ;;  %v10717_v38 = vcombine.high %v8200_v56, %v8200_v56  ;;  %v1769_v56 = vsel %vm207_vm2, %v8317_v21, -inf }
 0x233   :  { %v1649_v2 = vmax.f32 %v1647_v0, %v1648_v17  ;;  %v2100_v48 = vsel %vm2099_vm8, %v1635_v43, %v2098_v59  ;;  %v1612_v46 = vmax.f32 %v8183_v42, %v1611_v62  ;;  %v1626_v35 = vmax.f32 %v8246_v45, %v1625_v24 }
 0x234   :  { %v1636_v54 = vsel %vm207_vm2, %v10716_v28, -inf  ;;  %v1650_v32 = vsel %vm207_vm2, %v10717_v38, -inf  ;;  %v2103_v0 = vsel %vm2091_vm4, %v1586_v25, %v1572_v18  ;;  %v1770_v30 = vrot.slane %v1769_v56, 4 }
 0x235   :  { %v1637_v39 = vrot.slane %v1636_v54, 4  ;;  %v2102_v10 = vsel %vm2101_vm9, %v1649_v2, %v2100_v48  ;;  %v1651_v9 = vrot.slane %v1650_v32, 4  ;;  %v1613_v61 = vrot.slane %v1612_v46, 1 }
 0x236   :  { %2150 = vrot.lane.b32.xlu0 %v2102_v10, %s7873_s7  ;;  %v2104_v42 = vsel %vm2093_vm5, %v1600_v49, %v2103_v0  ;;  %v1627_v17 = vrot.slane %v1626_v35, 1  ;;  %v1366_v45 = vcombine.high %v8317_v21, %v8317_v21  ;;  %v10718_v18 = vrot.slane %v8284_v57, 1 }
 0x237   :  { %v1638_v44 = vmax.f32 %v1636_v54, %v1637_v39  ;;  %v1652_v29 = vmax.f32 %v1650_v32, %v1651_v9  ;;  %v1614_v43 = vmax.f32 %v1612_v46, %v1613_v61  ;;  %v10719_v62 = vrot.slane %v8282_v36, 1 }
 0x238   :  { %v1691_v25 = vmax.f32 %v8284_v57, %v10718_v18  ;;  %v1628_v49 = vmax.f32 %v1626_v35, %v1627_v17  ;;  %v1771_v28 = vmax.f32 %v1769_v56, %v1770_v30  ;;  %v1776_v54 = vsel %vm207_vm2, %v1366_v45, -inf }
 0x239   :  { %v1639_v59 = vrot.slane %v1638_v44, 2  ;;  %v1705_v2 = vmax.f32 %v8282_v36, %v10719_v62  ;;  %v1653_v24 = vrot.slane %v1652_v29, 2  ;;  %v2105_v39 = vsel %vm2095_vm6, %v1614_v43, %v2104_v42 }
 0x23a   :  { %v1777_v38 = vrot.slane %v1776_v54, 4  ;;  %v10720_v21 = vrot.slane %v8280_v31, 2  ;;  %v2106_v57 = vsel %vm2097_vm7, %v1628_v49, %v2105_v39  ;;  %v1772_v10 = vrot.slane %v1771_v28, 2 }
 0x23b   :  { %v1640_v48 = vmax.f32 %v1638_v44, %v1639_v59  ;;  %v1654_v32 = vmax.f32 %v1652_v29, %v1653_v24  ;;  %v10721_v9 = vrot.slane %v8334_v5, 2  ;;  %v10722_v44 = vrot.slane %v8324_v33, 4 }
 0x23c   :  { %v1717_v46 = vmax.f32 %v8280_v31, %v10720_v21  ;;  %v1778_v0 = vmax.f32 %v1776_v54, %v1777_v38  ;;  %v1773_v17 = vmax.f32 %v1771_v28, %v1772_v10  ;;  %v10723_v31 = vrot.slane %v8328_v23, 4 }
 0x23d   :  { %v1731_v36 = vmax.f32 %v8334_v5, %v10721_v9  ;;  %v1641_v35 = vrot.slane %v1640_v48, 1  ;;  %v1743_v42 = vmax.f32 %v8324_v33, %v10722_v44  ;;  %v1655_v56 = vrot.slane %v1654_v32, 1 }
 0x23e   :  { %v1718_v61 = vrot.slane %v1717_v46, 1  ;;  %v1757_v29 = vmax.f32 %v8328_v23, %v10723_v31  ;;  %v1779_v43 = vrot.slane %v1778_v0, 2  ;;  %v1774_v5 = vrot.slane %v1773_v17, 1 }
 0x23f   :  { %v1732_v30 = vrot.slane %v1731_v36, 1  ;;  %v1642_v45 = vmax.f32 %v1640_v48, %v1641_v35  ;;  %v1744_v18 = vrot.slane %v1743_v42, 2  ;;  %v1656_v62 = vmax.f32 %v1654_v32, %v1655_v56  ;;  %v10725_v35 = vld [vmem:[#allocation18_spill] sm:$0xff] }
 0x240   :  { %v1719_v59 = vmax.f32 %v1717_v46, %v1718_v61  ;;  %v1758_v24 = vrot.slane %v1757_v29, 2  ;;  %v1780_v39 = vmax.f32 %v1778_v0, %v1779_v43  ;;  %v2110_v33 = vsel %vm2109_vm10, %v8294_v37, %v8268_v1  ;;  %v10724_v1 = vld [vmem:[#allocation17_spill] sm:$0xff] }
 0x241   :  { %v1733_v49 = vmax.f32 %v1731_v36, %v1732_v30  ;;  %v2107_v54 = vsel %vm2099_vm8, %v1642_v45, %v2106_v57  ;;  %v1745_v38 = vmax.f32 %v1743_v42, %v1744_v18  ;;  %v1775_v21 = vmax.f32 %v1773_v17, %v1774_v5  ;;  %v10726_v30 = vld [vmem:[#allocation22_spill] sm:$0xff]  ;;  %v10727_v45 = vld [vmem:[#allocation21_spill] sm:$0xff]  ;;  %v10729_v18 = vld [vmem:[#allocation19_spill] sm:$0xff] }
 0x242   :  { %v2108_v28 = vsel %vm2101_vm9, %v1656_v62, %v2107_v54  ;;  %v1759_v23 = vmax.f32 %v1757_v29, %v1758_v24  ;;  %v2111_v48 = vsel %vm2091_vm4, %v1691_v25, %v2110_v33  ;;  %v1781_v46 = vrot.slane %v1780_v39, 1  ;;  %v10731_v5 = vld [vmem:[#allocation16_spill] sm:$0xff] }
 0x243   :  { %2152 = vrot.lane.b32.xlu1 %v2108_v28, %s7873_s7  ;;  %v1746_v32 = vrot.slane %v1745_v38, 1  ;;  %v2112_v10 = vsel %vm2093_vm5, %v1705_v2, %v2111_v48  ;;  %v1697_v57 = vrot.slane %v8287_v3, 1  ;;  %2158 = vrot.lane.b32.xlu0 %v1775_v21, %s7873_s7  ;;  %v1711_v37 = vrot.slane %v10724_v1, 1 }
 0x244   :  { %v1760_v9 = vrot.slane %v1759_v23, 1  ;;  %v2113_v36 = vsel %vm2095_vm6, %v1719_v59, %v2112_v10  ;;  %v1723_v0 = vrot.slane %v10725_v35, 2  ;;  %v1782_v61 = vmax.f32 %v1780_v39, %v1781_v46 }
 0x245   :  { %v1747_v44 = vmax.f32 %v1745_v38, %v1746_v32  ;;  %v2114_v25 = vsel %vm2097_vm7, %v1733_v49, %v2113_v36  ;;  %v1698_v42 = vmax.f32 %v8287_v3, %v1697_v57  ;;  %v1712_v2 = vmax.f32 %v10724_v1, %v1711_v37  ;;  %v10732_v49 = vld [vmem:[#allocation20_spill] sm:$0xff] }
 0x246   :  { %v1761_v56 = vmax.f32 %v1759_v23, %v1760_v9  ;;  %v1724_v17 = vmax.f32 %v10725_v35, %v1723_v0  ;;  %v1737_v31 = vrot.slane %v10726_v30, 2  ;;  %v10728_v43 = vcombine.high %v10727_v45, %v10727_v45 }
 0x247   :  { %2160 = vrot.lane.b32.xlu1 %v1782_v61, %s7873_s7  ;;  %v2115_v29 = vsel %vm2099_vm8, %v1747_v44, %v2114_v25  ;;  %v10730_v62 = vcombine.high %v10729_v18, %v10729_v18  ;;  %v2117_v24 = vsel %vm2109_vm10, %v10732_v49, %v10731_v5  ;;  %v10733_v23 = vrot.slane %v8363_v50, 1 }
 0x248   :  { %v1748_v59 = vsel %vm207_vm2, %v10728_v43, -inf  ;;  %v2116_v54 = vsel %vm2101_vm9, %v1761_v56, %v2115_v29  ;;  %v1725_v39 = vrot.slane %v1724_v17, 1  ;;  %v1738_v38 = vmax.f32 %v10726_v30, %v1737_v31  ;;  %v10738_v56 = vld [vmem:[#allocation30_spill] sm:$0xff] }
 0x249   :  { %v1762_v3 = vsel %vm207_vm2, %v10730_v62, -inf  ;;  %v1749_v33 = vrot.slane %v1748_v59, 4  ;;  %2154 = vrot.lane.b32.xlu0 %v2116_v54, %s7873_s7  ;;  %v2118_v21 = vsel %vm2091_vm4, %v1698_v42, %v2117_v24  ;;  %v1803_v48 = vmax.f32 %v8363_v50, %v10733_v23 }
 0x24a   :  { %v1763_v28 = vrot.slane %v1762_v3, 4  ;;  %v10734_v46 = vrot.slane %v8357_v8, 1  ;;  %v1726_v10 = vmax.f32 %v1724_v17, %v1725_v39  ;;  %v1739_v57 = vrot.slane %v1738_v38, 1  ;;  %v10741_v39 = vld [vmem:[#allocation23_spill] sm:$0xff] }
 0x24b   :  { %v1750_v9 = vmax.f32 %v1748_v59, %v1749_v33  ;;  %v2119_v36 = vsel %vm2093_vm5, %v1712_v2, %v2118_v21  ;;  %v10735_v37 = vrot.slane %v8359_v20, 2  ;;  %v10736_v0 = vrot.slane %v8443_v34, 2  ;;  %v10740_v59 = vld [vmem:[#allocation25_spill] sm:$0xff] }
 0x24c   :  { %v1817_v32 = vmax.f32 %v8357_v8, %v10734_v46  ;;  %v1764_v1 = vmax.f32 %v1762_v3, %v1763_v28  ;;  %v10737_v50 = vrot.slane %v8439_v14, 4  ;;  %v1740_v25 = vmax.f32 %v1738_v38, %v1739_v57  ;;  %v10743_v46 = vld [vmem:[#allocation26_spill] sm:$0xff] }
 0x24d   :  { %v1829_v35 = vmax.f32 %v8359_v20, %v10735_v37  ;;  %v1843_v61 = vmax.f32 %v8443_v34, %v10736_v0  ;;  %v1751_v8 = vrot.slane %v1750_v9, 2  ;;  %v2120_v42 = vsel %vm2095_vm6, %v1726_v10, %v2119_v36  ;;  %v10744_v36 = vld [vmem:[#allocation27_spill] sm:$0xff]  ;;  %v10745_v0 = vld [vmem:[#allocation24_spill] sm:$0xff] }
 0x24e   :  { %v1855_v44 = vmax.f32 %v8439_v14, %v10737_v50  ;;  %v10739_v17 = vrot.slane %v10738_v56, 4  ;;  %v1765_v30 = vrot.slane %v1764_v1, 2  ;;  %v2121_v43 = vsel %vm2097_vm7, %v1740_v25, %v2120_v42 }
 0x24f   :  { %v1830_v31 = vrot.slane %v1829_v35, 1  ;;  %v1844_v29 = vrot.slane %v1843_v61, 1  ;;  %v1752_v45 = vmax.f32 %v1750_v9, %v1751_v8  ;;  %v2124_v18 = vsel %vm2091_vm4, %v1803_v48, %v10740_v59  ;;  %v10746_v8 = vld [vmem:[#allocation31_spill] sm:$0xff] }
 0x250   :  { %v1869_v2 = vmax.f32 %v10738_v56, %v10739_v17  ;;  %v1856_v20 = vrot.slane %v1855_v44, 2  ;;  %v1766_v14 = vmax.f32 %v1764_v1, %v1765_v30  ;;  %v2125_v54 = vsel %vm2093_vm5, %v1817_v32, %v2124_v18  ;;  %v10747_v30 = vld [vmem:[#allocation29_spill] sm:$0xff] }
 0x251   :  { %v1831_v62 = vmax.f32 %v1829_v35, %v1830_v31  ;;  %v1845_v3 = vmax.f32 %v1843_v61, %v1844_v29  ;;  %v1753_v49 = vrot.slane %v1752_v45, 1  ;;  %v10742_v38 = vrot.slane %v10741_v39, 1 }
 0x252   :  { %v1870_v34 = vrot.slane %v1869_v2, 2  ;;  %v1857_v5 = vmax.f32 %v1855_v44, %v1856_v20  ;;  %v1767_v28 = vrot.slane %v1766_v14, 1  ;;  %v1809_v10 = vrot.slane %v10743_v46, 1 }
 0x253   :  { %v1796_v33 = vmax.f32 %v10741_v39, %v10742_v38  ;;  %v2126_v23 = vsel %vm2095_vm6, %v1831_v62, %v2125_v54  ;;  %v1754_v57 = vmax.f32 %v1752_v45, %v1753_v49  ;;  %v1823_v1 = vrot.slane %v10744_v36, 1 }
 0x254   :  { %v1871_v24 = vmax.f32 %v1869_v2, %v1870_v34  ;;  %v1858_v21 = vrot.slane %v1857_v5, 1  ;;  %v2127_v9 = vsel %vm2097_vm7, %v1845_v3, %v2126_v23  ;;  %v1768_v37 = vmax.f32 %v1766_v14, %v1767_v28  ;;  %v10749_v34 = vld [vmem:[#allocation28_spill] sm:$0xff] }
 0x255   :  { %v1810_v32 = vmax.f32 %v10743_v46, %v1809_v10  ;;  %v1835_v61 = vrot.slane %v10745_v0, 2  ;;  %v2122_v50 = vsel %vm2099_vm8, %v1754_v57, %v2121_v43  ;;  %v1824_v25 = vmax.f32 %v10744_v36, %v1823_v1 }
 0x256   :  { %v1872_v48 = vrot.slane %v1871_v24, 1  ;;  %v1859_v35 = vmax.f32 %v1857_v5, %v1858_v21  ;;  %v1849_v42 = vrot.slane %v10746_v8, 2  ;;  %v2123_v56 = vsel %vm2101_vm9, %v1768_v37, %v2122_v50 }
 0x257   :  { %v1836_v2 = vmax.f32 %v10745_v0, %v1835_v61  ;;  %v10748_v31 = vcombine.high %v10747_v30, %v10747_v30  ;;  %2156 = vrot.lane.b32.xlu1 %v2123_v56, %s7873_s7  ;;  %v10750_v59 = vcombine.high %v10749_v34, %v10749_v34  ;;  %v2130_v3 = vsel %vm2091_vm4, %v1810_v32, %v1796_v33 }
 0x258   :  { %v1873_v44 = vmax.f32 %v1871_v24, %v1872_v48  ;;  %v2128_v17 = vsel %vm2099_vm8, %v1859_v35, %v2127_v9  ;;  %v1850_v45 = vmax.f32 %v10746_v8, %v1849_v42  ;;  %v1915_v5 = vmax.f32 %v8464_v40, %v1914_v55 }
 0x259   :  { %v1860_v29 = vsel %vm207_vm2, %v10748_v31, -inf  ;;  %v1874_v18 = vsel %vm207_vm2, %v10750_v59, -inf  ;;  %v1837_v14 = vrot.slane %v1836_v2, 1  ;;  %v2131_v54 = vsel %vm2093_vm5, %v1824_v25, %v2130_v3 }
 0x25a   :  { %v2129_v20 = vsel %vm2101_vm9, %v1873_v44, %v2128_v17  ;;  %v1861_v43 = vrot.slane %v1860_v29, 4  ;;  %v1875_v62 = vrot.slane %v1874_v18, 4  ;;  %v1851_v49 = vrot.slane %v1850_v45, 1 }
 0x25b   :  { %2162 = vrot.lane.b32.xlu0 %v2129_v20, %s7873_s7  ;;  %v1929_v39 = vmax.f32 %v8473_v27, %v1928_v60  ;;  %v1838_v38 = vmax.f32 %v1836_v2, %v1837_v14  ;;  %v1941_v21 = vmax.f32 %v8477_v11, %v1940_v4  ;;  %v1955_v33 = vmax.f32 %v8529_v53, %v1954_v52 }
 0x25c   :  { %v1862_v24 = vmax.f32 %v1860_v29, %v1861_v43  ;;  %v1876_v28 = vmax.f32 %v1874_v18, %v1875_v62  ;;  %v1852_v23 = vmax.f32 %v1850_v45, %v1851_v49  ;;  %v10751_v55 = vrot.slane %v8525_v7, 4 }
 0x25d   :  { %v10752_v10 = vrot.slane %v8518_v47, 4  ;;  %v2132_v57 = vsel %vm2095_vm6, %v1838_v38, %v2131_v54  ;;  %v1942_v48 = vrot.slane %v1941_v21, 1  ;;  %v1956_v9 = vrot.slane %v1955_v33, 1  ;;  %v2449_v54 = vld [vmem:[#allocation11 + $0x488] sm:$0xff] }
 0x25e   :  { %v1863_v40 = vrot.slane %v1862_v24, 2  ;;  %v1967_v46 = vmax.f32 %v8525_v7, %v10751_v55  ;;  %v1877_v60 = vrot.slane %v1876_v28, 2  ;;  %v2133_v4 = vsel %vm2097_vm7, %v1852_v23, %v2132_v57  ;;  %v2455_v23 = vld [vmem:[#allocation11 + $0x4b8] sm:$0xff]  ;;  %v2452_v57 = vld [vmem:[#allocation11 + $0x4a0] sm:$0xff] }
 0x25f   :  { %v1981_v27 = vmax.f32 %v8518_v47, %v10752_v10  ;;  %v1943_v1 = vmax.f32 %v1941_v21, %v1942_v48  ;;  %v1957_v37 = vmax.f32 %v1955_v33, %v1956_v9  ;;  %v2136_v7 = vsel %vm2109_vm10, %v8469_v26, %v8460_v6  ;;  %v2451_v33 = vld [vmem:[#allocation11 + $0x498] sm:$0xff]  ;;  %v2450_v48 = vld [vmem:[#allocation11 + $0x490] sm:$0xff] }
 0x260   :  { %v1864_v11 = vmax.f32 %v1862_v24, %v1863_v40  ;;  %v1968_v36 = vrot.slane %v1967_v46, 2  ;;  %v1878_v52 = vmax.f32 %v1876_v28, %v1877_v60  ;;  %v2137_v0 = vsel %vm2091_vm4, %v1915_v5, %v2136_v7  ;;  %v2454_v9 = vld [vmem:[#allocation11 + $0x4b0] sm:$0xff] }
 0x261   :  { %v1982_v53 = vrot.slane %v1981_v27, 2  ;;  %v2138_v50 = vsel %vm2093_vm5, %v1929_v39, %v2137_v0  ;;  %v1921_v44 = vrot.slane %v8467_v12, 1  ;;  %v1935_v25 = vrot.slane %v8475_v41, 1  ;;  %v2453_v39 = vld [vmem:[#allocation11 + $0x4a8] sm:$0xff]  ;;  %v2456_v0 = vld [vmem:[#allocation11 + $0x4c0] sm:$0xff] }
 0x262   :  { %v1865_v35 = vrot.slane %v1864_v11, 1  ;;  %v1969_v32 = vmax.f32 %v1967_v46, %v1968_v36  ;;  %v1879_v61 = vrot.slane %v1878_v52, 1  ;;  %v2139_v17 = vsel %vm2095_vm6, %v1943_v1, %v2138_v50  ;;  %v2461_v1 = vld [vmem:[#allocation11 + $0x4e8] sm:$0xff] }
 0x263   :  { %v1983_v47 = vmax.f32 %v1981_v27, %v1982_v53  ;;  %v2140_v6 = vsel %vm2097_vm7, %v1957_v37, %v2139_v17  ;;  %v1922_v26 = vmax.f32 %v8467_v12, %v1921_v44  ;;  %v1936_v30 = vmax.f32 %v8475_v41, %v1935_v25  ;;  %v2459_v37 = vld [vmem:[#allocation11 + $0x4d8] sm:$0xff]  ;;  %v2465_v17 = vld [vmem:[#allocation11 + $0x508] sm:$0xff] }
 0x264   :  { %v1866_v8 = vmax.f32 %v1864_v11, %v1865_v35  ;;  %v1970_v42 = vrot.slane %v1969_v32, 1  ;;  %v1880_v2 = vmax.f32 %v1878_v52, %v1879_v61  ;;  %v1947_v45 = vrot.slane %v8492_v63, 2  ;;  %v2457_v52 = vld [vmem:[#allocation11 + $0x4c8] sm:$0xff]  ;;  %v2460_v61 = vld [vmem:[#allocation11 + $0x4e0] sm:$0xff] }
 0x265   :  { %v1984_v56 = vrot.slane %v1983_v47, 1  ;;  %v1961_v34 = vrot.slane %v8537_v51, 2  ;;  %v10753_v59 = vcombine.high %v8508_v16, %v8508_v16  ;;  %v10754_v12 = vcombine.high %v8497_v15, %v8497_v15 }
 0x266   :  { %v2134_v31 = vsel %vm2099_vm8, %v1866_v8, %v2133_v4  ;;  %v1971_v29 = vmax.f32 %v1969_v32, %v1970_v42  ;;  %v1948_v62 = vmax.f32 %v8492_v63, %v1947_v45  ;;  %v2143_v16 = vsel %vm2109_vm10, %v8479_v22, %v8462_v19  ;;  %v2448_v22 = vld [vmem:[#allocation11 + $0x480] sm:$0xff]  ;;  %v2458_v42 = vld [vmem:[#allocation11 + $0x4d0] sm:$0xff] }
 0x267   :  { %v1985_v20 = vmax.f32 %v1983_v47, %v1984_v56  ;;  %v2135_v43 = vsel %vm2101_vm9, %v1880_v2, %v2134_v31  ;;  %v1972_v18 = vsel %vm207_vm2, %v10753_v59, -inf  ;;  %v1986_v41 = vsel %vm207_vm2, %v10754_v12, -inf  ;;  %v2463_v47 = vld [vmem:[#allocation11 + $0x4f8] sm:$0xff]  ;;  %v2462_v56 = vld [vmem:[#allocation11 + $0x4f0] sm:$0xff]  ;;  %v2469_v31 = vld [vmem:[#allocation11 + $0x528] sm:$0xff] }
 0x268   :  { %2164 = vrot.lane.b32.xlu1 %v2135_v43, %s7873_s7  ;;  %v2141_v14 = vsel %vm2099_vm8, %v1971_v29, %v2140_v6  ;;  %v1973_v3 = vrot.slane %v1972_v18, 4  ;;  %v1987_v5 = vrot.slane %v1986_v41, 4  ;;  %v1962_v24 = vmax.f32 %v8537_v51, %v1961_v34  ;;  %v2467_v29 = vld [vmem:[#allocation11 + $0x518] sm:$0xff]  ;;  %v2464_v59 = vld [vmem:[#allocation11 + $0x500] sm:$0xff] }
 0x269   :  { %v2142_v49 = vsel %vm2101_vm9, %v1985_v20, %v2141_v14  ;;  %v1993_v15 = vsel %vm207_vm2, %v8513_v58, -inf  ;;  %v1949_v38 = vrot.slane %v1948_v62, 1  ;;  %v2144_v21 = vsel %vm2091_vm4, %v1922_v26, %v2143_v16  ;;  %v2471_v20 = vld [vmem:[#allocation11 + $0x538] sm:$0xff] }
 0x26a   :  { %2166 = vrot.lane.b32.xlu0 %v2142_v49, %s7873_s7  ;;  %v1974_v28 = vmax.f32 %v1972_v18, %v1973_v3  ;;  %v1988_v63 = vmax.f32 %v1986_v41, %v1987_v5  ;;  %v1963_v40 = vrot.slane %v1962_v24, 1  ;;  %v2145_v51 = vsel %vm2093_vm5, %v1936_v30, %v2144_v21  ;;  %v2468_v18 = vld [vmem:[#allocation11 + $0x520] sm:$0xff]  ;;  %v2470_v3 = vld [vmem:[#allocation11 + $0x530] sm:$0xff]  ;;  %v2479_v21 = vld [vmem:[#allocation11 + $0x578] sm:$0xff] }
 0x26b   :  { %v1994_v55 = vrot.slane %v1993_v15, 4  ;;  %v1494_v19 = vcombine.high %v8513_v58, %v8513_v58  ;;  %v1950_v46 = vmax.f32 %v1948_v62, %v1949_v38  ;;  %v6673_v60 = vpack.c.bf16 %v2453_v39, %v2449_v54  ;;  %v2466_v62 = vld [vmem:[#allocation11 + $0x510] sm:$0xff]  ;;  %v2477_v54 = vld [vmem:[#allocation11 + $0x568] sm:$0xff] }
 0x26c   :  { %v1975_v10 = vrot.slane %v1974_v28, 2  ;;  %v1989_v27 = vrot.slane %v1988_v63, 2  ;;  %v1964_v11 = vmax.f32 %v1962_v24, %v1963_v40  ;;  %v6745_v53 = vpack.c.bf16 %v2455_v23, %v2451_v33 }
 0x26d   :  { %v1995_v4 = vmax.f32 %v1993_v15, %v1994_v55  ;;  %v2000_v36 = vsel %vm207_vm2, %v1494_v19, -inf  ;;  %v2146_v58 = vsel %vm2095_vm6, %v1950_v46, %v2145_v51  ;;  %6674 = vmatprep.subr.bf16.mxu0 %v6673_v60  ;;  %v6675_v25 = vpack.c.bf16 %v2452_v57, %v2448_v22  ;;  %v2473_v15 = vld [vmem:[#allocation11 + $0x548] sm:$0xff]  ;;  %v2472_v51 = vld [vmem:[#allocation11 + $0x540] sm:$0xff]  ;;  %v2474_v46 = vld [vmem:[#allocation11 + $0x550] sm:$0xff] }
 0x26e   :  { %v1976_v7 = vmax.f32 %v1974_v28, %v1975_v10  ;;  %v1990_v35 = vmax.f32 %v1988_v63, %v1989_v27  ;;  %v2001_v32 = vrot.slane %v2000_v36, 4  ;;  %v2147_v50 = vsel %vm2097_vm7, %v1964_v11, %v2146_v58  ;;  %6746 = vmatprep.subr.bf16.mxu1 %v6745_v53  ;;  %v2475_v63 = vld [vmem:[#allocation11 + $0x558] sm:$0xff]  ;;  %v2476_v55 = vld [vmem:[#allocation11 + $0x560] sm:$0xff]  ;;  %v2478_v10 = vld [vmem:[#allocation11 + $0x570] sm:$0xff] }
 0x26f   :  { %v1996_v44 = vrot.slane %v1995_v4, 2  ;;  %v6747_v8 = vpack.c.bf16 %v2454_v9, %v2450_v48  ;;  %v6677_v30 = vpack.c.bf16 %v2461_v1, %v2457_v52  ;;  %6676 = vmatpush1.bf16.msra.mxu0 %v6675_v25  ;;  %v6749_v43 = vpack.c.bf16 %v2463_v47, %v2459_v37  ;;  %v2481_v27 = vld [vmem:[#allocation11 + $0x588] sm:$0xff]  ;;  %v2483_v9 = vld [vmem:[#allocation11 + $0x598] sm:$0xff]  ;;  %v2480_v52 = vld [vmem:[#allocation11 + $0x580] sm:$0xff] }
 0x270   :  { %v1977_v2 = vrot.slane %v1976_v7, 1  ;;  %v1991_v6 = vrot.slane %v1990_v35, 1  ;;  %v2002_v26 = vmax.f32 %v2000_v36, %v2001_v32  ;;  %v6679_v34 = vpack.c.bf16 %v2460_v61, %v2456_v0  ;;  %v8742_v60 = vld [vmem:[#allocation3] sm:$0xff]  ;;  %v2487_v11 = vld [vmem:[#allocation11 + $0x5b8] sm:$0xff]  ;;  %v2484_v1 = vld [vmem:[#allocation11 + $0x5a0] sm:$0xff] }
 0x271   :  { %v1997_v45 = vmax.f32 %v1995_v4, %v1996_v44  ;;  %6748 = vmatpush1.bf16.msra.mxu1 %v6747_v8  ;;  %6678 = vmatprep.subr.bf16.mxu0 %v6677_v30  ;;  %v6751_v14 = vpack.c.bf16 %v2462_v56, %v2458_v42  ;;  %v6681_v24 = vpack.c.bf16 %v2469_v31, %v2465_v17  ;;  %v2485_v48 = vld [vmem:[#allocation11 + $0x5a8] sm:$0xff]  ;;  %v2486_v58 = vld [vmem:[#allocation11 + $0x5b0] sm:$0xff]  ;;  %v2491_v0 = vld [vmem:[#allocation11 + $0x5d8] sm:$0xff] }
 0x272   :  { %v1978_v12 = vmax.f32 %v1976_v7, %v1977_v2  ;;  %v2003_v41 = vrot.slane %v2002_v26, 2  ;;  %v1992_v5 = vmax.f32 %v1990_v35, %v1991_v6  ;;  %6750 = vmatprep.subr.bf16.mxu1 %v6749_v43  ;;  %v6753_v16 = vpack.c.bf16 %v2471_v20, %v2467_v29  ;;  %2010 = vst.msk [vmem:[#allocation3 + $0x10] sm:$0xff] %vm2009_vm11, %v8742_v60  ;;  %v2482_v35 = vld [vmem:[#allocation11 + $0x590] sm:$0xff]  ;;  %v2489_v32 = vld [vmem:[#allocation11 + $0x5c8] sm:$0xff]  ;;  %v2495_v61 = vld [vmem:[#allocation11 + $0x5f8] sm:$0xff] }
 0x273   :  { %v1998_v49 = vrot.slane %v1997_v45, 1  ;;  %v6683_v28 = vpack.c.bf16 %v2468_v18, %v2464_v59  ;;  %6680 = vmatpush1.bf16.msra.mxu0 %v6679_v34  ;;  %v6755_v40 = vpack.c.bf16 %v2470_v3, %v2466_v62  ;;  %v6685_v22 = vpack.c.bf16 %v2477_v54, %v2473_v15  ;;  %2013 = vst.msk [vmem:[#allocation3 + $0x28] sm:$0xff] %vm2009_vm11, %v8742_v60  ;;  %v2493_v47 = vld [vmem:[#allocation11 + $0x5e8] sm:$0xff]  ;;  %v2488_v25 = vld [vmem:[#allocation11 + $0x5c0] sm:$0xff]  ;;  %v2490_v17 = vld [vmem:[#allocation11 + $0x5d0] sm:$0xff] }
 0x274   :  { %v2148_v39 = vsel %vm2099_vm8, %v1978_v12, %v2147_v50  ;;  %v2004_v38 = vmax.f32 %v2002_v26, %v2003_v41  ;;  %6682 = vmatprep.subr.bf16.mxu0 %v6681_v24  ;;  %2020 = vst.msk [vmem:[#allocation3 + $0x58] sm:$0xff] %vm2009_vm11, %v8742_v60  ;;  %2023 = vst.msk [vmem:[#allocation3 + $0x70] sm:$0xff] %vm2009_vm11, %v8742_v60  ;;  %v6757_v57 = vpack.c.bf16 %v2479_v21, %v2475_v63  ;;  %v2492_v8 = vld [vmem:[#allocation11 + $0x5e0] sm:$0xff]  ;;  %v2494_v2 = vld [vmem:[#allocation11 + $0x5f0] sm:$0xff] }
 0x275   :  { %v2149_v33 = vsel %vm2101_vm9, %v1992_v5, %v2148_v39  ;;  %v1999_v23 = vmax.f32 %v1997_v45, %v1998_v49  ;;  %6752 = vmatpush1.bf16.msra.mxu1 %v6751_v14  ;;  %v6687_v36 = vpack.c.bf16 %v2476_v55, %v2472_v51  ;;  %v6759_v53 = vpack.c.bf16 %v2478_v10, %v2474_v46  ;;  %v2497_v6 = vld [vmem:[#allocation11 + $0x608] sm:$0xff]  ;;  %v2499_v30 = vld [vmem:[#allocation11 + $0x618] sm:$0xff]  ;;  %v2496_v45 = vld [vmem:[#allocation11 + $0x600] sm:$0xff] }
 0x276   :  { %2168 = vrot.lane.b32.xlu1 %v2149_v33, %s7873_s7  ;;  %v2005_v19 = vrot.slane %v2004_v38, 1  ;;  %6754 = vmatprep.subr.bf16.mxu1 %v6753_v16  ;;  %v6689_v37 = vpack.c.bf16 %v2485_v48, %v2481_v27  ;;  %v6761_v7 = vpack.c.bf16 %v2487_v11, %v2483_v9  ;;  %v6691_v50 = vpack.c.bf16 %v2484_v1, %v2480_v52  ;;  %v2501_v26 = vld [vmem:[#allocation11 + $0x628] sm:$0xff]  ;;  %v2503_v31 = vld [vmem:[#allocation11 + $0x638] sm:$0xff]  ;;  %v2500_v43 = vld [vmem:[#allocation11 + $0x620] sm:$0xff] }
 0x277   :  { %2170 = vrot.lane.b32.xlu0 %v1999_v23, %s7873_s7  ;;  %6684 = vmatpush1.bf16.msra.mxu0 %v6683_v28  ;;  %v6763_v44 = vpack.c.bf16 %v2486_v58, %v2482_v35  ;;  %v6693_v42 = vpack.c.bf16 %v2493_v47, %v2489_v32  ;;  %v6765_v56 = vpack.c.bf16 %v2495_v61, %v2491_v0  ;;  %v2498_v18 = vld [vmem:[#allocation11 + $0x610] sm:$0xff]  ;;  %v2505_v41 = vld [vmem:[#allocation11 + $0x648] sm:$0xff]  ;;  %v2507_v62 = vld [vmem:[#allocation11 + $0x658] sm:$0xff] }
 0x278   :  { %v2006_v4 = vmax.f32 %v2004_v38, %v2005_v19  ;;  %6686 = vmatprep.subr.bf16.mxu0 %v6685_v22  ;;  %2017 = vst.msk [vmem:[#allocation3 + $0x40] sm:$0x3] %vm2016_vm12, %v8742_v60  ;;  %2026 = vst.msk [vmem:[#allocation3 + $0x88] sm:$0x3] %vm2016_vm12, %v8742_v60  ;;  %v6695_v29 = vpack.c.bf16 %v2492_v8, %v2488_v25  ;;  %v6767_v20 = vpack.c.bf16 %v2494_v2, %v2490_v17  ;;  %v2502_v12 = vld [vmem:[#allocation11 + $0x630] sm:$0xff]  ;;  %v2509_v14 = vld [vmem:[#allocation11 + $0x668] sm:$0xff] }
 0x279   :  { %6756 = vmatpush1.bf16.msra.mxu1 %v6755_v40  ;;  %v6697_v34 = vpack.c.bf16 %v2501_v26, %v2497_v6  ;;  %v6769_v59 = vpack.c.bf16 %v2503_v31, %v2499_v30  ;;  %v2511_v3 = vld [vmem:[#allocation11 + $0x678] sm:$0xff]  ;;  %v6699_v5 = vpack.c.bf16 %v2500_v43, %v2496_v45  ;;  %v6771_v49 = vpack.c.bf16 %v2502_v12, %v2498_v18  ;;  %v2504_v24 = vld [vmem:[#allocation11 + $0x640] sm:$0xff]  ;;  %v2506_v39 = vld [vmem:[#allocation11 + $0x650] sm:$0xff] }
 0x27a   :  { %2172 = vrot.lane.b32.xlu1 %v2006_v4, %s7873_s7  ;;  %6758 = vmatprep.subr.bf16.mxu1 %v6757_v57  ;;  %v2508_v16 = vld [vmem:[#allocation11 + $0x660] sm:$0xff]  ;;  %v6701_v15 = vpack.c.bf16 %v2509_v14, %v2505_v41  ;;  %v6773_v54 = vpack.c.bf16 %v2511_v3, %v2507_v62  ;;  %v2510_v38 = vld [vmem:[#allocation11 + $0x670] sm:$0xff]  ;;  %v2513_v28 = vld [vmem:[#allocation11 + $0x688] sm:$0xff]  ;;  %vm2408_vm12 = vcmask 1046528  }
 0x27b   :  { %6688 = vmatpush1.bf16.msra.mxu0 %v6687_v36  ;;  %v2517_v63 = vld [vmem:[#allocation11 + $0x6a8] sm:$0xff]  ;;  %v2515_v21 = vld [vmem:[#allocation11 + $0x698] sm:$0xff]  ;;  %v6703_v23 = vpack.c.bf16 %v2508_v16, %v2504_v24  ;;  %v6775_v40 = vpack.c.bf16 %v2510_v38, %v2506_v39  ;;  %v2512_v51 = vld [vmem:[#allocation11 + $0x680] sm:$0xff] }
 0x27c   :  { %6690 = vmatprep.subr.bf16.mxu0 %v6689_v37  ;;  %v2519_v33 = vld [vmem:[#allocation11 + $0x6b8] sm:$0xff]  ;;  %v2516_v55 = vld [vmem:[#allocation11 + $0x6a0] sm:$0xff]  ;;  %v6705_v19 = vpack.c.bf16 %v2517_v63, %v2513_v28  ;;  %v2514_v46 = vld [vmem:[#allocation11 + $0x690] sm:$0xff] }
 0x27d   :  { %6760 = vmatpush1.bf16.msra.mxu1 %v6759_v53  ;;  %v6777_v22 = vpack.c.bf16 %v2519_v33, %v2515_v21  ;;  %v2518_v10 = vld [vmem:[#allocation11 + $0x6b0] sm:$0xff]  ;;  %v2521_v27 = vld [vmem:[#allocation11 + $0x6c8] sm:$0xff]  ;;  %v2523_v48 = vld [vmem:[#allocation11 + $0x6d8] sm:$0xff]  ;;  %v6707_v11 = vpack.c.bf16 %v2516_v55, %v2512_v51 }
 0x27e   :  { %6762 = vmatprep.subr.bf16.mxu1 %v6761_v7  ;;  %v2525_v57 = vld [vmem:[#allocation11 + $0x6e8] sm:$0xff]  ;;  %v2527_v9 = vld [vmem:[#allocation11 + $0x6f8] sm:$0xff]  ;;  %v6779_v4 = vpack.c.bf16 %v2518_v10, %v2514_v46  ;;  %v2520_v36 = vld [vmem:[#allocation11 + $0x6c0] sm:$0xff] }
 0x27f   :  { %6692 = vmatpush1.bf16.msra.mxu0 %v6691_v50  ;;  %v2524_v53 = vld [vmem:[#allocation11 + $0x6e0] sm:$0xff]  ;;  %v6709_v52 = vpack.c.bf16 %v2525_v57, %v2521_v27  ;;  %v6781_v1 = vpack.c.bf16 %v2527_v9, %v2523_v48  ;;  %v2522_v37 = vld [vmem:[#allocation11 + $0x6d0] sm:$0xff]  ;;  %v2529_v35 = vld [vmem:[#allocation11 + $0x708] sm:$0xff] }
 0x280   :  { %6694 = vmatprep.subr.bf16.mxu0 %v6693_v42  ;;  %v2526_v7 = vld [vmem:[#allocation11 + $0x6f0] sm:$0xff]  ;;  %v2533_v58 = vld [vmem:[#allocation11 + $0x728] sm:$0xff]  ;;  %v2531_v32 = vld [vmem:[#allocation11 + $0x718] sm:$0xff]  ;;  %v6711_v0 = vpack.c.bf16 %v2524_v53, %v2520_v36 }
 0x281   :  { %6764 = vmatpush1.bf16.msra.mxu1 %v6763_v44  ;;  %v2535_v47 = vld [vmem:[#allocation11 + $0x738] sm:$0xff]  ;;  %v6783_v61 = vpack.c.bf16 %v2526_v7, %v2522_v37  ;;  %v2528_v50 = vld [vmem:[#allocation11 + $0x700] sm:$0xff]  ;;  %v6713_v25 = vpack.c.bf16 %v2533_v58, %v2529_v35  ;;  %v2530_v42 = vld [vmem:[#allocation11 + $0x710] sm:$0xff] }
 0x282   :  { %6766 = vmatprep.subr.bf16.mxu1 %v6765_v56  ;;  %v2532_v44 = vld [vmem:[#allocation11 + $0x720] sm:$0xff]  ;;  %v6785_v8 = vpack.c.bf16 %v2535_v47, %v2531_v32  ;;  %v2534_v56 = vld [vmem:[#allocation11 + $0x730] sm:$0xff]  ;;  %v2537_v17 = vld [vmem:[#allocation11 + $0x748] sm:$0xff] }
 0x283   :  { %6696 = vmatpush1.bf16.msra.mxu0 %v6695_v29  ;;  %v2541_v2 = vld [vmem:[#allocation11 + $0x768] sm:$0xff]  ;;  %v2539_v6 = vld [vmem:[#allocation11 + $0x758] sm:$0xff]  ;;  %v6715_v30 = vpack.c.bf16 %v2532_v44, %v2528_v50  ;;  %v6787_v31 = vpack.c.bf16 %v2534_v56, %v2530_v42  ;;  %v2536_v29 = vld [vmem:[#allocation11 + $0x740] sm:$0xff] }
 0x284   :  { %6698 = vmatprep.subr.bf16.mxu0 %v6697_v34  ;;  %v2543_v26 = vld [vmem:[#allocation11 + $0x778] sm:$0xff]  ;;  %v6717_v45 = vpack.c.bf16 %v2541_v2, %v2537_v17  ;;  %v2538_v34 = vld [vmem:[#allocation11 + $0x750] sm:$0xff]  ;;  %v2545_v18 = vld [vmem:[#allocation11 + $0x788] sm:$0xff] }
 0x285   :  { %6768 = vmatpush1.bf16.msra.mxu1 %v6767_v20  ;;  %v2540_v20 = vld [vmem:[#allocation11 + $0x760] sm:$0xff]  ;;  %v6789_v43 = vpack.c.bf16 %v2543_v26, %v2539_v6  ;;  %v2549_v12 = vld [vmem:[#allocation11 + $0x7a8] sm:$0xff]  ;;  %v2547_v41 = vld [vmem:[#allocation11 + $0x798] sm:$0xff] }
 0x286   :  { %6770 = vmatprep.subr.bf16.mxu1 %v6769_v59  ;;  %v2542_v59 = vld [vmem:[#allocation11 + $0x770] sm:$0xff]  ;;  %v2551_v14 = vld [vmem:[#allocation11 + $0x7b8] sm:$0xff]  ;;  %v6719_v62 = vpack.c.bf16 %v2540_v20, %v2536_v29  ;;  %v6721_v24 = vpack.c.bf16 %v2549_v12, %v2545_v18  ;;  %v2553_v39 = vld [vmem:[#allocation11 + $0x7c8] sm:$0xff] }
 0x287   :  { %6700 = vmatpush1.bf16.msra.mxu0 %v6699_v5  ;;  %v6791_v3 = vpack.c.bf16 %v2542_v59, %v2538_v34  ;;  %v2544_v5 = vld [vmem:[#allocation11 + $0x780] sm:$0xff]  ;;  %v6793_v16 = vpack.c.bf16 %v2551_v14, %v2547_v41  ;;  %v2557_v38 = vld [vmem:[#allocation11 + $0x7e8] sm:$0xff]  ;;  %v2555_v28 = vld [vmem:[#allocation11 + $0x7d8] sm:$0xff] }
 0x288   :  { %6702 = vmatprep.subr.bf16.mxu0 %v6701_v15  ;;  %v2546_v15 = vld [vmem:[#allocation11 + $0x790] sm:$0xff]  ;;  %v2559_v63 = vld [vmem:[#allocation11 + $0x7f8] sm:$0xff]  ;;  %v6725_v51 = vpack.c.bf16 %v2557_v38, %v2553_v39  ;;  %v2561_v46 = vld [vmem:[#allocation11 + $0x808] sm:$0xff] }
 0x289   :  { %6772 = vmatpush1.bf16.msra.mxu1 %v6771_v49  ;;  %v2548_v49 = vld [vmem:[#allocation11 + $0x7a0] sm:$0xff]  ;;  %v6797_v55 = vpack.c.bf16 %v2559_v63, %v2555_v28  ;;  %v2565_v10 = vld [vmem:[#allocation11 + $0x828] sm:$0xff]  ;;  %v2563_v27 = vld [vmem:[#allocation11 + $0x818] sm:$0xff] }
 0x28a   :  { %6774 = vmatprep.subr.bf16.mxu1 %v6773_v54  ;;  %v2550_v54 = vld [vmem:[#allocation11 + $0x7b0] sm:$0xff]  ;;  %v6723_v21 = vpack.c.bf16 %v2548_v49, %v2544_v5  ;;  %v2567_v57 = vld [vmem:[#allocation11 + $0x838] sm:$0xff]  ;;  %v6729_v36 = vpack.c.bf16 %v2565_v10, %v2561_v46  ;;  %v2569_v37 = vld [vmem:[#allocation11 + $0x848] sm:$0xff] }
 0x28b   :  { %6704 = vmatpush1.bf16.msra.mxu0 %v6703_v23  ;;  %v6795_v33 = vpack.c.bf16 %v2550_v54, %v2546_v15  ;;  %v2552_v23 = vld [vmem:[#allocation11 + $0x7c0] sm:$0xff]  ;;  %v6801_v53 = vpack.c.bf16 %v2567_v57, %v2563_v27  ;;  %v2573_v7 = vld [vmem:[#allocation11 + $0x868] sm:$0xff]  ;;  %v2571_v35 = vld [vmem:[#allocation11 + $0x858] sm:$0xff] }
 0x28c   :  { %6706 = vmatprep.subr.bf16.mxu0 %v6705_v19  ;;  %v2554_v19 = vld [vmem:[#allocation11 + $0x7d0] sm:$0xff]  ;;  %v2575_v58 = vld [vmem:[#allocation11 + $0x878] sm:$0xff]  ;;  %v6733_v50 = vpack.c.bf16 %v2573_v7, %v2569_v37  ;;  %v2577_v42 = vld [vmem:[#allocation11 + $0x888] sm:$0xff] }
 0x28d   :  { %6776 = vmatpush1.bf16.msra.mxu1 %v6775_v40  ;;  %v2556_v40 = vld [vmem:[#allocation11 + $0x7e0] sm:$0xff]  ;;  %v6805_v44 = vpack.c.bf16 %v2575_v58, %v2571_v35  ;;  %v2581_v56 = vld [vmem:[#allocation11 + $0x8a8] sm:$0xff]  ;;  %v2579_v17 = vld [vmem:[#allocation11 + $0x898] sm:$0xff] }
 0x28e   :  { %6778 = vmatprep.subr.bf16.mxu1 %v6777_v22  ;;  %v2558_v22 = vld [vmem:[#allocation11 + $0x7f0] sm:$0xff]  ;;  %v6727_v48 = vpack.c.bf16 %v2556_v40, %v2552_v23  ;;  %v2583_v2 = vld [vmem:[#allocation11 + $0x8b8] sm:$0xff]  ;;  %v2576_v49 = vld [vmem:[#allocation11 + $0x880] sm:$0xff] }
 0x28f   :  { %6708 = vmatpush1.bf16.msra.mxu0 %v6707_v11  ;;  %v6799_v9 = vpack.c.bf16 %v2558_v22, %v2554_v19  ;;  %v2560_v11 = vld [vmem:[#allocation11 + $0x800] sm:$0xff]  ;;  %v2578_v39 = vld [vmem:[#allocation11 + $0x890] sm:$0xff]  ;;  %v2585_v28 = vld [vmem:[#allocation11 + $0x8c8] sm:$0xff] }
 0x290   :  { %6710 = vmatprep.subr.bf16.mxu0 %v6709_v52  ;;  %v2562_v52 = vld [vmem:[#allocation11 + $0x810] sm:$0xff]  ;;  %v2589_v23 = vld [vmem:[#allocation11 + $0x8e8] sm:$0xff]  ;;  %v2587_v40 = vld [vmem:[#allocation11 + $0x8d8] sm:$0xff] }
 0x291   :  { %6780 = vmatpush1.bf16.msra.mxu1 %v6779_v4  ;;  %v2564_v4 = vld [vmem:[#allocation11 + $0x820] sm:$0xff]  ;;  %v2582_v38 = vld [vmem:[#allocation11 + $0x8b0] sm:$0xff]  ;;  %v2241_v37 = vld [vmem:[#allocation11 + $0x38] sm:$0xff] }
 0x292   :  { %6782 = vmatprep.subr.bf16.mxu1 %v6781_v1  ;;  %v2566_v1 = vld [vmem:[#allocation11 + $0x830] sm:$0xff]  ;;  %v6731_v32 = vpack.c.bf16 %v2564_v4, %v2560_v11  ;;  %v6811_v10 = vpack.c.bf16 %v2582_v38, %v2578_v39  ;;  %v2584_v27 = vld [vmem:[#allocation11 + $0x8c0] sm:$0xff]  ;;  %v2243_v38 = vld [vmem:[#allocation11 + $0x48] sm:$0xff] }
 0x293   :  { %6712 = vmatpush1.bf16.msra.mxu0 %v6711_v0  ;;  %v6803_v47 = vpack.c.bf16 %v2566_v1, %v2562_v52  ;;  %v2568_v0 = vld [vmem:[#allocation11 + $0x840] sm:$0xff]  ;;  %v2586_v11 = vld [vmem:[#allocation11 + $0x8d0] sm:$0xff]  ;;  %v2239_v52 = vld [vmem:[#allocation11 + $0x28] sm:$0xff] }
 0x294   :  { %6714 = vmatprep.subr.bf16.mxu0 %v6713_v25  ;;  %v2570_v25 = vld [vmem:[#allocation11 + $0x850] sm:$0xff]  ;;  %v2588_v57 = vld [vmem:[#allocation11 + $0x8e0] sm:$0xff]  ;;  %v2237_v1 = vld [vmem:[#allocation11 + $0x18] sm:$0xff] }
 0x295   :  { %6784 = vmatpush1.bf16.msra.mxu1 %v6783_v61  ;;  %v2572_v61 = vld [vmem:[#allocation11 + $0x860] sm:$0xff]  ;;  %v2590_v4 = vld [vmem:[#allocation11 + $0x8f0] sm:$0xff]  ;;  %v6743_v35 = vpack.c.bf16 %v2588_v57, %v2584_v27 }
 0x296   :  { %6786 = vmatprep.subr.bf16.mxu1 %v6785_v8  ;;  %v2574_v8 = vld [vmem:[#allocation11 + $0x870] sm:$0xff]  ;;  %v6735_v6 = vpack.c.bf16 %v2572_v61, %v2568_v0  ;;  %v6815_v58 = vpack.c.bf16 %v2590_v4, %v2586_v11  ;;  %v6889_v0 = vpack.c.bf16 %v2241_v37, %v2237_v1  ;;  %v2253_v11 = vld [vmem:[#allocation11 + $0x98] sm:$0xff]  ;;  %v2250_v37 = vld [vmem:[#allocation11 + $0x80] sm:$0xff] }
 0x297   :  { %6716 = vmatpush1.bf16.msra.mxu0 %v6715_v30  ;;  %v6807_v26 = vpack.c.bf16 %v2574_v8, %v2570_v25  ;;  %v6737_v30 = vpack.c.bf16 %v2581_v56, %v2577_v42  ;;  %v2257_v4 = vld [vmem:[#allocation11 + $0xb8] sm:$0xff] }
 0x298   :  { %6718 = vmatprep.subr.bf16.mxu0 %v6717_v45 }
 0x299   :  { %6788 = vmatpush1.bf16.msra.mxu1 %v6787_v31  ;;  %v6809_v31 = vpack.c.bf16 %v2583_v2, %v2579_v17 }
 0x29a   :  { %6790 = vmatprep.subr.bf16.mxu1 %v6789_v43 }
 0x29b   :  { %6720 = vmatpush1.bf16.msra.mxu0 %v6719_v62 }
 0x29c   :  { %6722 = vmatprep.subr.bf16.mxu0 %v6721_v24  ;;  %v2580_v24 = vld [vmem:[#allocation11 + $0x8a0] sm:$0xff] }
 0x29d   :  { %6792 = vmatpush1.bf16.msra.mxu1 %v6791_v3  ;;  %v6739_v46 = vpack.c.bf16 %v2580_v24, %v2576_v49  ;;  %v2236_v24 = vld [vmem:[#allocation11 + $0x10] sm:$0xff] }
 0x29e   :  { %6794 = vmatprep.subr.bf16.mxu1 %v6793_v16 }
 0x29f   :  { %6724 = vmatpush1.bf16.msra.mxu0 %v6723_v21 }
 0x2a0   :  { %6726 = vmatprep.subr.bf16.mxu0 %v6725_v51  ;;  %v2591_v51 = vld [vmem:[#allocation11 + $0x8f8] sm:$0xff] }
 0x2a1   :  { %6796 = vmatpush1.bf16.msra.mxu1 %v6795_v33 }
 0x2a2   :  { %6798 = vmatprep.subr.bf16.mxu1 %v6797_v55 }
 0x2a3   :  { %6728 = vmatpush1.bf16.msra.mxu0 %v6727_v48  ;;  %v6741_v48 = vpack.c.bf16 %v2589_v23, %v2585_v28  ;;  %v2247_v28 = vld [vmem:[#allocation11 + $0x68] sm:$0xff] }
 0x2a4   :  { %6730 = vmatprep.subr.bf16.mxu0 %v6729_v36  ;;  %v2235_v36 = vld [vmem:[#allocation11 + $0x8] sm:$0xff]  ;;  %v6821_v27 = vpack.c.bf16 %v2247_v28, %v2243_v38  ;;  %v2272_v38 = vld [vmem:[#allocation11 + $0x130] sm:$0xff] }
 0x2a5   :  { %6800 = vmatpush1.bf16.msra.mxu1 %v6799_v9  ;;  %v6813_v9 = vpack.c.bf16 %v2591_v51, %v2587_v40  ;;  %v2242_v51 = vld [vmem:[#allocation11 + $0x40] sm:$0xff]  ;;  %v2275_v28 = vld [vmem:[#allocation11 + $0x148] sm:$0xff] }
 0x2a6   :  { %6802 = vmatprep.subr.bf16.mxu1 %v6801_v53 }
 0x2a7   :  { %6732 = vmatpush1.bf16.msra.mxu0 %v6731_v32 }
 0x2a8   :  { %6734 = vmatprep.subr.bf16.mxu0 %v6733_v50  ;;  %v2151_v29 = vpop.permute.xlu0 %2150 }
 0x2a9   :  { %6804 = vmatpush1.bf16.msra.mxu1 %v6803_v47  ;;  %2200 = vst.msk [vmem:[#allocation3] sm:$0xfe] %vm2199_vm13, %v2151_v29  ;;  %v6817_v47 = vpack.c.bf16 %v2239_v52, %v2235_v36 }
 0x2aa   :  { %6806 = vmatprep.subr.bf16.mxu1 %v6805_v44 }
 0x2ab   :  { %6736 = vmatpush1.bf16.msra.mxu0 %v6735_v6 }
 0x2ac   :  { %6738 = vmatprep.subr.bf16.mxu0 %v6737_v30 }
 0x2ad   :  { %6808 = vmatpush1.bf16.msra.mxu1 %v6807_v26 }
 0x2ae   :  { %6810 = vmatprep.subr.bf16.mxu1 %v6809_v31 }
 0x2b0   :  { %v2378_v41 = vld [vmem:[#allocation3] sm:$0xfe] }
 0x2b1   :  { %v2409_v54 = vrot.slane %v2378_v41, 1 }
 0x2b5   :  { %v2153_v20 = vpop.permute.xlu1 %2152  ;;  %v2159_v43 = vpop.permute.xlu0 %2158 }
 0x2b6   :  { %v2175_v45 = vsel %vm2174_vm14, %v2151_v29, %v2153_v20  ;;  %2203 = vst.msk [vmem:[#allocation3 + $0x10] sm:$0xfe] %vm2202_vm15, %v2153_v20 }
 0x2b7   :  { %2201 = vst [vmem:[#allocation3 + $0x8] sm:$0xfe] %v2175_v45  ;;  %2209 = vst.msk [vmem:[#allocation3 + $0x30] sm:$0x1] %vm2208_vm0, %v2159_v43 }
 0x2b9   :  { %v2161_v34 = vpop.permute.xlu1 %2160 }
 0x2ba   :  { %v2177_v59 = vsel %vm2174_vm14, %v2159_v43, %v2161_v34  ;;  %2212 = vst.msk [vmem:[#allocation3 + $0x40] sm:$0x1] %vm2211_vm1, %v2161_v34 }
 0x2bb   :  { %2210 = vst [vmem:[#allocation3 + $0x38] sm:$0x1] %v2177_v59  ;;  %v2155_v18 = vpop.permute.xlu0 %2154 }
 0x2bc   :  { %2205 = vst.msk [vmem:[#allocation3 + $0x18] sm:$0xff] %vm2204_vm3, %v2155_v18 }
 0x2bd   :  { %v2380_v49 = vld [vmem:[#allocation3 + $0x10] sm:$0xfe] }
 0x2be   :  { %v2379_v14 = vld [vmem:[#allocation3 + $0x8] sm:$0xfe]  ;;  %v2381_v22 = vld [vmem:[#allocation3 + $0x30] sm:$0x1] }
 0x2bf   :  { %v2412_v63 = vrot.slane %v2379_v14, 1  ;;  %v2418_v7 = vrot.slane %v2381_v22, 1  ;;  %v2244_v22 = vld [vmem:[#allocation11 + $0x50] sm:$0xff] }
 0x2c2   :  { %v2382_v3 = vld [vmem:[#allocation3 + $0x38] sm:$0x1] }
 0x2c3   :  { %v8763_v12 = vld [vmem:[#allocation3 + $0x18] sm:$0xff]  ;;  %v2420_v33 = vrot.slane %v2382_v3, 1 }
 0x2c4   :  { %v2410_v62 = vrot.slane %v8763_v12, 1  ;;  %v2238_v3 = vld [vmem:[#allocation11 + $0x20] sm:$0xff] }
 0x2c6   :  { %v2411_v55 = vsel %vm2408_vm12, %v2409_v54, %v2410_v62  ;;  %v2419_v32 = vsel %vm2408_vm12, %v2410_v62, %v2418_v7  ;;  %v2234_v62 = vld [vmem:[#allocation11] sm:$0xff] }
 0x2c7   :  { %v6819_v23 = vpack.c.bf16 %v2238_v3, %v2234_v62  ;;  %v2254_v7 = vld [vmem:[#allocation11 + $0xa0] sm:$0xff]  ;;  %v2271_v62 = vld [vmem:[#allocation11 + $0x128] sm:$0xff]  ;;  %v2269_v3 = vld [vmem:[#allocation11 + $0x118] sm:$0xff] }
 0x2c9   :  { %v2157_v5 = vpop.permute.xlu1 %2156 }
 0x2ca   :  { %v8767_v16 = vsel %vm2174_vm14, %v2155_v18, %v2157_v5  ;;  %2207 = vst.msk [vmem:[#allocation3 + $0x28] sm:$0xff] %vm2174_vm14, %v2157_v5 }
 0x2cb   :  { %v2413_v21 = vrot.slane %v8767_v16, 1 }
 0x2cd   :  { %v2163_v15 = vpop.permute.xlu0 %2162  ;;  %v2414_v19 = vsel %vm2408_vm12, %v2412_v63, %v2413_v21  ;;  %v2421_v53 = vsel %vm2408_vm12, %v2413_v21, %v2420_v33  ;;  %v2245_v63 = vld [vmem:[#allocation11 + $0x58] sm:$0xff]  ;;  %v2415_v33 = vrot.slane %v2380_v49, 1 }
 0x2ce   :  { %2213 = vst.msk [vmem:[#allocation3 + $0x48] sm:$0xfe] %vm2199_vm13, %v2163_v15  ;;  %2664 = vmatprep.mubr.f32.mxu0 %v2414_v19  ;;  %2842 = vmatprep.mubr.f32.mxu1 %v2414_v19  ;;  %v2249_v21 = vld [vmem:[#allocation11 + $0x78] sm:$0xff]  ;;  %v2383_v19 = vld [vmem:[#allocation3 + $0x40] sm:$0x1]  ;;  %vm3346_vm13 = vcmask 1045504  }
 0x2cf   :  { %2665 = vmatmul.mubr.f32.vlgmr.msra.gmra.mrb[16].mxu0 %v2411_v55  ;;  %2843 = vmatmul.mubr.f32.vlgmr.msra.gmra.mrb[16].mxu1 %v2411_v55  ;;  %v2246_v55 = vld [vmem:[#allocation11 + $0x60] sm:$0xff]  ;;  %v6893_v57 = vpack.c.bf16 %v2249_v21, %v2245_v63 }
 0x2d0   :  { %2670 = vmatprep.mubr.f32.mxu0 %v2421_v53  ;;  %2848 = vmatprep.mubr.f32.mxu1 %v2421_v53  ;;  %v2422_v53 = vrot.slane %v2383_v19, 1  ;;  %v6823_v52 = vpack.c.bf16 %v2246_v55, %v2242_v51  ;;  %v2281_v51 = vld [vmem:[#allocation11 + $0x178] sm:$0xff]  ;;  %v2223_v55 = vld [vmem:[#allocation3 + $0x8] sm:$0xff] }
 0x2d1   :  { %6740 = vmatpush1.bf16.msra.mxu0 %v6739_v46  ;;  %6812 = vmatpush1.bf16.msra.mxu1 %v6811_v10  ;;  %v8793_v14 = vld [vmem:[#allocation3 + $0x28] sm:$0xff] }
 0x2d2   :  { %6742 = vmatprep.subr.bf16.mxu0 %v6741_v48  ;;  %6814 = vmatprep.subr.bf16.mxu1 %v6813_v9  ;;  %v2416_v39 = vrot.slane %v8793_v14, 1  ;;  %v2248_v46 = vld [vmem:[#allocation11 + $0x70] sm:$0xff]  ;;  %v2251_v48 = vld [vmem:[#allocation11 + $0x88] sm:$0xff] }
 0x2d3   :  { %2671 = vmatmul.mubr.f32.gmra.mrb[18].mxu0 %v2419_v32  ;;  %2849 = vmatmul.mubr.f32.gmra.mrb[18].mxu1 %v2419_v32  ;;  %v2255_v9 = vld [vmem:[#allocation11 + $0xa8] sm:$0xff]  ;;  %v6895_v1 = vpack.c.bf16 %v2248_v46, %v2244_v22  ;;  %v2256_v32 = vld [vmem:[#allocation11 + $0xb0] sm:$0xff]  ;;  %v2274_v22 = vld [vmem:[#allocation11 + $0x140] sm:$0xff] }
 0x2d4   :  { %v2417_v10 = vsel %vm2408_vm12, %v2415_v33, %v2416_v39  ;;  %v2278_v46 = vld [vmem:[#allocation11 + $0x160] sm:$0xff] }
 0x2d5   :  { %6744 = vmatpush1.bf16.msra.mxu0 %v6743_v35  ;;  %6816 = vmatpush1.bf16.msra.mxu1 %v6815_v58  ;;  %v2384_v42 = vld [vmem:[#allocation3 + $0x48] sm:$0xfe] }
 0x2d6   :  { %6818 = vmatprep.subr.bf16.mxu0 %v6817_v47  ;;  %6890 = vmatprep.subr.bf16.mxu1 %v6889_v0  ;;  %v2424_v30 = vrot.slane %v2384_v42, 1  ;;  %v2252_v58 = vld [vmem:[#allocation11 + $0x90] sm:$0xff]  ;;  %v2423_v47 = vsel %vm2408_vm12, %v2416_v39, %v2422_v53  ;;  %v6825_v0 = vpack.c.bf16 %v2255_v9, %v2251_v48  ;;  %v2261_v42 = vld [vmem:[#allocation11 + $0xd8] sm:$0xff]  ;;  %v2283_v9 = vld [vmem:[#allocation11 + $0x188] sm:$0xff] }
 0x2d7   :  { %v2268_v39 = vld [vmem:[#allocation11 + $0x110] sm:$0xff]  ;;  %v2289_v53 = vld [vmem:[#allocation11 + $0x1b8] sm:$0xff] }
 0x2d8   :  { %v6907_v19 = vpack.c.bf16 %v2272_v38, %v2268_v39  ;;  %v2280_v48 = vld [vmem:[#allocation11 + $0x170] sm:$0xff]  ;;  %v2313_v39 = vld [vmem:[#allocation11 + $0x278] sm:$0xff] }
 0x2da   :  { %v2165_v61 = vpop.permute.xlu1 %2164 }
 0x2db   :  { %v2178_v50 = vsel %vm2174_vm14, %v2163_v15, %v2165_v61  ;;  %2215 = vst.msk [vmem:[#allocation3 + $0x58] sm:$0xfe] %vm2202_vm15, %v2165_v61  ;;  %v2240_v15 = vld [vmem:[#allocation11 + $0x30] sm:$0xff]  ;;  %v6897_v61 = vpack.c.bf16 %v2257_v4, %v2253_v11  ;;  %v2287_v11 = vld [vmem:[#allocation11 + $0x1a8] sm:$0xff]  ;;  %v2285_v4 = vld [vmem:[#allocation11 + $0x198] sm:$0xff]  ;;  %vm4505_vm15 = vcmask 1040640  }
 0x2dc   :  { %2214 = vst [vmem:[#allocation3 + $0x50] sm:$0xfe] %v2178_v50  ;;  %v2167_v44 = vpop.permute.xlu0 %2166  ;;  %v6891_v40 = vpack.c.bf16 %v2240_v15, %v2236_v24  ;;  %v2266_v15 = vld [vmem:[#allocation11 + $0x100] sm:$0xff] }
 0x2dd   :  { %2216 = vst.msk [vmem:[#allocation3 + $0x60] sm:$0xff] %vm2204_vm3, %v2167_v44 }
 0x2e2   :  { %v2386_v35 = vld [vmem:[#allocation3 + $0x58] sm:$0xfe] }
 0x2e3   :  { %v2385_v8 = vld [vmem:[#allocation3 + $0x50] sm:$0xfe] }
 0x2e4   :  { %v8779_v25 = vld [vmem:[#allocation3 + $0x60] sm:$0xff]  ;;  %v2427_v2 = vrot.slane %v2385_v8, 1 }
 0x2e5   :  { %v2425_v56 = vrot.slane %v8779_v25, 1  ;;  %v2263_v8 = vld [vmem:[#allocation11 + $0xe8] sm:$0xff] }
 0x2e7   :  { %v2426_v29 = vsel %vm2408_vm12, %v2424_v30, %v2425_v56  ;;  %v6899_v30 = vpack.c.bf16 %v2256_v32, %v2252_v58  ;;  %v6913_v58 = vpack.c.bf16 %v2289_v53, %v2285_v4  ;;  %v2284_v32 = vld [vmem:[#allocation11 + $0x190] sm:$0xff]  ;;  %v2323_v53 = vld [vmem:[#allocation11 + $0x2c8] sm:$0xff] }
 0x2e8   :  { %v2169_v17 = vpop.permute.xlu1 %2168  ;;  %v2320_v4 = vld [vmem:[#allocation11 + $0x2b0] sm:$0xff] }
 0x2e9   :  { %v8783_v6 = vsel %vm2174_vm14, %v2167_v44, %v2169_v17  ;;  %2218 = vst.msk [vmem:[#allocation3 + $0x70] sm:$0xff] %vm2174_vm14, %v2169_v17  ;;  %v2171_v26 = vpop.permute.xlu0 %2170  ;;  %v2259_v44 = vld [vmem:[#allocation11 + $0xc8] sm:$0xff] }
 0x2ea   :  { %2217 = vst [vmem:[#allocation3 + $0x68] sm:$0xff] %v8783_v6  ;;  %2219 = vst.msk [vmem:[#allocation3 + $0x78] sm:$0x1] %vm2208_vm0, %v2171_v26  ;;  %v2428_v31 = vrot.slane %v8783_v6, 1  ;;  %vm4508_vm0 = vcmask 253952  }
 0x2ec   :  { %v2173_v20 = vpop.permute.xlu1 %2172  ;;  %v2429_v45 = vsel %vm2408_vm12, %v2427_v2, %v2428_v31  ;;  %v2430_v2 = vrot.slane %v2386_v35, 1  ;;  %v6841_v35 = vpack.c.bf16 %v2287_v11, %v2283_v9  ;;  %v2316_v11 = vld [vmem:[#allocation11 + $0x290] sm:$0xff] }
 0x2ed   :  { %v2180_v43 = vsel %vm2174_vm14, %v2171_v26, %v2173_v20  ;;  %2221 = vst.msk [vmem:[#allocation3 + $0x88] sm:$0x1] %vm2211_vm1, %v2173_v20  ;;  %2676 = vmatprep.mubr.f32.mxu0 %v2429_v45  ;;  %2854 = vmatprep.mubr.f32.mxu1 %v2429_v45  ;;  %v6827_v26 = vpack.c.bf16 %v2254_v7, %v2250_v37  ;;  %v2260_v20 = vld [vmem:[#allocation11 + $0xd0] sm:$0xff]  ;;  %v2282_v37 = vld [vmem:[#allocation11 + $0x180] sm:$0xff]  ;;  %vm4503_vm14 = vcmask 261121  }
 0x2ee   :  { %2220 = vst [vmem:[#allocation3 + $0x80] sm:$0x1] %v2180_v43  ;;  %2677 = vmatmul.mubr.f32.gmra.mrb[20].mxu0 %v2426_v29  ;;  %2855 = vmatmul.mubr.f32.gmra.mrb[20].mxu1 %v2426_v29  ;;  %v2262_v29 = vld [vmem:[#allocation11 + $0xe0] sm:$0xff]  ;;  %v2264_v45 = vld [vmem:[#allocation11 + $0xf0] sm:$0xff] }
 0x2ef   :  { %v6903_v24 = vpack.c.bf16 %v2264_v45, %v2260_v20  ;;  %v2286_v7 = vld [vmem:[#allocation11 + $0x1a0] sm:$0xff]  ;;  %v2303_v20 = vld [vmem:[#allocation11 + $0x228] sm:$0xff]  ;;  %v2301_v45 = vld [vmem:[#allocation11 + $0x218] sm:$0xff] }
 0x2f0   :  { %v8803_v36 = vld [vmem:[#allocation3 + $0x70] sm:$0xff] }
 0x2f1   :  { %v2387_v34 = vld [vmem:[#allocation3 + $0x78] sm:$0x1]  ;;  %v2431_v50 = vrot.slane %v8803_v36, 1 }
 0x2f2   :  { %v2433_v18 = vrot.slane %v2387_v34, 1  ;;  %v6829_v34 = vpack.c.bf16 %v2263_v8, %v2259_v44  ;;  %v2297_v44 = vld [vmem:[#allocation11 + $0x1f8] sm:$0xff]  ;;  %v6843_v8 = vpack.c.bf16 %v2286_v7, %v2282_v37 }
 0x2f3   :  { %v2432_v43 = vsel %vm2408_vm12, %v2430_v2, %v2431_v50  ;;  %v2329_v37 = vld [vmem:[#allocation11 + $0x2f8] sm:$0xff] }
 0x2f4   :  { %v2434_v54 = vsel %vm2408_vm12, %v2425_v56, %v2433_v18  ;;  %v2265_v56 = vld [vmem:[#allocation11 + $0xf8] sm:$0xff]  ;;  %v2389_v17 = vld [vmem:[#allocation3 + $0x88] sm:$0x1] }
 0x2f5   :  { %v2388_v59 = vld [vmem:[#allocation3 + $0x80] sm:$0x1]  ;;  %v2437_v18 = vrot.slane %v2389_v17, 1  ;;  %v2294_v17 = vld [vmem:[#allocation11 + $0x1e0] sm:$0xff] }
 0x2f6   :  { %v2435_v41 = vrot.slane %v2388_v59, 1  ;;  %v6901_v59 = vpack.c.bf16 %v2265_v56, %v2261_v42  ;;  %v2290_v56 = vld [vmem:[#allocation11 + $0x1c0] sm:$0xff] }
 0x2f7   :  { %v2438_v63 = vsel %vm2408_vm12, %v2431_v50, %v2437_v18  ;;  %v2293_v50 = vld [vmem:[#allocation11 + $0x1d8] sm:$0xff]  ;;  %v2298_v18 = vld [vmem:[#allocation11 + $0x200] sm:$0xff] }
 0x2f8   :  { %v2436_v5 = vsel %vm2408_vm12, %v2428_v31, %v2435_v41  ;;  %v2258_v31 = vld [vmem:[#allocation11 + $0xc0] sm:$0xff]  ;;  %v2267_v41 = vld [vmem:[#allocation11 + $0x108] sm:$0xff] }
 0x2f9   :  { %2682 = vmatprep.mubr.f32.mxu0 %v2436_v5  ;;  %2860 = vmatprep.mubr.f32.mxu1 %v2436_v5  ;;  %v2273_v5 = vld [vmem:[#allocation11 + $0x138] sm:$0xff]  ;;  %v6831_v49 = vpack.c.bf16 %v2262_v29, %v2258_v31  ;;  %v6833_v21 = vpack.c.bf16 %v2271_v62, %v2267_v41  ;;  %v2296_v31 = vld [vmem:[#allocation11 + $0x1f0] sm:$0xff]  ;;  %v2299_v29 = vld [vmem:[#allocation11 + $0x208] sm:$0xff] }
 0x2fa   :  { %2683 = vmatmul.mubr.f32.gmra.mrb[22].mxu0 %v2434_v54  ;;  %2861 = vmatmul.mubr.f32.gmra.mrb[22].mxu1 %v2434_v54  ;;  %v2270_v54 = vld [vmem:[#allocation11 + $0x120] sm:$0xff]  ;;  %v6905_v33 = vpack.c.bf16 %v2273_v5, %v2269_v3  ;;  %v6849_v62 = vpack.c.bf16 %v2303_v20, %v2299_v29  ;;  %v2300_v5 = vld [vmem:[#allocation11 + $0x210] sm:$0xff] }
 0x2fb   :  { %2753 = vmatprep.mubr.f32.mxu0 %v8742_v60  ;;  %2931 = vmatprep.mubr.f32.mxu1 %v8742_v60  ;;  %v2302_v41 = vld [vmem:[#allocation11 + $0x220] sm:$0xff]  ;;  %v2332_v20 = vld [vmem:[#allocation11 + $0x310] sm:$0xff] }
 0x2fc   :  { %v6851_v38 = vpack.c.bf16 %v2302_v41, %v2298_v18  ;;  %v2345_v18 = vld [vmem:[#allocation11 + $0x378] sm:$0xff] }
 0x2fe   :  { %6306 = vmatmul.mubr.msk.f32.vlgmr.msra.gmra.mrb[16].mxu0 %vm2009_vm11, %v2417_v10  ;;  %6310 = vmatmul.mubr.msk.f32.vlgmr.msra.gmra.mrb[16].mxu1 %vm2009_vm11, %v2417_v10 }
 0x2ff   :  { %6820 = vmatpush1.bf16.msra.mxu0 %v6819_v23  ;;  %6892 = vmatpush1.bf16.msra.mxu1 %v6891_v40  ;;  %v2279_v23 = vld [vmem:[#allocation11 + $0x168] sm:$0xff]  ;;  %v2277_v40 = vld [vmem:[#allocation11 + $0x158] sm:$0xff] }
 0x300   :  { %2759 = vmatprep.mubr.f32.mxu0 %v8742_v60  ;;  %2937 = vmatprep.mubr.f32.mxu1 %v8742_v60  ;;  %v6837_v10 = vpack.c.bf16 %v2279_v23, %v2275_v28 }
 0x301   :  { %6822 = vmatprep.subr.bf16.mxu0 %v6821_v27  ;;  %6894 = vmatprep.subr.bf16.mxu1 %v6893_v57  ;;  %v6909_v27 = vpack.c.bf16 %v2281_v51, %v2277_v40  ;;  %v2276_v57 = vld [vmem:[#allocation11 + $0x150] sm:$0xff] }
 0x302   :  { %6307 = vmatmul.mubr.msk.f32.gmra.mrb[18].mxu0 %vm2009_vm11, %v2423_v47  ;;  %6311 = vmatmul.mubr.msk.f32.gmra.mrb[18].mxu1 %vm2009_vm11, %v2423_v47  ;;  %v2288_v47 = vld [vmem:[#allocation11 + $0x1b0] sm:$0xff] }
 0x303   :  { %6824 = vmatpush1.bf16.msra.mxu0 %v6823_v52  ;;  %6896 = vmatpush1.bf16.msra.mxu1 %v6895_v1  ;;  %v6839_v52 = vpack.c.bf16 %v2278_v46, %v2274_v22  ;;  %v6911_v1 = vpack.c.bf16 %v2280_v48, %v2276_v57  ;;  %v6915_v42 = vpack.c.bf16 %v2288_v47, %v2284_v32  ;;  %v2308_v40 = vld [vmem:[#allocation11 + $0x250] sm:$0xff]  ;;  %v2321_v22 = vld [vmem:[#allocation11 + $0x2b8] sm:$0xff]  ;;  %v2318_v57 = vld [vmem:[#allocation11 + $0x2a0] sm:$0xff] }
 0x304   :  { %2765 = vmatprep.mubr.f32.mxu0 %v8742_v60  ;;  %2943 = vmatprep.mubr.f32.mxu1 %v8742_v60  ;;  %v2312_v51 = vld [vmem:[#allocation11 + $0x270] sm:$0xff]  ;;  %v2326_v32 = vld [vmem:[#allocation11 + $0x2e0] sm:$0xff] }
 0x305   :  { %6826 = vmatprep.subr.bf16.mxu0 %v6825_v0  ;;  %6898 = vmatprep.subr.bf16.mxu1 %v6897_v61  ;;  %v2291_v0 = vld [vmem:[#allocation11 + $0x1c8] sm:$0xff] }
 0x306   :  { %6308 = vmatmul.mubr.msk.f32.gmra.mrb[20].mxu0 %vm2009_vm11, %v2432_v43  ;;  %6312 = vmatmul.mubr.msk.f32.gmra.mrb[20].mxu1 %vm2009_vm11, %v2432_v43  ;;  %v2295_v61 = vld [vmem:[#allocation11 + $0x1e8] sm:$0xff]  ;;  %v2305_v43 = vld [vmem:[#allocation11 + $0x238] sm:$0xff] }
 0x307   :  { %6828 = vmatpush1.bf16.msra.mxu0 %v6827_v26  ;;  %6900 = vmatpush1.bf16.msra.mxu1 %v6899_v30  ;;  %v6845_v2 = vpack.c.bf16 %v2295_v61, %v2291_v0  ;;  %v6917_v26 = vpack.c.bf16 %v2297_v44, %v2293_v50  ;;  %v2292_v30 = vld [vmem:[#allocation11 + $0x1d0] sm:$0xff]  ;;  %v6921_v3 = vpack.c.bf16 %v2305_v43, %v2301_v45  ;;  %v2331_v44 = vld [vmem:[#allocation11 + $0x308] sm:$0xff] }
 0x308   :  { %2771 = vmatprep.mubr.f32.mxu0 %v8742_v60  ;;  %2949 = vmatprep.mubr.f32.mxu1 %v8742_v60  ;;  %v6835_v60 = vpack.c.bf16 %v2270_v54, %v2266_v15  ;;  %v2311_v15 = vld [vmem:[#allocation11 + $0x268] sm:$0xff]  ;;  %v2309_v54 = vld [vmem:[#allocation11 + $0x258] sm:$0xff]  ;;  %v2324_v61 = vld [vmem:[#allocation11 + $0x2d0] sm:$0xff] }
 0x309   :  { %6830 = vmatprep.subr.bf16.mxu0 %v6829_v34  ;;  %6902 = vmatprep.subr.bf16.mxu1 %v6901_v59  ;;  %v6847_v34 = vpack.c.bf16 %v2294_v17, %v2290_v56  ;;  %v6919_v59 = vpack.c.bf16 %v2296_v31, %v2292_v30  ;;  %v6925_v23 = vpack.c.bf16 %v2313_v39, %v2309_v54  ;;  %v2328_v50 = vld [vmem:[#allocation11 + $0x2f0] sm:$0xff]  ;;  %v2337_v56 = vld [vmem:[#allocation11 + $0x338] sm:$0xff]  ;;  %v2334_v30 = vld [vmem:[#allocation11 + $0x320] sm:$0xff] }
 0x30a   :  { %6309 = vmatmul.mubr.msk.f32.gmra.mrb[22].mxu0 %vm2009_vm11, %v2438_v63  ;;  %6313 = vmatmul.mubr.msk.f32.gmra.mrb[22].mxu1 %vm2009_vm11, %v2438_v63  ;;  %v2306_v63 = vld [vmem:[#allocation11 + $0x240] sm:$0xff]  ;;  %v2336_v45 = vld [vmem:[#allocation11 + $0x330] sm:$0xff]  ;;  %v2339_v43 = vld [vmem:[#allocation11 + $0x348] sm:$0xff] }
 0x30b   :  { %6832 = vmatpush1.bf16.msra.mxu0 %v6831_v49  ;;  %6904 = vmatpush1.bf16.msra.mxu1 %v6903_v24  ;;  %v2304_v49 = vld [vmem:[#allocation11 + $0x230] sm:$0xff]  ;;  %v2307_v24 = vld [vmem:[#allocation11 + $0x248] sm:$0xff] }
 0x30c   :  { %3030 = vmatprep.mubr.f32.mxu0 %v2223_v55  ;;  %3208 = vmatprep.mubr.f32.mxu1 %v2223_v55  ;;  %v6923_v28 = vpack.c.bf16 %v2304_v49, %v2300_v5  ;;  %v2315_v55 = vld [vmem:[#allocation11 + $0x288] sm:$0xff]  ;;  %v2342_v5 = vld [vmem:[#allocation11 + $0x360] sm:$0xff]  ;;  %v2344_v54 = vld [vmem:[#allocation11 + $0x370] sm:$0xff] }
 0x30d   :  { %6834 = vmatprep.subr.bf16.mxu0 %v6833_v21  ;;  %6906 = vmatprep.subr.bf16.mxu1 %v6905_v33  ;;  %v2310_v21 = vld [vmem:[#allocation11 + $0x260] sm:$0xff]  ;;  %v6853_v33 = vpack.c.bf16 %v2311_v15, %v2307_v24  ;;  %v2340_v15 = vld [vmem:[#allocation11 + $0x350] sm:$0xff]  ;;  %v2347_v39 = vld [vmem:[#allocation11 + $0x388] sm:$0xff] }
 0x30e   :  { %v6855_v46 = vpack.c.bf16 %v2310_v21, %v2306_v63  ;;  %v2353_v63 = vld [vmem:[#allocation11 + $0x3b8] sm:$0xff] }
 0x30f   :  { %6836 = vmatpush1.bf16.msra.mxu0 %v6835_v60  ;;  %6908 = vmatpush1.bf16.msra.mxu1 %v6907_v19  ;;  %v2319_v60 = vld [vmem:[#allocation11 + $0x2a8] sm:$0xff]  ;;  %v2317_v19 = vld [vmem:[#allocation11 + $0x298] sm:$0xff] }
 0x310   :  { %6838 = vmatprep.subr.bf16.mxu0 %v6837_v10  ;;  %6910 = vmatprep.subr.bf16.mxu1 %v6909_v27  ;;  %v6927_v10 = vpack.c.bf16 %v2312_v51, %v2308_v40  ;;  %v2314_v27 = vld [vmem:[#allocation11 + $0x280] sm:$0xff]  ;;  %v6857_v48 = vpack.c.bf16 %v2319_v60, %v2315_v55  ;;  %v6929_v9 = vpack.c.bf16 %v2321_v22, %v2317_v19  ;;  %v2348_v60 = vld [vmem:[#allocation11 + $0x390] sm:$0xff]  ;;  %v2355_v22 = vld [vmem:[#allocation11 + $0x3c8] sm:$0xff] }
 0x311   :  { %v6859_v7 = vpack.c.bf16 %v2318_v57, %v2314_v27  ;;  %v2350_v40 = vld [vmem:[#allocation11 + $0x3a0] sm:$0xff]  ;;  %v2352_v19 = vld [vmem:[#allocation11 + $0x3b0] sm:$0xff]  ;;  %v2361_v27 = vld [vmem:[#allocation11 + $0x3f8] sm:$0xff] }
 0x313   :  { %6840 = vmatpush1.bf16.msra.mxu0 %v6839_v52  ;;  %6912 = vmatpush1.bf16.msra.mxu1 %v6911_v1  ;;  %v2327_v52 = vld [vmem:[#allocation11 + $0x2e8] sm:$0xff]  ;;  %v2325_v1 = vld [vmem:[#allocation11 + $0x2d8] sm:$0xff] }
 0x314   :  { %6842 = vmatprep.subr.bf16.mxu0 %v6841_v35  ;;  %6914 = vmatprep.subr.bf16.mxu1 %v6913_v58  ;;  %v6931_v35 = vpack.c.bf16 %v2320_v4, %v2316_v11  ;;  %v2322_v58 = vld [vmem:[#allocation11 + $0x2c0] sm:$0xff]  ;;  %v6861_v47 = vpack.c.bf16 %v2327_v52, %v2323_v53  ;;  %v6933_v0 = vpack.c.bf16 %v2329_v37, %v2325_v1  ;;  %v2356_v52 = vld [vmem:[#allocation11 + $0x3d0] sm:$0xff]  ;;  %v2363_v37 = vld [vmem:[#allocation11 + $0x408] sm:$0xff] }
 0x315   :  { %v6863_v17 = vpack.c.bf16 %v2326_v32, %v2322_v58  ;;  %v2358_v11 = vld [vmem:[#allocation11 + $0x3e0] sm:$0xff]  ;;  %v2360_v1 = vld [vmem:[#allocation11 + $0x3f0] sm:$0xff]  ;;  %v2369_v58 = vld [vmem:[#allocation11 + $0x438] sm:$0xff] }
 0x317   :  { %6844 = vmatpush1.bf16.msra.mxu0 %v6843_v8  ;;  %6916 = vmatpush1.bf16.msra.mxu1 %v6915_v42  ;;  %v2335_v8 = vld [vmem:[#allocation11 + $0x328] sm:$0xff]  ;;  %v2333_v42 = vld [vmem:[#allocation11 + $0x318] sm:$0xff] }
 0x318   :  { %6846 = vmatprep.subr.bf16.mxu0 %v6845_v2  ;;  %6918 = vmatprep.subr.bf16.mxu1 %v6917_v26  ;;  %v6935_v2 = vpack.c.bf16 %v2328_v50, %v2324_v61  ;;  %v2330_v26 = vld [vmem:[#allocation11 + $0x300] sm:$0xff]  ;;  %v6865_v31 = vpack.c.bf16 %v2335_v8, %v2331_v44  ;;  %v6937_v29 = vpack.c.bf16 %v2337_v56, %v2333_v42  ;;  %v2364_v8 = vld [vmem:[#allocation11 + $0x410] sm:$0xff]  ;;  %v2371_v56 = vld [vmem:[#allocation11 + $0x448] sm:$0xff] }
 0x319   :  { %v6867_v41 = vpack.c.bf16 %v2334_v30, %v2330_v26  ;;  %v2362_v50 = vld [vmem:[#allocation11 + $0x400] sm:$0xff]  ;;  %v2368_v42 = vld [vmem:[#allocation11 + $0x430] sm:$0xff]  ;;  %v2377_v26 = vld [vmem:[#allocation11 + $0x478] sm:$0xff] }
 0x31a   :  { %v2366_v44 = vld [vmem:[#allocation11 + $0x420] sm:$0xff] }
 0x31b   :  { %6848 = vmatpush1.bf16.msra.mxu0 %v6847_v34  ;;  %6920 = vmatpush1.bf16.msra.mxu1 %v6919_v59  ;;  %v2343_v34 = vld [vmem:[#allocation11 + $0x368] sm:$0xff]  ;;  %v2341_v59 = vld [vmem:[#allocation11 + $0x358] sm:$0xff]  ;;  %v6883_v30 = vpack.c.bf16 %v2366_v44, %v2362_v50 }
 0x31c   :  { %6850 = vmatprep.subr.bf16.mxu0 %v6849_v62  ;;  %6922 = vmatprep.subr.bf16.mxu1 %v6921_v3  ;;  %v6939_v62 = vpack.c.bf16 %v2336_v45, %v2332_v20  ;;  %v2338_v3 = vld [vmem:[#allocation11 + $0x340] sm:$0xff]  ;;  %v6869_v49 = vpack.c.bf16 %v2343_v34, %v2339_v43  ;;  %v6941_v24 = vpack.c.bf16 %v2345_v18, %v2341_v59  ;;  %v2372_v59 = vld [vmem:[#allocation11 + $0x450] sm:$0xff]  ;;  %v3417_v50 = vld [vmem:[#allocation11 + $0x9f8] sm:$0xff] }
 0x31d   :  { %v6871_v21 = vpack.c.bf16 %v2342_v5, %v2338_v3  ;;  %v2370_v20 = vld [vmem:[#allocation11 + $0x440] sm:$0xff]  ;;  %v2376_v18 = vld [vmem:[#allocation11 + $0x470] sm:$0xff]  ;;  %v3389_v3 = vld [vmem:[#allocation11 + $0x918] sm:$0xff] }
 0x31e   :  { %v2374_v45 = vld [vmem:[#allocation11 + $0x460] sm:$0xff]  ;;  %v3393_v5 = vld [vmem:[#allocation11 + $0x938] sm:$0xff] }
 0x31f   :  { %6852 = vmatpush1.bf16.msra.mxu0 %v6851_v38  ;;  %6924 = vmatpush1.bf16.msra.mxu1 %v6923_v28  ;;  %v2351_v38 = vld [vmem:[#allocation11 + $0x3a8] sm:$0xff]  ;;  %v2349_v28 = vld [vmem:[#allocation11 + $0x398] sm:$0xff] }
 0x320   :  { %6854 = vmatprep.subr.bf16.mxu0 %v6853_v33  ;;  %6926 = vmatprep.subr.bf16.mxu1 %v6925_v23  ;;  %v6943_v33 = vpack.c.bf16 %v2344_v54, %v2340_v15  ;;  %v2346_v23 = vld [vmem:[#allocation11 + $0x380] sm:$0xff]  ;;  %v6873_v51 = vpack.c.bf16 %v2351_v38, %v2347_v39  ;;  %v6945_v55 = vpack.c.bf16 %v2353_v63, %v2349_v28  ;;  %v2229_v39 = vld [vmem:[#allocation3 + $0x50] sm:$0xff]  ;;  %v2228_v38 = vld [vmem:[#allocation3 + $0x48] sm:$0xff] }
 0x321   :  { %v6875_v57 = vpack.c.bf16 %v2350_v40, %v2346_v23  ;;  %v7033_v54 = vpack.c.bf16 %v3393_v5, %v3389_v3  ;;  %v3386_v28 = vld [vmem:[#allocation11 + $0x900] sm:$0xff]  ;;  %v3395_v23 = vld [vmem:[#allocation11 + $0x948] sm:$0xff]  ;;  %v3397_v40 = vld [vmem:[#allocation11 + $0x958] sm:$0xff] }
 0x322   :  { %v3390_v63 = vld [vmem:[#allocation11 + $0x920] sm:$0xff]  ;;  %v3420_v3 = vld [vmem:[#allocation11 + $0xa10] sm:$0xff] }
 0x323   :  { %6856 = vmatpush1.bf16.msra.mxu0 %v6855_v46  ;;  %6928 = vmatpush1.bf16.msra.mxu1 %v6927_v10  ;;  %v2359_v46 = vld [vmem:[#allocation11 + $0x3e8] sm:$0xff]  ;;  %v2357_v10 = vld [vmem:[#allocation11 + $0x3d8] sm:$0xff]  ;;  %v3424_v5 = vld [vmem:[#allocation11 + $0xa30] sm:$0xff] }
 0x324   :  { %6858 = vmatprep.subr.bf16.mxu0 %v6857_v48  ;;  %6930 = vmatprep.subr.bf16.mxu1 %v6929_v9  ;;  %v6947_v48 = vpack.c.bf16 %v2352_v19, %v2348_v60  ;;  %v2354_v9 = vld [vmem:[#allocation11 + $0x3c0] sm:$0xff]  ;;  %v6877_v4 = vpack.c.bf16 %v2359_v46, %v2355_v22  ;;  %v6949_v53 = vpack.c.bf16 %v2361_v27, %v2357_v10  ;;  %v3396_v46 = vld [vmem:[#allocation11 + $0x950] sm:$0xff]  ;;  %v2224_v27 = vld [vmem:[#allocation3 + $0x10] sm:$0xff] }
 0x325   :  { %v6879_v32 = vpack.c.bf16 %v2358_v11, %v2354_v9  ;;  %v6963_v60 = vpack.c.bf16 %v3390_v63, %v3386_v28  ;;  %v3394_v19 = vld [vmem:[#allocation11 + $0x940] sm:$0xff]  ;;  %v3400_v10 = vld [vmem:[#allocation11 + $0x970] sm:$0xff]  ;;  %v3403_v9 = vld [vmem:[#allocation11 + $0x988] sm:$0xff] }
 0x326   :  { %v3398_v22 = vld [vmem:[#allocation11 + $0x960] sm:$0xff]  ;;  %v3405_v11 = vld [vmem:[#allocation11 + $0x998] sm:$0xff] }
 0x327   :  { %6860 = vmatpush1.bf16.msra.mxu0 %v6859_v7  ;;  %6932 = vmatpush1.bf16.msra.mxu1 %v6931_v35  ;;  %v2367_v7 = vld [vmem:[#allocation11 + $0x428] sm:$0xff]  ;;  %v2365_v35 = vld [vmem:[#allocation11 + $0x418] sm:$0xff] }
 0x328   :  { %6862 = vmatprep.subr.bf16.mxu0 %v6861_v47  ;;  %6934 = vmatprep.subr.bf16.mxu1 %v6933_v0  ;;  %v6951_v47 = vpack.c.bf16 %v2360_v1, %v2356_v52  ;;  %v6881_v0 = vpack.c.bf16 %v2367_v7, %v2363_v37  ;;  %v6953_v61 = vpack.c.bf16 %v2369_v58, %v2365_v35  ;;  %v3402_v1 = vld [vmem:[#allocation11 + $0x980] sm:$0xff]  ;;  %v3404_v7 = vld [vmem:[#allocation11 + $0x990] sm:$0xff]  ;;  %v3433_v28 = vld [vmem:[#allocation11 + $0xa78] sm:$0xff] }
 0x329   :  { %v7039_v52 = vpack.c.bf16 %v3400_v10, %v3396_v46  ;;  %v3406_v37 = vld [vmem:[#allocation11 + $0x9a0] sm:$0xff]  ;;  %v3408_v35 = vld [vmem:[#allocation11 + $0x9b0] sm:$0xff]  ;;  %v3441_v46 = vld [vmem:[#allocation11 + $0xab8] sm:$0xff] }
 0x32a   :  { %v6971_v44 = vpack.c.bf16 %v3406_v37, %v3402_v1  ;;  %v3445_v1 = vld [vmem:[#allocation11 + $0xad8] sm:$0xff] }
 0x32b   :  { %6864 = vmatpush1.bf16.msra.mxu0 %v6863_v17  ;;  %6936 = vmatpush1.bf16.msra.mxu1 %v6935_v2  ;;  %v2375_v17 = vld [vmem:[#allocation11 + $0x468] sm:$0xff]  ;;  %v2373_v2 = vld [vmem:[#allocation11 + $0x458] sm:$0xff] }
 0x32c   :  { %6866 = vmatprep.subr.bf16.mxu0 %v6865_v31  ;;  %6938 = vmatprep.subr.bf16.mxu1 %v6937_v29  ;;  %v2222_v31 = vld [vmem:[#allocation3] sm:$0xff]  ;;  %v6955_v29 = vpack.c.bf16 %v2368_v42, %v2364_v8  ;;  %v6885_v43 = vpack.c.bf16 %v2375_v17, %v2371_v56  ;;  %v6957_v34 = vpack.c.bf16 %v2377_v26, %v2373_v2  ;;  %v3410_v42 = vld [vmem:[#allocation11 + $0x9c0] sm:$0xff]  ;;  %v3412_v17 = vld [vmem:[#allocation11 + $0x9d0] sm:$0xff] }
 0x32d   :  { %v7043_v8 = vpack.c.bf16 %v3408_v35, %v3404_v7  ;;  %v3414_v56 = vld [vmem:[#allocation11 + $0x9e0] sm:$0xff]  ;;  %v3416_v2 = vld [vmem:[#allocation11 + $0x9f0] sm:$0xff]  ;;  %v3449_v37 = vld [vmem:[#allocation11 + $0xaf8] sm:$0xff] }
 0x32e   :  { %v2230_v26 = vld [vmem:[#allocation3 + $0x58] sm:$0xff] }
 0x32f   :  { %6868 = vmatpush1.bf16.msra.mxu0 %v6867_v41  ;;  %6940 = vmatpush1.bf16.msra.mxu1 %v6939_v62  ;;  %v3387_v41 = vld [vmem:[#allocation11 + $0x908] sm:$0xff] }
 0x330   :  { %6870 = vmatprep.subr.bf16.mxu0 %v6869_v49  ;;  %6942 = vmatprep.subr.bf16.mxu1 %v6941_v24  ;;  %v3391_v62 = vld [vmem:[#allocation11 + $0x928] sm:$0xff]  ;;  %v6887_v49 = vpack.c.bf16 %v2374_v45, %v2370_v20  ;;  %v6959_v24 = vpack.c.bf16 %v2376_v18, %v2372_v59  ;;  %v3421_v45 = vld [vmem:[#allocation11 + $0xa18] sm:$0xff]  ;;  %v7047_v59 = vpack.c.bf16 %v3416_v2, %v3412_v17  ;;  %v3351_v18 = vrot.slane %v8767_v16, 2 }
 0x331   :  { %v6961_v15 = vpack.c.bf16 %v3391_v62, %v3387_v41  ;;  %v3423_v20 = vld [vmem:[#allocation11 + $0xa28] sm:$0xff]  ;;  %v3418_v41 = vld [vmem:[#allocation11 + $0xa00] sm:$0xff] }
 0x332   :  { %v3422_v62 = vld [vmem:[#allocation11 + $0xa20] sm:$0xff] }
 0x333   :  { %6872 = vmatpush1.bf16.msra.mxu0 %v6871_v21  ;;  %6944 = vmatpush1.bf16.msra.mxu1 %v6943_v33  ;;  %v3388_v21 = vld [vmem:[#allocation11 + $0x910] sm:$0xff] }
 0x334   :  { %6874 = vmatprep.subr.bf16.mxu0 %v6873_v51  ;;  %6946 = vmatprep.subr.bf16.mxu1 %v6945_v55  ;;  %v3392_v33 = vld [vmem:[#allocation11 + $0x930] sm:$0xff]  ;;  %v3401_v51 = vld [vmem:[#allocation11 + $0x978] sm:$0xff] }
 0x335   :  { %v8829_v55 = vld [vmem:[#allocation4] sm:$0xff] }
 0x337   :  { %6876 = vmatpush1.bf16.msra.mxu0 %v6875_v57  ;;  %6948 = vmatpush1.bf16.msra.mxu1 %v6947_v48  ;;  %v7037_v48 = vpack.c.bf16 %v3401_v51, %v3397_v40 }
 0x338   :  { %6878 = vmatprep.subr.bf16.mxu0 %v6877_v4  ;;  %6950 = vmatprep.subr.bf16.mxu1 %v6949_v53  ;;  %v3409_v4 = vld [vmem:[#allocation11 + $0x9b8] sm:$0xff]  ;;  %v6967_v53 = vpack.c.bf16 %v3398_v22, %v3394_v19  ;;  %v3435_v19 = vld [vmem:[#allocation11 + $0xa88] sm:$0xff] }
 0x339   :  { %v3437_v22 = vld [vmem:[#allocation11 + $0xa98] sm:$0xff] }
 0x33b   :  { %6880 = vmatpush1.bf16.msra.mxu0 %v6879_v32  ;;  %6952 = vmatpush1.bf16.msra.mxu1 %v6951_v47  ;;  %v7041_v32 = vpack.c.bf16 %v3409_v4, %v3405_v11  ;;  %v3411_v47 = vld [vmem:[#allocation11 + $0x9c8] sm:$0xff]  ;;  %v3436_v11 = vld [vmem:[#allocation11 + $0xa90] sm:$0xff] }
 0x33c   :  { %6882 = vmatprep.subr.bf16.mxu0 %v6881_v0  ;;  %6954 = vmatprep.subr.bf16.mxu1 %v6953_v61  ;;  %v3415_v0 = vld [vmem:[#allocation11 + $0x9e8] sm:$0xff]  ;;  %v3413_v61 = vld [vmem:[#allocation11 + $0x9d8] sm:$0xff]  ;;  %v3440_v4 = vld [vmem:[#allocation11 + $0xab0] sm:$0xff] }
 0x33d   :  { %v7059_v35 = vpack.c.bf16 %v3440_v4, %v3436_v11  ;;  %v3476_v11 = vld [vmem:[#allocation11 + $0xbd0] sm:$0xff] }
 0x33e   :  { %3031 = vmatmul.mubr.f32.vlgmr.msra.gmra.mrb[16].mxu0 %v2222_v31  ;;  %3209 = vmatmul.mubr.f32.vlgmr.msra.gmra.mrb[16].mxu1 %v2222_v31  ;;  %v3323_v31 = vld [vmem:[#allocation3 + $0x8] sm:$0xfc] }
 0x33f   :  { %3036 = vmatprep.mubr.f32.mxu0 %v8767_v16  ;;  %6884 = vmatpush1.bf16.msra.mxu0 %v6883_v30  ;;  %v6973_v30 = vpack.c.bf16 %v3415_v0, %v3411_v47  ;;  %v7061_v0 = vpack.c.bf16 %v3449_v37, %v3445_v1  ;;  %v3480_v4 = vld [vmem:[#allocation11 + $0xbf0] sm:$0xff]  ;;  %v3485_v1 = vld [vmem:[#allocation11 + $0xc18] sm:$0xff] }
 0x340   :  { %3214 = vmatprep.mubr.f32.mxu1 %v8767_v16  ;;  %6956 = vmatpush1.bf16.msra.mxu1 %v6955_v29  ;;  %v3419_v29 = vld [vmem:[#allocation11 + $0xa08] sm:$0xff]  ;;  %v3489_v37 = vld [vmem:[#allocation11 + $0xc38] sm:$0xff] }
 0x341   :  { %6886 = vmatprep.subr.bf16.mxu0 %v6885_v43  ;;  %6958 = vmatprep.subr.bf16.mxu1 %v6957_v34  ;;  %v3425_v43 = vld [vmem:[#allocation11 + $0xa38] sm:$0xff]  ;;  %v6975_v34 = vpack.c.bf16 %v3414_v56, %v3410_v42 }
 0x342   :  { %3037 = vmatmul.mubr.f32.gmra.mrb[18].mxu0 %v8763_v12  ;;  %3215 = vmatmul.mubr.f32.gmra.mrb[18].mxu1 %v8763_v12  ;;  %v3399_v12 = vld [vmem:[#allocation11 + $0x968] sm:$0xff]  ;;  %v3453_v42 = vld [vmem:[#allocation11 + $0xb18] sm:$0xff] }
 0x343   :  { %3042 = vmatprep.mubr.f32.mxu0 %v2229_v39  ;;  %3220 = vmatprep.mubr.f32.mxu1 %v2229_v39  ;;  %v6965_v57 = vpack.c.bf16 %v3399_v12, %v3395_v23  ;;  %v3431_v39 = vld [vmem:[#allocation11 + $0xa68] sm:$0xff]  ;;  %v3426_v23 = vld [vmem:[#allocation11 + $0xa40] sm:$0xff]  ;;  %v3457_v56 = vld [vmem:[#allocation11 + $0xb38] sm:$0xff] }
 0x344   :  { %6888 = vmatpush1.bf16.msra.mxu0 %v6887_v49  ;;  %6960 = vmatpush1.bf16.msra.mxu1 %v6959_v24  ;;  %v3427_v49 = vld [vmem:[#allocation11 + $0xa48] sm:$0xff]  ;;  %v3350_v24 = vrot.slane %v3323_v31, 2  ;;  %v3430_v12 = vld [vmem:[#allocation11 + $0xa60] sm:$0xff]  ;;  %v7065_v31 = vpack.c.bf16 %v3457_v56, %v3453_v42  ;;  %v3493_v42 = vld [vmem:[#allocation11 + $0xc58] sm:$0xff] }
 0x345   :  { %6962 = vmatprep.subr.bf16.mxu0 %v6961_v15  ;;  %7034 = vmatprep.subr.bf16.mxu1 %v7033_v54  ;;  %v6977_v15 = vpack.c.bf16 %v3423_v20, %v3419_v29  ;;  %v7049_v54 = vpack.c.bf16 %v3425_v43, %v3421_v45  ;;  %v6981_v40 = vpack.c.bf16 %v3431_v39, %v3427_v49  ;;  %v3452_v29 = vld [vmem:[#allocation11 + $0xb10] sm:$0xff]  ;;  %v3459_v45 = vld [vmem:[#allocation11 + $0xb48] sm:$0xff]  ;;  %v3497_v56 = vld [vmem:[#allocation11 + $0xc78] sm:$0xff] }
 0x346   :  { %3043 = vmatmul.mubr.f32.gmra.mrb[20].mxu0 %v2228_v38  ;;  %3221 = vmatmul.mubr.f32.gmra.mrb[20].mxu1 %v2228_v38  ;;  %v3429_v38 = vld [vmem:[#allocation11 + $0xa58] sm:$0xff]  ;;  %v3352_v63 = vsel %vm3346_vm13, %v3350_v24, %v3351_v18  ;;  %v6983_v10 = vpack.c.bf16 %v3430_v12, %v3426_v23  ;;  %v3456_v20 = vld [vmem:[#allocation11 + $0xb30] sm:$0xff]  ;;  %v3463_v43 = vld [vmem:[#allocation11 + $0xb68] sm:$0xff] }
 0x347   :  { %3048 = vmatprep.mubr.f32.mxu0 %v8783_v6  ;;  %3226 = vmatprep.mubr.f32.mxu1 %v8783_v6  ;;  %v7035_v6 = vpack.c.bf16 %v3392_v33, %v3388_v21  ;;  %v6979_v21 = vpack.c.bf16 %v3422_v62, %v3418_v41  ;;  %v7051_v33 = vpack.c.bf16 %v3424_v5, %v3420_v3  ;;  %v3458_v3 = vld [vmem:[#allocation11 + $0xb40] sm:$0xff]  ;;  %v3467_v39 = vld [vmem:[#allocation11 + $0xb88] sm:$0xff] }
 0x348   :  { %v7053_v51 = vpack.c.bf16 %v3433_v28, %v3429_v38  ;;  %v7067_v62 = vpack.c.bf16 %v3456_v20, %v3452_v29  ;;  %v3462_v5 = vld [vmem:[#allocation11 + $0xb60] sm:$0xff]  ;;  %v6997_v49 = vpack.c.bf16 %v3463_v43, %v3459_v45  ;;  %v3471_v38 = vld [vmem:[#allocation11 + $0xba8] sm:$0xff]  ;;  %v3469_v28 = vld [vmem:[#allocation11 + $0xb98] sm:$0xff] }
 0x349   :  { %v3466_v23 = vld [vmem:[#allocation11 + $0xb80] sm:$0xff]  ;;  %v3492_v29 = vld [vmem:[#allocation11 + $0xc50] sm:$0xff]  ;;  %v3499_v45 = vld [vmem:[#allocation11 + $0xc88] sm:$0xff] }
 0x34a   :  { %3049 = vmatmul.mubr.f32.gmra.mrb[22].mxu0 %v8779_v25  ;;  %3227 = vmatmul.mubr.f32.gmra.mrb[22].mxu1 %v8779_v25  ;;  %v3407_v25 = vld [vmem:[#allocation11 + $0x9a8] sm:$0xff]  ;;  %v3470_v12 = vld [vmem:[#allocation11 + $0xba0] sm:$0xff]  ;;  %v3496_v20 = vld [vmem:[#allocation11 + $0xc70] sm:$0xff] }
 0x34b   :  { %3119 = vmatprep.mubr.f32.mxu0 %v8829_v55  ;;  %3297 = vmatprep.mubr.f32.mxu1 %v8829_v55  ;;  %v6969_v58 = vpack.c.bf16 %v3407_v25, %v3403_v9  ;;  %v7057_v25 = vpack.c.bf16 %v3441_v46, %v3437_v22  ;;  %v3477_v22 = vld [vmem:[#allocation11 + $0xbd8] sm:$0xff]  ;;  %v3503_v43 = vld [vmem:[#allocation11 + $0xca8] sm:$0xff] }
 0x34c   :  { %v3481_v46 = vld [vmem:[#allocation11 + $0xbf8] sm:$0xff] }
 0x34e   :  { %6314 = vmatmul.mubr.msk.f32.vlgmr.msra.gmra.mrb[16].mxu0 %vm2009_vm11, %v2224_v27  ;;  %6318 = vmatmul.mubr.msk.f32.vlgmr.msra.gmra.mrb[16].mxu1 %vm2009_vm11, %v2224_v27 }
 0x34f   :  { %6964 = vmatpush1.bf16.msra.mxu0 %v6963_v60  ;;  %7036 = vmatpush1.bf16.msra.mxu1 %v7035_v6  ;;  %v3428_v60 = vld [vmem:[#allocation11 + $0xa50] sm:$0xff] }
 0x350   :  { %3125 = vmatprep.mubr.f32.mxu0 %v8829_v55  ;;  %3303 = vmatprep.mubr.f32.mxu1 %v8829_v55  ;;  %v3432_v6 = vld [vmem:[#allocation11 + $0xa70] sm:$0xff] }
 0x351   :  { %6966 = vmatprep.subr.bf16.mxu0 %v6965_v57  ;;  %7038 = vmatprep.subr.bf16.mxu1 %v7037_v48  ;;  %v7055_v27 = vpack.c.bf16 %v3432_v6, %v3428_v60  ;;  %v3434_v57 = vld [vmem:[#allocation11 + $0xa80] sm:$0xff]  ;;  %v3468_v60 = vld [vmem:[#allocation11 + $0xb90] sm:$0xff] }
 0x352   :  { %6315 = vmatmul.mubr.msk.f32.gmra.mrb[18].mxu0 %vm2009_vm11, %v8793_v14  ;;  %6319 = vmatmul.mubr.msk.f32.gmra.mrb[18].mxu1 %vm2009_vm11, %v8793_v14  ;;  %v7045_v14 = vpack.c.bf16 %v3417_v50, %v3413_v61  ;;  %v3438_v48 = vld [vmem:[#allocation11 + $0xaa0] sm:$0xff]  ;;  %v3444_v61 = vld [vmem:[#allocation11 + $0xad0] sm:$0xff] }
 0x353   :  { %6968 = vmatpush1.bf16.msra.mxu0 %v6967_v53  ;;  %7040 = vmatpush1.bf16.msra.mxu1 %v7039_v52  ;;  %v3443_v53 = vld [vmem:[#allocation11 + $0xac8] sm:$0xff]  ;;  %v6987_v7 = vpack.c.bf16 %v3438_v48, %v3434_v57  ;;  %v3448_v50 = vld [vmem:[#allocation11 + $0xaf0] sm:$0xff]  ;;  %v3474_v57 = vld [vmem:[#allocation11 + $0xbc0] sm:$0xff] }
 0x354   :  { %3131 = vmatprep.mubr.f32.mxu0 %v8829_v55  ;;  %3309 = vmatprep.mubr.f32.mxu1 %v8829_v55  ;;  %v3447_v52 = vld [vmem:[#allocation11 + $0xae8] sm:$0xff]  ;;  %v7063_v2 = vpack.c.bf16 %v3448_v50, %v3444_v61  ;;  %v3472_v6 = vld [vmem:[#allocation11 + $0xbb0] sm:$0xff]  ;;  %v3478_v48 = vld [vmem:[#allocation11 + $0xbe0] sm:$0xff] }
 0x355   :  { %6970 = vmatprep.subr.bf16.mxu0 %v6969_v58  ;;  %7042 = vmatprep.subr.bf16.mxu1 %v7041_v32  ;;  %v3442_v58 = vld [vmem:[#allocation11 + $0xac0] sm:$0xff]  ;;  %v6989_v47 = vpack.c.bf16 %v3447_v52, %v3443_v53  ;;  %v3483_v53 = vld [vmem:[#allocation11 + $0xc08] sm:$0xff]  ;;  %v3484_v61 = vld [vmem:[#allocation11 + $0xc10] sm:$0xff] }
 0x356   :  { %6316 = vmatmul.mubr.msk.f32.gmra.mrb[20].mxu0 %vm2009_vm11, %v2230_v26  ;;  %6320 = vmatmul.mubr.msk.f32.gmra.mrb[20].mxu1 %vm2009_vm11, %v2230_v26  ;;  %v3446_v32 = vld [vmem:[#allocation11 + $0xae0] sm:$0xff]  ;;  %v3487_v52 = vld [vmem:[#allocation11 + $0xc28] sm:$0xff]  ;;  %v3488_v50 = vld [vmem:[#allocation11 + $0xc30] sm:$0xff] }
 0x357   :  { %6972 = vmatpush1.bf16.msra.mxu0 %v6971_v44  ;;  %7044 = vmatpush1.bf16.msra.mxu1 %v7043_v8  ;;  %v3451_v44 = vld [vmem:[#allocation11 + $0xb08] sm:$0xff]  ;;  %v6991_v17 = vpack.c.bf16 %v3446_v32, %v3442_v58  ;;  %v3450_v26 = vld [vmem:[#allocation11 + $0xb00] sm:$0xff] }
 0x358   :  { %3137 = vmatprep.mubr.f32.mxu0 %v8829_v55  ;;  %3315 = vmatprep.mubr.f32.mxu1 %v8829_v55  ;;  %v3455_v8 = vld [vmem:[#allocation11 + $0xb28] sm:$0xff]  ;;  %v3482_v58 = vld [vmem:[#allocation11 + $0xc00] sm:$0xff] }
 0x359   :  { %6974 = vmatprep.subr.bf16.mxu0 %v6973_v30  ;;  %7046 = vmatprep.subr.bf16.mxu1 %v7045_v14  ;;  %v3454_v30 = vld [vmem:[#allocation11 + $0xb20] sm:$0xff]  ;;  %v6993_v14 = vpack.c.bf16 %v3455_v8, %v3451_v44  ;;  %v3491_v44 = vld [vmem:[#allocation11 + $0xc48] sm:$0xff] }
 0x35a   :  { %6317 = vmatmul.mubr.msk.f32.gmra.mrb[22].mxu0 %vm2009_vm11, %v8803_v36  ;;  %6321 = vmatmul.mubr.msk.f32.gmra.mrb[22].mxu1 %vm2009_vm11, %v8803_v36  ;;  %v3439_v36 = vld [vmem:[#allocation11 + $0xaa8] sm:$0xff]  ;;  %v6995_v41 = vpack.c.bf16 %v3454_v30, %v3450_v26  ;;  %v3486_v32 = vld [vmem:[#allocation11 + $0xc20] sm:$0xff] }
 0x35b   :  { %6976 = vmatpush1.bf16.msra.mxu0 %v6975_v34  ;;  %7048 = vmatpush1.bf16.msra.mxu1 %v7047_v59  ;;  %v6985_v9 = vpack.c.bf16 %v3439_v36, %v3435_v19  ;;  %v3461_v34 = vld [vmem:[#allocation11 + $0xb58] sm:$0xff]  ;;  %v3475_v19 = vld [vmem:[#allocation11 + $0xbc8] sm:$0xff]  ;;  %v3490_v26 = vld [vmem:[#allocation11 + $0xc40] sm:$0xff] }
 0x35c   :  { %3602 = vmatprep.mubr.f32.mxu0 %v3352_v63  ;;  %3780 = vmatprep.mubr.f32.mxu1 %v3352_v63  ;;  %v3465_v59 = vld [vmem:[#allocation11 + $0xb78] sm:$0xff]  ;;  %v3479_v36 = vld [vmem:[#allocation11 + $0xbe8] sm:$0xff]  ;;  %v3494_v30 = vld [vmem:[#allocation11 + $0xc60] sm:$0xff] }
 0x35d   :  { %6978 = vmatprep.subr.bf16.mxu0 %v6977_v15  ;;  %7050 = vmatprep.subr.bf16.mxu1 %v7049_v54  ;;  %v7069_v24 = vpack.c.bf16 %v3465_v59, %v3461_v34  ;;  %v3460_v15 = vld [vmem:[#allocation11 + $0xb50] sm:$0xff]  ;;  %v3473_v63 = vld [vmem:[#allocation11 + $0xbb8] sm:$0xff]  ;;  %v3495_v8 = vld [vmem:[#allocation11 + $0xc68] sm:$0xff] }
 0x35e   :  { %v3464_v54 = vld [vmem:[#allocation11 + $0xb70] sm:$0xff]  ;;  %v3501_v34 = vld [vmem:[#allocation11 + $0xc98] sm:$0xff] }
 0x35f   :  { %6980 = vmatpush1.bf16.msra.mxu0 %v6979_v21  ;;  %7052 = vmatpush1.bf16.msra.mxu1 %v7051_v33  ;;  %v6999_v21 = vpack.c.bf16 %v3462_v5, %v3458_v3  ;;  %v7071_v33 = vpack.c.bf16 %v3464_v54, %v3460_v15  ;;  %v3505_v59 = vld [vmem:[#allocation11 + $0xcb8] sm:$0xff]  ;;  %v3498_v3 = vld [vmem:[#allocation11 + $0xc80] sm:$0xff]  ;;  %v3500_v15 = vld [vmem:[#allocation11 + $0xc90] sm:$0xff] }
 0x360   :  { %6982 = vmatprep.subr.bf16.mxu0 %v6981_v40  ;;  %7054 = vmatprep.subr.bf16.mxu1 %v7053_v51  ;;  %v7001_v40 = vpack.c.bf16 %v3471_v38, %v3467_v39  ;;  %v7073_v51 = vpack.c.bf16 %v3473_v63, %v3469_v28  ;;  %v3502_v5 = vld [vmem:[#allocation11 + $0xca0] sm:$0xff]  ;;  %v3504_v54 = vld [vmem:[#allocation11 + $0xcb0] sm:$0xff]  ;;  %v3507_v39 = vld [vmem:[#allocation11 + $0xcc8] sm:$0xff] }
 0x361   :  { %v3511_v38 = vld [vmem:[#allocation11 + $0xce8] sm:$0xff]  ;;  %v3509_v28 = vld [vmem:[#allocation11 + $0xcd8] sm:$0xff] }
 0x362   :  { %v3513_v63 = vld [vmem:[#allocation11 + $0xcf8] sm:$0xff] }
 0x363   :  { %6984 = vmatpush1.bf16.msra.mxu0 %v6983_v10  ;;  %7056 = vmatpush1.bf16.msra.mxu1 %v7055_v27  ;;  %v7003_v10 = vpack.c.bf16 %v3470_v12, %v3466_v23  ;;  %v7075_v27 = vpack.c.bf16 %v3472_v6, %v3468_v60  ;;  %v3506_v23 = vld [vmem:[#allocation11 + $0xcc0] sm:$0xff]  ;;  %v3508_v60 = vld [vmem:[#allocation11 + $0xcd0] sm:$0xff] }
 0x364   :  { %6986 = vmatprep.subr.bf16.mxu0 %v6985_v9  ;;  %7058 = vmatprep.subr.bf16.mxu1 %v7057_v25  ;;  %v7005_v9 = vpack.c.bf16 %v3479_v36, %v3475_v19  ;;  %v7077_v25 = vpack.c.bf16 %v3481_v46, %v3477_v22  ;;  %v3510_v12 = vld [vmem:[#allocation11 + $0xce0] sm:$0xff]  ;;  %v3512_v6 = vld [vmem:[#allocation11 + $0xcf0] sm:$0xff]  ;;  %v3515_v19 = vld [vmem:[#allocation11 + $0xd08] sm:$0xff] }
 0x365   :  { %v3519_v36 = vld [vmem:[#allocation11 + $0xd28] sm:$0xff]  ;;  %v3517_v22 = vld [vmem:[#allocation11 + $0xd18] sm:$0xff] }
 0x366   :  { %v3521_v46 = vld [vmem:[#allocation11 + $0xd38] sm:$0xff] }
 0x367   :  { %6988 = vmatpush1.bf16.msra.mxu0 %v6987_v7  ;;  %7060 = vmatpush1.bf16.msra.mxu1 %v7059_v35  ;;  %v7007_v7 = vpack.c.bf16 %v3478_v48, %v3474_v57  ;;  %v7079_v35 = vpack.c.bf16 %v3480_v4, %v3476_v11  ;;  %v3326_v57 = vld [vmem:[#allocation3 + $0x38] sm:$0x3]  ;;  %v3322_v48 = vld [vmem:[#allocation3] sm:$0xfc] }
 0x368   :  { %6990 = vmatprep.subr.bf16.mxu0 %v6989_v47  ;;  %7062 = vmatprep.subr.bf16.mxu1 %v7061_v0  ;;  %v7009_v47 = vpack.c.bf16 %v3487_v52, %v3483_v53  ;;  %v7081_v0 = vpack.c.bf16 %v3489_v37, %v3485_v1  ;;  %v3514_v11 = vld [vmem:[#allocation11 + $0xd00] sm:$0xff]  ;;  %v3516_v1 = vld [vmem:[#allocation11 + $0xd10] sm:$0xff] }
 0x369   :  { %v3518_v4 = vld [vmem:[#allocation11 + $0xd20] sm:$0xff]  ;;  %v3520_v37 = vld [vmem:[#allocation11 + $0xd30] sm:$0xff] }
 0x36a   :  { %v7763_v53 = vld [vmem:[#allocation3 + $0x18] sm:$0xff] }
 0x36b   :  { %6992 = vmatpush1.bf16.msra.mxu0 %v6991_v17  ;;  %7064 = vmatpush1.bf16.msra.mxu1 %v7063_v2  ;;  %v7011_v17 = vpack.c.bf16 %v3486_v32, %v3482_v58  ;;  %v7083_v2 = vpack.c.bf16 %v3488_v50, %v3484_v61  ;;  %v3348_v52 = vrot.slane %v7763_v53, 2  ;;  %v3527_v58 = vld [vmem:[#allocation11 + $0xd68] sm:$0xff]  ;;  %v3525_v32 = vld [vmem:[#allocation11 + $0xd58] sm:$0xff]  ;;  %v7027_v61 = vpack.c.bf16 %v3518_v4, %v3514_v11  ;;  %v6335_v4 = vld [vmem:[%s10668_s3 + $0x2a8] sm:$0xff] }
 0x36c   :  { %6994 = vmatprep.subr.bf16.mxu0 %v6993_v14  ;;  %7066 = vmatprep.subr.bf16.mxu1 %v7065_v31  ;;  %v7013_v14 = vpack.c.bf16 %v3495_v8, %v3491_v44  ;;  %v7085_v31 = vpack.c.bf16 %v3497_v56, %v3493_v42  ;;  %v3329_v50 = vld [vmem:[#allocation3 + $0x50] sm:$0xfc]  ;;  %v7099_v44 = vpack.c.bf16 %v3520_v37, %v3516_v1  ;;  %v3325_v8 = vld [vmem:[#allocation3 + $0x30] sm:$0x3]  ;;  %v3522_v42 = vld [vmem:[#allocation11 + $0xd40] sm:$0xff] }
 0x36d   :  { %v6337_v53 = vld [vmem:[%s10668_s3 + $0x2b8] sm:$0xff]  ;;  %v6334_v37 = vld [vmem:[%s10668_s3 + $0x2a0] sm:$0xff] }
 0x36e   :  { %v7109_v1 = vpack.c.bf16 %v6337_v53, %v6335_v4  ;;  %v6373_v4 = vld [vmem:[%s10668_s3 + $0x3d8] sm:$0xff] }
 0x36f   :  { %6996 = vmatpush1.bf16.msra.mxu0 %v6995_v41  ;;  %7068 = vmatpush1.bf16.msra.mxu1 %v7067_v62  ;;  %v7015_v41 = vpack.c.bf16 %v3494_v30, %v3490_v26  ;;  %v7087_v62 = vpack.c.bf16 %v3496_v20, %v3492_v29  ;;  %v3526_v26 = vld [vmem:[#allocation11 + $0xd60] sm:$0xff]  ;;  %v3524_v30 = vld [vmem:[#allocation11 + $0xd50] sm:$0xff]  ;;  %v3365_v29 = vrot.slane %v3329_v50, 2 }
 0x370   :  { %6998 = vmatprep.subr.bf16.mxu0 %v6997_v49  ;;  %7070 = vmatprep.subr.bf16.mxu1 %v7069_v24  ;;  %v7017_v49 = vpack.c.bf16 %v3503_v43, %v3499_v45  ;;  %v7089_v24 = vpack.c.bf16 %v3505_v59, %v3501_v34  ;;  %v7764_v20 = vld [vmem:[#allocation3 + $0x68] sm:$0xff]  ;;  %v3356_v43 = vrot.slane %v3325_v8, 2  ;;  %v3332_v34 = vld [vmem:[#allocation3 + $0x80] sm:$0x3]  ;;  %v6343_v50 = vld [vmem:[%s10668_s3 + $0x2e8] sm:$0xff] }
 0x371   :  { %v3366_v45 = vrot.slane %v7764_v20, 2  ;;  %v3328_v59 = vld [vmem:[#allocation3 + $0x48] sm:$0xfc]  ;;  %v6351_v20 = vld [vmem:[%s10668_s3 + $0x328] sm:$0xff] }
 0x373   :  { %7000 = vmatpush1.bf16.msra.mxu0 %v6999_v21  ;;  %7072 = vmatpush1.bf16.msra.mxu1 %v7071_v33  ;;  %v7019_v21 = vpack.c.bf16 %v3502_v5, %v3498_v3  ;;  %v7091_v33 = vpack.c.bf16 %v3504_v54, %v3500_v15  ;;  %v3357_v3 = vsel %vm3346_vm13, %v3348_v52, %v3356_v43  ;;  %v7765_v5 = vld [vmem:[#allocation3 + $0x60] sm:$0xff]  ;;  %v3362_v15 = vrot.slane %v3328_v59, 2  ;;  %v6350_v59 = vld [vmem:[%s10668_s3 + $0x320] sm:$0xff] }
 0x374   :  { %7002 = vmatprep.subr.bf16.mxu0 %v7001_v40  ;;  %7074 = vmatprep.subr.bf16.mxu1 %v7073_v51  ;;  %v7021_v40 = vpack.c.bf16 %v3511_v38, %v3507_v39  ;;  %v7093_v51 = vpack.c.bf16 %v3513_v63, %v3509_v28  ;;  %v3367_v16 = vsel %vm3346_vm13, %v3365_v29, %v3366_v45  ;;  %v3324_v28 = vld [vmem:[#allocation3 + $0x10] sm:$0xfc]  ;;  %v6348_v29 = vld [vmem:[%s10668_s3 + $0x310] sm:$0xff] }
 0x377   :  { %7004 = vmatpush1.bf16.msra.mxu0 %v7003_v10  ;;  %7076 = vmatpush1.bf16.msra.mxu1 %v7075_v27  ;;  %v7023_v10 = vpack.c.bf16 %v3510_v12, %v3506_v23  ;;  %v7095_v27 = vpack.c.bf16 %v3512_v6, %v3508_v60  ;;  %v3353_v23 = vrot.slane %v3324_v28, 2  ;;  %v3327_v12 = vld [vmem:[#allocation3 + $0x40] sm:$0x3]  ;;  %v3330_v60 = vld [vmem:[#allocation3 + $0x58] sm:$0xfc] }
 0x378   :  { %7006 = vmatprep.subr.bf16.mxu0 %v7005_v9  ;;  %7078 = vmatprep.subr.bf16.mxu1 %v7077_v25  ;;  %v7025_v9 = vpack.c.bf16 %v3519_v36, %v3515_v19  ;;  %v7097_v25 = vpack.c.bf16 %v3521_v46, %v3517_v22  ;;  %v7767_v19 = vld [vmem:[#allocation3 + $0x70] sm:$0xff]  ;;  %v3333_v22 = vld [vmem:[#allocation3 + $0x88] sm:$0x3]  ;;  %v3368_v46 = vrot.slane %v3330_v60, 2  ;;  %v6360_v28 = vld [vmem:[%s10668_s3 + $0x370] sm:$0xff] }
 0x379   :  { %v3369_v36 = vrot.slane %v7767_v19, 2  ;;  %v6369_v60 = vld [vmem:[%s10668_s3 + $0x3b8] sm:$0xff] }
 0x37b   :  { %7008 = vmatpush1.bf16.msra.mxu0 %v7007_v7  ;;  %7080 = vmatpush1.bf16.msra.mxu1 %v7079_v35  ;;  %v3523_v7 = vld [vmem:[#allocation11 + $0xd48] sm:$0xff]  ;;  %v3358_v35 = vrot.slane %v3326_v57, 2 }
 0x37c   :  { %7010 = vmatprep.subr.bf16.mxu0 %v7009_v47  ;;  %7082 = vmatprep.subr.bf16.mxu1 %v7081_v0  ;;  %v3529_v47 = vld [vmem:[#allocation11 + $0xd78] sm:$0xff]  ;;  %v3347_v0 = vrot.slane %v3322_v48, 2  ;;  %v6331_v48 = vld [vmem:[%s10668_s3 + $0x288] sm:$0xff] }
 0x37e   :  { %v3349_v56 = vsel %vm3346_vm13, %v3347_v0, %v3348_v52  ;;  %v6338_v0 = vld [vmem:[%s10668_s3 + $0x2c0] sm:$0xff] }
 0x37f   :  { %7012 = vmatpush1.bf16.msra.mxu0 %v7011_v17  ;;  %7084 = vmatpush1.bf16.msra.mxu1 %v7083_v2  ;;  %v7029_v17 = vpack.c.bf16 %v3527_v58, %v3523_v7  ;;  %v7101_v2 = vpack.c.bf16 %v3529_v47, %v3525_v32  ;;  %v6336_v7 = vld [vmem:[%s10668_s3 + $0x2b0] sm:$0xff]  ;;  %v6341_v58 = vld [vmem:[%s10668_s3 + $0x2d8] sm:$0xff] }
 0x380   :  { %7014 = vmatprep.subr.bf16.mxu0 %v7013_v14  ;;  %7086 = vmatprep.subr.bf16.mxu1 %v7085_v31  ;;  %v3528_v14 = vld [vmem:[#allocation11 + $0xd70] sm:$0xff]  ;;  %v3359_v31 = vsel %vm3346_vm13, %v3351_v18, %v3358_v35  ;;  %v3373_v18 = vrot.slane %v3332_v34, 2  ;;  %v6339_v35 = vld [vmem:[%s10668_s3 + $0x2c8] sm:$0xff]  ;;  %v7111_v32 = vpack.c.bf16 %v6336_v7, %v6334_v37 }
 0x381   :  { %v7113_v47 = vpack.c.bf16 %v6341_v58, %v6339_v35  ;;  %v6370_v35 = vld [vmem:[%s10668_s3 + $0x3c0] sm:$0xff] }
 0x382   :  { %v3374_v38 = vsel %vm3346_vm13, %v3366_v45, %v3373_v18  ;;  %v6353_v45 = vld [vmem:[%s10668_s3 + $0x338] sm:$0xff]  ;;  %v6356_v18 = vld [vmem:[%s10668_s3 + $0x350] sm:$0xff] }
 0x383   :  { %7016 = vmatpush1.bf16.msra.mxu0 %v7015_v41  ;;  %7088 = vmatpush1.bf16.msra.mxu1 %v7087_v62  ;;  %v7031_v41 = vpack.c.bf16 %v3526_v26, %v3522_v42  ;;  %v7103_v62 = vpack.c.bf16 %v3528_v14, %v3524_v30  ;;  %v6349_v26 = vld [vmem:[%s10668_s3 + $0x318] sm:$0xff]  ;;  %v7125_v34 = vpack.c.bf16 %v6353_v45, %v6351_v20 }
 0x384   :  { %7018 = vmatprep.subr.bf16.mxu0 %v7017_v49  ;;  %7090 = vmatprep.subr.bf16.mxu1 %v7089_v24  ;;  %v3363_v49 = vrot.slane %v7765_v5, 2  ;;  %v3331_v24 = vld [vmem:[#allocation3 + $0x78] sm:$0x3] }
 0x385   :  { %v3371_v39 = vrot.slane %v3331_v24, 2  ;;  %v6359_v24 = vld [vmem:[%s10668_s3 + $0x368] sm:$0xff] }
 0x386   :  { %v3364_v54 = vsel %vm3346_vm13, %v3362_v15, %v3363_v49  ;;  %v6361_v15 = vld [vmem:[%s10668_s3 + $0x378] sm:$0xff] }
 0x387   :  { %7020 = vmatpush1.bf16.msra.mxu0 %v7019_v21  ;;  %7092 = vmatpush1.bf16.msra.mxu1 %v7091_v33  ;;  %v3372_v63 = vsel %vm3346_vm13, %v3363_v49, %v3371_v39  ;;  %v7766_v21 = vld [vmem:[#allocation3 + $0x28] sm:$0xff]  ;;  %v7133_v39 = vpack.c.bf16 %v6361_v15, %v6359_v24 }
 0x388   :  { %7022 = vmatprep.subr.bf16.mxu0 %v7021_v40  ;;  %7094 = vmatprep.subr.bf16.mxu1 %v7093_v51  ;;  %v3354_v33 = vrot.slane %v7766_v21, 2  ;;  %v3360_v51 = vrot.slane %v3327_v12, 2  ;;  %v6365_v21 = vld [vmem:[%s10668_s3 + $0x398] sm:$0xff]  ;;  %v6362_v12 = vld [vmem:[%s10668_s3 + $0x380] sm:$0xff] }
 0x38a   :  { %v3355_v40 = vsel %vm3346_vm13, %v3353_v23, %v3354_v33  ;;  %v3361_v6 = vsel %vm3346_vm13, %v3354_v33, %v3360_v51  ;;  %v6367_v51 = vld [vmem:[%s10668_s3 + $0x3a8] sm:$0xff] }
 0x38b   :  { %7024 = vmatpush1.bf16.msra.mxu0 %v7023_v10  ;;  %7096 = vmatpush1.bf16.msra.mxu1 %v7095_v27  ;;  %v3370_v10 = vsel %vm3346_vm13, %v3368_v46, %v3369_v36  ;;  %v3375_v27 = vrot.slane %v3333_v22, 2 }
 0x38c   :  { %7026 = vmatprep.subr.bf16.mxu0 %v7025_v9  ;;  %7098 = vmatprep.subr.bf16.mxu1 %v7097_v25  ;;  %v6333_v9 = vld [vmem:[%s10668_s3 + $0x298] sm:$0xff]  ;;  %v6330_v25 = vld [vmem:[%s10668_s3 + $0x280] sm:$0xff] }
 0x38d   :  { %v3376_v57 = vsel %vm3346_vm13, %v3369_v36, %v3375_v27  ;;  %v7105_v11 = vpack.c.bf16 %v6333_v9, %v6331_v48  ;;  %v6366_v48 = vld [vmem:[%s10668_s3 + $0x3a0] sm:$0xff]  ;;  %v6368_v9 = vld [vmem:[%s10668_s3 + $0x3b0] sm:$0xff] }
 0x38e   :  { %3603 = vmatmul.mubr.f32.vlgmr.msra.gmra.mrb[16].mxu0 %v3349_v56  ;;  %3781 = vmatmul.mubr.f32.vlgmr.msra.gmra.mrb[16].mxu1 %v3349_v56  ;;  %v6342_v56 = vld [vmem:[%s10668_s3 + $0x2e0] sm:$0xff]  ;;  %v7143_v7 = vpack.c.bf16 %v6368_v9, %v6366_v48 }
 0x38f   :  { %3608 = vmatprep.mubr.f32.mxu0 %v3359_v31  ;;  %7028 = vmatpush1.bf16.msra.mxu0 %v7027_v61  ;;  %v6340_v61 = vld [vmem:[%s10668_s3 + $0x2d0] sm:$0xff] }
 0x390   :  { %3786 = vmatprep.mubr.f32.mxu1 %v3359_v31  ;;  %7100 = vmatpush1.bf16.msra.mxu1 %v7099_v44  ;;  %v6345_v44 = vld [vmem:[%s10668_s3 + $0x2f8] sm:$0xff]  ;;  %v7115_v8 = vpack.c.bf16 %v6340_v61, %v6338_v0  ;;  %v6346_v31 = vld [vmem:[%s10668_s3 + $0x300] sm:$0xff] }
 0x391   :  { %7030 = vmatprep.subr.bf16.mxu0 %v7029_v17  ;;  %7102 = vmatprep.subr.bf16.mxu1 %v7101_v2  ;;  %v7117_v42 = vpack.c.bf16 %v6345_v44, %v6343_v50  ;;  %v6344_v17 = vld [vmem:[%s10668_s3 + $0x2f0] sm:$0xff]  ;;  %v6347_v2 = vld [vmem:[%s10668_s3 + $0x308] sm:$0xff]  ;;  %v7123_v43 = vpack.c.bf16 %v6348_v29, %v6346_v31 }
 0x392   :  { %3609 = vmatmul.mubr.f32.gmra.mrb[18].mxu0 %v3357_v3  ;;  %3787 = vmatmul.mubr.f32.gmra.mrb[18].mxu1 %v3357_v3  ;;  %v7119_v30 = vpack.c.bf16 %v6344_v17, %v6342_v56  ;;  %v7121_v14 = vpack.c.bf16 %v6349_v26, %v6347_v2  ;;  %v6357_v3 = vld [vmem:[%s10668_s3 + $0x358] sm:$0xff]  ;;  %v6372_v50 = vld [vmem:[%s10668_s3 + $0x3d0] sm:$0xff]  ;;  %v6375_v44 = vld [vmem:[%s10668_s3 + $0x3e8] sm:$0xff] }
 0x393   :  { %3614 = vmatprep.mubr.f32.mxu0 %v3367_v16  ;;  %3792 = vmatprep.mubr.f32.mxu1 %v3367_v16  ;;  %v6354_v16 = vld [vmem:[%s10668_s3 + $0x340] sm:$0xff]  ;;  %v6377_v2 = vld [vmem:[%s10668_s3 + $0x3f8] sm:$0xff] }
 0x394   :  { %7032 = vmatpush1.bf16.msra.mxu0 %v7031_v41  ;;  %7104 = vmatpush1.bf16.msra.mxu1 %v7103_v62  ;;  %v6352_v41 = vld [vmem:[%s10668_s3 + $0x330] sm:$0xff]  ;;  %v6355_v62 = vld [vmem:[%s10668_s3 + $0x348] sm:$0xff]  ;;  %v6374_v26 = vld [vmem:[%s10668_s3 + $0x3e0] sm:$0xff] }
 0x395   :  { %7106 = vmatprep.subr.bf16.mxu0 %v7105_v11  ;;  %v7127_v5 = vpack.c.bf16 %v6352_v41, %v6350_v59  ;;  %v7129_v49 = vpack.c.bf16 %v6357_v3, %v6355_v62 }
 0x396   :  { %3615 = vmatmul.mubr.f32.gmra.mrb[20].mxu0 %v3364_v54  ;;  %3793 = vmatmul.mubr.f32.gmra.mrb[20].mxu1 %v3364_v54  ;;  %v7131_v54 = vpack.c.bf16 %v6356_v18, %v6354_v16 }
 0x397   :  { %3620 = vmatprep.mubr.f32.mxu0 %v3374_v38  ;;  %3798 = vmatprep.mubr.f32.mxu1 %v3374_v38  ;;  %v6358_v38 = vld [vmem:[%s10668_s3 + $0x360] sm:$0xff] }
 0x398   :  { %v7135_v33 = vpack.c.bf16 %v6360_v28, %v6358_v38 }
 0x39a   :  { %3621 = vmatmul.mubr.f32.gmra.mrb[22].mxu0 %v3372_v63  ;;  %3799 = vmatmul.mubr.f32.gmra.mrb[22].mxu1 %v3372_v63  ;;  %v6363_v63 = vld [vmem:[%s10668_s3 + $0x388] sm:$0xff] }
 0x39b   :  { %3691 = vmatprep.mubr.f32.mxu0 %v8829_v55  ;;  %3869 = vmatprep.mubr.f32.mxu1 %v8829_v55  ;;  %v7137_v23 = vpack.c.bf16 %v6365_v21, %v6363_v63 }
 0x39e   :  { %6322 = vmatmul.mubr.msk.f32.vlgmr.msra.gmra.mrb[16].mxu0 %vm2009_vm11, %v3355_v40  ;;  %6326 = vmatmul.mubr.msk.f32.vlgmr.msra.gmra.mrb[16].mxu1 %vm2009_vm11, %v3355_v40  ;;  %v6364_v40 = vld [vmem:[%s10668_s3 + $0x390] sm:$0xff] }
 0x39f   :  { %3697 = vmatprep.mubr.f32.mxu0 %v8829_v55  ;;  %3875 = vmatprep.mubr.f32.mxu1 %v8829_v55  ;;  %v7139_v36 = vpack.c.bf16 %v6364_v40, %v6362_v12 }
 0x3a2   :  { %6323 = vmatmul.mubr.msk.f32.gmra.mrb[18].mxu0 %vm2009_vm11, %v3361_v6  ;;  %6327 = vmatmul.mubr.msk.f32.gmra.mrb[18].mxu1 %vm2009_vm11, %v3361_v6 }
 0x3a3   :  { %3703 = vmatprep.mubr.f32.mxu0 %v8829_v55  ;;  %3881 = vmatprep.mubr.f32.mxu1 %v8829_v55 }
 0x3a6   :  { %6324 = vmatmul.mubr.msk.f32.gmra.mrb[20].mxu0 %vm2009_vm11, %v3370_v10  ;;  %6328 = vmatmul.mubr.msk.f32.gmra.mrb[20].mxu1 %vm2009_vm11, %v3370_v10 }
 0x3a7   :  { %3709 = vmatprep.mubr.f32.mxu0 %v8829_v55  ;;  %3887 = vmatprep.mubr.f32.mxu1 %v8829_v55  ;;  %v6332_v55 = vld [vmem:[%s10668_s3 + $0x290] sm:$0xff] }
 0x3a8   :  { %v7107_v52 = vpack.c.bf16 %v6332_v55, %v6330_v25  ;;  %v6371_v55 = vld [vmem:[%s10668_s3 + $0x3c8] sm:$0xff] }
 0x3a9   :  { %v7145_v61 = vpack.c.bf16 %v6373_v4, %v6371_v55 }
 0x3aa   :  { %6325 = vmatmul.mubr.msk.f32.gmra.mrb[22].mxu0 %vm2009_vm11, %v3376_v57  ;;  %6329 = vmatmul.mubr.msk.f32.gmra.mrb[22].mxu1 %vm2009_vm11, %v3376_v57  ;;  %v7141_v57 = vpack.c.bf16 %v6369_v60, %v6367_v51 }
 0x3ab   :  { %7108 = vmatpush1.bf16.msra.mxu0 %v7107_v52 }
 0x3ac   :  { %7110 = vmatprep.subr.bf16.mxu0 %v7109_v1 }
 0x3af   :  { %7112 = vmatpush1.bf16.msra.mxu0 %v7111_v32 }
 0x3b0   :  { %7114 = vmatprep.subr.bf16.mxu0 %v7113_v47 }
 0x3b3   :  { %7116 = vmatpush1.bf16.msra.mxu0 %v7115_v8 }
 0x3b4   :  { %7118 = vmatprep.subr.bf16.mxu0 %v7117_v42 }
 0x3b7   :  { %7120 = vmatpush1.bf16.msra.mxu0 %v7119_v30  ;;  %v6376_v30 = vld [vmem:[%s10668_s3 + $0x3f0] sm:$0xff] }
 0x3b8   :  { %7122 = vmatprep.subr.bf16.mxu0 %v7121_v14 }
 0x3bb   :  { %7124 = vmatpush1.bf16.msra.mxu0 %v7123_v43 }
 0x3bc   :  { %7126 = vmatprep.subr.bf16.mxu0 %v7125_v34  ;;  %v7147_v34 = vpack.c.bf16 %v6372_v50, %v6370_v35 }
 0x3bf   :  { %7128 = vmatpush1.bf16.msra.mxu0 %v7127_v5  ;;  %v7149_v5 = vpack.c.bf16 %v6377_v2, %v6375_v44 }
 0x3c0   :  { %7130 = vmatprep.subr.bf16.mxu0 %v7129_v49  ;;  %v7151_v49 = vpack.c.bf16 %v6376_v30, %v6374_v26 }
 0x3c3   :  { %7132 = vmatpush1.bf16.msra.mxu0 %v7131_v54 }
 0x3c4   :  { %7134 = vmatprep.subr.bf16.mxu0 %v7133_v39 }
 0x3c7   :  { %7136 = vmatpush1.bf16.msra.mxu0 %v7135_v33 }
 0x3c8   :  { %7138 = vmatprep.subr.bf16.mxu0 %v7137_v23 }
 0x3cb   :  { %7140 = vmatpush1.bf16.msra.mxu0 %v7139_v36 }
 0x3cc   :  { %7142 = vmatprep.subr.bf16.mxu0 %v7141_v57 }
 0x3cf   :  { %7144 = vmatpush1.bf16.msra.mxu0 %v7143_v7 }
 0x3d0   :  { %7146 = vmatprep.subr.bf16.mxu0 %v7145_v61 }
 0x3d3   :  { %7148 = vmatpush1.bf16.msra.mxu0 %v7147_v34 }
 0x3d4   :  { %7150 = vmatprep.subr.bf16.mxu0 %v7149_v5 }
 0x3d7   :  { %7152 = vmatpush1.bf16.msra.mxu0 %v7151_v49 }
 0x471   :  { %v3693_v6 = vpop.f32.mrb[16].mxu0  ;;  %v3871_v19 = vpop.f32.mrb[16].mxu1 }
 0x472   :  { %v3910_v22 = vmax.f32 %v3693_v6, 0.0  ;;  %v3912_v46 = vmax.f32 %v3871_v19, 0.0  ;;  %v3695_v10 = vpop.f32.mrb[17].mxu0  ;;  %v3873_v27 = vpop.f32.mrb[17].mxu1 }
 0x473   :  { %v3911_v25 = vmax.f32 %v3695_v10, 0.0  ;;  %v3913_v11 = vmax.f32 %v3873_v27, 0.0 }
 0x474   :  { %v3926_v53 = vmax.f32 %v3910_v22, %v3912_v46 }
 0x475   :  { %v3927_v52 = vmax.f32 %v3911_v25, %v3913_v11  ;;  %v3699_v1 = vpop.f32.mrb[18].mxu0  ;;  %v3877_v37 = vpop.f32.mrb[18].mxu1 }
 0x476   :  { %v3914_v58 = vmax.f32 %v3699_v1, 0.0  ;;  %v3916_v32 = vmax.f32 %v3877_v37, 0.0  ;;  %v3701_v47 = vpop.f32.mrb[19].mxu0  ;;  %v3879_v0 = vpop.f32.mrb[19].mxu1 }
 0x477   :  { %v3942_v8 = vcombine.low %v3926_v53, %v3927_v52  ;;  %v3943_v42 = vcombine.high %v3926_v53, %v3927_v52  ;;  %v3915_v56 = vmax.f32 %v3701_v47, 0.0  ;;  %v3917_v17 = vmax.f32 %v3879_v0, 0.0 }
 0x478   :  { %v3928_v14 = vmax.f32 %v3914_v58, %v3916_v32 }
 0x479   :  { %v3950_v31 = vrot.slane %v3942_v8, %v8115_v13  ;;  %v3957_v29 = vrot.slane %v3943_v42, %v8115_v13  ;;  %v3929_v20 = vmax.f32 %v3915_v56, %v3917_v17  ;;  %v3705_v45 = vpop.f32.mrb[20].mxu0  ;;  %v3883_v43 = vpop.f32.mrb[20].mxu1 }
 0x47a   :  { %v3918_v59 = vmax.f32 %v3705_v45, 0.0  ;;  %v3920_v41 = vmax.f32 %v3883_v43, 0.0  ;;  %v9030_v62 = vpop.f32.mrb[21].mxu0  ;;  %v9032_v3 = vpop.f32.mrb[21].mxu1 }
 0x47b   :  { %v3958_v16 = vcombine.high %v3950_v31, %v3950_v31  ;;  %v3959_v18 = vcombine.high %v3957_v29, %v3957_v29  ;;  %v4020_v24 = vrot.slane %v3950_v31, %v8115_v13  ;;  %v4036_v15 = vrot.slane %v3957_v29, %v8115_v13 }
 0x47c   :  { %v3960_v54 = vcombine.low %v3928_v14, %v3929_v20  ;;  %v3961_v39 = vcombine.high %v3928_v14, %v3929_v20  ;;  %v9036_v38 = vmax.f32 %v3918_v59, %v3920_v41  ;;  %v3919_v28 = vmax.f32 %v9030_v62, 0.0 }
 0x47d   :  { %v4021_v63 = vcombine.high %v4020_v24, %v4020_v24  ;;  %v4028_v21 = vrot.slane %v3958_v16, %v8115_v13  ;;  %v4037_v33 = vcombine.high %v4036_v15, %v4036_v15  ;;  %v4044_v23 = vrot.slane %v3959_v18, %v8115_v13  ;;  %v9041_v12 = vpop.f32.mrb[22].mxu0  ;;  %v9043_v40 = vpop.f32.mrb[22].mxu1 }
 0x47e   :  { %v4174_v51 = vsel %vm207_vm2, %v4020_v24, -inf  ;;  %v4202_v60 = vsel %vm207_vm2, %v4036_v15, -inf  ;;  %v3968_v6 = vrot.slane %v3960_v54, %v8115_v13  ;;  %v9049_v19 = vrot.slane %v3961_v39, %v8115_v13  ;;  %v9051_v36 = vpop.f32.mrb[23].mxu0  ;;  %v9053_v22 = vpop.f32.mrb[23].mxu1 }
 0x47f   :  { %v4029_v46 = vcombine.high %v4028_v21, %v4028_v21  ;;  %v4045_v10 = vcombine.high %v4044_v23, %v4044_v23  ;;  %v4175_v27 = vrot.slane %v4174_v51, 4  ;;  %v4181_v57 = vsel %vm207_vm2, %v4021_v63, -inf }
 0x480   :  { %v4182_v48 = vrot.slane %v4181_v57, 4  ;;  %v4188_v9 = vsel %vm207_vm2, %v4028_v21, -inf  ;;  %v4203_v25 = vrot.slane %v4202_v60, 4  ;;  %v4209_v11 = vsel %vm207_vm2, %v4037_v33, -inf }
 0x481   :  { %v4176_v55 = vmax.f32 %v4174_v51, %v4175_v27  ;;  %v4189_v4 = vrot.slane %v4188_v9, 4  ;;  %v4195_v53 = vsel %vm207_vm2, %v4029_v46, -inf  ;;  %v4210_v52 = vrot.slane %v4209_v11, 4 }
 0x482   :  { %v4183_v1 = vmax.f32 %v4181_v57, %v4182_v48  ;;  %v4196_v37 = vrot.slane %v4195_v53, 4  ;;  %v4204_v7 = vmax.f32 %v4202_v60, %v4203_v25  ;;  %v4216_v35 = vsel %vm207_vm2, %v4044_v23, -inf }
 0x483   :  { %v4177_v58 = vrot.slane %v4176_v55, 2  ;;  %v4190_v32 = vmax.f32 %v4188_v9, %v4189_v4  ;;  %v4211_v47 = vmax.f32 %v4209_v11, %v4210_v52  ;;  %v4217_v0 = vrot.slane %v4216_v35, 4 }
 0x484   :  { %v4184_v61 = vrot.slane %v4183_v1, 2  ;;  %v4197_v50 = vmax.f32 %v4195_v53, %v4196_v37  ;;  %v4205_v44 = vrot.slane %v4204_v7, 2  ;;  %v4223_v8 = vsel %vm207_vm2, %v4045_v10, -inf }
 0x485   :  { %v4178_v42 = vmax.f32 %v4176_v55, %v4177_v58  ;;  %v4191_v56 = vrot.slane %v4190_v32, 2  ;;  %v4212_v17 = vrot.slane %v4211_v47, 2  ;;  %v4218_v2 = vmax.f32 %v4216_v35, %v4217_v0 }
 0x486   :  { %v9061_v26 = vmax.f32 %v4183_v1, %v4184_v61  ;;  %v4198_v30 = vrot.slane %v4197_v50, 2  ;;  %v4206_v14 = vmax.f32 %v4204_v7, %v4205_v44  ;;  %v4224_v31 = vrot.slane %v4223_v8, 4 }
 0x487   :  { %v4179_v29 = vrot.slane %v4178_v42, 1  ;;  %v4192_v20 = vmax.f32 %v4190_v32, %v4191_v56  ;;  %v9063_v45 = vmax.f32 %v4211_v47, %v4212_v17  ;;  %v4219_v43 = vrot.slane %v4218_v2, 2 }
 0x488   :  { %v4186_v34 = vrot.slane %v9061_v26, 1  ;;  %v9066_v59 = vmax.f32 %v4197_v50, %v4198_v30  ;;  %v4207_v41 = vrot.slane %v4206_v14, 1  ;;  %v9068_v5 = vmax.f32 %v4223_v8, %v4224_v31 }
 0x489   :  { %v9070_v49 = vmax.f32 %v4178_v42, %v4179_v29  ;;  %v4193_v16 = vrot.slane %v4192_v20, 1  ;;  %v3976_v18 = vcombine.high %v3968_v6, %v3968_v6  ;;  %v3977_v24 = vcombine.high %v9049_v19, %v9049_v19 }
 0x48a   :  { %v4052_v15 = vrot.slane %v3968_v6, %v8115_v13  ;;  %v9077_v54 = vrot.slane %v9049_v19, %v8115_v13  ;;  %v3921_v39 = vmax.f32 %v9032_v3, 0.0  ;;  %v3922_v63 = vmax.f32 %v9041_v12, 0.0 }
 0x48b   :  { %v9082_v21 = vrot.slane %v3976_v18, %v8115_v13  ;;  %v3924_v33 = vmax.f32 %v9043_v40, 0.0  ;;  %v3923_v23 = vmax.f32 %v9051_v36, 0.0  ;;  %v3925_v51 = vmax.f32 %v9053_v22, 0.0 }
 0x48c   :  { %v4053_v60 = vcombine.high %v4052_v15, %v4052_v15  ;;  %v4069_v6 = vcombine.high %v9077_v54, %v9077_v54  ;;  %v4230_v46 = vsel %vm207_vm2, %v4052_v15, -inf  ;;  %v3931_v3 = vmax.f32 %v3919_v28, %v3921_v39 }
 0x48d   :  { %v4061_v12 = vcombine.high %v9082_v21, %v9082_v21  ;;  %v4231_v10 = vrot.slane %v4230_v46, 4  ;;  %v3932_v27 = vmax.f32 %v3922_v63, %v3924_v33  ;;  %v3933_v57 = vmax.f32 %v3923_v23, %v3925_v51 }
 0x48e   :  { %v9095_v40 = vsel %vm207_vm2, %v4053_v60, -inf  ;;  %v3978_v36 = vcombine.low %v9036_v38, %v3931_v3  ;;  %v3979_v22 = vcombine.high %v9036_v38, %v3931_v3  ;;  %v9099_v48 = vmax.f32 %v4192_v20, %v4193_v16 }
 0x48f   :  { %v9101_v9 = vmax.f32 %v4230_v46, %v4231_v10  ;;  %v4238_v62 = vrot.slane %v9095_v40, 4  ;;  %v3996_v28 = vcombine.low %v3932_v27, %v3933_v57  ;;  %v3997_v25 = vcombine.high %v3932_v27, %v3933_v57 }
 0x490   :  { %v3986_v11 = vrot.slane %v3978_v36, %v8115_v13  ;;  %v3993_v55 = vrot.slane %v3979_v22, %v8115_v13  ;;  %v9106_v4 = vmax.f32 %v4206_v14, %v4207_v41  ;;  %v9108_v53 = vmax.f32 %v4218_v2, %v4219_v43 }
 0x491   :  { %v4004_v52 = vrot.slane %v3996_v28, %v8115_v13  ;;  %v9112_v38 = vrot.slane %v3997_v25, %v8115_v13  ;;  %v4233_v1 = vrot.slane %v9101_v9, 2  ;;  %v9117_v37 = vsel %vm207_vm2, %v9082_v21, -inf }
 0x492   :  { %v3994_v7 = vcombine.high %v3986_v11, %v3986_v11  ;;  %v3995_v35 = vcombine.high %v3993_v55, %v3993_v55  ;;  %v4084_v58 = vrot.slane %v3986_v11, %v8115_v13  ;;  %v4100_v32 = vrot.slane %v3993_v55, %v8115_v13 }
 0x493   :  { %v4012_v47 = vcombine.high %v4004_v52, %v4004_v52  ;;  %v4013_v0 = vcombine.high %v9112_v38, %v9112_v38  ;;  %v4116_v61 = vrot.slane %v4004_v52, %v8115_v13  ;;  %v9126_v50 = vrot.slane %v9112_v38, %v8115_v13  ;;  %v6379_v38 = vld [vmem:[%s10668_s3 + $0x408] sm:$0xff] }
 0x494   :  { %v4085_v44 = vcombine.high %v4084_v58, %v4084_v58  ;;  %v4092_v8 = vrot.slane %v3994_v7, %v8115_v13  ;;  %v4101_v42 = vcombine.high %v4100_v32, %v4100_v32  ;;  %v4108_v56 = vrot.slane %v3995_v35, %v8115_v13 }
 0x495   :  { %v4286_v17 = vsel %vm207_vm2, %v4084_v58, -inf  ;;  %v4314_v2 = vsel %vm207_vm2, %v4100_v32, -inf  ;;  %v4117_v30 = vcombine.high %v4116_v61, %v4116_v61  ;;  %v9133_v14 = vrot.slane %v4012_v47, %v8115_v13 }
 0x496   :  { %v4093_v31 = vcombine.high %v4092_v8, %v4092_v8  ;;  %v4109_v29 = vcombine.high %v4108_v56, %v4108_v56  ;;  %v4287_v20 = vrot.slane %v4286_v17, 4  ;;  %v4293_v43 = vsel %vm207_vm2, %v4085_v44, -inf }
 0x497   :  { %v4294_v41 = vrot.slane %v4293_v43, 4  ;;  %v4300_v16 = vsel %vm207_vm2, %v4092_v8, -inf  ;;  %v4315_v18 = vrot.slane %v4314_v2, 4  ;;  %v4321_v15 = vsel %vm207_vm2, %v4101_v42, -inf }
 0x498   :  { %v4288_v39 = vmax.f32 %v4286_v17, %v4287_v20  ;;  %v4301_v63 = vrot.slane %v4300_v16, 4  ;;  %v4307_v33 = vsel %vm207_vm2, %v4093_v31, -inf  ;;  %v4322_v23 = vrot.slane %v4321_v15, 4 }
 0x499   :  { %v4295_v51 = vmax.f32 %v4293_v43, %v4294_v41  ;;  %v4308_v60 = vrot.slane %v4307_v33, 4  ;;  %v4316_v46 = vmax.f32 %v4314_v2, %v4315_v18  ;;  %v4328_v3 = vsel %vm207_vm2, %v4108_v56, -inf }
 0x49a   :  { %v4289_v10 = vrot.slane %v4288_v39, 2  ;;  %v4302_v27 = vmax.f32 %v4300_v16, %v4301_v63  ;;  %v4323_v57 = vmax.f32 %v4321_v15, %v4322_v23  ;;  %v4329_v36 = vrot.slane %v4328_v3, 4 }
 0x49b   :  { %v4296_v22 = vrot.slane %v4295_v51, 2  ;;  %v4309_v28 = vmax.f32 %v4307_v33, %v4308_v60  ;;  %v4317_v25 = vrot.slane %v4316_v46, 2  ;;  %v4335_v11 = vsel %vm207_vm2, %v4109_v29, -inf }
 0x49c   :  { %v4290_v55 = vmax.f32 %v4288_v39, %v4289_v10  ;;  %v4303_v52 = vrot.slane %v4302_v27, 2  ;;  %v4324_v7 = vrot.slane %v4323_v57, 2  ;;  %v9141_v35 = vmax.f32 %v4328_v3, %v4329_v36 }
 0x49d   :  { %v9143_v58 = vmax.f32 %v4295_v51, %v4296_v22  ;;  %v4310_v32 = vrot.slane %v4309_v28, 2  ;;  %v9145_v47 = vmax.f32 %v4316_v46, %v4317_v25  ;;  %v4336_v44 = vrot.slane %v4335_v11, 4 }
 0x49e   :  { %v4291_v8 = vrot.slane %v4290_v55, 1  ;;  %v9147_v42 = vmax.f32 %v4302_v27, %v4303_v52  ;;  %v9149_v56 = vmax.f32 %v4323_v57, %v4324_v7  ;;  %v4331_v17 = vrot.slane %v9141_v35, 2 }
 0x49f   :  { %v4298_v2 = vrot.slane %v9143_v58, 1  ;;  %v9153_v31 = vmax.f32 %v4309_v28, %v4310_v32  ;;  %v4319_v29 = vrot.slane %v9145_v47, 1  ;;  %v9156_v20 = vmax.f32 %v4335_v11, %v4336_v44 }
 0x4a0   :  { %v9158_v43 = vmax.f32 %v4290_v55, %v4291_v8  ;;  %v4305_v41 = vrot.slane %v9147_v42, 1  ;;  %v4125_v16 = vcombine.high %v9133_v14, %v9133_v14  ;;  %v4133_v18 = vcombine.high %v9126_v50, %v9126_v50 }
 0x4a1   :  { %v4342_v15 = vsel %vm207_vm2, %v4116_v61, -inf  ;;  %v9167_v39 = vsel %vm207_vm2, %v4117_v30, -inf  ;;  %v4221_v63 = vrot.slane %v9108_v53, 1  ;;  %v4234_v33 = vmax.f32 %v9101_v9, %v4233_v1 }
 0x4a2   :  { %v4343_v23 = vrot.slane %v4342_v15, 4  ;;  %v4350_v51 = vrot.slane %v9167_v39, 4  ;;  %v4245_v60 = vrot.slane %v9117_v37, 4  ;;  %v4258_v46 = vsel %vm207_vm2, %v9077_v54, -inf }
 0x4a3   :  { %v4222_v3 = vmax.f32 %v9108_v53, %v4221_v63  ;;  %v4235_v61 = vrot.slane %v4234_v33, 1  ;;  %v4259_v10 = vrot.slane %v4258_v46, 4  ;;  %v4444_v30 = vsel %vm2091_vm4, %v9099_v48, %v9070_v49 }
 0x4a4   :  { %v9181_v27 = vmax.f32 %v4342_v15, %v4343_v23  ;;  %v4246_v9 = vmax.f32 %v9117_v37, %v4245_v60  ;;  %v4445_v1 = vsel %vm2093_vm5, %v9106_v4, %v4444_v30  ;;  %v4187_v57 = vmax.f32 %v9061_v26, %v4186_v34 }
 0x4a5   :  { %v4236_v36 = vmax.f32 %v4234_v33, %v4235_v61  ;;  %v4260_v22 = vmax.f32 %v4258_v46, %v4259_v10  ;;  %v4446_v53 = vsel %vm2095_vm6, %v4222_v3, %v4445_v1  ;;  %v4200_v28 = vrot.slane %v9066_v59, 1 }
 0x4a6   :  { %v4247_v25 = vrot.slane %v4246_v9, 2  ;;  %v4214_v49 = vrot.slane %v9063_v45, 1  ;;  %v4226_v48 = vrot.slane %v9068_v5, 2  ;;  %v4239_v37 = vmax.f32 %v9095_v40, %v4238_v62 }
 0x4a7   :  { %v4261_v4 = vrot.slane %v4260_v22, 2  ;;  %v4447_v11 = vsel %vm2097_vm7, %v4236_v36, %v4446_v53  ;;  %v4201_v26 = vmax.f32 %v9066_v59, %v4200_v28  ;;  %v4251_v34 = vsel %vm207_vm2, %v4061_v12, -inf }
 0x4a8   :  { %v4248_v55 = vmax.f32 %v4246_v9, %v4247_v25  ;;  %v4215_v52 = vmax.f32 %v9063_v45, %v4214_v49  ;;  %v4227_v7 = vmax.f32 %v9068_v5, %v4226_v48  ;;  %v4240_v32 = vrot.slane %v4239_v37, 2 }
 0x4a9   :  { %v4262_v44 = vmax.f32 %v4260_v22, %v4261_v4  ;;  %v4252_v8 = vrot.slane %v4251_v34, 4  ;;  %v4265_v40 = vsel %vm207_vm2, %v4069_v6, -inf  ;;  %v4450_v59 = vsel %vm2091_vm4, %v4201_v26, %v4187_v57 }
 0x4aa   :  { %v4249_v62 = vrot.slane %v4248_v55, 1  ;;  %v4228_v15 = vrot.slane %v4227_v7, 1  ;;  %v4241_v21 = vmax.f32 %v4239_v37, %v4240_v32  ;;  %v4266_v63 = vrot.slane %v4265_v40, 4 }
 0x4ab   :  { %v4263_v12 = vrot.slane %v4262_v44, 1  ;;  %v4253_v33 = vmax.f32 %v4251_v34, %v4252_v8  ;;  %v4451_v45 = vsel %vm2093_vm5, %v4215_v52, %v4450_v59  ;;  %v4076_v5 = vrot.slane %v3977_v24, %v8115_v13 }
 0x4ac   :  { %v4250_v23 = vmax.f32 %v4248_v55, %v4249_v62  ;;  %v4229_v60 = vmax.f32 %v4227_v7, %v4228_v15  ;;  %v4242_v54 = vrot.slane %v4241_v21, 1  ;;  %v4267_v46 = vmax.f32 %v4265_v40, %v4266_v63 }
 0x4ad   :  { %v4264_v6 = vmax.f32 %v4262_v44, %v4263_v12  ;;  %v4254_v3 = vrot.slane %v4253_v33, 2  ;;  %v4272_v61 = vsel %vm207_vm2, %v4076_v5, -inf  ;;  %v4077_v10 = vcombine.high %v4076_v5, %v4076_v5 }
 0x4ae   :  { %v4448_v30 = vsel %vm2099_vm8, %v4250_v23, %v4447_v11  ;;  %v4243_v9 = vmax.f32 %v4241_v21, %v4242_v54  ;;  %v4268_v1 = vrot.slane %v4267_v46, 2  ;;  %v4452_v57 = vsel %vm2095_vm6, %v4229_v60, %v4451_v45 }
 0x4af   :  { %v4449_v36 = vsel %vm2101_vm9, %v4264_v6, %v4448_v30  ;;  %v4255_v22 = vmax.f32 %v4253_v33, %v4254_v3  ;;  %v4273_v19 = vrot.slane %v4272_v61, 4  ;;  %v4279_v24 = vsel %vm207_vm2, %v4077_v10, -inf }
 0x4b0   :  { %4468 = vrot.lane.b32.xlu0 %v4449_v36, %s7865_s8  ;;  %v4269_v53 = vmax.f32 %v4267_v46, %v4268_v1  ;;  %v4453_v28 = vsel %vm2097_vm7, %v4243_v9, %v4452_v57  ;;  %v4280_v25 = vrot.slane %v4279_v24, 4  ;;  %v4306_v49 = vmax.f32 %v9147_v42, %v4305_v41 }
 0x4b1   :  { %v4256_v48 = vrot.slane %v4255_v22, 1  ;;  %v4274_v37 = vmax.f32 %v4272_v61, %v4273_v19  ;;  %v4320_v4 = vmax.f32 %v9145_v47, %v4319_v29  ;;  %v4332_v11 = vmax.f32 %v9141_v35, %v4331_v17 }
 0x4b2   :  { %v4270_v26 = vrot.slane %v4269_v53, 1  ;;  %v4281_v34 = vmax.f32 %v4279_v24, %v4280_v25  ;;  %v4345_v55 = vrot.slane %v9181_v27, 2  ;;  %v4356_v52 = vsel %vm207_vm2, %v9133_v14, -inf }
 0x4b3   :  { %v4257_v7 = vmax.f32 %v4255_v22, %v4256_v48  ;;  %v4275_v32 = vrot.slane %v4274_v37, 2  ;;  %v4333_v42 = vrot.slane %v4332_v11, 1  ;;  %v4357_v41 = vrot.slane %v4356_v52, 4 }
 0x4b4   :  { %v4271_v44 = vmax.f32 %v4269_v53, %v4270_v26  ;;  %v4282_v8 = vrot.slane %v4281_v34, 2  ;;  %v4346_v40 = vmax.f32 %v9181_v27, %v4345_v55  ;;  %v4370_v47 = vsel %vm207_vm2, %v9126_v50, -inf }
 0x4b5   :  { %v4454_v35 = vsel %vm2099_vm8, %v4257_v7, %v4453_v28  ;;  %v4276_v17 = vmax.f32 %v4274_v37, %v4275_v32  ;;  %v4334_v29 = vmax.f32 %v4332_v11, %v4333_v42  ;;  %v4358_v59 = vmax.f32 %v4356_v52, %v4357_v41 }
 0x4b6   :  { %v4455_v62 = vsel %vm2101_vm9, %v4271_v44, %v4454_v35  ;;  %v4283_v15 = vmax.f32 %v4281_v34, %v4282_v8  ;;  %v4347_v21 = vrot.slane %v4346_v40, 1  ;;  %v4371_v63 = vrot.slane %v4370_v47, 4  ;;  %v6380_v35 = vld [vmem:[%s10668_s3 + $0x410] sm:$0xff] }
 0x4b7   :  { %4470 = vrot.lane.b32.xlu1 %v4455_v62, %s7865_s8  ;;  %v4277_v12 = vrot.slane %v4276_v17, 1  ;;  %v4359_v33 = vrot.slane %v4358_v59, 2  ;;  %v4456_v27 = vsel %vm2091_vm4, %v4306_v49, %v9158_v43  ;;  %v4299_v45 = vmax.f32 %v9143_v58, %v4298_v2  ;;  %v6383_v62 = vld [vmem:[%s10668_s3 + $0x428] sm:$0xff] }
 0x4b8   :  { %v4284_v5 = vrot.slane %v4283_v15, 1  ;;  %v4348_v23 = vmax.f32 %v4346_v40, %v4347_v21  ;;  %v4372_v60 = vmax.f32 %v4370_v47, %v4371_v63  ;;  %v4457_v54 = vsel %vm2093_vm5, %v4320_v4, %v4456_v27  ;;  %v9283_v40 = vld [vmem:[#allocation4] sm:$0xff] }
 0x4b9   :  { %v4278_v46 = vmax.f32 %v4276_v17, %v4277_v12  ;;  %v4360_v6 = vmax.f32 %v4358_v59, %v4359_v33  ;;  %v4458_v3 = vsel %vm2095_vm6, %v4334_v29, %v4457_v54  ;;  %v4312_v61 = vrot.slane %v9153_v31, 1  ;;  %v6378_v47 = vld [vmem:[%s10668_s3 + $0x400] sm:$0xff]  ;;  %v6385_v33 = vld [vmem:[%s10668_s3 + $0x438] sm:$0xff] }
 0x4ba   :  { %v4285_v10 = vmax.f32 %v4283_v15, %v4284_v5  ;;  %v4373_v30 = vrot.slane %v4372_v60, 2  ;;  %v4459_v9 = vsel %vm2097_vm7, %v4348_v23, %v4458_v3  ;;  %v4326_v43 = vrot.slane %v9149_v56, 1  ;;  %v6382_v27 = vld [vmem:[%s10668_s3 + $0x420] sm:$0xff]  ;;  %v6389_v54 = vld [vmem:[%s10668_s3 + $0x458] sm:$0xff] }
 0x4bb   :  { %4472 = vrot.lane.b32.xlu0 %v4278_v46, %s7865_s8  ;;  %v4361_v58 = vrot.slane %v4360_v6, 1  ;;  %v4313_v2 = vmax.f32 %v9153_v31, %v4312_v61  ;;  %v4338_v1 = vrot.slane %v9156_v20, 2  ;;  %v4351_v57 = vmax.f32 %v9167_v39, %v4350_v51 }
 0x4bc   :  { %4474 = vrot.lane.b32.xlu1 %v4285_v10, %s7865_s8  ;;  %v4374_v36 = vmax.f32 %v4372_v60, %v4373_v30  ;;  %v4327_v22 = vmax.f32 %v9149_v56, %v4326_v43  ;;  %v4363_v19 = vsel %vm207_vm2, %v4125_v16, -inf  ;;  %v4377_v31 = vsel %vm207_vm2, %v4133_v18, -inf  ;;  %v6387_v60 = vld [vmem:[%s10668_s3 + $0x448] sm:$0xff] }
 0x4bd   :  { %v4362_v24 = vmax.f32 %v4360_v6, %v4361_v58  ;;  %v4339_v53 = vmax.f32 %v9156_v20, %v4338_v1  ;;  %v4352_v28 = vrot.slane %v4351_v57, 2  ;;  %v4364_v39 = vrot.slane %v4363_v19, 4  ;;  %v6386_v1 = vld [vmem:[%s10668_s3 + $0x440] sm:$0xff] }
 0x4be   :  { %v4375_v51 = vrot.slane %v4374_v36, 1  ;;  %v4378_v25 = vrot.slane %v4377_v31, 4  ;;  %v4462_v49 = vsel %vm2091_vm4, %v4313_v2, %v4299_v45  ;;  %v4140_v14 = vrot.slane %v4013_v0, %v8115_v13  ;;  %v6381_v0 = vld [vmem:[%s10668_s3 + $0x418] sm:$0xff]  ;;  %v6384_v45 = vld [vmem:[%s10668_s3 + $0x430] sm:$0xff] }
 0x4bf   :  { %v4460_v56 = vsel %vm2099_vm8, %v4362_v24, %v4459_v9  ;;  %v4340_v16 = vrot.slane %v4339_v53, 1  ;;  %v4353_v50 = vmax.f32 %v4351_v57, %v4352_v28  ;;  %v4365_v48 = vmax.f32 %v4363_v19, %v4364_v39  ;;  %v6388_v57 = vld [vmem:[%s10668_s3 + $0x450] sm:$0xff]  ;;  %v6393_v19 = vld [vmem:[%s10668_s3 + $0x478] sm:$0xff] }
 0x4c0   :  { %v4376_v18 = vmax.f32 %v4374_v36, %v4375_v51  ;;  %v4379_v37 = vmax.f32 %v4377_v31, %v4378_v25  ;;  %v4463_v20 = vsel %vm2093_vm5, %v4327_v22, %v4462_v49  ;;  %v4384_v4 = vsel %vm207_vm2, %v4140_v14, -inf  ;;  %v6391_v22 = vld [vmem:[%s10668_s3 + $0x468] sm:$0xff]  ;;  %v6390_v51 = vld [vmem:[%s10668_s3 + $0x460] sm:$0xff]  ;;  %v6392_v25 = vld [vmem:[%s10668_s3 + $0x470] sm:$0xff] }
 0x4c1   :  { %v4341_v11 = vmax.f32 %v4339_v53, %v4340_v16  ;;  %v4354_v26 = vrot.slane %v4353_v50, 1  ;;  %v4366_v34 = vrot.slane %v4365_v48, 2  ;;  %v4385_v55 = vrot.slane %v4384_v4, 4  ;;  %v6395_v49 = vld [vmem:[%s10668_s3 + $0x488] sm:$0xff] }
 0x4c2   :  { %v4461_v52 = vsel %vm2101_vm9, %v4376_v18, %v4460_v56  ;;  %v4380_v7 = vrot.slane %v4379_v37, 2  ;;  %v4141_v32 = vcombine.high %v4140_v14, %v4140_v14  ;;  %vm4400_vm4 = vcmask 523264   ;;  %v6397_v14 = vld [vmem:[%s10668_s3 + $0x498] sm:$0xff] }
 0x4c3   :  { %4476 = vrot.lane.b32.xlu0 %v4461_v52, %s7865_s8  ;;  %v4355_v42 = vmax.f32 %v4353_v50, %v4354_v26  ;;  %v4367_v41 = vmax.f32 %v4365_v48, %v4366_v34  ;;  %v4464_v44 = vsel %vm2095_vm6, %v4341_v11, %v4463_v20  ;;  %v4386_v8 = vmax.f32 %v4384_v4, %v4385_v55  ;;  %v6396_v52 = vld [vmem:[%s10668_s3 + $0x490] sm:$0xff] }
 0x4c4   :  { %4401 = vst.msk [vmem:[#allocation4 + $0x10] sm:$0xff] %vm4400_vm4, %v9283_v40  ;;  %4408 = vst.msk [vmem:[#allocation4 + $0x40] sm:$0xff] %vm4400_vm4, %v9283_v40  ;;  %v4381_v17 = vmax.f32 %v4379_v37, %v4380_v7  ;;  %v4391_v29 = vsel %vm207_vm2, %v4141_v32, -inf  ;;  %v7153_v59 = vpack.c.bf16 %v6381_v0, %v6379_v38  ;;  %v7155_v23 = vpack.c.bf16 %v6380_v35, %v6378_v47  ;;  %v6394_v0 = vld [vmem:[%s10668_s3 + $0x480] sm:$0xff] }
 0x4c5   :  { %v4368_v15 = vrot.slane %v4367_v41, 1  ;;  %v4465_v21 = vsel %vm2097_vm7, %v4355_v42, %v4464_v44  ;;  %v4387_v63 = vrot.slane %v4386_v8, 2  ;;  %v4392_v12 = vrot.slane %v4391_v29, 4  ;;  %v6399_v42 = vld [vmem:[%s10668_s3 + $0x4a8] sm:$0xff] }
 0x4c6   :  { %v4382_v5 = vrot.slane %v4381_v17, 1  ;;  %7154 = vmatprep.subr.bf16.mxu0 %v7153_v59  ;;  %vm4404_vm6 = vcmask 517120   ;;  %v7157_v10 = vpack.c.bf16 %v6385_v33, %v6383_v62  ;;  %v7159_v30 = vpack.c.bf16 %v6384_v45, %v6382_v27  ;;  %v6398_v59 = vld [vmem:[%s10668_s3 + $0x4a0] sm:$0xff]  ;;  %v6400_v62 = vld [vmem:[%s10668_s3 + $0x4b0] sm:$0xff] }
 0x4c7   :  { %v4369_v46 = vmax.f32 %v4367_v41, %v4368_v15  ;;  %v4388_v6 = vmax.f32 %v4386_v8, %v4387_v63  ;;  %v4393_v3 = vmax.f32 %v4391_v29, %v4392_v12  ;;  %4405 = vst.msk [vmem:[#allocation4 + $0x28] sm:$0x3] %vm4404_vm6, %v9283_v40  ;;  %4411 = vst.msk [vmem:[#allocation4 + $0x58] sm:$0x3] %vm4404_vm6, %v9283_v40  ;;  %7156 = vmatpush1.bf16.msra.mxu0 %v7155_v23  ;;  %v6401_v41 = vld [vmem:[%s10668_s3 + $0x4b8] sm:$0xff]  ;;  %v6404_v23 = vld [vmem:[%s10668_s3 + $0x4d0] sm:$0xff] }
 0x4c8   :  { %v4383_v61 = vmax.f32 %v4381_v17, %v4382_v5  ;;  %v7161_v2 = vpack.c.bf16 %v6389_v54, %v6387_v60  ;;  %7158 = vmatprep.subr.bf16.mxu0 %v7157_v10  ;;  %v7163_v53 = vpack.c.bf16 %v6388_v57, %v6386_v1  ;;  %v7165_v39 = vpack.c.bf16 %v6393_v19, %v6391_v22  ;;  %v6405_v63 = vld [vmem:[%s10668_s3 + $0x4d8] sm:$0xff]  ;;  %v6402_v5 = vld [vmem:[%s10668_s3 + $0x4c0] sm:$0xff]  ;;  %v6407_v54 = vld [vmem:[%s10668_s3 + $0x4e8] sm:$0xff] }
 0x4c9   :  { %v4466_v9 = vsel %vm2099_vm8, %v4369_v46, %v4465_v21  ;;  %v4389_v43 = vrot.slane %v4388_v6, 1  ;;  %v4394_v58 = vrot.slane %v4393_v3, 2  ;;  %v7167_v16 = vpack.c.bf16 %v6392_v25, %v6390_v51  ;;  %v6403_v21 = vld [vmem:[%s10668_s3 + $0x4c8] sm:$0xff]  ;;  %v6409_v46 = vld [vmem:[%s10668_s3 + $0x4f8] sm:$0xff]  ;;  %v6408_v10 = vld [vmem:[%s10668_s3 + $0x4f0] sm:$0xff] }
 0x4ca   :  { %v4467_v36 = vsel %vm2101_vm9, %v4383_v61, %v4466_v9  ;;  %v7169_v50 = vpack.c.bf16 %v6397_v14, %v6395_v49  ;;  %vm4500_vm8 = vcmask 1047809   ;;  %v7171_v35 = vpack.c.bf16 %v6396_v52, %v6394_v0  ;;  %v6406_v61 = vld [vmem:[%s10668_s3 + $0x4e0] sm:$0xff]  ;;  %v4523_v9 = vld [vmem:[%s10668_s3 + $0x8] sm:$0xff]  ;;  %v4524_v14 = vld [vmem:[%s10668_s3 + $0x10] sm:$0xff] }
 0x4cb   :  { %4478 = vrot.lane.b32.xlu1 %v4467_v36, %s7865_s8  ;;  %v4390_v31 = vmax.f32 %v4388_v6, %v4389_v43  ;;  %v4395_v24 = vmax.f32 %v4393_v3, %v4394_v58  ;;  %7160 = vmatpush1.bf16.msra.mxu0 %v7159_v30  ;;  %v7173_v29 = vpack.c.bf16 %v6401_v41, %v6399_v42  ;;  %v4525_v43 = vld [vmem:[%s10668_s3 + $0x18] sm:$0xff]  ;;  %v4522_v49 = vld [vmem:[%s10668_s3] sm:$0xff]  ;;  %v4531_v0 = vld [vmem:[%s10668_s3 + $0x48] sm:$0xff] }
 0x4cc   :  { %7162 = vmatprep.subr.bf16.mxu0 %v7161_v2  ;;  %v7175_v33 = vpack.c.bf16 %v6400_v62, %v6398_v59  ;;  %v7177_v45 = vpack.c.bf16 %v6405_v63, %v6403_v21  ;;  %v7179_v6 = vpack.c.bf16 %v6404_v23, %v6402_v5  ;;  %v7181_v3 = vpack.c.bf16 %v6409_v46, %v6407_v54  ;;  %v4533_v52 = vld [vmem:[%s10668_s3 + $0x58] sm:$0xff]  ;;  %v4530_v41 = vld [vmem:[%s10668_s3 + $0x40] sm:$0xff]  ;;  %v4539_v21 = vld [vmem:[%s10668_s3 + $0x88] sm:$0xff] }
 0x4cd   :  { %4480 = vrot.lane.b32.xlu0 %v4390_v31, %s7865_s8  ;;  %v4396_v28 = vrot.slane %v4395_v24, 1  ;;  %v7183_v2 = vpack.c.bf16 %v6408_v10, %v6406_v61  ;;  %v7185_v1 = vpack.c.bf16 %v4525_v43, %v4523_v9  ;;  %v7193_v42 = vpack.c.bf16 %v4533_v52, %v4531_v0  ;;  %v4534_v62 = vld [vmem:[%s10668_s3 + $0x60] sm:$0xff]  ;;  %v4541_v63 = vld [vmem:[%s10668_s3 + $0x98] sm:$0xff]  ;;  %v4543_v5 = vld [vmem:[%s10668_s3 + $0xa8] sm:$0xff] }
 0x4ce   :  { %v4545_v23 = vld [vmem:[%s10668_s3 + $0xb8] sm:$0xff]  ;;  %v4542_v46 = vld [vmem:[%s10668_s3 + $0xa0] sm:$0xff]  ;;  %v4548_v43 = vld [vmem:[%s10668_s3 + $0xd0] sm:$0xff] }
 0x4cf   :  { %v4397_v56 = vmax.f32 %v4395_v24, %v4396_v28  ;;  %7164 = vmatpush1.bf16.msra.mxu0 %v7163_v53  ;;  %v7205_v54 = vpack.c.bf16 %v4545_v23, %v4543_v5  ;;  %v4549_v61 = vld [vmem:[%s10668_s3 + $0xd8] sm:$0xff]  ;;  %v4546_v9 = vld [vmem:[%s10668_s3 + $0xc0] sm:$0xff] }
 0x4d0   :  { %7166 = vmatprep.subr.bf16.mxu0 %v7165_v39  ;;  %v5547_v0 = vld [vmem:[%s10669_s4 + $0x20] sm:$0xff]  ;;  %v5558_v5 = vld [vmem:[%s10669_s4 + $0x78] sm:$0xff] }
 0x4d1   :  { %4482 = vrot.lane.b32.xlu1 %v4397_v56, %s7865_s8  ;;  %v5543_v52 = vld [vmem:[%s10669_s4] sm:$0xff] }
 0x4d3   :  { %7168 = vmatpush1.bf16.msra.mxu0 %v7167_v16 }
 0x4d4   :  { %7170 = vmatprep.subr.bf16.mxu0 %v7169_v50  ;;  %v4527_v50 = vld [vmem:[%s10668_s3 + $0x28] sm:$0xff] }
 0x522   :  { %v4469_v48 = vpop.permute.xlu0 %4468 }
 0x523   :  { %4501 = vst.msk [vmem:[#allocation4] sm:$0xfe] %vm4500_vm8, %v4469_v48 }
 0x529   :  { %v4471_v18 = vpop.permute.xlu1 %4470 }
 0x52a   :  { %v4484_v37 = vsel %vm2009_vm11, %v4469_v48, %v4471_v18  ;;  %4504 = vst.msk [vmem:[#allocation4 + $0x10] sm:$0xfe] %vm4503_vm14, %v4471_v18  ;;  %v4602_v38 = vld [vmem:[#allocation4] sm:$0xfe]  ;;  %v4529_v48 = vld [vmem:[%s10668_s3 + $0x38] sm:$0xff] }
 0x52b   :  { %4502 = vst [vmem:[#allocation4 + $0x8] sm:$0xfe] %v4484_v37  ;;  %v4626_v47 = vrot.slane %v4602_v38, 1 }
 0x52d   :  { %v4473_v20 = vpop.permute.xlu0 %4472 }
 0x52e   :  { %4506 = vst.msk [vmem:[#allocation4 + $0x18] sm:$0x1] %vm4505_vm15, %v4473_v20  ;;  %v4475_v4 = vpop.permute.xlu1 %4474 }
 0x52f   :  { %v4485_v11 = vsel %vm2009_vm11, %v4473_v20, %v4475_v4  ;;  %4509 = vst.msk [vmem:[#allocation4 + $0x28] sm:$0x1] %vm4508_vm0, %v4475_v4  ;;  %v7187_v20 = vpack.c.bf16 %v4524_v14, %v4522_v49 }
 0x530   :  { %4507 = vst [vmem:[#allocation4 + $0x20] sm:$0x1] %v4485_v11  ;;  %v7189_v11 = vpack.c.bf16 %v4529_v48, %v4527_v50  ;;  %v4563_v50 = vld [vmem:[%s10668_s3 + $0x148] sm:$0xff]  ;;  %v4565_v48 = vld [vmem:[%s10668_s3 + $0x158] sm:$0xff] }
 0x531   :  { %v4604_v25 = vld [vmem:[#allocation4 + $0x10] sm:$0xfe] }
 0x532   :  { %v4603_v34 = vld [vmem:[#allocation4 + $0x8] sm:$0xfe]  ;;  %v4632_v37 = vrot.slane %v4604_v25, 1  ;;  %v4561_v25 = vld [vmem:[%s10668_s3 + $0x138] sm:$0xff] }
 0x533   :  { %v4629_v44 = vrot.slane %v4603_v34, 1  ;;  %v4528_v34 = vld [vmem:[%s10668_s3 + $0x30] sm:$0xff] }
 0x535   :  { %v4477_v26 = vpop.permute.xlu0 %4476  ;;  %v4605_v55 = vld [vmem:[#allocation4 + $0x18] sm:$0x1] }
 0x536   :  { %4510 = vst.msk [vmem:[#allocation4 + $0x30] sm:$0xfe] %vm4500_vm8, %v4477_v26  ;;  %v4627_v32 = vrot.slane %v4605_v55, 1  ;;  %v4607_v28 = vld [vmem:[#allocation4 + $0x28] sm:$0x1] }
 0x537   :  { %v4606_v7 = vld [vmem:[#allocation4 + $0x20] sm:$0x1]  ;;  %v4633_v16 = vrot.slane %v4607_v28, 1 }
 0x538   :  { %v4630_v8 = vrot.slane %v4606_v7, 1  ;;  %v4628_v15 = vsel %vm2408_vm12, %v4626_v47, %v4627_v32  ;;  %v4535_v47 = vld [vmem:[%s10668_s3 + $0x68] sm:$0xff]  ;;  %v4554_v28 = vld [vmem:[%s10668_s3 + $0x100] sm:$0xff] }
 0x539   :  { %v4634_v55 = vsel %vm2408_vm12, %v4632_v37, %v4633_v16  ;;  %v4560_v16 = vld [vmem:[%s10668_s3 + $0x130] sm:$0xff]  ;;  %v7225_v37 = vpack.c.bf16 %v4565_v48, %v4563_v50 }
 0x53a   :  { %v4631_v17 = vsel %vm2408_vm12, %v4629_v44, %v4630_v8  ;;  %v4532_v44 = vld [vmem:[%s10668_s3 + $0x50] sm:$0xff] }
 0x53b   :  { %4797 = vmatprep.mubr.f32.mxu0 %v4631_v17  ;;  %v4517_v17 = vld [vmem:[#allocation4 + $0x8] sm:$0xff] }
 0x53c   :  { %4798 = vmatmul.mubr.f32.vlgmr.msra.gmra.mrb[24].mxu0 %v4628_v15  ;;  %v4536_v15 = vld [vmem:[%s10668_s3 + $0x70] sm:$0xff] }
 0x53d   :  { %v4479_v12 = vpop.permute.xlu1 %4478  ;;  %7172 = vmatpush1.bf16.msra.mxu0 %v7171_v35  ;;  %v4608_v22 = vld [vmem:[#allocation4 + $0x30] sm:$0xfe]  ;;  %v4537_v35 = vld [vmem:[%s10668_s3 + $0x78] sm:$0xff] }
 0x53e   :  { %v4486_v27 = vsel %vm2009_vm11, %v4477_v26, %v4479_v12  ;;  %4512 = vst.msk [vmem:[#allocation4 + $0x40] sm:$0xfe] %vm4503_vm14, %v4479_v12  ;;  %7174 = vmatprep.subr.bf16.mxu0 %v7173_v29  ;;  %v4635_v39 = vrot.slane %v4608_v22, 1  ;;  %v4526_v26 = vld [vmem:[%s10668_s3 + $0x20] sm:$0xff]  ;;  %v7195_v29 = vpack.c.bf16 %v4532_v44, %v4530_v41  ;;  %v7197_v59 = vpack.c.bf16 %v4537_v35, %v4535_v47  ;;  %v4552_v22 = vld [vmem:[%s10668_s3 + $0xf0] sm:$0xff]  ;;  %v5550_v41 = vld [vmem:[%s10669_s4 + $0x38] sm:$0xff] }
 0x53f   :  { %4511 = vst [vmem:[#allocation4 + $0x38] sm:$0xfe] %v4486_v27  ;;  %v4481_v60 = vpop.permute.xlu0 %4480  ;;  %v7191_v32 = vpack.c.bf16 %v4528_v34, %v4526_v26  ;;  %v7199_v12 = vpack.c.bf16 %v4536_v15, %v4534_v62  ;;  %v4538_v27 = vld [vmem:[%s10668_s3 + $0x80] sm:$0xff]  ;;  %v4569_v26 = vld [vmem:[%s10668_s3 + $0x178] sm:$0xff]  ;;  %v5553_v44 = vld [vmem:[%s10669_s4 + $0x50] sm:$0xff] }
 0x540   :  { %4513 = vst.msk [vmem:[#allocation4 + $0x48] sm:$0x1] %vm4505_vm15, %v4481_v60  ;;  %v4566_v34 = vld [vmem:[%s10668_s3 + $0x160] sm:$0xff]  ;;  %v7349_v35 = vpack.c.bf16 %v5553_v44, %v5550_v41  ;;  %v4571_v62 = vld [vmem:[%s10668_s3 + $0x188] sm:$0xff]  ;;  %v4573_v15 = vld [vmem:[%s10668_s3 + $0x198] sm:$0xff] }
 0x541   :  { %7176 = vmatpush1.bf16.msra.mxu0 %v7175_v33  ;;  %v7201_v33 = vpack.c.bf16 %v4541_v63, %v4539_v21  ;;  %v5559_v21 = vld [vmem:[%s10669_s4 + $0x80] sm:$0xff]  ;;  %v7233_v23 = vpack.c.bf16 %v4573_v15, %v4571_v62  ;;  %v4596_v44 = vld [vmem:[%s10668_s3 + $0x250] sm:$0xff]  ;;  %v6415_v15 = vld [vmem:[%s10668_s3 + $0x508] sm:$0xff] }
 0x542   :  { %7178 = vmatprep.subr.bf16.mxu0 %v7177_v45  ;;  %v4540_v45 = vld [vmem:[%s10668_s3 + $0x90] sm:$0xff]  ;;  %v4594_v41 = vld [vmem:[%s10668_s3 + $0x240] sm:$0xff] }
 0x543   :  { %v4483_v30 = vpop.permute.xlu1 %4482  ;;  %v4600_v62 = vld [vmem:[%s10668_s3 + $0x270] sm:$0xff] }
 0x544   :  { %v4487_v58 = vsel %vm2009_vm11, %v4481_v60, %v4483_v30  ;;  %4515 = vst.msk [vmem:[#allocation4 + $0x58] sm:$0x1] %vm4508_vm0, %v4483_v30  ;;  %v7203_v60 = vpack.c.bf16 %v4540_v45, %v4538_v27  ;;  %v5555_v45 = vld [vmem:[%s10669_s4 + $0x60] sm:$0xff]  ;;  %vm6228_vm11 = vcmask 74752  }
 0x545   :  { %4514 = vst [vmem:[#allocation4 + $0x50] sm:$0x1] %v4487_v58  ;;  %7180 = vmatpush1.bf16.msra.mxu0 %v7179_v6  ;;  %v4610_v4 = vld [vmem:[#allocation4 + $0x40] sm:$0xfe]  ;;  %v4544_v6 = vld [vmem:[%s10668_s3 + $0xb0] sm:$0xff]  ;;  %v4551_v58 = vld [vmem:[%s10668_s3 + $0xe8] sm:$0xff] }
 0x546   :  { %7182 = vmatprep.subr.bf16.mxu0 %v7181_v3  ;;  %v4609_v36 = vld [vmem:[#allocation4 + $0x38] sm:$0xfe]  ;;  %v4641_v7 = vrot.slane %v4610_v4, 1  ;;  %v4547_v3 = vld [vmem:[%s10668_s3 + $0xc8] sm:$0xff]  ;;  %v7207_v10 = vpack.c.bf16 %v4544_v6, %v4542_v46  ;;  %v4564_v4 = vld [vmem:[%s10668_s3 + $0x150] sm:$0xff] }
 0x547   :  { %v4611_v57 = vld [vmem:[#allocation4 + $0x48] sm:$0x1]  ;;  %v4638_v24 = vrot.slane %v4609_v36, 1  ;;  %v7209_v30 = vpack.c.bf16 %v4549_v61, %v4547_v3  ;;  %v4550_v36 = vld [vmem:[%s10668_s3 + $0xe0] sm:$0xff]  ;;  %v5565_v46 = vld [vmem:[%s10669_s4 + $0xb0] sm:$0xff]  ;;  %v7355_v61 = vpack.c.bf16 %v5558_v5, %v5555_v45 }
 0x548   :  { %v4636_v31 = vrot.slane %v4611_v57, 1  ;;  %v4575_v6 = vld [vmem:[%s10668_s3 + $0x1a8] sm:$0xff]  ;;  %v4577_v3 = vld [vmem:[%s10668_s3 + $0x1b8] sm:$0xff] }
 0x549   :  { %7184 = vmatpush1.bf16.msra.mxu0 %v7183_v2  ;;  %v4553_v2 = vld [vmem:[%s10668_s3 + $0xf8] sm:$0xff]  ;;  %v6419_v45 = vld [vmem:[%s10668_s3 + $0x528] sm:$0xff] }
 0x54a   :  { %7186 = vmatprep.subr.bf16.mxu0 %v7185_v1  ;;  %v4637_v56 = vsel %vm2408_vm12, %v4635_v39, %v4636_v31  ;;  %v7211_v1 = vpack.c.bf16 %v4548_v43, %v4546_v9  ;;  %v7213_v57 = vpack.c.bf16 %v4553_v2, %v4551_v58  ;;  %v4557_v31 = vld [vmem:[%s10668_s3 + $0x118] sm:$0xff]  ;;  %v4556_v39 = vld [vmem:[%s10668_s3 + $0x110] sm:$0xff]  ;;  %v5564_v43 = vld [vmem:[%s10669_s4 + $0xa8] sm:$0xff]  ;;  %v7237_v58 = vpack.c.bf16 %v4577_v3, %v4575_v6 }
 0x54b   :  { %v4613_v18 = vld [vmem:[#allocation4 + $0x58] sm:$0x1]  ;;  %v7219_v49 = vpack.c.bf16 %v4556_v39, %v4554_v28  ;;  %v5561_v9 = vld [vmem:[%s10669_s4 + $0x90] sm:$0xff]  ;;  %v4574_v2 = vld [vmem:[%s10668_s3 + $0x1a0] sm:$0xff] }
 0x54c   :  { %v4612_v19 = vld [vmem:[#allocation4 + $0x50] sm:$0x1]  ;;  %v4642_v38 = vrot.slane %v4613_v18, 1  ;;  %v4583_v28 = vld [vmem:[%s10668_s3 + $0x1e8] sm:$0xff]  ;;  %v4585_v39 = vld [vmem:[%s10668_s3 + $0x1f8] sm:$0xff] }
 0x54d   :  { %v4639_v53 = vrot.slane %v4612_v19, 1  ;;  %v4555_v19 = vld [vmem:[%s10668_s3 + $0x108] sm:$0xff]  ;;  %v6421_v5 = vld [vmem:[%s10668_s3 + $0x538] sm:$0xff]  ;;  %v6420_v6 = vld [vmem:[%s10668_s3 + $0x530] sm:$0xff] }
 0x54e   :  { %v4643_v8 = vsel %vm2408_vm12, %v4641_v7, %v4642_v38  ;;  %v5544_v38 = vld [vmem:[%s10669_s4 + $0x8] sm:$0xff] }
 0x54f   :  { %v4640_v51 = vsel %vm2408_vm12, %v4638_v24, %v4639_v53  ;;  %v7215_v24 = vpack.c.bf16 %v4552_v22, %v4550_v36  ;;  %v7217_v53 = vpack.c.bf16 %v4557_v31, %v4555_v19  ;;  %v4581_v36 = vld [vmem:[%s10668_s3 + $0x1d8] sm:$0xff]  ;;  %v7359_v22 = vpack.c.bf16 %v5564_v43, %v5561_v9  ;;  %v6423_v3 = vld [vmem:[%s10668_s3 + $0x548] sm:$0xff] }
 0x550   :  { %4803 = vmatprep.mubr.f32.mxu0 %v4640_v51  ;;  %v4559_v51 = vld [vmem:[%s10668_s3 + $0x128] sm:$0xff] }
 0x551   :  { %4804 = vmatmul.mubr.f32.gmra.mrb[26].mxu0 %v4637_v56  ;;  %v7221_v14 = vpack.c.bf16 %v4561_v25, %v4559_v51  ;;  %v4558_v56 = vld [vmem:[%s10668_s3 + $0x120] sm:$0xff]  ;;  %v7245_v25 = vpack.c.bf16 %v4585_v39, %v4583_v28  ;;  %v6428_v39 = vld [vmem:[%s10668_s3 + $0x570] sm:$0xff] }
 0x552   :  { %4874 = vmatprep.mubr.f32.mxu0 %v9283_v40  ;;  %v7223_v18 = vpack.c.bf16 %v4560_v16, %v4558_v56  ;;  %v4587_v56 = vld [vmem:[%s10668_s3 + $0x208] sm:$0xff]  ;;  %v4589_v16 = vld [vmem:[%s10668_s3 + $0x218] sm:$0xff]  ;;  %v6426_v28 = vld [vmem:[%s10668_s3 + $0x560] sm:$0xff] }
 0x553   :  { %v7249_v48 = vpack.c.bf16 %v4589_v16, %v4587_v56  ;;  %v6430_v56 = vld [vmem:[%s10668_s3 + $0x580] sm:$0xff]  ;;  %v6432_v16 = vld [vmem:[%s10668_s3 + $0x590] sm:$0xff] }
 0x555   :  { %6410 = vmatmul.mubr.msk.f32.vlgmr.msra.gmra.mrb[24].mxu0 %vm4400_vm4, %v4634_v55  ;;  %v4568_v55 = vld [vmem:[%s10668_s3 + $0x170] sm:$0xff] }
 0x556   :  { %7188 = vmatpush1.bf16.msra.mxu0 %v7187_v20  ;;  %4880 = vmatprep.mubr.f32.mxu0 %v9283_v40  ;;  %v4562_v20 = vld [vmem:[%s10668_s3 + $0x140] sm:$0xff] }
 0x557   :  { %7190 = vmatprep.subr.bf16.mxu0 %v7189_v11  ;;  %v4567_v11 = vld [vmem:[%s10668_s3 + $0x168] sm:$0xff]  ;;  %v7227_v7 = vpack.c.bf16 %v4564_v4, %v4562_v20  ;;  %v4593_v4 = vld [vmem:[%s10668_s3 + $0x238] sm:$0xff] }
 0x558   :  { %v4591_v20 = vld [vmem:[%s10668_s3 + $0x228] sm:$0xff] }
 0x559   :  { %6411 = vmatmul.mubr.msk.f32.gmra.mrb[26].mxu0 %vm4400_vm4, %v4643_v8  ;;  %v7229_v8 = vpack.c.bf16 %v4569_v26, %v4567_v11  ;;  %v7253_v26 = vpack.c.bf16 %v4593_v4, %v4591_v20  ;;  %v6434_v20 = vld [vmem:[%s10668_s3 + $0x5a0] sm:$0xff]  ;;  %v6436_v4 = vld [vmem:[%s10668_s3 + $0x5b0] sm:$0xff] }
 0x55a   :  { %7192 = vmatpush1.bf16.msra.mxu0 %v7191_v32  ;;  %4957 = vmatprep.mubr.f32.mxu0 %v4517_v17  ;;  %v7345_v32 = vpack.c.bf16 %v5547_v0, %v5544_v38  ;;  %v5549_v17 = vld [vmem:[%s10669_s4 + $0x30] sm:$0xff]  ;;  %v4516_v38 = vld [vmem:[#allocation4] sm:$0xff]  ;;  %v4595_v0 = vld [vmem:[%s10668_s3 + $0x248] sm:$0xff] }
 0x55b   :  { %7194 = vmatprep.subr.bf16.mxu0 %v7193_v42  ;;  %v5546_v42 = vld [vmem:[%s10669_s4 + $0x18] sm:$0xff] }
 0x55c   :  { %v7347_v47 = vpack.c.bf16 %v5546_v42, %v5543_v52  ;;  %7346 = vmatprep.subr.bf16.mxu1 %v7345_v32  ;;  %v4597_v52 = vld [vmem:[%s10668_s3 + $0x258] sm:$0xff] }
 0x55d   :  { %v7257_v42 = vpack.c.bf16 %v4597_v52, %v4595_v0  ;;  %v6440_v0 = vld [vmem:[%s10668_s3 + $0x5d0] sm:$0xff]  ;;  %v6443_v52 = vld [vmem:[%s10668_s3 + $0x5e8] sm:$0xff] }
 0x55e   :  { %7196 = vmatpush1.bf16.msra.mxu0 %v7195_v29  ;;  %v5552_v29 = vld [vmem:[%s10669_s4 + $0x48] sm:$0xff]  ;;  %7348 = vmatpush1.bf16.msra.mxu1 %v7347_v47 }
 0x55f   :  { %7198 = vmatprep.subr.bf16.mxu0 %v7197_v59  ;;  %v5556_v59 = vld [vmem:[%s10669_s4 + $0x68] sm:$0xff]  ;;  %v7351_v63 = vpack.c.bf16 %v5552_v29, %v5549_v17  ;;  %7350 = vmatprep.subr.bf16.mxu1 %v7349_v35  ;;  %v4601_v35 = vld [vmem:[%s10668_s3 + $0x278] sm:$0xff]  ;;  %v7259_v17 = vpack.c.bf16 %v4596_v44, %v4594_v41  ;;  %v6442_v41 = vld [vmem:[%s10668_s3 + $0x5e0] sm:$0xff] }
 0x560   :  { %v7353_v27 = vpack.c.bf16 %v5559_v21, %v5556_v59  ;;  %v4599_v47 = vld [vmem:[%s10668_s3 + $0x268] sm:$0xff]  ;;  %v4598_v59 = vld [vmem:[%s10668_s3 + $0x260] sm:$0xff]  ;;  %v6417_v21 = vld [vmem:[%s10668_s3 + $0x518] sm:$0xff] }
 0x561   :  { %v7261_v29 = vpack.c.bf16 %v4601_v35, %v4599_v47  ;;  %v6444_v44 = vld [vmem:[%s10668_s3 + $0x5f0] sm:$0xff]  ;;  %v6449_v47 = vld [vmem:[%s10668_s3 + $0x618] sm:$0xff] }
 0x562   :  { %7200 = vmatpush1.bf16.msra.mxu0 %v7199_v12  ;;  %v7231_v12 = vpack.c.bf16 %v4568_v55, %v4566_v34  ;;  %7352 = vmatpush1.bf16.msra.mxu1 %v7351_v63  ;;  %v4590_v34 = vld [vmem:[%s10668_s3 + $0x220] sm:$0xff]  ;;  %v4592_v55 = vld [vmem:[%s10668_s3 + $0x230] sm:$0xff]  ;;  %v7263_v63 = vpack.c.bf16 %v4600_v62, %v4598_v59  ;;  %v7295_v35 = vpack.c.bf16 %v6444_v44, %v6442_v41  ;;  %v6451_v62 = vld [vmem:[%s10668_s3 + $0x628] sm:$0xff] }
 0x563   :  { %7202 = vmatprep.subr.bf16.mxu0 %v7201_v33  ;;  %v4570_v33 = vld [vmem:[%s10668_s3 + $0x180] sm:$0xff]  ;;  %7354 = vmatprep.subr.bf16.mxu1 %v7353_v27  ;;  %v7255_v32 = vpack.c.bf16 %v4592_v55, %v4590_v34  ;;  %v6416_v27 = vld [vmem:[%s10668_s3 + $0x510] sm:$0xff]  ;;  %v7287_v34 = vpack.c.bf16 %v6436_v4, %v6434_v20  ;;  %v6479_v20 = vld [vmem:[%s10668_s3 + $0x708] sm:$0xff] }
 0x564   :  { %v6448_v59 = vld [vmem:[%s10668_s3 + $0x610] sm:$0xff]  ;;  %v6481_v4 = vld [vmem:[%s10668_s3 + $0x718] sm:$0xff] }
 0x565   :  { %v6485_v41 = vld [vmem:[%s10668_s3 + $0x738] sm:$0xff] }
 0x566   :  { %7204 = vmatpush1.bf16.msra.mxu0 %v7203_v60  ;;  %v4572_v60 = vld [vmem:[%s10668_s3 + $0x190] sm:$0xff]  ;;  %7356 = vmatpush1.bf16.msra.mxu1 %v7355_v61 }
 0x567   :  { %7206 = vmatprep.subr.bf16.mxu0 %v7205_v54  ;;  %v5562_v54 = vld [vmem:[%s10669_s4 + $0x98] sm:$0xff]  ;;  %v4518_v61 = vld [vmem:[#allocation4 + $0x10] sm:$0xff] }
 0x56a   :  { %7208 = vmatpush1.bf16.msra.mxu0 %v7207_v10  ;;  %v7235_v10 = vpack.c.bf16 %v4572_v60, %v4570_v33  ;;  %v6414_v33 = vld [vmem:[%s10668_s3 + $0x500] sm:$0xff] }
 0x56b   :  { %7210 = vmatprep.subr.bf16.mxu0 %v7209_v30  ;;  %v7357_v30 = vpack.c.bf16 %v5565_v46, %v5562_v54  ;;  %v5051_v60 = vld [vmem:[#allocation4 + $0x20] sm:$0x3]  ;;  %v7269_v54 = vpack.c.bf16 %v6421_v5, %v6419_v45  ;;  %v6457_v45 = vld [vmem:[%s10668_s3 + $0x658] sm:$0xff] }
 0x56c   :  { %v6418_v46 = vld [vmem:[%s10668_s3 + $0x520] sm:$0xff]  ;;  %v5075_v9 = vrot.slane %v5051_v60, 2 }
 0x56d   :  { %7358 = vmatprep.subr.bf16.mxu1 %v7357_v30  ;;  %v6425_v30 = vld [vmem:[%s10668_s3 + $0x558] sm:$0xff]  ;;  %v7271_v43 = vpack.c.bf16 %v6420_v6, %v6418_v46  ;;  %v6454_v60 = vld [vmem:[%s10668_s3 + $0x640] sm:$0xff]  ;;  %v6459_v46 = vld [vmem:[%s10668_s3 + $0x668] sm:$0xff] }
 0x56e   :  { %7212 = vmatpush1.bf16.msra.mxu0 %v7211_v1  ;;  %v4576_v1 = vld [vmem:[%s10668_s3 + $0x1b0] sm:$0xff]  ;;  %7360 = vmatpush1.bf16.msra.mxu1 %v7359_v22  ;;  %v6427_v22 = vld [vmem:[%s10668_s3 + $0x568] sm:$0xff]  ;;  %v6461_v6 = vld [vmem:[%s10668_s3 + $0x678] sm:$0xff] }
 0x56f   :  { %7214 = vmatprep.subr.bf16.mxu0 %v7213_v57  ;;  %v4579_v57 = vld [vmem:[%s10668_s3 + $0x1c8] sm:$0xff]  ;;  %v7239_v19 = vpack.c.bf16 %v4576_v1, %v4574_v2  ;;  %v7273_v2 = vpack.c.bf16 %v6425_v30, %v6423_v3  ;;  %v6422_v1 = vld [vmem:[%s10668_s3 + $0x540] sm:$0xff]  ;;  %v6460_v30 = vld [vmem:[%s10668_s3 + $0x670] sm:$0xff] }
 0x570   :  { %v7241_v31 = vpack.c.bf16 %v4581_v36, %v4579_v57  ;;  %v6424_v57 = vld [vmem:[%s10668_s3 + $0x550] sm:$0xff]  ;;  %v4521_v36 = vld [vmem:[#allocation4 + $0x40] sm:$0xff] }
 0x572   :  { %7216 = vmatpush1.bf16.msra.mxu0 %v7215_v24  ;;  %v4578_v24 = vld [vmem:[%s10668_s3 + $0x1c0] sm:$0xff] }
 0x573   :  { %7218 = vmatprep.subr.bf16.mxu0 %v7217_v53  ;;  %v4580_v53 = vld [vmem:[%s10668_s3 + $0x1d0] sm:$0xff] }
 0x574   :  { %v7243_v51 = vpack.c.bf16 %v4580_v53, %v4578_v24  ;;  %v7275_v24 = vpack.c.bf16 %v6424_v57, %v6422_v1  ;;  %v6462_v1 = vld [vmem:[%s10668_s3 + $0x680] sm:$0xff]  ;;  %v6464_v57 = vld [vmem:[%s10668_s3 + $0x690] sm:$0xff] }
 0x576   :  { %7220 = vmatpush1.bf16.msra.mxu0 %v7219_v49  ;;  %v4582_v49 = vld [vmem:[%s10668_s3 + $0x1e0] sm:$0xff] }
 0x577   :  { %7222 = vmatprep.subr.bf16.mxu0 %v7221_v14  ;;  %v4584_v14 = vld [vmem:[%s10668_s3 + $0x1f0] sm:$0xff] }
 0x578   :  { %v7247_v50 = vpack.c.bf16 %v4584_v14, %v4582_v49  ;;  %v7279_v49 = vpack.c.bf16 %v6428_v39, %v6426_v28  ;;  %v6471_v28 = vld [vmem:[%s10668_s3 + $0x6c8] sm:$0xff]  ;;  %v6473_v39 = vld [vmem:[%s10668_s3 + $0x6d8] sm:$0xff] }
 0x57a   :  { %7224 = vmatpush1.bf16.msra.mxu0 %v7223_v18  ;;  %v4586_v18 = vld [vmem:[%s10668_s3 + $0x200] sm:$0xff] }
 0x57b   :  { %7226 = vmatprep.subr.bf16.mxu0 %v7225_v37  ;;  %v4588_v37 = vld [vmem:[%s10668_s3 + $0x210] sm:$0xff] }
 0x57c   :  { %v7251_v11 = vpack.c.bf16 %v4588_v37, %v4586_v18  ;;  %v7283_v18 = vpack.c.bf16 %v6432_v16, %v6430_v56  ;;  %v6475_v56 = vld [vmem:[%s10668_s3 + $0x6e8] sm:$0xff]  ;;  %v6477_v16 = vld [vmem:[%s10668_s3 + $0x6f8] sm:$0xff] }
 0x57e   :  { %7228 = vmatpush1.bf16.msra.mxu0 %v7227_v7  ;;  %v4520_v7 = vld [vmem:[#allocation4 + $0x38] sm:$0xff] }
 0x57f   :  { %7230 = vmatprep.subr.bf16.mxu0 %v7229_v8  ;;  %v4519_v8 = vld [vmem:[#allocation4 + $0x30] sm:$0xff] }
 0x582   :  { %7232 = vmatpush1.bf16.msra.mxu0 %v7231_v12  ;;  %v7265_v12 = vpack.c.bf16 %v6417_v21, %v6415_v15  ;;  %v6453_v15 = vld [vmem:[%s10668_s3 + $0x638] sm:$0xff] }
 0x583   :  { %7234 = vmatprep.subr.bf16.mxu0 %v7233_v23  ;;  %v7267_v23 = vpack.c.bf16 %v6416_v27, %v6414_v33  ;;  %v6452_v33 = vld [vmem:[%s10668_s3 + $0x630] sm:$0xff]  ;;  %v6455_v27 = vld [vmem:[%s10668_s3 + $0x648] sm:$0xff] }
 0x586   :  { %7236 = vmatpush1.bf16.msra.mxu0 %v7235_v10  ;;  %v5048_v10 = vld [vmem:[#allocation4 + $0x8] sm:$0xfc] }
 0x587   :  { %7238 = vmatprep.subr.bf16.mxu0 %v7237_v58  ;;  %v5074_v58 = vrot.slane %v5048_v10, 2  ;;  %v6458_v10 = vld [vmem:[%s10668_s3 + $0x660] sm:$0xff] }
 0x58a   :  { %7240 = vmatpush1.bf16.msra.mxu0 %v7239_v19  ;;  %v6429_v19 = vld [vmem:[%s10668_s3 + $0x578] sm:$0xff] }
 0x58b   :  { %7242 = vmatprep.subr.bf16.mxu0 %v7241_v31  ;;  %v5076_v31 = vsel %vm3346_vm13, %v5074_v58, %v5075_v9  ;;  %v7277_v53 = vpack.c.bf16 %v6429_v19, %v6427_v22  ;;  %v6463_v9 = vld [vmem:[%s10668_s3 + $0x688] sm:$0xff]  ;;  %v7311_v58 = vpack.c.bf16 %v6460_v30, %v6458_v10  ;;  %v6469_v22 = vld [vmem:[%s10668_s3 + $0x6b8] sm:$0xff]  ;;  %v7315_v19 = vpack.c.bf16 %v6464_v57, %v6462_v1  ;;  %v6490_v30 = vld [vmem:[%s10668_s3 + $0x760] sm:$0xff] }
 0x58c   :  { %v5058_v57 = vld [vmem:[#allocation4 + $0x58] sm:$0x3] }
 0x58e   :  { %7244 = vmatpush1.bf16.msra.mxu0 %v7243_v51  ;;  %v6431_v51 = vld [vmem:[%s10668_s3 + $0x588] sm:$0xff] }
 0x58f   :  { %7246 = vmatprep.subr.bf16.mxu0 %v7245_v25  ;;  %v6433_v25 = vld [vmem:[%s10668_s3 + $0x598] sm:$0xff] }
 0x590   :  { %v7281_v14 = vpack.c.bf16 %v6433_v25, %v6431_v51  ;;  %v7321_v25 = vpack.c.bf16 %v6473_v39, %v6471_v28  ;;  %v5568_v28 = vld [vmem:[%s10669_s4 + $0xc8] sm:$0xff]  ;;  %v5571_v39 = vld [vmem:[%s10669_s4 + $0xe0] sm:$0xff] }
 0x592   :  { %7248 = vmatpush1.bf16.msra.mxu0 %v7247_v50  ;;  %v6435_v50 = vld [vmem:[%s10668_s3 + $0x5a8] sm:$0xff] }
 0x593   :  { %7250 = vmatprep.subr.bf16.mxu0 %v7249_v48  ;;  %v6437_v48 = vld [vmem:[%s10668_s3 + $0x5b8] sm:$0xff] }
 0x594   :  { %v7285_v37 = vpack.c.bf16 %v6437_v48, %v6435_v50  ;;  %v7325_v48 = vpack.c.bf16 %v6477_v16, %v6475_v56  ;;  %v5574_v56 = vld [vmem:[%s10669_s4 + $0xf8] sm:$0xff]  ;;  %v5577_v16 = vld [vmem:[%s10669_s4 + $0x110] sm:$0xff] }
 0x595   :  { %4958 = vmatmul.mubr.f32.vlgmr.msra.gmra.mrb[24].mxu0 %v4516_v38  ;;  %v6438_v38 = vld [vmem:[%s10668_s3 + $0x5c0] sm:$0xff] }
 0x596   :  { %4963 = vmatprep.mubr.f32.mxu0 %v4520_v7  ;;  %7252 = vmatpush1.bf16.msra.mxu0 %v7251_v11  ;;  %v6439_v11 = vld [vmem:[%s10668_s3 + $0x5c8] sm:$0xff]  ;;  %v6445_v7 = vld [vmem:[%s10668_s3 + $0x5f8] sm:$0xff] }
 0x597   :  { %7254 = vmatprep.subr.bf16.mxu0 %v7253_v26  ;;  %v6441_v26 = vld [vmem:[%s10668_s3 + $0x5d8] sm:$0xff] }
 0x598   :  { %v7289_v55 = vpack.c.bf16 %v6441_v26, %v6439_v11  ;;  %v5050_v11 = vld [vmem:[#allocation4 + $0x18] sm:$0x3] }
 0x599   :  { %4964 = vmatmul.mubr.f32.gmra.mrb[26].mxu0 %v4519_v8  ;;  %v6447_v8 = vld [vmem:[%s10668_s3 + $0x608] sm:$0xff] }
 0x59a   :  { %7256 = vmatpush1.bf16.msra.mxu0 %v7255_v32  ;;  %5034 = vmatprep.mubr.f32.mxu0 %v9283_v40  ;;  %v7291_v32 = vpack.c.bf16 %v6440_v0, %v6438_v38  ;;  %v7329_v38 = vpack.c.bf16 %v6481_v4, %v6479_v20  ;;  %v6478_v0 = vld [vmem:[%s10668_s3 + $0x700] sm:$0xff]  ;;  %v5580_v20 = vld [vmem:[%s10669_s4 + $0x128] sm:$0xff] }
 0x59b   :  { %7258 = vmatprep.subr.bf16.mxu0 %v7257_v42  ;;  %v7293_v42 = vpack.c.bf16 %v6445_v7, %v6443_v52  ;;  %v6480_v52 = vld [vmem:[%s10668_s3 + $0x710] sm:$0xff]  ;;  %v5072_v7 = vrot.slane %v5050_v11, 2  ;;  %v5583_v4 = vld [vmem:[%s10669_s4 + $0x140] sm:$0xff] }
 0x59c   :  { %v7369_v11 = vpack.c.bf16 %v5583_v4, %v5580_v20 }
 0x59e   :  { %7260 = vmatpush1.bf16.msra.mxu0 %v7259_v17  ;;  %v7297_v17 = vpack.c.bf16 %v6449_v47, %v6447_v8  ;;  %v5056_v8 = vld [vmem:[#allocation4 + $0x48] sm:$0x3] }
 0x59f   :  { %7262 = vmatprep.subr.bf16.mxu0 %v7261_v29  ;;  %v6446_v29 = vld [vmem:[%s10668_s3 + $0x600] sm:$0xff] }
 0x5a0   :  { %v7299_v21 = vpack.c.bf16 %v6448_v59, %v6446_v29  ;;  %v5053_v29 = vld [vmem:[#allocation4 + $0x30] sm:$0xfc] }
 0x5a2   :  { %7264 = vmatpush1.bf16.msra.mxu0 %v7263_v63  ;;  %v7301_v63 = vpack.c.bf16 %v6453_v15, %v6451_v62  ;;  %v6482_v62 = vld [vmem:[%s10668_s3 + $0x720] sm:$0xff]  ;;  %v6484_v15 = vld [vmem:[%s10668_s3 + $0x730] sm:$0xff] }
 0x5a3   :  { %7266 = vmatprep.subr.bf16.mxu0 %v7265_v12  ;;  %v6450_v12 = vld [vmem:[%s10668_s3 + $0x620] sm:$0xff] }
 0x5a4   :  { %v7303_v5 = vpack.c.bf16 %v6452_v33, %v6450_v12  ;;  %v6487_v12 = vld [vmem:[%s10668_s3 + $0x748] sm:$0xff]  ;;  %v6489_v33 = vld [vmem:[%s10668_s3 + $0x758] sm:$0xff] }
 0x5a5   :  { %6412 = vmatmul.mubr.msk.f32.vlgmr.msra.gmra.mrb[24].mxu0 %vm4400_vm4, %v4518_v61  ;;  %v7309_v61 = vpack.c.bf16 %v6461_v6, %v6459_v46  ;;  %v6491_v6 = vld [vmem:[%s10668_s3 + $0x768] sm:$0xff] }
 0x5a6   :  { %7268 = vmatpush1.bf16.msra.mxu0 %v7267_v23  ;;  %5040 = vmatprep.mubr.f32.mxu0 %v9283_v40  ;;  %v7305_v23 = vpack.c.bf16 %v6457_v45, %v6455_v27  ;;  %v5080_v45 = vrot.slane %v5053_v29, 2  ;;  %v5598_v29 = vld [vmem:[%s10669_s4 + $0x1b8] sm:$0xff] }
 0x5a7   :  { %7270 = vmatprep.subr.bf16.mxu0 %v7269_v54  ;;  %v6456_v54 = vld [vmem:[%s10668_s3 + $0x650] sm:$0xff] }
 0x5a8   :  { %v7307_v3 = vpack.c.bf16 %v6456_v54, %v6454_v60  ;;  %v6486_v60 = vld [vmem:[%s10668_s3 + $0x740] sm:$0xff]  ;;  %v6488_v54 = vld [vmem:[%s10668_s3 + $0x750] sm:$0xff] }
 0x5a9   :  { %6413 = vmatmul.mubr.msk.f32.gmra.mrb[26].mxu0 %vm4400_vm4, %v4521_v36  ;;  %v6467_v36 = vld [vmem:[%s10668_s3 + $0x6a8] sm:$0xff] }
 0x5aa   :  { %7272 = vmatpush1.bf16.msra.mxu0 %v7271_v43  ;;  %5242 = vmatprep.mubr.f32.mxu0 %v5076_v31  ;;  %v6465_v43 = vld [vmem:[%s10668_s3 + $0x698] sm:$0xff]  ;;  %v7317_v31 = vpack.c.bf16 %v6469_v22, %v6467_v36  ;;  %v5055_v22 = vld [vmem:[#allocation4 + $0x40] sm:$0xfc] }
 0x5ab   :  { %7274 = vmatprep.subr.bf16.mxu0 %v7273_v2  ;;  %v7313_v2 = vpack.c.bf16 %v6465_v43, %v6463_v9  ;;  %v6492_v9 = vld [vmem:[%s10668_s3 + $0x770] sm:$0xff]  ;;  %v5052_v43 = vld [vmem:[#allocation4 + $0x28] sm:$0x3] }
 0x5ac   :  { %v5078_v1 = vrot.slane %v5052_v43, 2 }
 0x5ae   :  { %7276 = vmatpush1.bf16.msra.mxu0 %v7275_v24  ;;  %v6466_v24 = vld [vmem:[%s10668_s3 + $0x6a0] sm:$0xff] }
 0x5af   :  { %7278 = vmatprep.subr.bf16.mxu0 %v7277_v53  ;;  %v6468_v53 = vld [vmem:[%s10668_s3 + $0x6b0] sm:$0xff] }
 0x5b0   :  { %v7319_v51 = vpack.c.bf16 %v6468_v53, %v6466_v24  ;;  %v5086_v24 = vrot.slane %v5055_v22, 2  ;;  %v5621_v22 = vld [vmem:[%s10669_s4 + $0x270] sm:$0xff] }
 0x5b2   :  { %7280 = vmatpush1.bf16.msra.mxu0 %v7279_v49  ;;  %v6470_v49 = vld [vmem:[%s10668_s3 + $0x6c0] sm:$0xff] }
 0x5b3   :  { %7282 = vmatprep.subr.bf16.mxu0 %v7281_v14  ;;  %v6472_v14 = vld [vmem:[%s10668_s3 + $0x6d0] sm:$0xff] }
 0x5b4   :  { %v7323_v50 = vpack.c.bf16 %v6472_v14, %v6470_v49  ;;  %v5570_v49 = vld [vmem:[%s10669_s4 + $0xd8] sm:$0xff] }
 0x5b6   :  { %7284 = vmatpush1.bf16.msra.mxu0 %v7283_v18  ;;  %v6474_v18 = vld [vmem:[%s10668_s3 + $0x6e0] sm:$0xff] }
 0x5b7   :  { %7286 = vmatprep.subr.bf16.mxu0 %v7285_v37  ;;  %v6476_v37 = vld [vmem:[%s10668_s3 + $0x6f0] sm:$0xff] }
 0x5b8   :  { %v7327_v26 = vpack.c.bf16 %v6476_v37, %v6474_v18  ;;  %v5576_v18 = vld [vmem:[%s10669_s4 + $0x108] sm:$0xff] }
 0x5ba   :  { %7288 = vmatpush1.bf16.msra.mxu0 %v7287_v34  ;;  %v5057_v34 = vld [vmem:[#allocation4 + $0x50] sm:$0x3] }
 0x5bb   :  { %7290 = vmatprep.subr.bf16.mxu0 %v7289_v55  ;;  %v5047_v55 = vld [vmem:[#allocation4] sm:$0xfc]  ;;  %v5084_v44 = vrot.slane %v5057_v34, 2  ;;  %v5582_v34 = vld [vmem:[%s10669_s4 + $0x138] sm:$0xff] }
 0x5bc   :  { %v5071_v47 = vrot.slane %v5047_v55, 2 }
 0x5be   :  { %7292 = vmatpush1.bf16.msra.mxu0 %v7291_v32  ;;  %v5054_v32 = vld [vmem:[#allocation4 + $0x38] sm:$0xfc] }
 0x5bf   :  { %7294 = vmatprep.subr.bf16.mxu0 %v7293_v42  ;;  %v6483_v42 = vld [vmem:[%s10668_s3 + $0x728] sm:$0xff] }
 0x5c0   :  { %v7333_v59 = vpack.c.bf16 %v6485_v41, %v6483_v42  ;;  %v5592_v41 = vld [vmem:[%s10669_s4 + $0x188] sm:$0xff] }
 0x5c2   :  { %7296 = vmatpush1.bf16.msra.mxu0 %v7295_v35  ;;  %v7331_v35 = vpack.c.bf16 %v6480_v52, %v6478_v0  ;;  %v5589_v0 = vld [vmem:[%s10669_s4 + $0x170] sm:$0xff] }
 0x5c3   :  { %7298 = vmatprep.subr.bf16.mxu0 %v7297_v17  ;;  %v5083_v17 = vrot.slane %v5054_v32, 2  ;;  %v5588_v32 = vld [vmem:[%s10669_s4 + $0x168] sm:$0xff] }
 0x5c5   :  { %v5085_v27 = vsel %vm3346_vm13, %v5083_v17, %v5084_v44  ;;  %v5595_v44 = vld [vmem:[%s10669_s4 + $0x1a0] sm:$0xff] }
 0x5c6   :  { %7300 = vmatpush1.bf16.msra.mxu0 %v7299_v21  ;;  %v5073_v21 = vsel %vm3346_vm13, %v5071_v47, %v5072_v7  ;;  %v5585_v7 = vld [vmem:[%s10669_s4 + $0x150] sm:$0xff]  ;;  %v5591_v47 = vld [vmem:[%s10669_s4 + $0x180] sm:$0xff] }
 0x5c7   :  { %7302 = vmatprep.subr.bf16.mxu0 %v7301_v63  ;;  %v5081_v63 = vrot.slane %v5056_v8, 2  ;;  %v7375_v42 = vpack.c.bf16 %v5588_v32, %v5585_v7  ;;  %v7377_v8 = vpack.c.bf16 %v5595_v44, %v5592_v41 }
 0x5c9   :  { %v5082_v46 = vsel %vm3346_vm13, %v5080_v45, %v5081_v63  ;;  %v5603_v45 = vld [vmem:[%s10669_s4 + $0x1e0] sm:$0xff] }
 0x5ca   :  { %7304 = vmatpush1.bf16.msra.mxu0 %v7303_v5  ;;  %v7335_v5 = vpack.c.bf16 %v6484_v15, %v6482_v62  ;;  %v5597_v15 = vld [vmem:[%s10669_s4 + $0x1b0] sm:$0xff] }
 0x5cb   :  { %7306 = vmatprep.subr.bf16.mxu0 %v7305_v23  ;;  %v7337_v23 = vpack.c.bf16 %v6489_v33, %v6487_v12  ;;  %v5604_v12 = vld [vmem:[%s10669_s4 + $0x1e8] sm:$0xff]  ;;  %v5607_v33 = vld [vmem:[%s10669_s4 + $0x200] sm:$0xff] }
 0x5ce   :  { %7308 = vmatpush1.bf16.msra.mxu0 %v7307_v3  ;;  %v6493_v3 = vld [vmem:[%s10668_s3 + $0x778] sm:$0xff] }
 0x5cf   :  { %7310 = vmatprep.subr.bf16.mxu0 %v7309_v61  ;;  %v7339_v61 = vpack.c.bf16 %v6488_v54, %v6486_v60  ;;  %v7341_v10 = vpack.c.bf16 %v6493_v3, %v6491_v6  ;;  %v5610_v60 = vld [vmem:[%s10669_s4 + $0x218] sm:$0xff]  ;;  %v5613_v54 = vld [vmem:[%s10669_s4 + $0x230] sm:$0xff]  ;;  %v5612_v3 = vld [vmem:[%s10669_s4 + $0x228] sm:$0xff] }
 0x5d0   :  { %v5609_v6 = vld [vmem:[%s10669_s4 + $0x210] sm:$0xff] }
 0x5d2   :  { %7312 = vmatpush1.bf16.msra.mxu0 %v7311_v58  ;;  %v7343_v58 = vpack.c.bf16 %v6492_v9, %v6490_v30  ;;  %v5619_v30 = vld [vmem:[%s10669_s4 + $0x260] sm:$0xff] }
 0x5d3   :  { %7314 = vmatprep.subr.bf16.mxu0 %v7313_v2  ;;  %v5049_v2 = vld [vmem:[#allocation4 + $0x10] sm:$0xfc]  ;;  %v5615_v9 = vld [vmem:[%s10669_s4 + $0x240] sm:$0xff] }
 0x5d4   :  { %v5077_v36 = vrot.slane %v5049_v2, 2  ;;  %v5622_v2 = vld [vmem:[%s10669_s4 + $0x278] sm:$0xff] }
 0x5d6   :  { %7316 = vmatpush1.bf16.msra.mxu0 %v7315_v19  ;;  %v5079_v19 = vsel %vm3346_vm13, %v5077_v36, %v5078_v1  ;;  %v5625_v1 = vld [vmem:[%s10669_s4 + $0x290] sm:$0xff] }
 0x5d7   :  { %7318 = vmatprep.subr.bf16.mxu0 %v7317_v31  ;;  %v5087_v31 = vrot.slane %v5058_v57, 2  ;;  %v7397_v36 = vpack.c.bf16 %v5625_v1, %v5622_v2 }
 0x5d9   :  { %v5088_v53 = vsel %vm3346_vm13, %v5086_v24, %v5087_v31  ;;  %v5628_v31 = vld [vmem:[%s10669_s4 + $0x2a8] sm:$0xff]  ;;  %v5631_v24 = vld [vmem:[%s10669_s4 + $0x2c0] sm:$0xff] }
 0x5da   :  { %7320 = vmatpush1.bf16.msra.mxu0 %v7319_v51  ;;  %v7361_v51 = vpack.c.bf16 %v5571_v39, %v5568_v28  ;;  %v7401_v28 = vpack.c.bf16 %v5631_v24, %v5628_v31  ;;  %v5627_v39 = vld [vmem:[%s10669_s4 + $0x2a0] sm:$0xff] }
 0x5db   :  { %7322 = vmatprep.subr.bf16.mxu0 %v7321_v25  ;;  %v5567_v25 = vld [vmem:[%s10669_s4 + $0xc0] sm:$0xff] }
 0x5dc   :  { %v7363_v14 = vpack.c.bf16 %v5570_v49, %v5567_v25  ;;  %7362 = vmatprep.subr.bf16.mxu1 %v7361_v51  ;;  %v5630_v51 = vld [vmem:[%s10669_s4 + $0x2b8] sm:$0xff]  ;;  %v5637_v49 = vld [vmem:[%s10669_s4 + $0x2f0] sm:$0xff] }
 0x5dd   :  { %v5634_v25 = vld [vmem:[%s10669_s4 + $0x2d8] sm:$0xff] }
 0x5de   :  { %7324 = vmatpush1.bf16.msra.mxu0 %v7323_v50  ;;  %7364 = vmatpush1.bf16.msra.mxu1 %v7363_v14  ;;  %v7365_v50 = vpack.c.bf16 %v5577_v16, %v5574_v56  ;;  %v7403_v14 = vpack.c.bf16 %v5630_v51, %v5627_v39  ;;  %v7405_v56 = vpack.c.bf16 %v5637_v49, %v5634_v25  ;;  %v5633_v16 = vld [vmem:[%s10669_s4 + $0x2d0] sm:$0xff] }
 0x5df   :  { %7326 = vmatprep.subr.bf16.mxu0 %v7325_v48  ;;  %v5573_v48 = vld [vmem:[%s10669_s4 + $0xf0] sm:$0xff] }
 0x5e0   :  { %v7367_v37 = vpack.c.bf16 %v5576_v18, %v5573_v48  ;;  %7366 = vmatprep.subr.bf16.mxu1 %v7365_v50  ;;  %v5636_v50 = vld [vmem:[%s10669_s4 + $0x2e8] sm:$0xff]  ;;  %v5643_v18 = vld [vmem:[%s10669_s4 + $0x320] sm:$0xff] }
 0x5e1   :  { %v5640_v48 = vld [vmem:[%s10669_s4 + $0x308] sm:$0xff] }
 0x5e2   :  { %7328 = vmatpush1.bf16.msra.mxu0 %v7327_v26  ;;  %7368 = vmatpush1.bf16.msra.mxu1 %v7367_v37  ;;  %v5579_v26 = vld [vmem:[%s10669_s4 + $0x120] sm:$0xff]  ;;  %v7407_v37 = vpack.c.bf16 %v5636_v50, %v5633_v16  ;;  %v7409_v20 = vpack.c.bf16 %v5643_v18, %v5640_v48 }
 0x5e3   :  { %7330 = vmatprep.subr.bf16.mxu0 %v7329_v38  ;;  %v7371_v55 = vpack.c.bf16 %v5582_v34, %v5579_v26  ;;  %7370 = vmatprep.subr.bf16.mxu1 %v7369_v11  ;;  %v5586_v38 = vld [vmem:[%s10669_s4 + $0x158] sm:$0xff] }
 0x5e4   :  { %v7373_v52 = vpack.c.bf16 %v5589_v0, %v5586_v38 }
 0x5e5   :  { %5243 = vmatmul.mubr.f32.vlgmr.msra.gmra.mrb[24].mxu0 %v5073_v21  ;;  %v5600_v21 = vld [vmem:[%s10669_s4 + $0x1c8] sm:$0xff] }
 0x5e6   :  { %5248 = vmatprep.mubr.f32.mxu0 %v5085_v27  ;;  %7332 = vmatpush1.bf16.msra.mxu0 %v7331_v35  ;;  %v5594_v35 = vld [vmem:[%s10669_s4 + $0x198] sm:$0xff]  ;;  %v7383_v63 = vpack.c.bf16 %v5600_v21, %v5597_v15  ;;  %v7385_v27 = vpack.c.bf16 %v5607_v33, %v5604_v12 }
 0x5e7   :  { %7334 = vmatprep.subr.bf16.mxu0 %v7333_v59  ;;  %7372 = vmatpush1.bf16.msra.mxu1 %v7371_v55  ;;  %v7379_v17 = vpack.c.bf16 %v5594_v35, %v5591_v47  ;;  %v5601_v59 = vld [vmem:[%s10669_s4 + $0x1d0] sm:$0xff] }
 0x5e8   :  { %7374 = vmatprep.subr.bf16.mxu1 %v7373_v52  ;;  %v7381_v62 = vpack.c.bf16 %v5601_v59, %v5598_v29 }
 0x5e9   :  { %5249 = vmatmul.mubr.f32.gmra.mrb[26].mxu0 %v5082_v46  ;;  %v7389_v46 = vpack.c.bf16 %v5613_v54, %v5610_v60 }
 0x5ea   :  { %7336 = vmatpush1.bf16.msra.mxu0 %v7335_v5  ;;  %5319 = vmatprep.mubr.f32.mxu0 %v9283_v40  ;;  %v5606_v5 = vld [vmem:[%s10669_s4 + $0x1f8] sm:$0xff] }
 0x5eb   :  { %7338 = vmatprep.subr.bf16.mxu0 %v7337_v23  ;;  %7376 = vmatpush1.bf16.msra.mxu1 %v7375_v42  ;;  %v7387_v23 = vpack.c.bf16 %v5606_v5, %v5603_v45 }
 0x5ec   :  { %7378 = vmatprep.subr.bf16.mxu1 %v7377_v8 }
 0x5ee   :  { %7340 = vmatpush1.bf16.msra.mxu0 %v7339_v61  ;;  %v7391_v61 = vpack.c.bf16 %v5612_v3, %v5609_v6 }
 0x5ef   :  { %7342 = vmatprep.subr.bf16.mxu0 %v7341_v10  ;;  %7380 = vmatpush1.bf16.msra.mxu1 %v7379_v17  ;;  %v5616_v10 = vld [vmem:[%s10669_s4 + $0x248] sm:$0xff] }
 0x5f0   :  { %7382 = vmatprep.subr.bf16.mxu1 %v7381_v62  ;;  %v7393_v43 = vpack.c.bf16 %v5619_v30, %v5616_v10 }
 0x5f2   :  { %7344 = vmatpush1.bf16.msra.mxu0 %v7343_v58  ;;  %v5618_v58 = vld [vmem:[%s10669_s4 + $0x258] sm:$0xff] }
 0x5f3   :  { %7384 = vmatpush1.bf16.msra.mxu1 %v7383_v63  ;;  %v7395_v57 = vpack.c.bf16 %v5618_v58, %v5615_v9 }
 0x5f4   :  { %7386 = vmatprep.subr.bf16.mxu1 %v7385_v27 }
 0x5f5   :  { %6494 = vmatmul.mubr.msk.f32.vlgmr.msra.gmra.mrb[24].mxu0 %vm4400_vm4, %v5079_v19  ;;  %v5624_v19 = vld [vmem:[%s10669_s4 + $0x288] sm:$0xff] }
 0x5f6   :  { %5325 = vmatprep.mubr.f32.mxu0 %v9283_v40 }
 0x5f7   :  { %7388 = vmatpush1.bf16.msra.mxu1 %v7387_v23 }
 0x5f8   :  { %7390 = vmatprep.subr.bf16.mxu1 %v7389_v46 }
 0x5f9   :  { %6495 = vmatmul.mubr.msk.f32.gmra.mrb[26].mxu0 %vm4400_vm4, %v5088_v53  ;;  %v7399_v53 = vpack.c.bf16 %v5624_v19, %v5621_v22 }
 0x5fb   :  { %7392 = vmatpush1.bf16.msra.mxu1 %v7391_v61 }
 0x5fc   :  { %7394 = vmatprep.subr.bf16.mxu1 %v7393_v43 }
 0x5ff   :  { %7396 = vmatpush1.bf16.msra.mxu1 %v7395_v57 }
 0x600   :  { %7398 = vmatprep.subr.bf16.mxu1 %v7397_v36 }
 0x603   :  { %7400 = vmatpush1.bf16.msra.mxu1 %v7399_v53 }
 0x604   :  { %7402 = vmatprep.subr.bf16.mxu1 %v7401_v28 }
 0x607   :  { %7404 = vmatpush1.bf16.msra.mxu1 %v7403_v14 }
 0x608   :  { %7406 = vmatprep.subr.bf16.mxu1 %v7405_v56 }
 0x60b   :  { %7408 = vmatpush1.bf16.msra.mxu1 %v7407_v37 }
 0x60c   :  { %7410 = vmatprep.subr.bf16.mxu1 %v7409_v20 }
 0x6c8   :  { %v5321_v4 = vpop.f32.mrb[24].mxu0 }
 0x6c9   :  { %v5336_v11 = vmax.f32 %v5321_v4, 0.0  ;;  %v5323_v26 = vpop.f32.mrb[25].mxu0 }
 0x6ca   :  { %v5337_v34 = vmax.f32 %v5323_v26, 0.0 }
 0x6cc   :  { %v5340_v55 = vmax.f32 %v5336_v11, %v5337_v34  ;;  %v5327_v38 = vpop.f32.mrb[26].mxu0 }
 0x6cd   :  { %v5338_v0 = vmax.f32 %v5327_v38, 0.0  ;;  %v5329_v52 = vpop.f32.mrb[27].mxu0 }
 0x6ce   :  { %v5344_v7 = vcombine.high %v5340_v55, %v5340_v55  ;;  %v5351_v32 = vrot.slane %v5340_v55, %v8115_v13  ;;  %v5339_v42 = vmax.f32 %v5329_v52, 0.0 }
 0x6d0   :  { %v5358_v41 = vrot.slane %v5344_v7, %v8115_v13  ;;  %v5359_v44 = vcombine.high %v5351_v32, %v5351_v32  ;;  %v5386_v8 = vsel %vm207_vm2, %v5351_v32, -inf  ;;  %v5341_v47 = vmax.f32 %v5338_v0, %v5339_v42 }
 0x6d1   :  { %v5387_v35 = vrot.slane %v5386_v8, 4 }
 0x6d2   :  { %v5360_v17 = vcombine.high %v5358_v41, %v5358_v41  ;;  %v5393_v29 = vsel %vm207_vm2, %v5359_v44, -inf  ;;  %v5400_v59 = vsel %vm207_vm2, %v5358_v41, -inf  ;;  %v5361_v62 = vcombine.high %v5341_v47, %v5341_v47 }
 0x6d3   :  { %v5388_v15 = vmax.f32 %v5386_v8, %v5387_v35  ;;  %v5394_v21 = vrot.slane %v5393_v29, 4  ;;  %v5401_v63 = vrot.slane %v5400_v59, 4  ;;  %v5368_v12 = vrot.slane %v5341_v47, %v8115_v13 }
 0x6d4   :  { %v5407_v33 = vsel %vm207_vm2, %v5360_v17, -inf  ;;  %v5375_v27 = vrot.slane %v5361_v62, %v8115_v13 }
 0x6d5   :  { %v5389_v45 = vrot.slane %v5388_v15, 2  ;;  %v5395_v5 = vmax.f32 %v5393_v29, %v5394_v21  ;;  %v5402_v23 = vmax.f32 %v5400_v59, %v5401_v63  ;;  %v5408_v60 = vrot.slane %v5407_v33, 4 }
 0x6d6   :  { %v5376_v54 = vcombine.high %v5368_v12, %v5368_v12  ;;  %v5377_v46 = vcombine.high %v5375_v27, %v5375_v27  ;;  %v5414_v6 = vsel %vm207_vm2, %v5368_v12, -inf  ;;  %v5428_v3 = vsel %vm207_vm2, %v5375_v27, -inf }
 0x6d7   :  { %v5396_v61 = vrot.slane %v5395_v5, 2  ;;  %v5403_v10 = vrot.slane %v5402_v23, 2  ;;  %v5409_v30 = vmax.f32 %v5407_v33, %v5408_v60  ;;  %v5415_v9 = vrot.slane %v5414_v6, 4 }
 0x6d8   :  { %v5421_v43 = vsel %vm207_vm2, %v5376_v54, -inf  ;;  %v5429_v58 = vrot.slane %v5428_v3, 4  ;;  %v5435_v2 = vsel %vm207_vm2, %v5377_v46, -inf  ;;  %v5390_v1 = vmax.f32 %v5388_v15, %v5389_v45 }
 0x6d9   :  { %v5404_v57 = vmax.f32 %v5402_v23, %v5403_v10  ;;  %v5410_v36 = vrot.slane %v5409_v30, 2  ;;  %v5416_v22 = vmax.f32 %v5414_v6, %v5415_v9  ;;  %v5422_v19 = vrot.slane %v5421_v43, 4 }
 0x6da   :  { %v5430_v31 = vmax.f32 %v5428_v3, %v5429_v58  ;;  %v5436_v24 = vrot.slane %v5435_v2, 4  ;;  %v5397_v53 = vmax.f32 %v5395_v5, %v5396_v61  ;;  %v5391_v14 = vrot.slane %v5390_v1, 1 }
 0x6db   :  { %v5411_v28 = vmax.f32 %v5409_v30, %v5410_v36  ;;  %v5417_v39 = vrot.slane %v5416_v22, 2  ;;  %v5423_v51 = vmax.f32 %v5421_v43, %v5422_v19  ;;  %v5405_v56 = vrot.slane %v5404_v57, 1  ;;  %v5639_v36 = vld [vmem:[%s10669_s4 + $0x300] sm:$0xff] }
 0x6dc   :  { %v5431_v25 = vrot.slane %v5430_v31, 2  ;;  %v5437_v49 = vmax.f32 %v5435_v2, %v5436_v24  ;;  %v5398_v37 = vrot.slane %v5397_v53, 1  ;;  %v5392_v55 = vmax.f32 %v5390_v1, %v5391_v14  ;;  %v5646_v24 = vld [vmem:[%s10669_s4 + $0x338] sm:$0xff]  ;;  %v5648_v14 = vld [vmem:[%s10669_s4 + $0x348] sm:$0xff] }
 0x6dd   :  { %v5418_v16 = vmax.f32 %v5416_v22, %v5417_v39  ;;  %v5424_v50 = vrot.slane %v5423_v51, 2  ;;  %v5412_v20 = vrot.slane %v5411_v28, 1  ;;  %v5406_v38 = vmax.f32 %v5404_v57, %v5405_v56  ;;  %v5642_v22 = vld [vmem:[%s10669_s4 + $0x318] sm:$0xff] }
 0x6de   :  { %v5432_v48 = vmax.f32 %v5430_v31, %v5431_v25  ;;  %v5438_v18 = vrot.slane %v5437_v49, 2  ;;  %v5399_v42 = vmax.f32 %v5397_v53, %v5398_v37  ;;  %v5450_v17 = vrot.slane %v5392_v55, %v8115_v13  ;;  %v5649_v53 = vld [vmem:[%s10669_s4 + $0x350] sm:$0xff]  ;;  %v5654_v37 = vld [vmem:[%s10669_s4 + $0x378] sm:$0xff]  ;;  %v5660_v55 = vld [vmem:[%s10669_s4 + $0x3a8] sm:$0xff] }
 0x6df   :  { %v5419_v4 = vrot.slane %v5418_v16, 1  ;;  %v5425_v11 = vmax.f32 %v5423_v51, %v5424_v50  ;;  %v5413_v41 = vmax.f32 %v5411_v28, %v5412_v20  ;;  %v5500_v29 = vrot.slane %v5406_v38, %v8115_v13  ;;  %v5658_v20 = vld [vmem:[%s10669_s4 + $0x398] sm:$0xff]  ;;  %v5664_v38 = vld [vmem:[%s10669_s4 + $0x3c8] sm:$0xff] }
 0x6e0   :  { %v5433_v26 = vrot.slane %v5432_v48, 1  ;;  %v5439_v34 = vmax.f32 %v5437_v49, %v5438_v18  ;;  %v5475_v63 = vrot.slane %v5399_v42, %v8115_v13  ;;  %v7411_v39 = vpack.c.bf16 %v5642_v22, %v5639_v36  ;;  %v5645_v49 = vld [vmem:[%s10669_s4 + $0x330] sm:$0xff]  ;;  %v5651_v18 = vld [vmem:[%s10669_s4 + $0x360] sm:$0xff]  ;;  %v5666_v42 = vld [vmem:[%s10669_s4 + $0x3d8] sm:$0xff] }
 0x6e1   :  { %v5420_v0 = vmax.f32 %v5418_v16, %v5419_v4  ;;  %v5426_v52 = vrot.slane %v5425_v11, 1  ;;  %v5525_v12 = vrot.slane %v5413_v41, %v8115_v13  ;;  %v7413_v25 = vpack.c.bf16 %v5649_v53, %v5646_v24  ;;  %v5655_v16 = vld [vmem:[%s10669_s4 + $0x380] sm:$0xff]  ;;  %v5661_v4 = vld [vmem:[%s10669_s4 + $0x3b0] sm:$0xff]  ;;  %v5670_v41 = vld [vmem:[%s10669_s4 + $0x3f8] sm:$0xff] }
 0x6e2   :  { %v5434_v7 = vmax.f32 %v5432_v48, %v5433_v26  ;;  %v5440_v32 = vrot.slane %v5439_v34, 1  ;;  %v7415_v50 = vpack.c.bf16 %v5648_v14, %v5645_v49  ;;  %v7421_v26 = vpack.c.bf16 %v5661_v4, %v5658_v20  ;;  %v5702_v24 = vld [vmem:[%s10669_s4 + $0x4f8] sm:$0xff]  ;;  %v5705_v14 = vld [vmem:[%s10669_s4 + $0x510] sm:$0xff] }
 0x6e3   :  { %v5427_v44 = vmax.f32 %v5425_v11, %v5426_v52  ;;  %v5457_v47 = vrot.slane %v5420_v0, %v8115_v13  ;;  %v7419_v11 = vpack.c.bf16 %v5654_v37, %v5651_v18  ;;  %v5667_v0 = vld [vmem:[%s10669_s4 + $0x3e0] sm:$0xff]  ;;  %v5706_v53 = vld [vmem:[%s10669_s4 + $0x518] sm:$0xff]  ;;  %vm7875_vm2 = vmmov 0  }
 0x6e4   :  { %v5441_v8 = vmax.f32 %v5439_v34, %v5440_v32  ;;  %v5507_v35 = vrot.slane %v5434_v7, %v8115_v13  ;;  %v5657_v34 = vld [vmem:[%s10669_s4 + $0x390] sm:$0xff]  ;;  %v7425_v7 = vpack.c.bf16 %v5667_v0, %v5664_v38  ;;  %v5663_v32 = vld [vmem:[%s10669_s4 + $0x3c0] sm:$0xff]  ;;  %v5714_v20 = vld [vmem:[%s10669_s4 + $0x558] sm:$0xff] }
 0x6e5   :  { %v5460_v59 = vrot.slane %v5457_v47, 7  ;;  %v5482_v62 = vrot.slane %v5427_v44, %v8115_v13  ;;  %v7423_v52 = vpack.c.bf16 %v5660_v55, %v5657_v34  ;;  %v5673_v44 = vld [vmem:[%s10669_s4 + $0x410] sm:$0xff]  ;;  %v5711_v37 = vld [vmem:[%s10669_s4 + $0x540] sm:$0xff]  ;;  %v5718_v4 = vld [vmem:[%s10669_s4 + $0x578] sm:$0xff] }
 0x6e6   :  { %v5510_v15 = vrot.slane %v5507_v35, 7  ;;  %v5532_v21 = vrot.slane %v5441_v8, %v8115_v13  ;;  %v7427_v8 = vpack.c.bf16 %v5666_v42, %v5663_v32  ;;  %v7429_v47 = vpack.c.bf16 %v5673_v44, %v5670_v41  ;;  %v5669_v35 = vld [vmem:[%s10669_s4 + $0x3f0] sm:$0xff]  ;;  %v5720_v38 = vld [vmem:[%s10669_s4 + $0x588] sm:$0xff]  ;;  %v5723_v42 = vld [vmem:[%s10669_s4 + $0x5a0] sm:$0xff] }
 0x6e7   :  { %v5461_v33 = vsel %vm2109_vm10, %v5460_v59, %v5450_v17  ;;  %v5485_v27 = vrot.slane %v5482_v62, 7  ;;  %v5672_v17 = vld [vmem:[%s10669_s4 + $0x408] sm:$0xff]  ;;  %v5717_v55 = vld [vmem:[%s10669_s4 + $0x570] sm:$0xff]  ;;  %v5726_v41 = vld [vmem:[%s10669_s4 + $0x5b8] sm:$0xff] }
 0x6e8   :  { %v5511_v45 = vsel %vm2109_vm10, %v5510_v15, %v5500_v29  ;;  %v5535_v5 = vrot.slane %v5532_v21, 7  ;;  %v5462_v23 = vsel %vm2093_vm5, %v5460_v59, %v5461_v33  ;;  %v5676_v29 = vld [vmem:[%s10669_s4 + $0x428] sm:$0xff]  ;;  %v7431_v62 = vpack.c.bf16 %v5672_v17, %v5669_v35  ;;  %v5675_v21 = vld [vmem:[%s10669_s4 + $0x420] sm:$0xff]  ;;  %v5685_v33 = vld [vmem:[%s10669_s4 + $0x470] sm:$0xff] }
 0x6e9   :  { %v5512_v60 = vsel %vm2093_vm5, %v5510_v15, %v5511_v45  ;;  %v5463_v54 = vsel %vm2097_vm7, %v5460_v59, %v5462_v23  ;;  %v5486_v46 = vsel %vm2109_vm10, %v5485_v27, %v5475_v63  ;;  %v5678_v63 = vld [vmem:[%s10669_s4 + $0x438] sm:$0xff]  ;;  %v5684_v23 = vld [vmem:[%s10669_s4 + $0x468] sm:$0xff]  ;;  %v5729_v17 = vld [vmem:[%s10669_s4 + $0x5d0] sm:$0xff] }
 0x6ea   :  { %v5513_v6 = vsel %vm2097_vm7, %v5510_v15, %v5512_v60  ;;  %v5536_v3 = vsel %vm2109_vm10, %v5535_v5, %v5525_v12  ;;  %v5464_v61 = vsel %vm2101_vm9, %v5460_v59, %v5463_v54  ;;  %v5487_v10 = vsel %vm2093_vm5, %v5485_v27, %v5486_v46  ;;  %v5679_v59 = vld [vmem:[%s10669_s4 + $0x440] sm:$0xff]  ;;  %v5682_v12 = vld [vmem:[%s10669_s4 + $0x458] sm:$0xff]  ;;  %v5688_v60 = vld [vmem:[%s10669_s4 + $0x488] sm:$0xff] }
 0x6eb   :  { %v5514_v30 = vsel %vm2101_vm9, %v5510_v15, %v5513_v6  ;;  %v5537_v9 = vsel %vm2093_vm5, %v5535_v5, %v5536_v3  ;;  %5466 = vst [vmem:[#allocation5] sm:$0x3] %v5464_v61  ;;  %v5488_v43 = vsel %vm2097_vm7, %v5485_v27, %v5487_v10  ;;  %v7433_v15 = vpack.c.bf16 %v5679_v59, %v5676_v29  ;;  %v5691_v54 = vld [vmem:[%s10669_s4 + $0x4a0] sm:$0xff]  ;;  %v5690_v61 = vld [vmem:[%s10669_s4 + $0x498] sm:$0xff]  ;;  %v5724_v0 = vld [vmem:[%s10669_s4 + $0x5a8] sm:$0xff] }
 0x6ec   :  { %5516 = vst [vmem:[#allocation5 + $0x4] sm:$0x3] %v5514_v30  ;;  %v5538_v58 = vsel %vm2097_vm7, %v5535_v5, %v5537_v9  ;;  %v5489_v2 = vsel %vm2101_vm9, %v5485_v27, %v5488_v43  ;;  %v7435_v27 = vpack.c.bf16 %v5678_v63, %v5675_v21  ;;  %v7437_v45 = vpack.c.bf16 %v5685_v33, %v5682_v12  ;;  %v5687_v3 = vld [vmem:[%s10669_s4 + $0x480] sm:$0xff]  ;;  %v5694_v10 = vld [vmem:[%s10669_s4 + $0x4b8] sm:$0xff]  ;;  %v5697_v30 = vld [vmem:[%s10669_s4 + $0x4d0] sm:$0xff] }
 0x6ed   :  { %v5539_v1 = vsel %vm2101_vm9, %v5535_v5, %v5538_v58  ;;  %5491 = vst [vmem:[#allocation5 + $0x2] sm:$0x3] %v5489_v2  ;;  %v5681_v5 = vld [vmem:[%s10669_s4 + $0x450] sm:$0xff]  ;;  %v7441_v6 = vpack.c.bf16 %v5691_v54, %v5688_v60  ;;  %v7443_v9 = vpack.c.bf16 %v5690_v61, %v5687_v3  ;;  %v7445_v43 = vpack.c.bf16 %v5697_v30, %v5694_v10  ;;  %v5696_v2 = vld [vmem:[%s10669_s4 + $0x4c8] sm:$0xff]  ;;  %v5730_v44 = vld [vmem:[%s10669_s4 + $0x5d8] sm:$0xff] }
 0x6ee   :  { %5541 = vst [vmem:[#allocation5 + $0x6] sm:$0x3] %v5539_v1  ;;  %v7439_v46 = vpack.c.bf16 %v5684_v23, %v5681_v5  ;;  %v5693_v58 = vld [vmem:[%s10669_s4 + $0x4b0] sm:$0xff]  ;;  %v5700_v1 = vld [vmem:[%s10669_s4 + $0x4e8] sm:$0xff]  ;;  %v5599_v33 = vld [vmem:[%s10669_s4 + $0x1c0] sm:$0xff]  ;;  %vm6084_vm5 = vcmask 1043456  }
 0x6ef   :  { %v7447_v36 = vpack.c.bf16 %v5696_v2, %v5693_v58  ;;  %v5732_v29 = vld [vmem:[%s10669_s4 + $0x5e8] sm:$0xff]  ;;  %v5593_v59 = vld [vmem:[%s10669_s4 + $0x190] sm:$0xff]  ;;  %v5551_v23 = vld [vmem:[%s10669_s4 + $0x40] sm:$0xff]  ;;  %vm7876_vm7 = vmmov 1   ;;  %vm6080_vm10 = vcmask 359424  }
 0x6f0   :  { %v5545_v63 = vld [vmem:[%s10669_s4 + $0x10] sm:$0xff]  ;;  %v5548_v12 = vld [vmem:[%s10669_s4 + $0x28] sm:$0xff]  ;;  %v5554_v60 = vld [vmem:[%s10669_s4 + $0x58] sm:$0xff] }
 0x6f1   :  { %v5605_v54 = vld [vmem:[%s10669_s4 + $0x1f0] sm:$0xff]  ;;  %v5560_v10 = vld [vmem:[%s10669_s4 + $0x88] sm:$0xff]  ;;  %v5611_v30 = vld [vmem:[%s10669_s4 + $0x220] sm:$0xff] }
 0x6f2   :  { %v5557_v61 = vld [vmem:[%s10669_s4 + $0x70] sm:$0xff]  ;;  %v5563_v58 = vld [vmem:[%s10669_s4 + $0xa0] sm:$0xff]  ;;  %v5566_v2 = vld [vmem:[%s10669_s4 + $0xb8] sm:$0xff] }
 0x6f3   :  { %vm7577_vm9 = vmpackc.low %vm6084_vm5, %vm7876_vm7 }
 0x6f5   :  { %v5542_v57 = vld [vmem:[#allocation5] sm:$0xff] }
 0x6f6   :  { %v10145_v19 = vrot.slane %v5542_v57, %v8115_v13  ;;  %v5736_v31 = vcombine.high %v5542_v57, %v5542_v57  ;;  %v5703_v57 = vld [vmem:[%s10669_s4 + $0x500] sm:$0xff] }
 0x6f7   :  { %v7449_v22 = vpack.c.bf16 %v5703_v57, %v5700_v1  ;;  %v5617_v1 = vld [vmem:[%s10669_s4 + $0x250] sm:$0xff]  ;;  %v5620_v57 = vld [vmem:[%s10669_s4 + $0x268] sm:$0xff] }
 0x6f8   :  { %v10155_v28 = vcombine.high %v10145_v19, %v10145_v19  ;;  %v10158_v51 = vrot.slane %v5736_v31, %v8115_v13  ;;  %v5652_v13 = vld [vmem:[%s10669_s4 + $0x368] sm:$0xff]  ;;  %v5699_v31 = vld [vmem:[%s10669_s4 + $0x4e0] sm:$0xff] }
 0x6f9   :  { %v7417_v48 = vpack.c.bf16 %v5655_v16, %v5652_v13  ;;  %v5708_v13 = vld [vmem:[%s10669_s4 + $0x528] sm:$0xff] }
 0x6fa   :  { %5821 = vmatprep.mubr.f32.mxu1 %v10155_v28  ;;  %v10169_v56 = vcombine.high %v10158_v51, %v10158_v51  ;;  %v5712_v16 = vld [vmem:[%s10669_s4 + $0x548] sm:$0xff] }
 0x6fb   :  { %5822 = vmatmul.mubr.f32.vlgmr.msra.gmra.mrb[24].mxu1 %v10145_v19 }
 0x6fc   :  { %7412 = vmatpush1.bf16.msra.mxu1 %v7411_v39  ;;  %5892 = vmatprep.mubr.f32.mxu1 %v10169_v56  ;;  %v5709_v39 = vld [vmem:[%s10669_s4 + $0x530] sm:$0xff] }
 0x6fd   :  { %7414 = vmatprep.subr.bf16.mxu1 %v7413_v25  ;;  %v7451_v25 = vpack.c.bf16 %v5702_v24, %v5699_v31  ;;  %v7453_v49 = vpack.c.bf16 %v5709_v39, %v5706_v53  ;;  %v5569_v31 = vld [vmem:[%s10669_s4 + $0xd0] sm:$0xff]  ;;  %v5572_v24 = vld [vmem:[%s10669_s4 + $0xe8] sm:$0xff]  ;;  %v5623_v53 = vld [vmem:[%s10669_s4 + $0x280] sm:$0xff] }
 0x6fe   :  { %v5626_v39 = vld [vmem:[%s10669_s4 + $0x298] sm:$0xff] }
 0x700   :  { %7416 = vmatpush1.bf16.msra.mxu1 %v7415_v50  ;;  %v5715_v50 = vld [vmem:[%s10669_s4 + $0x560] sm:$0xff] }
 0x701   :  { %7418 = vmatprep.subr.bf16.mxu1 %v7417_v48  ;;  %v7455_v48 = vpack.c.bf16 %v5708_v13, %v5705_v14  ;;  %v7457_v18 = vpack.c.bf16 %v5715_v50, %v5712_v16  ;;  %v5575_v14 = vld [vmem:[%s10669_s4 + $0x100] sm:$0xff]  ;;  %v5578_v13 = vld [vmem:[%s10669_s4 + $0x118] sm:$0xff]  ;;  %v5629_v16 = vld [vmem:[%s10669_s4 + $0x2b0] sm:$0xff] }
 0x702   :  { %v5632_v50 = vld [vmem:[%s10669_s4 + $0x2c8] sm:$0xff] }
 0x704   :  { %7420 = vmatpush1.bf16.msra.mxu1 %v7419_v11  ;;  %v5721_v11 = vld [vmem:[%s10669_s4 + $0x590] sm:$0xff] }
 0x705   :  { %7422 = vmatprep.subr.bf16.mxu1 %v7421_v26  ;;  %v7459_v26 = vpack.c.bf16 %v5714_v20, %v5711_v37  ;;  %v7461_v34 = vpack.c.bf16 %v5721_v11, %v5718_v4  ;;  %v5581_v37 = vld [vmem:[%s10669_s4 + $0x130] sm:$0xff]  ;;  %v5584_v20 = vld [vmem:[%s10669_s4 + $0x148] sm:$0xff]  ;;  %v5635_v4 = vld [vmem:[%s10669_s4 + $0x2e0] sm:$0xff] }
 0x706   :  { %v5638_v11 = vld [vmem:[%s10669_s4 + $0x2f8] sm:$0xff] }
 0x708   :  { %7424 = vmatpush1.bf16.msra.mxu1 %v7423_v52  ;;  %v5727_v52 = vld [vmem:[%s10669_s4 + $0x5c0] sm:$0xff] }
 0x709   :  { %7426 = vmatprep.subr.bf16.mxu1 %v7425_v7  ;;  %v7463_v7 = vpack.c.bf16 %v5720_v38, %v5717_v55  ;;  %v7465_v32 = vpack.c.bf16 %v5727_v52, %v5724_v0  ;;  %v5587_v55 = vld [vmem:[%s10669_s4 + $0x160] sm:$0xff]  ;;  %v5590_v38 = vld [vmem:[%s10669_s4 + $0x178] sm:$0xff]  ;;  %v5689_v0 = vld [vmem:[%s10669_s4 + $0x490] sm:$0xff] }
 0x70a   :  { %v5692_v52 = vld [vmem:[%s10669_s4 + $0x4a8] sm:$0xff] }
 0x70c   :  { %7428 = vmatpush1.bf16.msra.mxu1 %v7427_v8  ;;  %v5733_v8 = vld [vmem:[%s10669_s4 + $0x5f0] sm:$0xff] }
 0x70d   :  { %7430 = vmatprep.subr.bf16.mxu1 %v7429_v47  ;;  %v7467_v47 = vpack.c.bf16 %v5726_v41, %v5723_v42  ;;  %v7469_v35 = vpack.c.bf16 %v5733_v8, %v5730_v44  ;;  %v5641_v42 = vld [vmem:[%s10669_s4 + $0x310] sm:$0xff]  ;;  %v5644_v41 = vld [vmem:[%s10669_s4 + $0x328] sm:$0xff]  ;;  %v5695_v44 = vld [vmem:[%s10669_s4 + $0x4c0] sm:$0xff] }
 0x70e   :  { %v5698_v8 = vld [vmem:[%s10669_s4 + $0x4d8] sm:$0xff] }
 0x710   :  { %7432 = vmatpush1.bf16.msra.mxu1 %v7431_v62  ;;  %v5596_v62 = vld [vmem:[%s10669_s4 + $0x1a8] sm:$0xff] }
 0x711   :  { %7434 = vmatprep.subr.bf16.mxu1 %v7433_v15  ;;  %v7471_v15 = vpack.c.bf16 %v5732_v29, %v5729_v17  ;;  %v7473_v21 = vpack.c.bf16 %v5596_v62, %v5593_v59  ;;  %v5647_v17 = vld [vmem:[%s10669_s4 + $0x340] sm:$0xff]  ;;  %v5650_v29 = vld [vmem:[%s10669_s4 + $0x358] sm:$0xff]  ;;  %v5701_v59 = vld [vmem:[%s10669_s4 + $0x4f0] sm:$0xff] }
 0x712   :  { %v5704_v62 = vld [vmem:[%s10669_s4 + $0x508] sm:$0xff] }
 0x714   :  { %7436 = vmatpush1.bf16.msra.mxu1 %v7435_v27  ;;  %v5602_v27 = vld [vmem:[%s10669_s4 + $0x1d8] sm:$0xff] }
 0x715   :  { %7438 = vmatprep.subr.bf16.mxu1 %v7437_v45  ;;  %v7475_v45 = vpack.c.bf16 %v5548_v12, %v5545_v63  ;;  %v7477_v5 = vpack.c.bf16 %v5602_v27, %v5599_v33  ;;  %v5653_v63 = vld [vmem:[%s10669_s4 + $0x370] sm:$0xff]  ;;  %v5656_v12 = vld [vmem:[%s10669_s4 + $0x388] sm:$0xff]  ;;  %v5707_v33 = vld [vmem:[%s10669_s4 + $0x520] sm:$0xff] }
 0x718   :  { %7440 = vmatpush1.bf16.msra.mxu1 %v7439_v46  ;;  %v5608_v46 = vld [vmem:[%s10669_s4 + $0x208] sm:$0xff] }
 0x719   :  { %7442 = vmatprep.subr.bf16.mxu1 %v7441_v6  ;;  %v7479_v6 = vpack.c.bf16 %v5554_v60, %v5551_v23  ;;  %v7481_v3 = vpack.c.bf16 %v5608_v46, %v5605_v54  ;;  %v5713_v23 = vld [vmem:[%s10669_s4 + $0x550] sm:$0xff]  ;;  %v5716_v60 = vld [vmem:[%s10669_s4 + $0x568] sm:$0xff] }
 0x71a   :  { %v7521_v46 = vpack.c.bf16 %v5716_v60, %v5713_v23  ;;  %v6054_v60 = vld [vmem:[%s10670_s5 + $0x60] sm:$0xff] }
 0x71c   :  { %7444 = vmatpush1.bf16.msra.mxu1 %v7443_v9  ;;  %v5614_v9 = vld [vmem:[%s10669_s4 + $0x238] sm:$0xff] }
 0x71d   :  { %7446 = vmatprep.subr.bf16.mxu1 %v7445_v43  ;;  %v7485_v43 = vpack.c.bf16 %v5614_v9, %v5611_v30 }
 0x720   :  { %7448 = vmatpush1.bf16.msra.mxu1 %v7447_v36  ;;  %v7487_v36 = vpack.c.bf16 %v5566_v2, %v5563_v58  ;;  %v5725_v58 = vld [vmem:[%s10669_s4 + $0x5b0] sm:$0xff]  ;;  %v5728_v2 = vld [vmem:[%s10669_s4 + $0x5c8] sm:$0xff] }
 0x721   :  { %7450 = vmatprep.subr.bf16.mxu1 %v7449_v22  ;;  %v7489_v22 = vpack.c.bf16 %v5620_v57, %v5617_v1  ;;  %v7529_v57 = vpack.c.bf16 %v5728_v2, %v5725_v58  ;;  %v6075_v58 = vld [vmem:[%s10670_s5 + $0x108] sm:$0xff] }
 0x724   :  { %7452 = vmatpush1.bf16.msra.mxu1 %v7451_v25  ;;  %v7491_v25 = vpack.c.bf16 %v5572_v24, %v5569_v31  ;;  %v5731_v31 = vld [vmem:[%s10669_s4 + $0x5e0] sm:$0xff]  ;;  %v5734_v24 = vld [vmem:[%s10669_s4 + $0x5f8] sm:$0xff] }
 0x725   :  { %7454 = vmatprep.subr.bf16.mxu1 %v7453_v49  ;;  %v7493_v49 = vpack.c.bf16 %v5626_v39, %v5623_v53  ;;  %v7533_v39 = vpack.c.bf16 %v5734_v24, %v5731_v31  ;;  %v6076_v31 = vld [vmem:[%s10670_s5 + $0x110] sm:$0xff]  ;;  %v6077_v24 = vld [vmem:[%s10670_s5 + $0x118] sm:$0xff] }
 0x728   :  { %7456 = vmatpush1.bf16.msra.mxu1 %v7455_v48  ;;  %v7495_v48 = vpack.c.bf16 %v5578_v13, %v5575_v14  ;;  %v6058_v14 = vld [vmem:[%s10670_s5 + $0x80] sm:$0xff]  ;;  %v6059_v13 = vld [vmem:[%s10670_s5 + $0x88] sm:$0xff] }
 0x729   :  { %7458 = vmatprep.subr.bf16.mxu1 %v7457_v18  ;;  %v7497_v18 = vpack.c.bf16 %v5632_v50, %v5629_v16  ;;  %v7537_v50 = vpack.c.bf16 %v6059_v13, %v6058_v14 }
 0x72c   :  { %7460 = vmatpush1.bf16.msra.mxu1 %v7459_v26  ;;  %v7499_v26 = vpack.c.bf16 %v5584_v20, %v5581_v37  ;;  %v6060_v37 = vld [vmem:[%s10670_s5 + $0x90] sm:$0xff]  ;;  %v6061_v20 = vld [vmem:[%s10670_s5 + $0x98] sm:$0xff] }
 0x72d   :  { %7462 = vmatprep.subr.bf16.mxu1 %v7461_v34  ;;  %v7501_v34 = vpack.c.bf16 %v5638_v11, %v5635_v4  ;;  %v7541_v11 = vpack.c.bf16 %v6061_v20, %v6060_v37 }
 0x730   :  { %7464 = vmatpush1.bf16.msra.mxu1 %v7463_v7  ;;  %v7503_v7 = vpack.c.bf16 %v5590_v38, %v5587_v55  ;;  %v6062_v55 = vld [vmem:[%s10670_s5 + $0xa0] sm:$0xff]  ;;  %v6063_v38 = vld [vmem:[%s10670_s5 + $0xa8] sm:$0xff] }
 0x731   :  { %7466 = vmatprep.subr.bf16.mxu1 %v7465_v32  ;;  %v7505_v32 = vpack.c.bf16 %v5692_v52, %v5689_v0  ;;  %v7545_v52 = vpack.c.bf16 %v6063_v38, %v6062_v55 }
 0x734   :  { %7468 = vmatpush1.bf16.msra.mxu1 %v7467_v47  ;;  %v7507_v47 = vpack.c.bf16 %v5644_v41, %v5641_v42  ;;  %v6064_v42 = vld [vmem:[%s10670_s5 + $0xb0] sm:$0xff] }
 0x735   :  { %7470 = vmatprep.subr.bf16.mxu1 %v7469_v35  ;;  %v7509_v35 = vpack.c.bf16 %v5698_v8, %v5695_v44  ;;  %v6048_v8 = vld [vmem:[%s10670_s5 + $0x30] sm:$0xff] }
 0x738   :  { %7472 = vmatpush1.bf16.msra.mxu1 %v7471_v15  ;;  %v7511_v15 = vpack.c.bf16 %v5650_v29, %v5647_v17  ;;  %v6067_v17 = vld [vmem:[%s10670_s5 + $0xc8] sm:$0xff] }
 0x739   :  { %7474 = vmatprep.subr.bf16.mxu1 %v7473_v21  ;;  %v7513_v21 = vpack.c.bf16 %v5704_v62, %v5701_v59  ;;  %v6050_v62 = vld [vmem:[%s10670_s5 + $0x40] sm:$0xff] }
 0x73b   :  { %5893 = vmatmul.mubr.f32.vlgmr.msra.gmra.mrb[24].mxu1 %v10158_v51 }
 0x73c   :  { %7476 = vmatpush3.bf16.msra.mxu1 %v7475_v45  ;;  %5963 = vmatprep.mubr.f32.mxu1 %v10155_v28  ;;  %v7483_v28 = vpack.c.bf16 %v5560_v10, %v5557_v61  ;;  %v5659_v45 = vld [vmem:[%s10669_s4 + $0x3a0] sm:$0xff]  ;;  %v5722_v10 = vld [vmem:[%s10669_s4 + $0x598] sm:$0xff] }
 0x73d   :  { %7478 = vmatprep.subr.bf16.mxu1 %v7477_v5  ;;  %v5662_v5 = vld [vmem:[%s10669_s4 + $0x3b8] sm:$0xff]  ;;  %v5719_v61 = vld [vmem:[%s10669_s4 + $0x580] sm:$0xff] }
 0x73e   :  { %v7519_v54 = vpack.c.bf16 %v5662_v5, %v5659_v45  ;;  %v7525_v9 = vpack.c.bf16 %v5722_v10, %v5719_v61  ;;  %v6071_v45 = vld [vmem:[%s10670_s5 + $0xe8] sm:$0xff]  ;;  %v6056_v10 = vld [vmem:[%s10670_s5 + $0x70] sm:$0xff] }
 0x740   :  { %7480 = vmatpush3.bf16.msra.mxu1 %v7479_v6  ;;  %v5665_v6 = vld [vmem:[%s10669_s4 + $0x3d0] sm:$0xff] }
 0x741   :  { %7482 = vmatprep.subr.bf16.mxu1 %v7481_v3  ;;  %v5668_v3 = vld [vmem:[%s10669_s4 + $0x3e8] sm:$0xff] }
 0x742   :  { %v7523_v30 = vpack.c.bf16 %v5668_v3, %v5665_v6  ;;  %v6072_v6 = vld [vmem:[%s10670_s5 + $0xf0] sm:$0xff]  ;;  %v6073_v3 = vld [vmem:[%s10670_s5 + $0xf8] sm:$0xff] }
 0x743   :  { %v7565_v61 = vpack.c.bf16 %v6073_v3, %v6072_v6 }
 0x744   :  { %7484 = vmatpush3.bf16.msra.mxu1 %v7483_v28  ;;  %v5671_v28 = vld [vmem:[%s10669_s4 + $0x400] sm:$0xff] }
 0x745   :  { %7486 = vmatprep.subr.bf16.mxu1 %v7485_v43  ;;  %v5674_v43 = vld [vmem:[%s10669_s4 + $0x418] sm:$0xff] }
 0x746   :  { %v7527_v1 = vpack.c.bf16 %v5674_v43, %v5671_v28  ;;  %v7874_v28 = vmov 0.0|0.0   ;;  %v6074_v43 = vld [vmem:[%s10670_s5 + $0x100] sm:$0xff] }
 0x748   :  { %7488 = vmatpush3.bf16.msra.mxu1 %v7487_v36  ;;  %v5677_v36 = vld [vmem:[%s10669_s4 + $0x430] sm:$0xff] }
 0x749   :  { %7490 = vmatprep.subr.bf16.mxu1 %v7489_v22  ;;  %v5680_v22 = vld [vmem:[%s10669_s4 + $0x448] sm:$0xff] }
 0x74a   :  { %v7531_v53 = vpack.c.bf16 %v5680_v22, %v5677_v36  ;;  %v7570_v36 = vpack.c.bf16 %v6075_v58, %v6074_v43 }
 0x74c   :  { %7492 = vmatpush3.bf16.msra.mxu1 %v7491_v25  ;;  %v5683_v25 = vld [vmem:[%s10669_s4 + $0x460] sm:$0xff] }
 0x74d   :  { %7494 = vmatprep.subr.bf16.mxu1 %v7493_v49  ;;  %v5686_v49 = vld [vmem:[%s10669_s4 + $0x478] sm:$0xff] }
 0x74e   :  { %v7535_v16 = vpack.c.bf16 %v5686_v49, %v5683_v25  ;;  %v6079_v25 = vld [vmem:[%s10670_s5 + $0x128] sm:$0xf] }
 0x750   :  { %7496 = vmatpush3.bf16.msra.mxu1 %v7495_v48  ;;  %v6042_v48 = vld [vmem:[%s10670_s5] sm:$0xff] }
 0x751   :  { %7498 = vmatprep.subr.bf16.mxu1 %v7497_v18  ;;  %v6043_v18 = vld [vmem:[%s10670_s5 + $0x8] sm:$0xff] }
 0x752   :  { %v7539_v4 = vpack.c.bf16 %v6043_v18, %v6042_v48 }
 0x754   :  { %7500 = vmatpush3.bf16.msra.mxu1 %v7499_v26  ;;  %v6044_v26 = vld [vmem:[%s10670_s5 + $0x10] sm:$0xff] }
 0x755   :  { %7502 = vmatprep.subr.bf16.mxu1 %v7501_v34  ;;  %v6045_v34 = vld [vmem:[%s10670_s5 + $0x18] sm:$0xff] }
 0x756   :  { %v7543_v0 = vpack.c.bf16 %v6045_v34, %v6044_v26 }
 0x758   :  { %7504 = vmatpush3.bf16.msra.mxu1 %v7503_v7  ;;  %v6046_v7 = vld [vmem:[%s10670_s5 + $0x20] sm:$0xff] }
 0x759   :  { %7506 = vmatprep.subr.bf16.mxu1 %v7505_v32  ;;  %v6047_v32 = vld [vmem:[%s10670_s5 + $0x28] sm:$0xff] }
 0x75a   :  { %v7547_v41 = vpack.c.bf16 %v6047_v32, %v6046_v7 }
 0x75b   :  { %5964 = vmatmul.mubr.f32.vlgmr.msra.gmra.mrb[26].mxu1 %v10145_v19  ;;  %v5710_v19 = vld [vmem:[%s10669_s4 + $0x538] sm:$0xff] }
 0x75c   :  { %7508 = vmatpush3.bf16.msra.mxu1 %v7507_v47  ;;  %6033 = vmatprep.mubr.f32.mxu1 %v10169_v56  ;;  %v7515_v56 = vpack.c.bf16 %v5656_v12, %v5653_v63  ;;  %v7517_v27 = vpack.c.bf16 %v5710_v19, %v5707_v33  ;;  %v6049_v47 = vld [vmem:[%s10670_s5 + $0x38] sm:$0xff]  ;;  %v6052_v19 = vld [vmem:[%s10670_s5 + $0x50] sm:$0xff] }
 0x75d   :  { %7510 = vmatprep.subr.bf16.mxu1 %v7509_v35  ;;  %v6066_v35 = vld [vmem:[%s10670_s5 + $0xc0] sm:$0xff]  ;;  %v7551_v29 = vpack.c.bf16 %v6049_v47, %v6048_v8  ;;  %v6069_v63 = vld [vmem:[%s10670_s5 + $0xd8] sm:$0xff] }
 0x75e   :  { %v7553_v59 = vpack.c.bf16 %v6067_v17, %v6066_v35 }
 0x760   :  { %7512 = vmatpush3.bf16.msra.mxu1 %v7511_v15  ;;  %v6051_v15 = vld [vmem:[%s10670_s5 + $0x48] sm:$0xff] }
 0x761   :  { %7514 = vmatprep.subr.bf16.mxu1 %v7513_v21  ;;  %v6068_v21 = vld [vmem:[%s10670_s5 + $0xd0] sm:$0xff]  ;;  %v7555_v12 = vpack.c.bf16 %v6051_v15, %v6050_v62 }
 0x762   :  { %v7557_v33 = vpack.c.bf16 %v6069_v63, %v6068_v21 }
 0x764   :  { %7516 = vmatpush3.bf16.msra.mxu1 %v7515_v56  ;;  %v6053_v56 = vld [vmem:[%s10670_s5 + $0x58] sm:$0xff] }
 0x765   :  { %7518 = vmatprep.subr.bf16.mxu1 %v7517_v27  ;;  %v6070_v27 = vld [vmem:[%s10670_s5 + $0xe0] sm:$0xff]  ;;  %v7559_v5 = vpack.c.bf16 %v6053_v56, %v6052_v19 }
 0x766   :  { %v7561_v23 = vpack.c.bf16 %v6071_v45, %v6070_v27 }
 0x768   :  { %7520 = vmatpush3.bf16.msra.mxu1 %v7519_v54  ;;  %v6055_v54 = vld [vmem:[%s10670_s5 + $0x68] sm:$0xff] }
 0x769   :  { %7522 = vmatprep.subr.bf16.mxu1 %v7521_v46  ;;  %v7563_v46 = vpack.c.bf16 %v6055_v54, %v6054_v60 }
 0x76c   :  { %7524 = vmatpush3.bf16.msra.mxu1 %v7523_v30  ;;  %v6057_v30 = vld [vmem:[%s10670_s5 + $0x78] sm:$0xff] }
 0x76d   :  { %7526 = vmatprep.subr.bf16.mxu1 %v7525_v9  ;;  %v7567_v9 = vpack.c.bf16 %v6057_v30, %v6056_v10 }
 0x770   :  { %7528 = vmatpush3.bf16.msra.mxu1 %v7527_v1 }
 0x771   :  { %7530 = vmatprep.subr.bf16.mxu1 %v7529_v57 }
 0x774   :  { %7532 = vmatpush3.bf16.msra.mxu1 %v7531_v53  ;;  %v7573_v53 = vpack.c.bf16 %v6077_v24, %v6076_v31 }
 0x775   :  { %7534 = vmatprep.subr.bf16.mxu1 %v7533_v39  ;;  %v6078_v39 = vld [vmem:[%s10670_s5 + $0x120] sm:$0xff] }
 0x776   :  { %v7576_v49 = vpack.c.bf16 %v6079_v25, %v6078_v39 }
 0x778   :  { %7536 = vmatpush3.bf16.msra.mxu1 %v7535_v16 }
 0x779   :  { %7538 = vmatprep.subr.bf16.mxu1 %v7537_v50 }
 0x77b   :  { %6034 = vmatmul.mubr.f32.vlgmr.msra.gmra.mrb[28].mxu1 %v10158_v51  ;;  %v6065_v51 = vld [vmem:[%s10670_s5 + $0xb8] sm:$0xff]  ;;  %s7877_s5 = smov [#allocation12]  }
 0x77c   :  { %7540 = vmatpush3.bf16.msra.mxu1 %v7539_v4  ;;  %v7549_v44 = vpack.c.bf16 %v6065_v51, %v6064_v42  ;;  %s6236_s20 = sshll.u32 %s7877_s5, 4  ;;  %s6237_s20 = int_to_ptr.vmem [resolvable:$true] %s6236_s20 }
 0x77d   :  { %7542 = vmatprep.subr.bf16.mxu1 %v7541_v11  ;;  %s7835_s1 = scalar_lea.vmem %s6237_s20, 32  ;;  %p7840_p11 = scmp.lt.s32.totalorder %s6237_s20, %s6237_s20 }
 0x77e   :  { %p7836_p10 = scmp.ne.s32.totalorder %s6237_s20, %s7835_s1  ;;  %p7841_p12 = scmp.lt.s32.totalorder %s7835_s1, %s7835_s1 }
 0x780   :  { %7544 = vmatpush3.bf16.msra.mxu1 %v7543_v0  ;;  %p7842_p13 = por %p7841_p12, %p7840_p11 }
 0x781   :  { %7546 = vmatprep.subr.bf16.mxu1 %v7545_v52 }
 0x782   :  { %p7843_p0 = pnand %p7842_p13, %p7836_p10 }
 0x784   :  { %7548 = vmatpush3.bf16.msra.mxu1 %v7547_v41 }
 0x785   :  { %7550 = vmatprep.subr.bf16.mxu1 %v7549_v44 }
 0x788   :  { %7552 = vmatpush3.bf16.msra.mxu1 %v7551_v29 }
 0x789   :  { %7554 = vmatprep.subr.bf16.mxu1 %v7553_v59 }
 0x78c   :  { %7556 = vmatpush3.bf16.msra.mxu1 %v7555_v12 }
 0x78d   :  { %7558 = vmatprep.subr.bf16.mxu1 %v7557_v33 }
 0x790   :  { %7560 = vmatpush3.bf16.msra.mxu1 %v7559_v5 }
 0x791   :  { %7562 = vmatprep.subr.bf16.mxu1 %v7561_v23 }
 0x794   :  { %7564 = vmatpush3.bf16.msra.mxu1 %v7563_v46 }
 0x795   :  { %7566 = vmatprep.subr.bf16.mxu1 %v7565_v61 }
 0x798   :  { %7568 = vmatpush3.bf16.msra.mxu1 %v7567_v9 }
 0x799   :  { %7569 = vmatprep.subr.bf16.mxu1 %v7874_v28 }
 0x80e   :  { %v5894_v2 = vpop.f32.mrb[24].mxu1 }
 0x80f   :  { %v5896_v1 = vpop.f32.mrb[25].mxu1  ;;  %v6039_v22 = vmax.f32 %v5894_v2, 0.0 }
 0x810   :  { %v6040_v57 = vmax.f32 %v5896_v1, 0.0 }
 0x812   :  { %6152 = vmatprep.mubr.f32.mxu1 %v6040_v57 }
 0x813   :  { %6153 = vmatmul.mubr.f32.vlgmr.msra.gmra.mrb[30].mxu1 %v6039_v22 }
 0x814   :  { %7571 = vmatpush3.bf16.msra.mxu1 %v7570_v36  ;;  %6622 = vmatprep.mubr.msk.f32.mxu1 %vm7875_vm2, %v9283_v40 }
 0x815   :  { %7572 = vmatprep.subr.bf16.mxu1 %v7874_v28 }
 0x818   :  { %7574 = vmatpush3.bf16.msra.mxu1 %v7573_v53 }
 0x819   :  { %7575 = vmatprep.subr.bf16.mxu1 %v7874_v28 }
 0x81c   :  { %7578 = vmatpush3.bf16.msk.msra.mxu1 %vm7577_vm9, %v7576_v49 }
 0x82e   :  { %v6530_v14 = vpop.f32.mrb[26].mxu1 }
 0x82f   :  { %v6531_v13 = vpop.f32.mrb[27].mxu1 }
 0x830   :  { %v6532_v16 = vadd.f32 %v6531_v13, %v6530_v14 }
 0x84e   :  { %v6565_v40 = vpop.f32.mrb[28].mxu1 }
 0x84f   :  { %v6566_v50 = vpop.f32.mrb[29].mxu1 }
 0x850   :  { %v6567_v48 = vadd.f32 %v6566_v50, %v6565_v40 }
 0x852   :  { %v6036_v18 = vadd.f32 %v6567_v48, %v6532_v16 }
 0x854   :  { %v6041_v37 = vmax.f32 %v6036_v18, 0.0 }
 0x856   :  { %6623 = vmatmul.mubr.msk.f32.vlgmr.msra.gmra.mrb[32].mxu1 %vm6080_vm10, %v6041_v37 }
 0x8e6   :  { %v6600_v20 = vpop.f32.mrb[30].mxu1 }
 0x8e7   :  { %v6601_v4 = vpop.f32.mrb[31].mxu1 }
 0x8e8   :  { %v6602_v11 = vadd.f32 %v6601_v4, %v6600_v20 }
 0x929   :  { %v6224_v26 = vpop.f32.mrb[32].mxu1 }
 0x92a   :  { %v6225_v34 = vadd.f32 %v6602_v11, %v6224_v26  ;;  %v6624_v55 = vpop.f32.mrb[33].mxu1 }
 0x92c   :  { %6229 = vst.msk [vmem:[#allocation12] sm:$0x3] %vm6228_vm11, %v6225_v34 }
 0x92d   :  { %7846 = shalt.err (!%p7843_p0)
}
 0x92e   :  { %s7847_s23 = scalar_lea.hbm %s10671_s6, 32 }
 0x92f   :  { %p7848_p1 = scmp.ne.s32.totalorder %s10671_s6, %s7847_s23  ;;  %p7851_p2 = scmp.lt.u32.totalorder %s7847_s23, %s10671_s6 }
 0x931   :  { %p7853_p3 = pnand %p7851_p2, %p7848_p1 }
 0x933   :  { %7856 = shalt.err (!%p7853_p3)
}
 0x934   :  { %6239 = dma.vmem_to_hbm [thread:$0]  %s6237_s20, 32, %s10671_s6, [#allocation8]  }
 0x935   :  { %7861 = dma.done.wait [#allocation8], 32  }
 0x936   :  { %7862 = vsyncadd [#allocation8], 4294967264 }
 0x937   :  { %6243 = vsyncpa [#allocation7], 1 }
 0x938   :  { %6244 = vsyncpa [#allocation10], 1 }
 0x939   :  { %6245 = vsyncpa [#allocation8], 1 }

</bundles_post_ra>
